<compile_context>
chip_gen: v6e
topology: v6e:2x2x1
jax: 0.10.0
libtpu: 0.0.40
codegen_flags: <defaults>
</compile_context>

<pallas_src>
import jax
import jax.numpy as jnp
from jax import lax
from jax.experimental import pallas as pl
from jax.experimental.pallas import tpu as pltpu

EPS = 1e-5


# ---------------------------------------------------------------------------
# Parameters (deterministic, synthetic) -- same layout as the PyTorch module
# ---------------------------------------------------------------------------
def _make_bn(key, c):
    k1, k2, k3, k4 = jax.random.split(key, 4)
    gamma = 1.0 + 0.1 * jax.random.normal(k1, (c,), jnp.float32)
    beta = 0.1 * jax.random.normal(k2, (c,), jnp.float32)
    mean = 0.1 * jax.random.normal(k3, (c,), jnp.float32)
    var = jax.random.uniform(k4, (c,), jnp.float32, 0.5, 1.5)
    return gamma, beta, mean, var


def _make_conv(key, c_out, fan_in, shape):
    k1, k2 = jax.random.split(key)
    bound = 1.0 / (fan_in ** 0.5)
    w = jax.random.uniform(k1, shape, jnp.float32, -bound, bound)
    b = jax.random.uniform(k2, (c_out,), jnp.float32, -bound, bound)
    return w, b


def init_params(key, cc, attn, n_mels=96):
    kit = iter(jax.random.split(key, 64))
    p = {}
    g, b, m, v = _make_bn(next(kit), 1)
    in_scale = g / jnp.sqrt(v + EPS)
    p["in_scale"] = in_scale
    p["in_shift"] = b - m * in_scale

    vert_cfg = [(cc, int(0.9 * n_mels), 7), (2 * cc, int(0.9 * n_mels), 3),
                (4 * cc, int(0.9 * n_mels), 1), (cc, int(0.4 * n_mels), 7),
                (2 * cc, int(0.4 * n_mels), 3), (4 * cc, int(0.4 * n_mels), 1)]
    vert = []
    for c_out, kh, kw in vert_cfg:
        w, bias = _make_conv(next(kit), c_out, kh * kw, (c_out, 1, kh, kw))
        g, be, m, v = _make_bn(next(kit), c_out)
        vert.append(dict(w=w, b=bias, gamma=g, beta=be, mean=m, var=v, kh=kh, kw=kw))

    horiz_cfg = [(cc, 165), (2 * cc, 129), (4 * cc, 65), (8 * cc, 33)]
    horiz = []
    for c_out, L in horiz_cfg:
        w, bias = _make_conv(next(kit), c_out, L, (c_out, 1, L))
        g, be, m, v = _make_bn(next(kit), c_out)
        horiz.append(dict(w=w, b=bias, gamma=g, beta=be, mean=m, var=v, L=L))

    w1, b1 = _make_conv(next(kit), attn, 29 * cc, (attn, 29 * cc))  # Conv1d kernel_size=1
    g, be, m, v = _make_bn(next(kit), attn)
    p.update(vert=vert, horiz=horiz,
             final=dict(w=w1, b=b1, gamma=g, beta=be, mean=m, var=v))
    return p


# ---------------------------------------------------------------------------
# Trace-time weight folding
# ---------------------------------------------------------------------------
def _bn_scale(gamma, var):
    return gamma / jnp.sqrt(var + EPS)


def _vert_weight(w, s_c, fp_, F):
    """w: (C,1,kh,kw) raw conv weight -> (C*fp_, kw*F) bf16 banded matmul weight.

    Row order: (c major, f_out minor); column order: (tap j major, freq f minor).
    f_out is padded from fout to fp_ (multiple of 8) by DUPLICATING the f_out=0 band so
    the subsequent max over f_out is unchanged.  BN scale s_c (>0) is folded in.
    """
    C, _, kh, kw = w.shape
    ws = w[:, 0] * s_c[:, None, None]                       # (C, kh, kw)
    fout = F - kh + 1
    fo = jnp.arange(fout)
    f = jnp.arange(F)
    dh = f[None, :] - fo[:, None]                           # (fout, F)
    valid = (dh >= 0) & (dh < kh)
    g = ws[:, jnp.clip(dh, 0, kh - 1), :]                   # (C, fout, F, kw)
    g = jnp.where(valid[None, :, :, None], g, 0.0)
    g = jnp.transpose(g, (3, 0, 1, 2))                      # (kw, C, fout, F)
    g = jnp.concatenate(
        [g, jnp.repeat(g[:, :, :1, :], fp_ - fout, axis=2)], axis=2)  # (kw, C, fp_, F)
    return jnp.transpose(g, (1, 2, 0, 3)).reshape(C * fp_, kw * F).astype(jnp.bfloat16)


def _vmem_limit_bytes(t_tile):
    # ~1.2 MB bf16 weights (double-buffered) + intermediates (z, cat, patch matrices)
    # that scale ~linearly with t_tile; generous headroom, still << 64 MiB (v7x/TC).
    return min(8 * 1024 * 1024 + t_tile * 28 * 1024, 48 * 1024 * 1024)


# ---------------------------------------------------------------------------
# Fused Pallas kernel
# ---------------------------------------------------------------------------
def _make_kernel(groups, t_tile, kw_max, k_pad, srows, red_dtype):
    n_groups = len(groups)
    n_hgrp = k_pad // srows

    def kernel(x_ref, m_ref, *refs):
        wv_refs = refs[:n_groups]
        wh_ref, wf_ref, scat_ref, sf_ref, o_ref = refs[n_groups:]

        # ---- vertical heads: one banded MXU matmul per distinct kw ----------
        xwin = x_ref[0, 0]                                    # (F, t_tile + 8) bf16
        pieces = [xwin[:, d:d + t_tile] for d in range(kw_max)]

        outs = []
        for grp, w_ref in zip(groups, wv_refs):
            kw = grp["kw"]
            do = (kw_max // 2) - (kw // 2)
            xop = pieces[do] if kw == 1 else jnp.concatenate(pieces[do:do + kw], axis=0)
            z = jnp.dot(w_ref[...], xop,
                        preferred_element_type=jnp.float32)  # (sum C*Fp, t_tile)
            z = z.astype(red_dtype)                           # bf16 freq-max on v6e/v7x
            row = 0
            for (C, Fp, Cp) in grp["heads"]:
                h = jnp.max(z[row:row + C * Fp].reshape(C, Fp, t_tile), axis=1)
                if Cp > C:                                    # 8-align the concat piece
                    h = jnp.concatenate(
                        [h, jnp.zeros((Cp - C, t_tile), red_dtype)], axis=0)
                outs.append(h)
                row += C * Fp

        # ---- horizontal heads: tap patches built in VMEM (no HBM im2col) ----
        mwin = m_ref[0, 0]                                    # (srows, t_tile + k_pad)
        hpat = jnp.concatenate(
            [mwin[:, g * srows: g * srows + t_tile] for g in range(n_hgrp)],
            axis=0)                                           # (k_pad, t_tile)
        zh = jnp.dot(wh_ref[...], hpat,
                     preferred_element_type=jnp.float32)      # (64, t_tile)
        outs.append(zh.astype(red_dtype))

        # ---- aligned 128-channel concat + shift + ReLU + final 1x1 ----------
        cat = jnp.concatenate(outs, axis=0).astype(jnp.float32)        # (128, t_tile)
        cat = jnp.maximum(cat + scat_ref[...], 0.0).astype(jnp.bfloat16)
        out = jnp.dot(wf_ref[...], cat,
                      preferred_element_type=jnp.float32) + sf_ref[...]
        o_ref[0] = jnp.maximum(out, 0.0).astype(o_ref.dtype)  # (attn, t_tile), lane-dense

    return kernel


# ---------------------------------------------------------------------------
# Forward pass (Pallas)
# ---------------------------------------------------------------------------
def pons_forward_pallas(x, params, back_end="won", t_tile=None, out_dtype=jnp.float32):
    if back_end != "won":
        # TODO(synk): expose the 116-channel concat as the kernel output for other back-ends.
        raise NotImplementedError("only back_end='won' is implemented in the Pallas path")

    B, _, F, T = x.shape
    if t_tile is None:
        t_tile = 512 if T >= 512 else (256 if T >= 256 else 128)
    nt = pl.cdiv(T, t_tile)
    t_round = nt * t_tile

    kw_max = max(lp["kw"] for lp in params["vert"])           # 7
    pad_v = kw_max // 2
    halo = 8                                                  # >= kw_max - 1
    t_win = t_tile + halo

    l_max = max(lp["L"] for lp in params["horiz"])            # 165
    pad_h = l_max // 2
    srows = 16                                                # pre-shifted sublane rows
    k_pad = ((l_max + srows - 1) // srows) * srows            # 176
    t_mwin = t_tile + k_pad

    # freq-max reduction dtype: bf16 on chips with a bf16 VPU, f32 on v5e
    try:
        kind = jax.devices()[0].device_kind.lower()
    except Exception:  # pragma: no cover
        kind = ""
    red_dtype = jnp.float32 if "v5" in kind else jnp.bfloat16

    # ---- input BN applied while padding / casting (no separate kernel)
    xbn = x[:, 0].astype(jnp.float32) * params["in_scale"] + params["in_shift"]   # (B,F,T)

    canv_len = t_round + halo
    xcanv = jnp.pad(xbn, ((0, 0), (0, 0), (pad_v, canv_len - pad_v - T)))
    # Overlapping time slabs (gather-free, only +8 halo columns per tile).
    x_tiles = jnp.stack(
        [xcanv[:, :, i * t_tile: i * t_tile + t_win] for i in range(nt)],
        axis=1).astype(jnp.bfloat16)                                    # (B, nt, F, t_win)

    # ---- horizontal path: tiny 16-row pre-shifted mean slab (replaces hpatch)
    xmean = jnp.mean(xbn, axis=1)                                       # (B, T)
    m_len = t_round + k_pad + srows
    mcanv = jnp.pad(xmean, ((0, 0), (pad_h, m_len - pad_h - T)))
    m_tiles = jnp.stack(
        [jnp.stack([mcanv[:, i * t_tile + s: i * t_tile + s + t_mwin]
                    for s in range(srows)], axis=1)
         for i in range(nt)], axis=1).astype(jnp.bfloat16)              # (B, nt, 16, t_mwin)

    # ---- fold conv bias + BN into weights / post-max shifts; merge heads by kw
    shifts116 = []
    per_head = []
    off116 = 0
    for lp in params["vert"]:
        C, _, kh, kw = lp["w"].shape
        s_c = _bn_scale(lp["gamma"], lp["var"])
        fout = F - kh + 1
        Fp = ((fout + 7) // 8) * 8
        Cp = ((C + 7) // 8) * 8
        per_head.append(dict(kw=kw, C=C, Fp=Fp, Cp=Cp, start=off116,
                             w=_vert_weight(lp["w"], s_c, Fp, F)))
        shifts116.append((lp["b"] - lp["mean"]) * s_c + lp["beta"])
        off116 += C

    kw_seen = []
    for h in per_head:
        if h["kw"] not in kw_seen:
            kw_seen.append(h["kw"])
    groups, wv_list, cat_pieces = [], [], []
    for kw in kw_seen:
        hs = [h for h in per_head if h["kw"] == kw]
        wv_list.append(jnp.concatenate([h["w"] for h in hs], axis=0))
        groups.append(dict(kw=kw, heads=[(h["C"], h["Fp"], h["Cp"]) for h in hs]))
        cat_pieces.extend([(h["start"], h["C"], h["Cp"]) for h in hs])

    wh_rows, CH = [], 0
    for lp in params["horiz"]:
        C = lp["w"].shape[0]
        L = lp["L"]
        s_c = _bn_scale(lp["gamma"], lp["var"])
        blk = jnp.zeros((C, k_pad), jnp.float32)
        off = pad_h - L // 2
        blk = blk.at[:, off:off + L].set(lp["w"][:, 0, :] * s_c[:, None])
        wh_rows.append(blk)
        shifts116.append((lp["b"] - lp["mean"]) * s_c + lp["beta"])
        CH += C
    CHp = ((CH + 7) // 8) * 8                                           # 60 -> 64
    wh = jnp.concatenate(wh_rows, axis=0)
    wh = jnp.pad(wh, ((0, CHp - CH), (0, 0))).astype(jnp.bfloat16)      # (64, k_pad)
    cat_pieces.append((off116, CH, CHp))

    shift116 = jnp.concatenate(shifts116)                               # (116,)
    fpm = params["final"]
    s_f = _bn_scale(fpm["gamma"], fpm["var"])
    wf116 = fpm["w"] * s_f[:, None]                                     # (attn, 116)
    shift_f = ((fpm["b"] - fpm["mean"]) * s_f + fpm["beta"])[:, None].astype(jnp.float32)
    attn = wf116.shape[0]

    # permute/zero-pad wf columns + shifts to the kernel's 8-aligned concat order
    wf_cols, sh_rows = [], []
    for (start, C, Cp) in cat_pieces:
        wf_cols.append(wf116[:, start:start + C])
        sh_rows.append(shift116[start:start + C])
        if Cp > C:
            wf_cols.append(jnp.zeros((attn, Cp - C), jnp.float32))
            sh_rows.append(jnp.zeros((Cp - C,), jnp.float32))
    wf_pad = jnp.concatenate(wf_cols, axis=1).astype(jnp.bfloat16)      # (attn, 128)
    shift_pad = jnp.concatenate(sh_rows)[:, None].astype(jnp.float32)   # (128, 1)
    c_cat = shift_pad.shape[0]

    kernel = _make_kernel(groups, t_tile, kw_max, k_pad, srows, red_dtype)

    in_specs = [
        pl.BlockSpec((1, 1, F, t_win), lambda b, t: (b, t, 0, 0)),      # x slab (+8 halo)
        pl.BlockSpec((1, 1, srows, t_mwin), lambda b, t: (b, t, 0, 0)), # mean slab
    ]
    for w in wv_list:
        in_specs.append(pl.BlockSpec(w.shape, lambda b, t: (0, 0)))     # merged vert weights
    in_specs += [
        pl.BlockSpec(wh.shape, lambda b, t: (0, 0)),                    # horizontal weights
        pl.BlockSpec(wf_pad.shape, lambda b, t: (0, 0)),                # final 1x1 weights
        pl.BlockSpec((c_cat, 1), lambda b, t: (0, 0)),                  # per-channel shifts
        pl.BlockSpec((attn, 1), lambda b, t: (0, 0)),                   # final shifts
    ]

    out = pl.pallas_call(
        kernel,
        out_shape=jax.ShapeDtypeStruct((B, attn, t_round), out_dtype),
        grid=(B, nt),
        in_specs=in_specs,
        out_specs=pl.BlockSpec((1, attn, t_tile), lambda b, t: (b, 0, t)),
        compiler_params=pltpu.CompilerParams(
            dimension_semantics=("parallel", "parallel"),
            vmem_limit_bytes=_vmem_limit_bytes(t_tile)),
    )(x_tiles, m_tiles, *wv_list, wh, wf_pad, shift_pad, shift_f)

    return out[:, :, :T]                                                # (B, attn, T) NCT


# ---------------------------------------------------------------------------
# Independent pure-JAX/XLA reference (lax.conv) for correctness checking
# ---------------------------------------------------------------------------
def pons_forward_reference(x, params):
    prec = lax.Precision.HIGHEST
    xbn = x * params["in_scale"] + params["in_shift"]        # (B,1,F,T)
    outs = []
    for lp in params["vert"]:
        kw = lp["kw"]
        y = lax.conv_general_dilated(
            xbn, lp["w"], (1, 1), [(0, 0), (kw // 2, kw // 2)],
            dimension_numbers=("NCHW", "OIHW", "NCHW"), precision=prec)
        y = y + lp["b"][None, :, None, None]
        s = lp["gamma"] / jnp.sqrt(lp["var"] + EPS)
        y = (y - lp["mean"][None, :, None, None]) * s[None, :, None, None] \
            + lp["beta"][None, :, None, None]
        y = jnp.maximum(y, 0.0)
        outs.append(jnp.max(y, axis=2))                      # (B, C, T)
    xmean = jnp.mean(xbn, axis=2, keepdims=True)             # (B,1,1,T)
    for lp in params["horiz"]:
        L = lp["L"]
        y = lax.conv_general_dilated(
            xmean, lp["w"][:, :, None, :], (1, 1), [(0, 0), (L // 2, L // 2)],
            dimension_numbers=("NCHW", "OIHW", "NCHW"), precision=prec)
        y = y + lp["b"][None, :, None, None]
        s = lp["gamma"] / jnp.sqrt(lp["var"] + EPS)
        y = (y - lp["mean"][None, :, None, None]) * s[None, :, None, None] \
            + lp["beta"][None, :, None, None]
        y = jnp.maximum(y, 0.0)
        outs.append(y[:, :, 0, :])                           # (B, C, T)
    cat = jnp.concatenate(outs, axis=1)                      # (B, 29*cc, T)
    fp = params["final"]
    y = jnp.einsum("oc,bct->bot", fp["w"], cat, precision=prec) + fp["b"][None, :, None]
    s = fp["gamma"] / jnp.sqrt(fp["var"] + EPS)
    y = (y - fp["mean"][None, :, None]) * s[None, :, None] + fp["beta"][None, :, None]
    return jnp.maximum(y, 0.0)


# ---------------------------------------------------------------------------
if __name__ == "__main__":
    class Config:
        conv_channels = 4
        attention_channels = 32
        back_end = "won"

    B, F = 2, 96   # F=96 mel bins is implied by the 0.9*96 / 0.4*96 filter heights
    key = jax.random.PRNGKey(0)
    kx1, kx2, kp = jax.random.split(key, 3)
    params = init_params(kp, Config.conv_channels, Config.attention_channels, n_mels=F)

    def relerr(a, b):
        return float(jnp.max(jnp.abs(a - b))) / (float(jnp.max(jnp.abs(b))) + 1e-6)

    # Multi-tile path: T > t_tile and not a multiple of it (halo + tail exercised).
    T1 = 300
    x1 = jax.random.normal(kx1, (B, 1, F, T1), jnp.float32)            # NCHW, like PyTorch
    out1 = jax.block_until_ready(pons_forward_pallas(x1, params, Config.back_end))
    ref1 = jax.block_until_ready(pons_forward_reference(x1, params))
    assert out1.shape == (B, Config.attention_channels, T1), out1.shape
    # bf16 operands / bf16 freq-max / bf16 final dot with f32 accumulation.
    assert relerr(out1, ref1) < 4e-2, f"multi-tile mismatch: rel_err={relerr(out1, ref1)}"

    # Single short tile path.
    T2 = 16
    x2 = jax.random.normal(kx2, (B, 1, F, T2), jnp.float32)
    out2 = jax.block_until_ready(pons_forward_pallas(x2, params, Config.back_end))
    ref2 = jax.block_until_ready(pons_forward_reference(x2, params))
    assert out2.shape == (B, Config.attention_channels, T2), out2.shape
    assert relerr(out2, ref2) < 4e-2, f"short-T mismatch: rel_err={relerr(out2, ref2)}"

    print("KERNEL_OK")
</pallas_src>

<mosaic_0001>
module attributes {stable_mosaic.version = 11 : i64} {
  func.func @kernel(%arg0: i32, %arg1: i32, %arg2: memref<1x1x96x264xbf16, #tpu.memory_space<vmem>>, %arg3: memref<1x1x16x432xbf16, #tpu.memory_space<vmem>>, %arg4: memref<320x672xbf16, #tpu.memory_space<vmem>>, %arg5: memref<640x288xbf16, #tpu.memory_space<vmem>>, %arg6: memref<1280x96xbf16, #tpu.memory_space<vmem>>, %arg7: memref<64x176xbf16, #tpu.memory_space<vmem>>, %arg8: memref<32x128xbf16, #tpu.memory_space<vmem>>, %arg9: memref<128x1xf32, #tpu.memory_space<vmem>>, %arg10: memref<32x1xf32, #tpu.memory_space<vmem>>, %arg11: memref<1x32x256xf32, #tpu.memory_space<vmem>>) attributes {dimension_semantics = [#tpu.dimension_semantics<parallel>, #tpu.dimension_semantics<parallel>], iteration_bounds = array<i64: 2, 2>, scalar_prefetch = 0 : i64, scratch_operands = 0 : i64, tpu.core_type = #tpu.core_type<tc>, window_params = [{transform_indices = @transform_0, window_bounds = array<i64: 1, 1, 96, 264>}, {transform_indices = @transform_1, window_bounds = array<i64: 1, 1, 16, 432>}, {pipeline_mode = #tpu.pipeline_mode<synchronous>, transform_indices = @transform_2, window_bounds = array<i64: 320, 672>}, {pipeline_mode = #tpu.pipeline_mode<synchronous>, transform_indices = @transform_3, window_bounds = array<i64: 640, 288>}, {pipeline_mode = #tpu.pipeline_mode<synchronous>, transform_indices = @transform_4, window_bounds = array<i64: 1280, 96>}, {pipeline_mode = #tpu.pipeline_mode<synchronous>, transform_indices = @transform_5, window_bounds = array<i64: 64, 176>}, {pipeline_mode = #tpu.pipeline_mode<synchronous>, transform_indices = @transform_6, window_bounds = array<i64: 32, 128>}, {pipeline_mode = #tpu.pipeline_mode<synchronous>, transform_indices = @transform_7, window_bounds = array<i64: 128, 1>}, {pipeline_mode = #tpu.pipeline_mode<synchronous>, transform_indices = @transform_8, window_bounds = array<i64: 32, 1>}, {transform_indices = @transform_9, window_bounds = array<i64: 1, 32, 256>}]} {
    %c0 = arith.constant 0 : index
    %c0_0 = arith.constant 0 : index
    %c0_1 = arith.constant 0 : index
    %c0_2 = arith.constant 0 : index
    %0 = vector.load %arg2[%c0, %c0_0, %c0_1, %c0_2] : memref<1x1x96x264xbf16, #tpu.memory_space<vmem>>, vector<1x1x96x264xbf16>
    %1 = vector.shape_cast %0 : vector<1x1x96x264xbf16> to vector<96x264xbf16>
    %2 = vector.extract_strided_slice %1 {offsets = [0, 0], sizes = [96, 256], strides = [1, 1]} : vector<96x264xbf16> to vector<96x256xbf16>
    %3 = vector.extract_strided_slice %1 {offsets = [0, 1], sizes = [96, 256], strides = [1, 1]} : vector<96x264xbf16> to vector<96x256xbf16>
    %4 = vector.extract_strided_slice %1 {offsets = [0, 2], sizes = [96, 256], strides = [1, 1]} : vector<96x264xbf16> to vector<96x256xbf16>
    %5 = vector.extract_strided_slice %1 {offsets = [0, 3], sizes = [96, 256], strides = [1, 1]} : vector<96x264xbf16> to vector<96x256xbf16>
    %6 = vector.extract_strided_slice %1 {offsets = [0, 4], sizes = [96, 256], strides = [1, 1]} : vector<96x264xbf16> to vector<96x256xbf16>
    %7 = vector.extract_strided_slice %1 {offsets = [0, 5], sizes = [96, 256], strides = [1, 1]} : vector<96x264xbf16> to vector<96x256xbf16>
    %8 = vector.extract_strided_slice %1 {offsets = [0, 6], sizes = [96, 256], strides = [1, 1]} : vector<96x264xbf16> to vector<96x256xbf16>
    %9 = tpu.concatenate %2, %3, %4, %5, %6, %7, %8 in 0 : vector<96x256xbf16>, vector<96x256xbf16>, vector<96x256xbf16>, vector<96x256xbf16>, vector<96x256xbf16>, vector<96x256xbf16>, vector<96x256xbf16> -> vector<672x256xbf16>
    %c0_3 = arith.constant 0 : index
    %c0_4 = arith.constant 0 : index
    %10 = vector.load %arg4[%c0_3, %c0_4] : memref<320x672xbf16, #tpu.memory_space<vmem>>, vector<320x672xbf16>
    %cst = arith.constant dense<0.000000e+00> : vector<320x256xf32>
    %11 = tpu.matmul %10, %9, %cst {dimension_numbers = #tpu.dot_dimension_numbers<[1], [0], [0], [1], [0, 0, 1, 1], [], []>} : vector<320x672xbf16>, vector<672x256xbf16>, vector<320x256xf32> -> vector<320x256xf32>
    %12 = arith.truncf %11 : vector<320x256xf32> to vector<320x256xbf16>
    %13 = vector.extract_strided_slice %12 {offsets = [0, 0], sizes = [64, 256], strides = [1, 1]} : vector<320x256xbf16> to vector<64x256xbf16>
    %14 = vector.shape_cast %13 : vector<64x256xbf16> to vector<4x16x256xbf16>
    %cst_5 = arith.constant dense<0xFF80> : vector<4x256xbf16>
    %15 = vector.multi_reduction <maximumf>, %14, %cst_5 [1] : vector<4x16x256xbf16> to vector<4x256xbf16>
    %cst_6 = arith.constant 0.000000e+00 : bf16
    %16 = vector.broadcast %cst_6 : bf16 to vector<4x256xbf16>
    %17 = tpu.concatenate %15, %16 in 0 : vector<4x256xbf16>, vector<4x256xbf16> -> vector<8x256xbf16>
    %18 = vector.extract_strided_slice %12 {offsets = [64, 0], sizes = [256, 256], strides = [1, 1]} : vector<320x256xbf16> to vector<256x256xbf16>
    %19 = vector.shape_cast %18 : vector<256x256xbf16> to vector<4x64x256xbf16>
    %cst_7 = arith.constant dense<0xFF80> : vector<4x256xbf16>
    %20 = vector.multi_reduction <maximumf>, %19, %cst_7 [1] : vector<4x64x256xbf16> to vector<4x256xbf16>
    %cst_8 = arith.constant 0.000000e+00 : bf16
    %21 = vector.broadcast %cst_8 : bf16 to vector<4x256xbf16>
    %22 = tpu.concatenate %20, %21 in 0 : vector<4x256xbf16>, vector<4x256xbf16> -> vector<8x256xbf16>
    %23 = tpu.concatenate %4, %5, %6 in 0 : vector<96x256xbf16>, vector<96x256xbf16>, vector<96x256xbf16> -> vector<288x256xbf16>
    %c0_9 = arith.constant 0 : index
    %c0_10 = arith.constant 0 : index
    %24 = vector.load %arg5[%c0_9, %c0_10] : memref<640x288xbf16, #tpu.memory_space<vmem>>, vector<640x288xbf16>
    %cst_11 = arith.constant dense<0.000000e+00> : vector<640x256xf32>
    %25 = tpu.matmul %24, %23, %cst_11 {dimension_numbers = #tpu.dot_dimension_numbers<[1], [0], [0], [1], [0, 0, 1, 1], [], []>} : vector<640x288xbf16>, vector<288x256xbf16>, vector<640x256xf32> -> vector<640x256xf32>
    %26 = arith.truncf %25 : vector<640x256xf32> to vector<640x256xbf16>
    %27 = vector.extract_strided_slice %26 {offsets = [0, 0], sizes = [128, 256], strides = [1, 1]} : vector<640x256xbf16> to vector<128x256xbf16>
    %28 = vector.shape_cast %27 : vector<128x256xbf16> to vector<8x16x256xbf16>
    %cst_12 = arith.constant dense<0xFF80> : vector<8x256xbf16>
    %29 = vector.multi_reduction <maximumf>, %28, %cst_12 [1] : vector<8x16x256xbf16> to vector<8x256xbf16>
    %30 = vector.extract_strided_slice %26 {offsets = [128, 0], sizes = [512, 256], strides = [1, 1]} : vector<640x256xbf16> to vector<512x256xbf16>
    %31 = vector.shape_cast %30 : vector<512x256xbf16> to vector<8x64x256xbf16>
    %cst_13 = arith.constant dense<0xFF80> : vector<8x256xbf16>
    %32 = vector.multi_reduction <maximumf>, %31, %cst_13 [1] : vector<8x64x256xbf16> to vector<8x256xbf16>
    %c0_14 = arith.constant 0 : index
    %c0_15 = arith.constant 0 : index
    %33 = vector.load %arg6[%c0_14, %c0_15] : memref<1280x96xbf16, #tpu.memory_space<vmem>>, vector<1280x96xbf16>
    %cst_16 = arith.constant dense<0.000000e+00> : vector<1280x256xf32>
    %34 = tpu.matmul %33, %5, %cst_16 {dimension_numbers = #tpu.dot_dimension_numbers<[1], [0], [0], [1], [0, 0, 1, 1], [], []>} : vector<1280x96xbf16>, vector<96x256xbf16>, vector<1280x256xf32> -> vector<1280x256xf32>
    %35 = arith.truncf %34 : vector<1280x256xf32> to vector<1280x256xbf16>
    %36 = vector.extract_strided_slice %35 {offsets = [0, 0], sizes = [256, 256], strides = [1, 1]} : vector<1280x256xbf16> to vector<256x256xbf16>
    %37 = vector.shape_cast %36 : vector<256x256xbf16> to vector<16x16x256xbf16>
    %cst_17 = arith.constant dense<0xFF80> : vector<16x256xbf16>
    %38 = vector.multi_reduction <maximumf>, %37, %cst_17 [1] : vector<16x16x256xbf16> to vector<16x256xbf16>
    %39 = vector.extract_strided_slice %35 {offsets = [256, 0], sizes = [1024, 256], strides = [1, 1]} : vector<1280x256xbf16> to vector<1024x256xbf16>
    %40 = vector.shape_cast %39 : vector<1024x256xbf16> to vector<16x64x256xbf16>
    %cst_18 = arith.constant dense<0xFF80> : vector<16x256xbf16>
    %41 = vector.multi_reduction <maximumf>, %40, %cst_18 [1] : vector<16x64x256xbf16> to vector<16x256xbf16>
    %c0_19 = arith.constant 0 : index
    %c0_20 = arith.constant 0 : index
    %c0_21 = arith.constant 0 : index
    %c0_22 = arith.constant 0 : index
    %42 = vector.load %arg3[%c0_19, %c0_20, %c0_21, %c0_22] : memref<1x1x16x432xbf16, #tpu.memory_space<vmem>>, vector<1x1x16x432xbf16>
    %43 = vector.shape_cast %42 : vector<1x1x16x432xbf16> to vector<16x432xbf16>
    %44 = vector.extract_strided_slice %43 {offsets = [0, 0], sizes = [16, 256], strides = [1, 1]} : vector<16x432xbf16> to vector<16x256xbf16>
    %45 = vector.extract_strided_slice %43 {offsets = [0, 16], sizes = [16, 256], strides = [1, 1]} : vector<16x432xbf16> to vector<16x256xbf16>
    %46 = vector.extract_strided_slice %43 {offsets = [0, 32], sizes = [16, 256], strides = [1, 1]} : vector<16x432xbf16> to vector<16x256xbf16>
    %47 = vector.extract_strided_slice %43 {offsets = [0, 48], sizes = [16, 256], strides = [1, 1]} : vector<16x432xbf16> to vector<16x256xbf16>
    %48 = vector.extract_strided_slice %43 {offsets = [0, 64], sizes = [16, 256], strides = [1, 1]} : vector<16x432xbf16> to vector<16x256xbf16>
    %49 = vector.extract_strided_slice %43 {offsets = [0, 80], sizes = [16, 256], strides = [1, 1]} : vector<16x432xbf16> to vector<16x256xbf16>
    %50 = vector.extract_strided_slice %43 {offsets = [0, 96], sizes = [16, 256], strides = [1, 1]} : vector<16x432xbf16> to vector<16x256xbf16>
    %51 = vector.extract_strided_slice %43 {offsets = [0, 112], sizes = [16, 256], strides = [1, 1]} : vector<16x432xbf16> to vector<16x256xbf16>
    %52 = vector.extract_strided_slice %43 {offsets = [0, 128], sizes = [16, 256], strides = [1, 1]} : vector<16x432xbf16> to vector<16x256xbf16>
    %53 = vector.extract_strided_slice %43 {offsets = [0, 144], sizes = [16, 256], strides = [1, 1]} : vector<16x432xbf16> to vector<16x256xbf16>
    %54 = vector.extract_strided_slice %43 {offsets = [0, 160], sizes = [16, 256], strides = [1, 1]} : vector<16x432xbf16> to vector<16x256xbf16>
    %55 = tpu.concatenate %44, %45, %46, %47, %48, %49, %50, %51, %52, %53, %54 in 0 : vector<16x256xbf16>, vector<16x256xbf16>, vector<16x256xbf16>, vector<16x256xbf16>, vector<16x256xbf16>, vector<16x256xbf16>, vector<16x256xbf16>, vector<16x256xbf16>, vector<16x256xbf16>, vector<16x256xbf16>, vector<16x256xbf16> -> vector<176x256xbf16>
    %c0_23 = arith.constant 0 : index
    %c0_24 = arith.constant 0 : index
    %56 = vector.load %arg7[%c0_23, %c0_24] : memref<64x176xbf16, #tpu.memory_space<vmem>>, vector<64x176xbf16>
    %cst_25 = arith.constant dense<0.000000e+00> : vector<64x256xf32>
    %57 = tpu.matmul %56, %55, %cst_25 {dimension_numbers = #tpu.dot_dimension_numbers<[1], [0], [0], [1], [0, 0, 1, 1], [], []>} : vector<64x176xbf16>, vector<176x256xbf16>, vector<64x256xf32> -> vector<64x256xf32>
    %58 = arith.truncf %57 : vector<64x256xf32> to vector<64x256xbf16>
    %59 = tpu.concatenate %17, %22, %29, %32, %38, %41, %58 in 0 : vector<8x256xbf16>, vector<8x256xbf16>, vector<8x256xbf16>, vector<8x256xbf16>, vector<16x256xbf16>, vector<16x256xbf16>, vector<64x256xbf16> -> vector<128x256xbf16>
    %60 = arith.extf %59 : vector<128x256xbf16> to vector<128x256xf32>
    %c0_26 = arith.constant 0 : index
    %c0_27 = arith.constant 0 : index
    %61 = vector.load %arg9[%c0_26, %c0_27] : memref<128x1xf32, #tpu.memory_space<vmem>>, vector<128x1xf32>
    %62 = vector.broadcast %61 : vector<128x1xf32> to vector<128x256xf32>
    %63 = arith.addf %60, %62 : vector<128x256xf32>
    %cst_28 = arith.constant 0.000000e+00 : f32
    %64 = vector.broadcast %cst_28 : f32 to vector<128x256xf32>
    %65 = arith.maximumf %63, %64 : vector<128x256xf32>
    %66 = arith.truncf %65 : vector<128x256xf32> to vector<128x256xbf16>
    %c0_29 = arith.constant 0 : index
    %c0_30 = arith.constant 0 : index
    %67 = vector.load %arg8[%c0_29, %c0_30] : memref<32x128xbf16, #tpu.memory_space<vmem>>, vector<32x128xbf16>
    %cst_31 = arith.constant dense<0.000000e+00> : vector<32x256xf32>
    %68 = tpu.matmul %67, %66, %cst_31 {dimension_numbers = #tpu.dot_dimension_numbers<[1], [0], [0], [1], [0, 0, 1, 1], [], []>} : vector<32x128xbf16>, vector<128x256xbf16>, vector<32x256xf32> -> vector<32x256xf32>
    %c0_32 = arith.constant 0 : index
    %c0_33 = arith.constant 0 : index
    %69 = vector.load %arg10[%c0_32, %c0_33] : memref<32x1xf32, #tpu.memory_space<vmem>>, vector<32x1xf32>
    %70 = vector.broadcast %69 : vector<32x1xf32> to vector<32x256xf32>
    %71 = arith.addf %68, %70 : vector<32x256xf32>
    %cst_34 = arith.constant 0.000000e+00 : f32
    %72 = vector.broadcast %cst_34 : f32 to vector<32x256xf32>
    %73 = arith.maximumf %71, %72 : vector<32x256xf32>
    %c0_35 = arith.constant 0 : index
    %c0_36 = arith.constant 0 : index
    %c0_37 = arith.constant 0 : index
    %74 = vector.load %arg11[%c0_35, %c0_36, %c0_37] : memref<1x32x256xf32, #tpu.memory_space<vmem>>, vector<1x32x256xf32>
    %75 = vector.shape_cast %74 : vector<1x32x256xf32> to vector<32x256xf32>
    %76 = vector.shape_cast %73 : vector<32x256xf32> to vector<1x32x256xf32>
    tpu.vector_store %arg11[%c0_35, %c0_36, %c0_37], %76 {strides = array<i32>} : memref<1x32x256xf32, #tpu.memory_space<vmem>>, vector<1x32x256xf32>,
    return
  }
  func.func @transform_0(%arg0: i32, %arg1: i32) -> (i32, i32, i32, i32) {
    %c0_i32 = arith.constant 0 : i32
    %c0_i32_0 = arith.constant 0 : i32
    %c0_i32_1 = arith.constant 0 : i32
    return %arg0, %arg1, %c0_i32, %c0_i32_0 : i32, i32, i32, i32
  }
  func.func @transform_1(%arg0: i32, %arg1: i32) -> (i32, i32, i32, i32) {
    %c0_i32 = arith.constant 0 : i32
    %c0_i32_0 = arith.constant 0 : i32
    %c0_i32_1 = arith.constant 0 : i32
    return %arg0, %arg1, %c0_i32, %c0_i32_0 : i32, i32, i32, i32
  }
  func.func @transform_2(%arg0: i32, %arg1: i32) -> (i32, i32) {
    %c0_i32 = arith.constant 0 : i32
    %c0_i32_0 = arith.constant 0 : i32
    %c0_i32_1 = arith.constant 0 : i32
    return %c0_i32, %c0_i32_0 : i32, i32
  }
  func.func @transform_3(%arg0: i32, %arg1: i32) -> (i32, i32) {
    %c0_i32 = arith.constant 0 : i32
    %c0_i32_0 = arith.constant 0 : i32
    %c0_i32_1 = arith.constant 0 : i32
    return %c0_i32, %c0_i32_0 : i32, i32
  }
  func.func @transform_4(%arg0: i32, %arg1: i32) -> (i32, i32) {
    %c0_i32 = arith.constant 0 : i32
    %c0_i32_0 = arith.constant 0 : i32
    %c0_i32_1 = arith.constant 0 : i32
    return %c0_i32, %c0_i32_0 : i32, i32
  }
  func.func @transform_5(%arg0: i32, %arg1: i32) -> (i32, i32) {
    %c0_i32 = arith.constant 0 : i32
    %c0_i32_0 = arith.constant 0 : i32
    %c0_i32_1 = arith.constant 0 : i32
    return %c0_i32, %c0_i32_0 : i32, i32
  }
  func.func @transform_6(%arg0: i32, %arg1: i32) -> (i32, i32) {
    %c0_i32 = arith.constant 0 : i32
    %c0_i32_0 = arith.constant 0 : i32
    %c0_i32_1 = arith.constant 0 : i32
    return %c0_i32, %c0_i32_0 : i32, i32
  }
  func.func @transform_7(%arg0: i32, %arg1: i32) -> (i32, i32) {
    %c0_i32 = arith.constant 0 : i32
    %c0_i32_0 = arith.constant 0 : i32
    %c0_i32_1 = arith.constant 0 : i32
    return %c0_i32, %c0_i32_0 : i32, i32
  }
  func.func @transform_8(%arg0: i32, %arg1: i32) -> (i32, i32) {
    %c0_i32 = arith.constant 0 : i32
    %c0_i32_0 = arith.constant 0 : i32
    %c0_i32_1 = arith.constant 0 : i32
    return %c0_i32, %c0_i32_0 : i32, i32
  }
  func.func @transform_9(%arg0: i32, %arg1: i32) -> (i32, i32, i32) {
    %c0_i32 = arith.constant 0 : i32
    %c0_i32_0 = arith.constant 0 : i32
    return %arg0, %c0_i32, %arg1 : i32, i32, i32
  }
}

</mosaic_0001>

<bundles_post_ra>
// kernel: tpu_custom_call.1
= control target key start
LH: loop header
LB: loop body
LE: loop exit
PB: predicated region body
PF: predicated region fallthrough
CT: control target
= control target key end

     0   :  { %s13881_s0 = inlined_call_operand.vmem [shape: bf16[2,2,96,264], index: 0, kind: input, shape index: {}]   ;;  %s13882_s1 = inlined_call_operand.vmem [shape: bf16[2,2,16,432], index: 1, kind: input, shape index: {}]   ;;  %s13883_s2 = inlined_call_operand.vmem [shape: bf16[320,672], index: 2, kind: input, shape index: {}]   ;;  %s13884_s3 = inlined_call_operand.vmem [shape: bf16[640,288], index: 3, kind: input, shape index: {}]   ;;  %s13885_s4 = inlined_call_operand.vmem [shape: bf16[1280,96], index: 4, kind: input, shape index: {}]   ;;  %s13886_s5 = inlined_call_operand.vmem [shape: bf16[64,176], index: 5, kind: input, shape index: {}]   ;;  %s13887_s6 = inlined_call_operand.vmem [shape: bf16[32,128], index: 6, kind: input, shape index: {}]   ;;  %s13888_s7 = inlined_call_operand.vmem [shape: f32[128,1], index: 7, kind: input, shape index: {}]   ;;  %s13889_s8 = inlined_call_operand.vmem [shape: f32[32,1], index: 8, kind: input, shape index: {}]   ;;  %s13890_s9 = inlined_call_operand.hbm [shape: f32[2,32,512], index: 9, kind: output, shape index: {}]  }
   0x1   :  { %13906 = sst [smem:[#allocation140_spill]] %s13881_s0 }
   0x2   :  { %14 = vsyncpa [#allocation3], 0 }
   0x3   :  { %16 = vsyncpa [#allocation3 + $0x1], 0  ;;  %s9741_s30 = smov 0   ;;  %s9743_s10 = smov 0  }
   0x4   :  { %s9745_s11 = smov 0   ;;  %s9747_s12 = smov 0  }
   0x5   :  { %s9749_s13 = smov 0   ;;  %s9751_s14 = smov 0  }
   0x6   :  { %s9753_s15 = smov 0   ;;  %s9755_s16 = smov 0  }
   0x7 LB: > { %13907 = sst [smem:[#allocation5_spill]] %s9668_s15  ;;  %s8460_s17 = sadd.s32 4294967295, %s9672_s16   ;;  %s9672_s16 = sphi %s9755_s16, %s22_s16   ;;  %s9668_s15 = sphi %s9753_s15, %s14261_s15   ;;  %s9664_s14 = sphi %s9751_s14, %s14266_s14   ;;  %s9660_s13 = sphi %s9749_s13, %s14259_s13   ;;  %s9656_s12 = sphi %s9747_s12, %s14265_s12   ;;  %s9652_s11 = sphi %s9745_s11, %s14264_s11   ;;  %s9648_s10 = sphi %s9743_s10, %s14263_s10   ;;  %s9644_s30 = sphi %s9741_s30, %s14262_s30  }
   0x8   : > { %s8461_s18 = sadd.s32 4294967294, %s9672_s16   ;;  %s31_s19 = sadd.s32 1, %s9664_s14 }
   0x9   : > { %p32_p0 = scmp.ge.s32.totalorder %s31_s19, 2  ;;  %s34_s20 = sadd.s32 1, %s9668_s15 }
   0xa   : > { %p256_p1 = scmp.ne.s32.totalorder %s9652_s11, %s9648_s10  ;;  %p257_p2 = scmp.eq.s32.totalorder %s8460_s17, 3 }
   0xb   : > { %s14268_s19 = smov (%p32_p0, %s31_s19), 0  ;;  %s14270_s20 = smov (!%p32_p0, %s34_s20), %s9668_s15 }
   0xc   : > { %13908 = sst [smem:[#allocation6_spill]] %s14268_s19  ;;  %s242_s21 = ssub.s32 %s9664_s14, %s14268_s19 }
   0xd   : > { %p9792_p3 = por %p257_p2, %p256_p1  ;;  %p36_p4 = scmp.ge.s32.totalorder %s14270_s20, 2 }
   0xe   : > { %p262_p5 = scmp.ne.s32.totalorder %s9648_s10, %s9644_s30  ;;  %p263_p6 = scmp.eq.s32.totalorder %s8461_s18, 3 }
   0xf   : > { %p8464_p7 = scmp.ge.s32.totalorder %s9672_s16, 1  ;;  %s14272_s20 = smov (%p36_p4, %s14270_s20), 0 }
  0x10   : > { %13910 = sst [smem:[#allocation7_spill]] %s14272_s20  ;;  %p9801_p8 = por %p263_p6, %p262_p5 }
  0x11   : > { %p326_p9 = scmp.lt.s32.totalorder %s9672_s16, 5  ;;  %s241_s24 = ssub.s32 %s9668_s15, %s14272_s20 }
  0x12   : > { %s246_s25 = sadd.s32 1, %s9652_s11  ;;  %s243_s26 = sor.u32 %s242_s21, %s241_s24 }
  0x13   : > { %p327_p10 = pnand %p8464_p7, %p326_p9  ;;  %p244_p11 = scmp.eq.s32.totalorder %s243_s26, 0 }
  0x15   : > { %s9810_s27 = scalar_select %p244_p11, %s9652_s11, %s246_s25  }
  0x16   : > { %330 = sbr.rel (%p327_p10) target bundleno = 1675 (0x68b), region = 56 }
  0x1b   : > { %p375_p12 = scmp.lt.s32.totalorder %s9660_s13, 1  ;;  %p377_p13 = scmp.lt.s32.totalorder %s9656_s12, 1  ;;  %vm667_vm0 = vcmask 1022976   ;;  %v9121_v24 = vld [vmem:[%s13883_s2 + $0xc] ss:$24 sps:$4 sm:$0xff]   ;;  %vm606_vm1 = vcmask 1031168  }
  0x1c   : > { %s13912_s0 = sld [smem:[#allocation140_spill]]  ;;  %s9678_s26 = smov 124   ;;  %1901 = vmatprep.mubr.bf16.mxu1 %v9121_v24  ;;  %v9136_v46 = vld [vmem:[%s13883_s2 + $0x4] ss:$24 sps:$4 sm:$0xff]   ;;  %vm545_vm2 = vcmask 1039360   ;;  %vm789_vm3 = vcmask 1006592  }
  0x1d   : > { %s9815_s28 = scalar_select %p375_p12, %s9660_s13, 1  ;;  %1668 = vmatprep.mubr.bf16.mxu0 %v9136_v46  ;;  %vm728_vm4 = vcmask 1014784   ;;  %vm850_vm5 = vcmask 998400   ;;  %vm1575_vm6 = vcmask 261120   ;;  %vm5494_vm7 = vcmask 785408  }
  0x1e   : > { %s9818_s29 = scalar_select %p377_p13, %s9656_s12, 1  ;;  %vm2471_vm8 = vcmask 1041409   ;;  %vm2473_vm9 = vcmask 1042434   ;;  %vm2475_vm10 = vcmask 1043459   ;;  %vm2482_vm11 = vcmask 1041408  }
  0x1f   : > { %s9005_s17 = smul.u32 72, %s9815_s28  ;;  %s13913_s19 = smov 126   ;;  %vm7749_vm12 = vcmask 1044484   ;;  %vm7751_vm13 = vcmask 1045509   ;;  %vm7753_vm14 = vcmask 1046534   ;;  %vm8006_vm15 = vcmask 1043456  }
  0x20   : > { %s9004_s18 = smul.u32 36, %s9818_s29  ;;  %s13914_s15 = smov 123  }
  0x21   : > { %s13915_s25 = smov 122  }
  0x22   : > { %s381_s21 = sadd.s32 %s9005_s17, %s9004_s18  ;;  %s9674_s17 = smov 125  }
  0x23   : > { %s8466_s24 = sshll.u32 %s381_s21, 2  ;;  %s13895_s18 = smov 126  }
  0x24   : > { %s9825_s20 = scalar_lea.vmem %s13912_s0, %s8466_s24  ;;  %s9676_s21 = smov 127  }
  0x25   : > { %v9828_v0 = vld [vmem:[%s9825_s20 + $0x7c] ss:$12 sps:$4 sm:$0xff]   ;;  %v9831_v1 = vld [vmem:[%s9825_s20 + $0x78] ss:$12 sps:$4 sm:$0xff]   ;;  %v9836_v2 = vld [vmem:[%s9825_s20 + $0x80] ss:$12 sps:$4 sm:$0xff]  }
  0x26   : > { %663 = vrot.lane.b32.xlu0 %v9828_v0, %s9674_s17  ;;  %661 = vrot.lane.b32.xlu1 %v9831_v1, %s9674_s17  ;;  %v9841_v3 = vld [vmem:[%s9825_s20 + $0x64] ss:$12 sps:$4 sm:$0xff]   ;;  %v9846_v4 = vld [vmem:[%s9825_s20 + $0x68] ss:$12 sps:$4 sm:$0xff]   ;;  %s13892_s24 = smov 123  }
  0x27   : > { %v9102_v5 = vld [vmem:[%s9825_s20 + $0x60] ss:$12 sps:$4 sm:$0xff]   ;;  %v9103_v7 = vld [vmem:[%s9825_s20 + $0x50] ss:$12 sps:$4 sm:$0xff]   ;;  %v9106_v8 = vld [vmem:[%s9825_s20 + $0x48] ss:$12 sps:$4 sm:$0xff]  }
  0x28   : > { %v9104_v6 = vld [vmem:[%s9825_s20 + $0x4c] ss:$12 sps:$4 sm:$0xff]   ;;  %v9858_v9 = vld [vmem:[%s9825_s20 + $0x34] ss:$12 sps:$4 sm:$0xff]   ;;  %v9864_v11 = vld [vmem:[%s9825_s20 + $0x30] ss:$12 sps:$4 sm:$0xff]  }
  0x29   : > { %v9109_v10 = vld [vmem:[%s9825_s20 + $0x38] ss:$12 sps:$4 sm:$0xff]   ;;  %v9870_v12 = vld [vmem:[%s9825_s20 + $0x1c] ss:$12 sps:$4 sm:$0xff]   ;;  %v9873_v13 = vld [vmem:[%s9825_s20 + $0x20] ss:$12 sps:$4 sm:$0xff]  }
  0x2a   : > { %665 = vrot.lane.b32.xlu0 %v9836_v2, %s9674_s17  ;;  %657 = vrot.lane.b32.xlu1 %v9841_v3, %s9674_s17  ;;  %v9879_v14 = vld [vmem:[%s9825_s20 + $0x18] ss:$12 sps:$4 sm:$0xff]   ;;  %v9889_v16 = vld [vmem:[%s9825_s20 + $0x8] ss:$12 sps:$4 sm:$0xff]  }
  0x2b   : > { %v9882_v15 = vld [vmem:[%s9825_s20 + $0x4] ss:$12 sps:$4 sm:$0xff]   ;;  %v9892_v17 = vld [vmem:[%s9825_s20] ss:$12 sps:$4 sm:$0xff]   ;;  %v10046_v52 = vld [vmem:[%s9825_s20 + $0x48] ss:$12 sps:$4 sm:$0xff]  }
  0x2c   : > { %v10020_v42 = vld [vmem:[%s9825_s20 + $0x60] ss:$12 sps:$4 sm:$0xff]   ;;  %v10037_v48 = vld [vmem:[%s9825_s20 + $0x50] ss:$12 sps:$4 sm:$0xff]   ;;  %v10062_v57 = vld [vmem:[%s9825_s20 + $0x38] ss:$12 sps:$4 sm:$0xff]  }
  0x2d   : > { %v10032_v47 = vld [vmem:[%s9825_s20 + $0x4c] ss:$12 sps:$4 sm:$0xff]   ;;  %v10054_v54 = vld [vmem:[%s9825_s20 + $0x34] ss:$12 sps:$4 sm:$0xff]   ;;  %v10071_v59 = vld [vmem:[%s9825_s20 + $0x30] ss:$12 sps:$4 sm:$0xff]  }
  0x2e   : > { %659 = vrot.lane.b32.xlu0 %v9846_v4, %s9674_s17  ;;  %655 = vrot.lane.b32.xlu1 %v9102_v5, %s9674_s17  ;;  %v10133_v46 = vld [vmem:[%s9825_s20 + $0x4] ss:$12 sps:$4 sm:$0xff]  }
  0x32   : > { %651 = vrot.lane.b32.xlu0 %v9104_v6, %s9674_s17  ;;  %653 = vrot.lane.b32.xlu1 %v9103_v7, %s9674_s17 }
  0x36   : > { %649 = vrot.lane.b32.xlu0 %v9106_v8, %s9674_s17  ;;  %645 = vrot.lane.b32.xlu1 %v9858_v9, %s9674_s17 }
  0x3a   : > { %647 = vrot.lane.b32.xlu0 %v9109_v10, %s9674_s17  ;;  %643 = vrot.lane.b32.xlu1 %v9864_v11, %s9674_s17 }
  0x3e   : > { %639 = vrot.lane.b32.xlu0 %v9870_v12, %s9674_s17  ;;  %641 = vrot.lane.b32.xlu1 %v9873_v13, %s9674_s17 }
  0x42   : > { %637 = vrot.lane.b32.xlu0 %v9879_v14, %s9674_s17  ;;  %633 = vrot.lane.b32.xlu1 %v9882_v15, %s9674_s17 }
  0x46   : > { %635 = vrot.lane.b32.xlu0 %v9889_v16, %s9674_s17  ;;  %631 = vrot.lane.b32.xlu1 %v9892_v17, %s9674_s17  ;;  %s8468_s17 = sshll.u32 %s9815_s28, 4 }
  0x4a   : > { %602 = vrot.lane.b32.xlu0 %v9828_v0, %s13895_s18  ;;  %604 = vrot.lane.b32.xlu1 %v9836_v2, %s13895_s18 }
  0x4e   : > { %517 = vrot.lane.b32.xlu0 %v9870_v12, %s9676_s21  ;;  %519 = vrot.lane.b32.xlu1 %v9873_v13, %s9676_s21 }
  0x52   : > { %600 = vrot.lane.b32.xlu0 %v9831_v1, %s13895_s18  ;;  %515 = vrot.lane.b32.xlu1 %v9879_v14, %s9676_s21 }
  0x56   : > { %596 = vrot.lane.b32.xlu0 %v9841_v3, %s13895_s18  ;;  %598 = vrot.lane.b32.xlu1 %v9846_v4, %s13895_s18 }
  0x5a   : > { %511 = vrot.lane.b32.xlu0 %v9882_v15, %s9676_s21  ;;  %513 = vrot.lane.b32.xlu1 %v9889_v16, %s9676_s21 }
  0x5e   : > { %594 = vrot.lane.b32.xlu0 %v9102_v5, %s13895_s18  ;;  %509 = vrot.lane.b32.xlu1 %v9892_v17, %s9676_s21 }
  0x62   : > { %761 = vrot.lane.b32.xlu0 %v9870_v12, %s13892_s24  ;;  %763 = vrot.lane.b32.xlu1 %v9873_v13, %s13892_s24 }
  0x66   : > { %759 = vrot.lane.b32.xlu0 %v9879_v14, %s13892_s24  ;;  %755 = vrot.lane.b32.xlu1 %v9882_v15, %s13892_s24 }
  0x6a   : > { %757 = vrot.lane.b32.xlu0 %v9889_v16, %s13892_s24  ;;  %753 = vrot.lane.b32.xlu1 %v9892_v17, %s13892_s24 }
  0x6e   : > { %724 = vrot.lane.b32.xlu0 %v9828_v0, %s9678_s26  ;;  %726 = vrot.lane.b32.xlu1 %v9836_v2, %s9678_s26 }
  0x72   : > { %722 = vrot.lane.b32.xlu0 %v9831_v1, %s9678_s26  ;;  %718 = vrot.lane.b32.xlu1 %v9841_v3, %s9678_s26 }
  0x76   : > { %720 = vrot.lane.b32.xlu0 %v9846_v4, %s9678_s26  ;;  %716 = vrot.lane.b32.xlu1 %v9102_v5, %s9678_s26 }
  0x7a   : > { %712 = vrot.lane.b32.xlu0 %v9104_v6, %s9678_s26  ;;  %714 = vrot.lane.b32.xlu1 %v9103_v7, %s9678_s26 }
  0x7e   : > { %710 = vrot.lane.b32.xlu0 %v9106_v8, %s9678_s26  ;;  %706 = vrot.lane.b32.xlu1 %v9858_v9, %s9678_s26 }
  0x82   : > { %708 = vrot.lane.b32.xlu0 %v9109_v10, %s9678_s26  ;;  %704 = vrot.lane.b32.xlu1 %v9864_v11, %s9678_s26 }
  0x86   : > { %700 = vrot.lane.b32.xlu0 %v9870_v12, %s9678_s26  ;;  %702 = vrot.lane.b32.xlu1 %v9873_v13, %s9678_s26 }
  0x8a   : > { %590 = vrot.lane.b32.xlu0 %v9104_v6, %s13895_s18  ;;  %592 = vrot.lane.b32.xlu1 %v9103_v7, %s13895_s18 }
  0x8e   : > { %698 = vrot.lane.b32.xlu0 %v9879_v14, %s9678_s26  ;;  %588 = vrot.lane.b32.xlu1 %v9106_v8, %s13895_s18 }
  0x92   : > { %694 = vrot.lane.b32.xlu0 %v9882_v15, %s9678_s26  ;;  %696 = vrot.lane.b32.xlu1 %v9889_v16, %s9678_s26 }
  0x96   : > { %584 = vrot.lane.b32.xlu0 %v9858_v9, %s13895_s18  ;;  %586 = vrot.lane.b32.xlu1 %v9109_v10, %s13895_s18 }
  0x98   : > { %v664_v18 = vpop.permute.xlu0 %663  ;;  %v662_v19 = vpop.permute.xlu1 %661 }
  0x99   : > { %v9965_v23 = vsel %vm667_vm0, %v662_v19, %v664_v18  ;;  %v10111_v19 = vld [vmem:[%s9825_s20 + $0x64] ss:$12 sps:$4 sm:$0xff]  }
  0x9a   : > { %692 = vrot.lane.b32.xlu0 %v9892_v17, %s9678_s26  ;;  %582 = vrot.lane.b32.xlu1 %v9864_v11, %s13895_s18  ;;  %s9683_s26 = smov 48  }
  0x9c   : > { %v666_v20 = vpop.permute.xlu0 %665  ;;  %v658_v21 = vpop.permute.xlu1 %657 }
  0x9d   : > { %v9959_v22 = vsel %vm667_vm0, %v664_v18, %v666_v20 }
  0x9e   : > { %1869 = vmatprep.subr.bf16.mxu1 %v9959_v22  ;;  %578 = vrot.lane.b32.xlu0 %v9870_v12, %s13895_s18 }
  0x9f   : > { %580 = vrot.lane.b32.xlu1 %v9873_v13, %s13895_s18  ;;  %1870 = vmatpush1.bf16.msra.mxu1 %v9965_v23 }
  0xa0   : > { %v660_v25 = vpop.permute.xlu0 %659  ;;  %v656_v26 = vpop.permute.xlu1 %655 }
  0xa1   : > { %v9974_v27 = vsel %vm667_vm0, %v658_v21, %v660_v25  ;;  %v9980_v28 = vsel %vm667_vm0, %v656_v26, %v658_v21 }
  0xa2   : > { %1871 = vmatprep.subr.bf16.mxu1 %v9974_v27  ;;  %576 = vrot.lane.b32.xlu0 %v9879_v14, %s13895_s18  ;;  %v10102_v14 = vld [vmem:[%s9825_s20 + $0x7c] ss:$12 sps:$4 sm:$0xff]  }
  0xa3   : > { %572 = vrot.lane.b32.xlu1 %v9882_v15, %s13895_s18  ;;  %1872 = vmatpush1.bf16.msra.mxu1 %v9980_v28 }
  0xa4   : > { %v652_v29 = vpop.permute.xlu0 %651  ;;  %v654_v30 = vpop.permute.xlu1 %653 }
  0xa5   : > { %v9986_v31 = vsel %vm667_vm0, %v652_v29, %v654_v30 }
  0xa6   : > { %574 = vrot.lane.b32.xlu0 %v9889_v16, %s13895_s18  ;;  %1873 = vmatprep.subr.bf16.mxu1 %v9986_v31 }
  0xa7   : > { %570 = vrot.lane.b32.xlu1 %v9892_v17, %s13895_s18  ;;  %v10107_v17 = vld [vmem:[%s9825_s20 + $0x78] ss:$12 sps:$4 sm:$0xff]  }
  0xa8   : > { %v650_v32 = vpop.permute.xlu0 %649  ;;  %v646_v33 = vpop.permute.xlu1 %645 }
  0xa9   : > { %v9994_v34 = vsel %vm667_vm0, %v650_v32, %v652_v29 }
  0xaa   : > { %1874 = vmatpush1.bf16.msra.mxu1 %v9994_v34  ;;  %541 = vrot.lane.b32.xlu0 %v9828_v0, %s9676_s21 }
  0xab   : > { %543 = vrot.lane.b32.xlu1 %v9836_v2, %s9676_s21 }
  0xac   : > { %v648_v35 = vpop.permute.xlu0 %647  ;;  %v644_v36 = vpop.permute.xlu1 %643 }
  0xad   : > { %v10002_v37 = vsel %vm667_vm0, %v646_v33, %v648_v35  ;;  %v10008_v38 = vsel %vm667_vm0, %v644_v36, %v646_v33  ;;  %v10124_v36 = vld [vmem:[%s9825_s20 + $0x1c] ss:$12 sps:$4 sm:$0xff]  }
  0xae   : > { %1875 = vmatprep.subr.bf16.mxu1 %v10002_v37  ;;  %539 = vrot.lane.b32.xlu0 %v9831_v1, %s9676_s21 }
  0xaf   : > { %535 = vrot.lane.b32.xlu1 %v9841_v3, %s9676_s21  ;;  %1876 = vmatpush1.bf16.msra.mxu1 %v10008_v38 }
  0xb0   : > { %v640_v39 = vpop.permute.xlu0 %639  ;;  %v642_v40 = vpop.permute.xlu1 %641 }
  0xb1   : > { %v10014_v41 = vsel %vm667_vm0, %v640_v39, %v642_v40 }
  0xb2   : > { %537 = vrot.lane.b32.xlu0 %v9846_v4, %s9676_s21  ;;  %1877 = vmatprep.subr.bf16.mxu1 %v10014_v41 }
  0xb3   : > { %533 = vrot.lane.b32.xlu1 %v10020_v42, %s9676_s21 }
  0xb4   : > { %v638_v43 = vpop.permute.xlu0 %637  ;;  %v634_v44 = vpop.permute.xlu1 %633 }
  0xb5   : > { %v10025_v45 = vsel %vm667_vm0, %v638_v43, %v640_v39  ;;  %v10129_v43 = vld [vmem:[%s9825_s20 + $0x18] ss:$12 sps:$4 sm:$0xff]  }
  0xb6   : > { %1878 = vmatpush1.bf16.msra.mxu1 %v10025_v45  ;;  %529 = vrot.lane.b32.xlu0 %v10032_v47, %s9676_s21 }
  0xb7   : > { %531 = vrot.lane.b32.xlu1 %v10037_v48, %s9676_s21 }
  0xb8   : > { %v636_v49 = vpop.permute.xlu0 %635  ;;  %v632_v50 = vpop.permute.xlu1 %631 }
  0xb9   : > { %v10042_v51 = vsel %vm667_vm0, %v634_v44, %v636_v49  ;;  %v10051_v53 = vsel %vm667_vm0, %v632_v50, %v634_v44  ;;  %vm7555_vm0 = vcmask 130048  }
  0xba   : > { %1879 = vmatprep.subr.bf16.mxu1 %v10042_v51  ;;  %527 = vrot.lane.b32.xlu0 %v10046_v52, %s9676_s21 }
  0xbb   : > { %523 = vrot.lane.b32.xlu1 %v10054_v54, %s9676_s21  ;;  %1880 = vmatpush1.bf16.msra.mxu1 %v10051_v53 }
  0xbc   : > { %v603_v55 = vpop.permute.xlu0 %602  ;;  %v10059_v56 = vpop.permute.xlu1 %604 }
  0xbd   : > { %v10068_v58 = vsel %vm606_vm1, %v603_v55, %v10059_v56 }
  0xbe   : > { %525 = vrot.lane.b32.xlu0 %v10062_v57, %s9676_s21  ;;  %1881 = vmatprep.subr.bf16.mxu1 %v10068_v58 }
  0xbf   : > { %521 = vrot.lane.b32.xlu1 %v10071_v59, %s9676_s21  ;;  %s13898_s21 = smov 122  }
  0xc0   : > { %v518_v60 = vpop.permute.xlu0 %517  ;;  %v520_v61 = vpop.permute.xlu1 %519 }
  0xc1   : > { %v549_v62 = vsel %vm545_vm2, %v518_v60, %v520_v61 }
  0xc2   : > { %3388 = vrot.lane.b32.xlu0 %v549_v62, %s13895_s18  ;;  %1636 = vmatprep.subr.bf16.mxu0 %v549_v62 }
  0xc3   : > { %3390 = vrot.lane.b32.xlu1 %v520_v61, %s13895_s18 }
  0xc4   : > { %v601_v63 = vpop.permute.xlu0 %600  ;;  %v516_v1 = vpop.permute.xlu1 %515 }
  0xc5   : > { %v10080_v0 = vsel %vm606_vm1, %v601_v63, %v603_v55  ;;  %v548_v2 = vsel %vm545_vm2, %v516_v1, %v518_v60  ;;  %v10139_v60 = vld [vmem:[%s9825_s20] ss:$12 sps:$4 sm:$0xff]  }
  0xc6   : > { %1882 = vmatpush1.bf16.msra.mxu1 %v10080_v0  ;;  %3386 = vrot.lane.b32.xlu0 %v548_v2, %s13895_s18 }
  0xc7   : > { %1637 = vmatpush1.bf16.msra.mxu0 %v548_v2 }
  0xc8   : > { %v597_v3 = vpop.permute.xlu0 %596  ;;  %v10085_v4 = vpop.permute.xlu1 %598 }
  0xc9   : > { %v10089_v5 = vsel %vm606_vm1, %v597_v3, %v10085_v4 }
  0xca   : > { %1883 = vmatprep.subr.bf16.mxu1 %v10089_v5 }
  0xcc   : > { %v512_v6 = vpop.permute.xlu0 %511  ;;  %v514_v7 = vpop.permute.xlu1 %513 }
  0xcd   : > { %v547_v8 = vsel %vm545_vm2, %v512_v6, %v514_v7  ;;  %3384 = vrot.lane.b32.xlu0 %v514_v7, %s13895_s18 }
  0xce   : > { %3382 = vrot.lane.b32.xlu1 %v547_v8, %s13895_s18  ;;  %1638 = vmatprep.subr.bf16.mxu0 %v547_v8 }
  0xd0   : > { %v595_v9 = vpop.permute.xlu0 %594  ;;  %v510_v11 = vpop.permute.xlu1 %509 }
  0xd1   : > { %v10096_v10 = vsel %vm606_vm1, %v595_v9, %v597_v3  ;;  %v546_v12 = vsel %vm545_vm2, %v510_v11, %v512_v6 }
  0xd2   : > { %1884 = vmatpush1.bf16.msra.mxu1 %v10096_v10  ;;  %3380 = vrot.lane.b32.xlu1 %v546_v12, %s13895_s18 }
  0xd3   : > { %1639 = vmatpush1.bf16.msra.mxu0 %v546_v12 }
  0xd4   : > { %v762_v13 = vpop.permute.xlu0 %761  ;;  %1640 = vmatprep.subr.bf16.mxu0 %v10102_v14  ;;  %v764_v15 = vpop.permute.xlu1 %763 }
  0xd5   : > { %v793_v16 = vsel %vm789_vm3, %v762_v13, %v764_v15 }
  0xd6   : > { %1885 = vmatprep.subr.bf16.mxu1 %v793_v16 }
  0xd7   : > { %1641 = vmatpush1.bf16.msra.mxu0 %v10107_v17 }
  0xd8   : > { %v760_v18 = vpop.permute.xlu0 %759  ;;  %1642 = vmatprep.subr.bf16.mxu0 %v10111_v19  ;;  %v756_v20 = vpop.permute.xlu1 %755 }
  0xd9   : > { %v792_v21 = vsel %vm789_vm3, %v760_v18, %v762_v13 }
  0xda   : > { %1886 = vmatpush2.bf16.msra.mxu1 %v792_v21 }
  0xdb   : > { %1643 = vmatpush1.bf16.msra.mxu0 %v10020_v42 }
  0xdc   : > { %v758_v24 = vpop.permute.xlu0 %757  ;;  %1644 = vmatprep.subr.bf16.mxu0 %v10032_v47  ;;  %v754_v25 = vpop.permute.xlu1 %753 }
  0xdd   : > { %v791_v26 = vsel %vm789_vm3, %v756_v20, %v758_v24  ;;  %v790_v29 = vsel %vm789_vm3, %v754_v25, %v756_v20 }
  0xde   : > { %1887 = vmatprep.subr.bf16.mxu1 %v791_v26 }
  0xdf   : > { %1888 = vmatpush2.bf16.msra.mxu1 %v790_v29  ;;  %1645 = vmatpush1.bf16.msra.mxu0 %v10046_v52 }
  0xe0   : > { %v725_v30 = vpop.permute.xlu0 %724  ;;  %1646 = vmatprep.subr.bf16.mxu0 %v10054_v54  ;;  %v727_v32 = vpop.permute.xlu1 %726 }
  0xe1   : > { %v740_v33 = vsel %vm728_vm4, %v725_v30, %v727_v32 }
  0xe2   : > { %1889 = vmatprep.subr.bf16.mxu1 %v740_v33 }
  0xe3   : > { %1647 = vmatpush1.bf16.msra.mxu0 %v10071_v59 }
  0xe4   : > { %v723_v35 = vpop.permute.xlu0 %722  ;;  %1648 = vmatprep.subr.bf16.mxu0 %v10124_v36  ;;  %v719_v39 = vpop.permute.xlu1 %718 }
  0xe5   : > { %v739_v40 = vsel %vm728_vm4, %v723_v35, %v725_v30 }
  0xe6   : > { %1890 = vmatpush2.bf16.msra.mxu1 %v739_v40 }
  0xe7   : > { %1649 = vmatpush1.bf16.msra.mxu0 %v10129_v43 }
  0xe8   : > { %v721_v44 = vpop.permute.xlu0 %720  ;;  %1650 = vmatprep.subr.bf16.mxu0 %v10133_v46  ;;  %v717_v49 = vpop.permute.xlu1 %716 }
  0xe9   : > { %v738_v50 = vsel %vm728_vm4, %v719_v39, %v721_v44  ;;  %v737_v55 = vsel %vm728_vm4, %v717_v49, %v719_v39  ;;  %v9119_v49 = vld [vmem:[%s13883_s2 + $0x8] ss:$24 sps:$4 sm:$0xff]  }
  0xea   : > { %1891 = vmatprep.subr.bf16.mxu1 %v738_v50 }
  0xeb   : > { %1892 = vmatpush2.bf16.msra.mxu1 %v737_v55  ;;  %1651 = vmatpush1.bf16.msra.mxu0 %v10139_v60  ;;  %v9122_v55 = vld [vmem:[%s13883_s2 + $0x3c] ss:$24 sps:$4 sm:$0xff]  }
  0xec   : > { %v713_v61 = vpop.permute.xlu0 %712  ;;  %v715_v62 = vpop.permute.xlu1 %714 }
  0xed   : > { %v736_v63 = vsel %vm728_vm4, %v713_v61, %v715_v62 }
  0xee   : > { %1893 = vmatprep.subr.bf16.mxu1 %v736_v63 }
  0xf0   : > { %v711_v1 = vpop.permute.xlu0 %710  ;;  %v707_v2 = vpop.permute.xlu1 %706 }
  0xf1   : > { %v735_v3 = vsel %vm728_vm4, %v711_v1, %v713_v61 }
  0xf2   : > { %1894 = vmatpush2.bf16.msra.mxu1 %v735_v3 }
  0xf4   : > { %v709_v6 = vpop.permute.xlu0 %708  ;;  %v705_v7 = vpop.permute.xlu1 %704 }
  0xf5   : > { %v734_v8 = vsel %vm728_vm4, %v707_v2, %v709_v6  ;;  %v733_v9 = vsel %vm728_vm4, %v705_v7, %v707_v2  ;;  %v9124_v6 = vld [vmem:[%s13883_s2 + $0x38] ss:$24 sps:$4 sm:$0xff]  }
  0xf6   : > { %1895 = vmatprep.subr.bf16.mxu1 %v734_v8  ;;  %v9125_v8 = vld [vmem:[%s13883_s2 + $0x6c] ss:$24 sps:$4 sm:$0xff]  }
  0xf7   : > { %1896 = vmatpush2.bf16.msra.mxu1 %v733_v9 }
  0xf8   : > { %v701_v11 = vpop.permute.xlu0 %700  ;;  %v703_v12 = vpop.permute.xlu1 %702 }
  0xf9   : > { %v732_v13 = vsel %vm728_vm4, %v701_v11, %v703_v12 }
  0xfa   : > { %1897 = vmatprep.subr.bf16.mxu1 %v732_v13 }
  0xfc   : > { %v591_v15 = vpop.permute.xlu0 %590  ;;  %v593_v16 = vpop.permute.xlu1 %592 }
  0xfd   : > { %v10148_v18 = vsel %vm606_vm1, %v591_v15, %v593_v16  ;;  %3438 = vrot.lane.b32.xlu1 %v593_v16, %s13895_s18  ;;  %v9127_v16 = vld [vmem:[%s13883_s2 + $0x68] ss:$24 sps:$4 sm:$0xff]  }
  0xfe   : > { %3436 = vrot.lane.b32.xlu0 %v10148_v18, %s13895_s18  ;;  %1652 = vmatprep.subr.bf16.mxu0 %v10148_v18 }
 0x100   : > { %v699_v20 = vpop.permute.xlu0 %698  ;;  %v589_v21 = vpop.permute.xlu1 %588 }
 0x101   : > { %v731_v24 = vsel %vm728_vm4, %v699_v20, %v701_v11  ;;  %v10156_v25 = vsel %vm606_vm1, %v589_v21, %v591_v15  ;;  %v9128_v21 = vld [vmem:[%s13883_s2 + $0x9c] ss:$24 sps:$4 sm:$0xff]  }
 0x102   : > { %1898 = vmatpush2.bf16.msra.mxu1 %v731_v24  ;;  %3434 = vrot.lane.b32.xlu0 %v10156_v25, %s13895_s18 }
 0x103   : > { %1653 = vmatpush2.bf16.msra.mxu0 %v10156_v25 }
 0x104   : > { %v695_v26 = vpop.permute.xlu0 %694  ;;  %v697_v29 = vpop.permute.xlu1 %696 }
 0x105   : > { %v730_v30 = vsel %vm728_vm4, %v695_v26, %v697_v29 }
 0x106   : > { %1899 = vmatprep.subr.bf16.mxu1 %v730_v30 }
 0x108   : > { %v585_v32 = vpop.permute.xlu0 %584  ;;  %v587_v33 = vpop.permute.xlu1 %586 }
 0x109   : > { %v10163_v35 = vsel %vm606_vm1, %v585_v32, %v587_v33  ;;  %3432 = vrot.lane.b32.xlu0 %v587_v33, %s13895_s18 }
 0x10a   : > { %3430 = vrot.lane.b32.xlu1 %v10163_v35, %s13895_s18  ;;  %1654 = vmatprep.subr.bf16.mxu0 %v10163_v35 }
 0x10c   : > { %v693_v39 = vpop.permute.xlu0 %692  ;;  %v583_v40 = vpop.permute.xlu1 %582 }
 0x10d   : > { %v729_v44 = vsel %vm728_vm4, %v693_v39, %v695_v26  ;;  %v10174_v50 = vsel %vm606_vm1, %v583_v40, %v585_v32  ;;  %v9130_v39 = vld [vmem:[%s13883_s2 + $0x98] ss:$24 sps:$4 sm:$0xff]   ;;  %vm7511_vm4 = vcmask 654336  }
 0x10e   : > { %1900 = vmatpush2.bf16.msra.mxu1 %v729_v44  ;;  %3428 = vrot.lane.b32.xlu1 %v10174_v50, %s13895_s18  ;;  %v9131_v44 = vld [vmem:[%s13883_s2 + $0xcc] ss:$24 sps:$4 sm:$0xff]  }
 0x10f   : > { %1655 = vmatpush2.bf16.msra.mxu0 %v10174_v50 }
 0x110   : > { %v579_v61 = vpop.permute.xlu0 %578 }
 0x111   : > { %v581_v62 = vpop.permute.xlu1 %580  ;;  %1902 = vmatmul.mubr.bf16.vlgmr.msra.gmra.mxu1 %v9119_v49 }
 0x112   : > { %v10183_v63 = vsel %vm606_vm1, %v579_v61, %v581_v62  ;;  %1911 = vmatprep.mubr.bf16.mxu1 %v9122_v55  ;;  %3426 = vrot.lane.b32.xlu1 %v581_v62, %s13895_s18 }
 0x113   : > { %3424 = vrot.lane.b32.xlu0 %v10183_v63, %s13895_s18  ;;  %1656 = vmatprep.subr.bf16.mxu0 %v10183_v63 }
 0x114   : > { %v577_v1 = vpop.permute.xlu0 %576 }
 0x115   : > { %v10190_v2 = vsel %vm606_vm1, %v577_v1, %v579_v61  ;;  %v573_v3 = vpop.permute.xlu1 %572 }
 0x116   : > { %1657 = vmatpush2.bf16.msra.mxu0 %v10190_v2 }
 0x117   : > { %3422 = vrot.lane.b32.xlu0 %v10190_v2, %s13895_s18 }
 0x118   : > { %v575_v7 = vpop.permute.xlu0 %574 }
 0x119   : > { %v571_v9 = vpop.permute.xlu1 %570  ;;  %v10202_v11 = vsel %vm606_vm1, %v573_v3, %v575_v7  ;;  %1912 = vmatmul.mubr.bf16.gmra.mxu1 %v9124_v6  ;;  %v9133_v6 = vld [vmem:[%s13883_s2 + $0xc8] ss:$24 sps:$4 sm:$0xff]  }
 0x11a   : > { %v10205_v12 = vsel %vm606_vm1, %v571_v9, %v573_v3  ;;  %3418 = vrot.lane.b32.xlu1 %v10202_v11, %s13895_s18  ;;  %1658 = vmatprep.subr.bf16.mxu0 %v10202_v11 }
 0x11b   : > { %3420 = vrot.lane.b32.xlu0 %v575_v7, %s13895_s18  ;;  %1659 = vmatpush2.bf16.msra.mxu0 %v10205_v12 }
 0x11c   : > { %v542_v13 = vpop.permute.xlu0 %541  ;;  %1921 = vmatprep.mubr.bf16.mxu1 %v9125_v8  ;;  %v9137_v8 = vld [vmem:[%s13883_s2 + $0xfc] ss:$24 sps:$4 sm:$0xff]  }
 0x11d   : > { %v544_v15 = vpop.permute.xlu1 %543 }
 0x11e   : > { %3416 = vrot.lane.b32.xlu1 %v10205_v12, %s13895_s18  ;;  %v557_v20 = vsel %vm545_vm2, %v542_v13, %v544_v15 }
 0x11f   : > { %3412 = vrot.lane.b32.xlu0 %v557_v20, %s13895_s18  ;;  %1660 = vmatprep.subr.bf16.mxu0 %v557_v20  ;;  %v9140_v20 = vld [vmem:[%s13883_s2 + $0x34] ss:$24 sps:$4 sm:$0xff]  }
 0x120   : > { %v540_v24 = vpop.permute.xlu0 %539 }
 0x121   : > { %v536_v26 = vpop.permute.xlu1 %535  ;;  %v556_v29 = vsel %vm545_vm2, %v540_v24, %v542_v13  ;;  %1922 = vmatmul.mubr.bf16.gmra.mxu1 %v9127_v16  ;;  %v9134_v16 = vld [vmem:[%s13883_s2] ss:$24 sps:$4 sm:$0xff]  }
 0x122   : > { %3414 = vrot.lane.b32.xlu1 %v544_v15, %s13895_s18  ;;  %1661 = vmatpush2.bf16.msra.mxu0 %v556_v29  ;;  %v9139_v24 = vld [vmem:[%s13883_s2 + $0xf8] ss:$24 sps:$4 sm:$0xff]  }
 0x123   : > { %834 = vrot.lane.b32.xlu0 %v10032_v47, %s13898_s21  ;;  %1931 = vmatprep.mubr.bf16.mxu1 %v9128_v21 }
 0x124   : > { %v538_v30 = vpop.permute.xlu0 %537 }
 0x125   : > { %v534_v32 = vpop.permute.xlu1 %533  ;;  %v555_v33 = vsel %vm545_vm2, %v536_v26, %v538_v30 }
 0x126   : > { %v554_v40 = vsel %vm545_vm2, %v534_v32, %v536_v26  ;;  %836 = vrot.lane.b32.xlu1 %v10037_v48, %s13898_s21  ;;  %1662 = vmatprep.subr.bf16.mxu0 %v555_v33 }
 0x127   : > { %3410 = vrot.lane.b32.xlu0 %v556_v29, %s13895_s18  ;;  %1663 = vmatpush2.bf16.msra.mxu0 %v554_v40  ;;  %v9142_v29 = vld [vmem:[%s13883_s2 + $0x12c] ss:$24 sps:$4 sm:$0xff]  }
 0x128   : > { %v530_v49 = vpop.permute.xlu0 %529 }
 0x129   : > { %v532_v55 = vpop.permute.xlu1 %531  ;;  %1932 = vmatmul.mubr.bf16.gmra.mxu1 %v9130_v39  ;;  %v9144_v39 = vld [vmem:[%s13883_s2 + $0x30] ss:$24 sps:$4 sm:$0xff]  }
 0x12a   : > { %832 = vrot.lane.b32.xlu1 %v10046_v52, %s13898_s21  ;;  %v553_v61 = vsel %vm545_vm2, %v530_v49, %v532_v55  ;;  %1941 = vmatprep.mubr.bf16.mxu1 %v9131_v44  ;;  %v9145_v44 = vld [vmem:[%s13883_s2 + $0x128] ss:$24 sps:$4 sm:$0xff]  }
 0x12b   : > { %3406 = vrot.lane.b32.xlu0 %v555_v33, %s13895_s18  ;;  %1664 = vmatprep.subr.bf16.mxu0 %v553_v61 }
 0x12c   : > { %v528_v62 = vpop.permute.xlu0 %527 }
 0x12d   : > { %v552_v1 = vsel %vm545_vm2, %v528_v62, %v530_v49  ;;  %v524_v3 = vpop.permute.xlu1 %523  ;;  %v9573_v49 = vld [vmem:[%s9825_s20 + $0x20] ss:$12 sps:$4 sm:$0xff]  }
 0x12e   : > { %3408 = vrot.lane.b32.xlu1 %v538_v30, %s13895_s18  ;;  %1665 = vmatpush2.bf16.msra.mxu0 %v552_v1 }
 0x12f   : > { %828 = vrot.lane.b32.xlu0 %v10054_v54, %s13898_s21 }
 0x130   : > { %v526_v7 = vpop.permute.xlu0 %525 }
 0x131   : > { %v522_v9 = vpop.permute.xlu1 %521  ;;  %1942 = vmatmul.mubr.bf16.gmra.mxu1 %v9133_v6  ;;  %v551_v13 = vsel %vm545_vm2, %v524_v3, %v526_v7 }
 0x132   : > { %830 = vrot.lane.b32.xlu1 %v10062_v57, %s13898_s21  ;;  %1666 = vmatprep.subr.bf16.mxu0 %v551_v13  ;;  %v550_v15 = vsel %vm545_vm2, %v522_v9, %v524_v3  ;;  %v9150_v3 = vld [vmem:[%s13883_s2 + $0x60] ss:$24 sps:$4 sm:$0xff]   ;;  %v9154_v9 = vld [vmem:[%s13883_s2 + $0x18c] ss:$24 sps:$4 sm:$0xff]   ;;  %vm7533_vm2 = vcmask 392192  }
 0x133   : > { %3404 = vrot.lane.b32.xlu0 %v554_v40, %s13895_s18  ;;  %1667 = vmatpush2.bf16.msra.mxu0 %v550_v15  ;;  %v9146_v40 = vld [vmem:[%s13883_s2 + $0x64] ss:$24 sps:$4 sm:$0xff]  }
 0x134   : > { %1951 = vmatprep.mubr.bf16.mxu1 %v9137_v8  ;;  %v3389_v21 = vpop.permute.xlu0 %3388 }
 0x135   : > { %v3391_v26 = vpop.permute.xlu1 %3390 }
 0x136   : > { %826 = vrot.lane.b32.xlu1 %v10071_v59, %s13898_s21  ;;  %1669 = vmatmul.mubr.bf16.vlgmr.msra.gmra.mxu0 %v9134_v16  ;;  %v10272_v30 = vsel %vm606_vm1, %v3389_v21, %v3391_v26  ;;  %v9157_v16 = vld [vmem:[%s13883_s2 + $0x188] ss:$24 sps:$4 sm:$0xff]   ;;  %v9166_v26 = vld [vmem:[%s13883_s2 + $0x1ec] ss:$24 sps:$4 sm:$0xff]  }
 0x137   : > { %3400 = vrot.lane.b32.xlu0 %v553_v61, %s13895_s18  ;;  %1678 = vmatprep.mubr.bf16.mxu0 %v9140_v20  ;;  %v9575_v20 = vld [vmem:[%s9825_s20 + $0x80] ss:$12 sps:$4 sm:$0xff]  }
 0x138   : > { %8972 = vmatprep.subr.bf16.mxu1 %v10272_v30  ;;  %v3387_v32 = vpop.permute.xlu0 %3386 }
 0x139   : > { %1952 = vmatmul.mubr.bf16.gmra.mxu1 %v9139_v24  ;;  %v10276_v33 = vsel %vm606_vm1, %v3387_v32, %v3389_v21  ;;  %v9164_v21 = vld [vmem:[%s13883_s2 + $0xf4] ss:$24 sps:$4 sm:$0xff]   ;;  %v9163_v24 = vld [vmem:[%s13883_s2 + $0x1b8] ss:$24 sps:$4 sm:$0xff]  }
 0x13a   : > { %3402 = vrot.lane.b32.xlu1 %v532_v55, %s13895_s18  ;;  %1961 = vmatprep.mubr.bf16.mxu1 %v9142_v29  ;;  %v9148_v55 = vld [vmem:[%s13883_s2 + $0x15c] ss:$24 sps:$4 sm:$0xff]   ;;  %v9168_v32 = vld [vmem:[%s13883_s2 + $0xf0] ss:$24 sps:$4 sm:$0xff]   ;;  %s9682_s18 = smov 32  }
 0x13b   : > { %822 = vrot.lane.b32.xlu0 %v10124_v36, %s13898_s21  ;;  %8988 = vmatpush1.bf16.msra.mxu1 %v10276_v33  ;;  %v9576_v29 = vld [vmem:[%s9825_s20 + $0x68] ss:$12 sps:$4 sm:$0xff]  }
 0x13e   : > { %824 = vrot.lane.b32.xlu1 %v9573_v49, %s13898_s21  ;;  %1679 = vmatmul.mubr.bf16.gmra.mxu0 %v9144_v39  ;;  %v9170_v39 = vld [vmem:[%s13883_s2 + $0x124] ss:$24 sps:$4 sm:$0xff]  }
 0x13f   : > { %3398 = vrot.lane.b32.xlu0 %v552_v1, %s13913_s19  ;;  %1688 = vmatprep.mubr.bf16.mxu0 %v9146_v40  ;;  %v3385_v36 = vpop.permute.xlu0 %3384  ;;  %v9152_v1 = vld [vmem:[%s13883_s2 + $0x94] ss:$24 sps:$4 sm:$0xff]   ;;  %v9169_v40 = vld [vmem:[%s13883_s2 + $0x1e8] ss:$24 sps:$4 sm:$0xff]  }
 0x140   : > { %v3383_v61 = vpop.permute.xlu1 %3382  ;;  %v9182_v49 = vld [vmem:[%s13883_s2 + $0x27c] ss:$24 sps:$4 sm:$0xff]  }
 0x141   : > { %1962 = vmatmul.mubr.bf16.gmra.mxu1 %v9145_v44  ;;  %v10300_v62 = vsel %vm606_vm1, %v3383_v61, %v3385_v36  ;;  %v9176_v44 = vld [vmem:[%s13883_s2 + $0x154] ss:$24 sps:$4 sm:$0xff]  }
 0x142   : > { %820 = vrot.lane.b32.xlu1 %v10129_v43, %s13898_s21  ;;  %1971 = vmatprep.mubr.bf16.mxu1 %v9148_v55  ;;  %v9151_v43 = vld [vmem:[%s13883_s2 + $0x158] ss:$24 sps:$4 sm:$0xff]  }
 0x143   : > { %3394 = vrot.lane.b32.xlu0 %v551_v13, %s13913_s19  ;;  %8973 = vmatprep.subr.bf16.mxu1 %v10300_v62  ;;  %v9574_v13 = vld [vmem:[%s9825_s20 + $0x8] ss:$12 sps:$4 sm:$0xff]  }
 0x144   : > { %v3381_v6 = vpop.permute.xlu1 %3380 }
 0x145   : > { %v10314_v8 = vsel %vm606_vm1, %v3381_v6, %v3383_v61  ;;  %v9190_v61 = vld [vmem:[%s13883_s2 + $0x1b4] ss:$24 sps:$4 sm:$0xff]  }
 0x146   : > { %3396 = vrot.lane.b32.xlu1 %v526_v7, %s13913_s19  ;;  %1689 = vmatmul.mubr.bf16.gmra.mxu0 %v9150_v3  ;;  %v9156_v7 = vld [vmem:[%s13883_s2 + $0x90] ss:$24 sps:$4 sm:$0xff]   ;;  %v9188_v6 = vld [vmem:[%s13883_s2 + $0x2ac] ss:$24 sps:$4 sm:$0xff]  }
 0x147   : > { %816 = vrot.lane.b32.xlu0 %v10133_v46, %s13898_s21  ;;  %8989 = vmatpush1.bf16.msra.mxu1 %v10314_v8  ;;  %v9158_v46 = vld [vmem:[%s13883_s2 + $0xc4] ss:$24 sps:$4 sm:$0xff]  }
 0x148   : > { %8974 = vmatprep.subr.bf16.mxu1 %v10068_v58  ;;  %1698 = vmatprep.mubr.bf16.mxu0 %v9152_v1 }
 0x149   : > { %1972 = vmatmul.mubr.bf16.gmra.mxu1 %v9151_v43  ;;  %v9196_v43 = vld [vmem:[%s13883_s2 + $0x1e4] ss:$24 sps:$4 sm:$0xff]  }
 0x14a   : > { %818 = vrot.lane.b32.xlu1 %v9574_v13, %s13898_s21  ;;  %1981 = vmatprep.mubr.bf16.mxu1 %v9154_v9 }
 0x14b   : > { %3392 = vrot.lane.b32.xlu0 %v550_v15, %s13913_s19  ;;  %8990 = vmatpush1.bf16.msra.mxu1 %v10080_v0  ;;  %v9160_v15 = vld [vmem:[%s13883_s2 + $0x1bc] ss:$24 sps:$4 sm:$0xff]  }
 0x14c   : > { %8975 = vmatprep.subr.bf16.mxu1 %v10089_v5 }
 0x14e   : > { %814 = vrot.lane.b32.xlu1 %v10139_v60, %s13898_s21  ;;  %1699 = vmatmul.mubr.bf16.gmra.mxu0 %v9156_v7  ;;  %v9162_v60 = vld [vmem:[%s13883_s2 + $0xc0] ss:$24 sps:$4 sm:$0xff]   ;;  %s9681_s21 = smov 16  }
 0x14f   : > { %785 = vrot.lane.b32.xlu0 %v10102_v14, %s13914_s15  ;;  %8991 = vmatpush1.bf16.msra.mxu1 %v10096_v10  ;;  %v9193_v7 = vld [vmem:[%s13883_s2 + $0x2a8] ss:$24 sps:$4 sm:$0xff]  }
 0x150   : > { %8976 = vmatprep.subr.bf16.mxu1 %v10148_v18  ;;  %1708 = vmatprep.mubr.bf16.mxu0 %v9158_v46 }
 0x151   : > { %1982 = vmatmul.mubr.bf16.gmra.mxu1 %v9157_v16 }
 0x152   : > { %787 = vrot.lane.b32.xlu1 %v9575_v20, %s13914_s15  ;;  %1991 = vmatprep.mubr.bf16.mxu1 %v9160_v15 }
 0x153   : > { %783 = vrot.lane.b32.xlu0 %v10107_v17, %s13914_s15  ;;  %8992 = vmatpush1.bf16.msra.mxu1 %v10156_v25 }
 0x154   : > { %8977 = vmatprep.subr.bf16.mxu1 %v10163_v35 }
 0x156   : > { %779 = vrot.lane.b32.xlu1 %v10111_v19, %s13914_s15  ;;  %1709 = vmatmul.mubr.bf16.gmra.mxu0 %v9162_v60  ;;  %v9202_v60 = vld [vmem:[%s13883_s2 + $0x214] ss:$24 sps:$4 sm:$0xff]  }
 0x157   : > { %781 = vrot.lane.b32.xlu0 %v9576_v29, %s13914_s15  ;;  %8993 = vmatpush1.bf16.msra.mxu1 %v10174_v50 }
 0x158   : > { %8978 = vmatprep.subr.bf16.mxu1 %v10183_v63  ;;  %1718 = vmatprep.mubr.bf16.mxu0 %v9164_v21 }
 0x159   : > { %1992 = vmatmul.mubr.bf16.gmra.mxu1 %v9163_v24  ;;  %v9199_v24 = vld [vmem:[%s13883_s2 + $0x2d8] ss:$24 sps:$4 sm:$0xff]  }
 0x15a   : > { %777 = vrot.lane.b32.xlu1 %v10020_v42, %s13914_s15  ;;  %2001 = vmatprep.mubr.bf16.mxu1 %v9166_v26 }
 0x15b   : > { %773 = vrot.lane.b32.xlu0 %v10032_v47, %s13914_s15  ;;  %8994 = vmatpush1.bf16.msra.mxu1 %v10190_v2  ;;  %v9172_v47 = vld [vmem:[%s13883_s2 + $0x21c] ss:$24 sps:$4 sm:$0xff]  }
 0x15c   : > { %8979 = vmatprep.subr.bf16.mxu1 %v10202_v11 }
 0x15e   : > { %775 = vrot.lane.b32.xlu1 %v10037_v48, %s13914_s15  ;;  %1719 = vmatmul.mubr.bf16.gmra.mxu0 %v9168_v32  ;;  %v9174_v48 = vld [vmem:[%s13883_s2 + $0x120] ss:$24 sps:$4 sm:$0xff]  }
 0x15f   : > { %771 = vrot.lane.b32.xlu0 %v10046_v52, %s13914_s15  ;;  %8995 = vmatpush1.bf16.msra.mxu1 %v10205_v12  ;;  %v9175_v52 = vld [vmem:[%s13883_s2 + $0x218] ss:$24 sps:$4 sm:$0xff]  }
 0x160   : > { %1728 = vmatprep.mubr.bf16.mxu0 %v9170_v39 }
 0x161   : > { %2002 = vmatmul.mubr.bf16.gmra.mxu1 %v9169_v40 }
 0x162   : > { %767 = vrot.lane.b32.xlu1 %v10054_v54, %s13914_s15  ;;  %2011 = vmatprep.mubr.bf16.mxu1 %v9172_v47  ;;  %v9178_v54 = vld [vmem:[%s13883_s2 + $0x24c] ss:$24 sps:$4 sm:$0xff]   ;;  %v9204_v47 = vld [vmem:[%s13883_s2 + $0x210] ss:$24 sps:$4 sm:$0xff]  }
 0x163   : > { %769 = vrot.lane.b32.xlu0 %v10062_v57, %s13914_s15  ;;  %v9180_v57 = vld [vmem:[%s13883_s2 + $0x150] ss:$24 sps:$4 sm:$0xff]  }
 0x166   : > { %765 = vrot.lane.b32.xlu1 %v10071_v59, %s13914_s15  ;;  %1729 = vmatmul.mubr.bf16.gmra.mxu0 %v9174_v48  ;;  %v9184_v59 = vld [vmem:[%s13883_s2 + $0x184] ss:$24 sps:$4 sm:$0xff]  }
 0x167   : > { %846 = vrot.lane.b32.xlu0 %v10102_v14, %s13915_s25  ;;  %1738 = vmatprep.mubr.bf16.mxu0 %v9176_v44  ;;  %v9181_v14 = vld [vmem:[%s13883_s2 + $0x248] ss:$24 sps:$4 sm:$0xff]   ;;  %v9208_v48 = vld [vmem:[%s13883_s2 + $0x244] ss:$24 sps:$4 sm:$0xff]  }
 0x169   : > { %2012 = vmatmul.mubr.bf16.gmra.mxu1 %v9175_v52 }
 0x16a   : > { %848 = vrot.lane.b32.xlu1 %v9575_v20, %s13915_s25  ;;  %2021 = vmatprep.mubr.bf16.mxu1 %v9178_v54  ;;  %v9198_v20 = vld [vmem:[%s13883_s2 + $0x1e0] ss:$24 sps:$4 sm:$0xff]  }
 0x16b   : > { %844 = vrot.lane.b32.xlu0 %v10107_v17, %s13915_s25  ;;  %v9205_v54 = vld [vmem:[%s13883_s2 + $0x308] ss:$24 sps:$4 sm:$0xff]  }
 0x16e   : > { %840 = vrot.lane.b32.xlu1 %v10111_v19, %s13915_s25  ;;  %1739 = vmatmul.mubr.bf16.gmra.mxu0 %v9180_v57  ;;  %v9186_v19 = vld [vmem:[%s13883_s2 + $0x180] ss:$24 sps:$4 sm:$0xff]  }
 0x16f   : > { %842 = vrot.lane.b32.xlu0 %v9576_v29, %s13915_s25  ;;  %1748 = vmatprep.mubr.bf16.mxu0 %v9184_v59  ;;  %v3439_v17 = vpop.permute.xlu1 %3438  ;;  %v9200_v29 = vld [vmem:[%s13883_s2 + $0x30c] ss:$24 sps:$4 sm:$0xff]   ;;  %v9206_v59 = vld [vmem:[%s13883_s2 + $0x33c] ss:$24 sps:$4 sm:$0xff]  }
 0x170   : > { %v3437_v55 = vpop.permute.xlu0 %3436 }
 0x171   : > { %2022 = vmatmul.mubr.bf16.gmra.mxu1 %v9181_v14  ;;  %v10435_v36 = vsel %vm606_vm1, %v3437_v55, %v3439_v17 }
 0x172   : > { %838 = vrot.lane.b32.xlu1 %v10020_v42, %s13915_s25  ;;  %2031 = vmatprep.mubr.bf16.mxu1 %v9182_v49  ;;  %v9187_v42 = vld [vmem:[%s13883_s2 + $0x278] ss:$24 sps:$4 sm:$0xff]   ;;  %s8467_s25 = sshll.u32 %s9818_s29, 3 }
 0x173   : > { %3448 = vrot.lane.b32.xlu0 %v10068_v58, %s13913_s19  ;;  %8980 = vmatprep.subr.bf16.mxu1 %v10435_v36 }
 0x174   : > { %v3435_v3 = vpop.permute.xlu0 %3434 }
 0x175   : > { %v10450_v1 = vsel %vm606_vm1, %v3435_v3, %v3437_v55  ;;  %v9210_v55 = vld [vmem:[%s13883_s2 + $0x240] ss:$24 sps:$4 sm:$0xff]  }
 0x176   : > { %3450 = vrot.lane.b32.xlu1 %v10059_v56, %s13913_s19  ;;  %1749 = vmatmul.mubr.bf16.gmra.mxu0 %v9186_v19  ;;  %v9192_v56 = vld [vmem:[%s13883_s2 + $0x1b0] ss:$24 sps:$4 sm:$0xff]   ;;  %v9214_v19 = vld [vmem:[%s13883_s2 + $0x274] ss:$24 sps:$4 sm:$0xff]  }
 0x177   : > { %3446 = vrot.lane.b32.xlu0 %v10080_v0, %s13913_s19  ;;  %8996 = vmatpush2.bf16.msra.mxu1 %v10450_v1 }
 0x178   : > { %1758 = vmatprep.mubr.bf16.mxu0 %v9190_v61 }
 0x179   : > { %2032 = vmatmul.mubr.bf16.gmra.mxu1 %v9187_v42 }
 0x17a   : > { %3442 = vrot.lane.b32.xlu1 %v10089_v5, %s13913_s19  ;;  %2041 = vmatprep.mubr.bf16.mxu1 %v9188_v6  ;;  %v9211_v6 = vld [vmem:[%s13883_s2 + $0x338] ss:$24 sps:$4 sm:$0xff]  }
 0x17b   : > { %3444 = vrot.lane.b32.xlu0 %v10085_v4, %s13913_s19  ;;  %v3433_v9 = vpop.permute.xlu0 %3432  ;;  %v9194_v4 = vld [vmem:[%s13883_s2 + $0x2dc] ss:$24 sps:$4 sm:$0xff]  }
 0x17c   : > { %v3431_v13 = vpop.permute.xlu1 %3430 }
 0x17d   : > { %v10476_v46 = vsel %vm606_vm1, %v3431_v13, %v3433_v9 }
 0x17e   : > { %3440 = vrot.lane.b32.xlu1 %v10096_v10, %s13913_s19  ;;  %1759 = vmatmul.mubr.bf16.gmra.mxu0 %v9192_v56  ;;  %v9212_v56 = vld [vmem:[%s13883_s2 + $0x36c] ss:$24 sps:$4 sm:$0xff]   ;;  %s390_s19 = sadd.s32 %s8468_s17, %s8467_s25  ;;  %s9685_s17 = smov 80  }
 0x17f   : > { %8981 = vmatprep.subr.bf16.mxu1 %v10476_v46  ;;  %1768 = vmatprep.mubr.bf16.mxu0 %v9196_v43  ;;  %s8469_s28 = sshll.u32 %s390_s19, 2  ;;  %s9684_s19 = smov 64  }
 0x180   : > { %v3429_v16 = vpop.permute.xlu1 %3428  ;;  %s10966_s24 = scalar_lea.vmem %s13882_s1, %s8469_s28 }
 0x181   : > { %2042 = vmatmul.mubr.bf16.gmra.mxu1 %v9193_v7  ;;  %v10483_v15 = vsel %vm606_vm1, %v3429_v16, %v3431_v13 }
 0x182   : > { %2051 = vmatprep.mubr.bf16.mxu1 %v9194_v4  ;;  %8997 = vmatpush2.bf16.msra.mxu1 %v10483_v15  ;;  %v9216_v4 = vld [vmem:[%s13883_s2 + $0x270] ss:$24 sps:$4 sm:$0xff]  }
 0x184   : > { %v3427_v26 = vpop.permute.xlu1 %3426 }
 0x185   : > { %v3425_v21 = vpop.permute.xlu0 %3424 }
 0x186   : > { %1769 = vmatmul.mubr.bf16.gmra.mxu0 %v9198_v20  ;;  %v10499_v32 = vsel %vm606_vm1, %v3425_v21, %v3427_v26  ;;  %v9220_v20 = vld [vmem:[%s13883_s2 + $0x2a4] ss:$24 sps:$4 sm:$0xff]  }
 0x187   : > { %1778 = vmatprep.mubr.bf16.mxu0 %v9202_v60  ;;  %8982 = vmatprep.subr.bf16.mxu1 %v10499_v32  ;;  %v9218_v26 = vld [vmem:[%s13883_s2 + $0x39c] ss:$24 sps:$4 sm:$0xff]  }
 0x189   : > { %v3423_v39 = vpop.permute.xlu0 %3422  ;;  %2052 = vmatmul.mubr.bf16.gmra.mxu1 %v9199_v24  ;;  %v9217_v24 = vld [vmem:[%s13883_s2 + $0x368] ss:$24 sps:$4 sm:$0xff]  }
 0x18a   : > { %v10503_v40 = vsel %vm606_vm1, %v3423_v39, %v3425_v21  ;;  %2061 = vmatprep.mubr.bf16.mxu1 %v9200_v29 }
 0x18b   : > { %8998 = vmatpush2.bf16.msra.mxu1 %v10503_v40 }
 0x18c   : > { %v3419_v44 = vpop.permute.xlu1 %3418 }
 0x18d   : > { %v3421_v52 = vpop.permute.xlu0 %3420 }
 0x18e   : > { %v10516_v57 = vsel %vm606_vm1, %v3419_v44, %v3421_v52  ;;  %1779 = vmatmul.mubr.bf16.gmra.mxu0 %v9204_v47  ;;  %v9227_v52 = vld [vmem:[%s13883_s2 + $0x2d4] ss:$24 sps:$4 sm:$0xff]  }
 0x18f   : > { %8983 = vmatprep.subr.bf16.mxu1 %v10516_v57  ;;  %1788 = vmatprep.mubr.bf16.mxu0 %v9208_v48  ;;  %v9222_v48 = vld [vmem:[%s13883_s2 + $0x2a0] ss:$24 sps:$4 sm:$0xff]  }
 0x190   : > { %v3417_v14 = vpop.permute.xlu1 %3416 }
 0x191   : > { %v3413_v49 = vpop.permute.xlu0 %3412  ;;  %v10523_v17 = vsel %vm606_vm1, %v3417_v14, %v3419_v44  ;;  %2062 = vmatmul.mubr.bf16.gmra.mxu1 %v9205_v54  ;;  %v9223_v14 = vld [vmem:[%s13883_s2 + $0x398] ss:$24 sps:$4 sm:$0xff]  }
 0x192   : > { %8999 = vmatpush2.bf16.msra.mxu1 %v10523_v17  ;;  %2071 = vmatprep.mubr.bf16.mxu1 %v9206_v59 }
 0x194   : > { %v3415_v61 = vpop.permute.xlu1 %3414 }
 0x195   : > { %v835_v3 = vpop.permute.xlu0 %834  ;;  %v10533_v42 = vsel %vm606_vm1, %v3413_v49, %v3415_v61  ;;  %v13900_v61 = vmov 0  }
 0x196   : > { %8984 = vmatprep.subr.bf16.mxu1 %v10533_v42  ;;  %1789 = vmatmul.mubr.bf16.gmra.mxu0 %v9210_v55  ;;  %v9226_v55 = vld [vmem:[%s13884_s3 + $0x28c] ss:$12 sps:$4 sm:$0xff]  }
 0x197   : > { %1798 = vmatprep.mubr.bf16.mxu0 %v9214_v19  ;;  %9093 = vset.pattern.permute.xlu1 %v13900_v61 }
 0x198   : > { %v837_v43 = vpop.permute.xlu1 %836  ;;  %9094 = vset.pattern.permute.xlu0 %v13900_v61 }
 0x199   : > { %v3411_v9 = vpop.permute.xlu0 %3410  ;;  %v858_v13 = vsel %vm850_vm5, %v835_v3, %v837_v43  ;;  %2072 = vmatmul.mubr.bf16.gmra.mxu1 %v9211_v6 }
 0x19a   : > { %v10544_v7 = vsel %vm606_vm1, %v3411_v9, %v3413_v49  ;;  %2102 = vmatprep.subr.bf16.mxu0 %v858_v13  ;;  %2081 = vmatprep.mubr.bf16.mxu1 %v9212_v56  ;;  %v9229_v56 = vld [vmem:[%s13883_s2 + $0x2d0] ss:$24 sps:$4 sm:$0xff]   ;;  %v9230_v9 = vld [vmem:[%s13883_s2 + $0x304] ss:$24 sps:$4 sm:$0xff]  }
 0x19b   : > { %9000 = vmatpush2.bf16.msra.mxu1 %v10544_v7 }
 0x19c   : > { %v833_v16 = vpop.permute.xlu1 %832 }
 0x19d   : > { %v3407_v60 = vpop.permute.xlu0 %3406  ;;  %v857_v21 = vsel %vm850_vm5, %v833_v16, %v835_v3 }
 0x19e   : > { %2103 = vmatpush1.bf16.msra.mxu0 %v857_v21 }
 0x19f   : > { %1799 = vmatmul.mubr.bf16.gmra.mxu0 %v9216_v4 }
 0x1a0   : > { %v3409_v29 = vpop.permute.xlu1 %3408  ;;  %1808 = vmatprep.mubr.bf16.mxu0 %v9220_v20 }
 0x1a1   : > { %v829_v39 = vpop.permute.xlu0 %828  ;;  %v10561_v47 = vsel %vm606_vm1, %v3407_v60, %v3409_v29  ;;  %2082 = vmatmul.mubr.bf16.gmra.mxu1 %v9217_v24  ;;  %v9234_v24 = vld [vmem:[%s13883_s2 + $0x300] ss:$24 sps:$4 sm:$0xff]   ;;  %v9236_v29 = vld [vmem:[%s13883_s2 + $0x334] ss:$24 sps:$4 sm:$0xff]  }
 0x1a2   : > { %8985 = vmatprep.subr.bf16.mxu1 %v10561_v47  ;;  %2091 = vmatprep.mubr.bf16.mxu1 %v9218_v26 }
 0x1a4   : > { %v831_v44 = vpop.permute.xlu1 %830 }
 0x1a5   : > { %v3405_v54 = vpop.permute.xlu0 %3404  ;;  %v856_v59 = vsel %vm850_vm5, %v829_v39, %v831_v44 }
 0x1a6   : > { %v10575_v49 = vsel %vm606_vm1, %v3405_v54, %v3407_v60  ;;  %2104 = vmatprep.subr.bf16.mxu0 %v856_v59  ;;  %v9240_v59 = vld [vmem:[%s13883_s2 + $0x330] ss:$24 sps:$4 sm:$0xff]  }
 0x1a7   : > { %9001 = vmatpush2.bf16.msra.mxu1 %v10575_v49  ;;  %1809 = vmatmul.mubr.bf16.gmra.mxu0 %v9222_v48 }
 0x1a8   : > { %v827_v19 = vpop.permute.xlu1 %826  ;;  %1818 = vmatprep.mubr.bf16.mxu0 %v9227_v52 }
 0x1a9   : > { %v3401_v3 = vpop.permute.xlu0 %3400  ;;  %v855_v6 = vsel %vm850_vm5, %v827_v19, %v829_v39  ;;  %2092 = vmatmul.mubr.bf16.gmra.mxu1 %v9223_v14 }
 0x1aa   : > { %2105 = vmatpush1.bf16.msra.mxu0 %v855_v6  ;;  %3922 = vmatprep.mubr.bf16.mxu1 %v9226_v55  ;;  %v9242_v55 = vld [vmem:[%s13883_s2 + $0x364] ss:$24 sps:$4 sm:$0xff]  }
 0x1ac   : > { %v3403_v43 = vpop.permute.xlu1 %3402 }
 0x1ad   : > { %v823_v13 = vpop.permute.xlu0 %822  ;;  %v10591_v4 = vsel %vm606_vm1, %v3401_v3, %v3403_v43  ;;  %v9232_v43 = vld [vmem:[%s13884_s3 + $0x2a4] ss:$12 sps:$4 sm:$0xff]  }
 0x1ae   : > { %8986 = vmatprep.subr.bf16.mxu1 %v10591_v4 }
 0x1af   : > { %1819 = vmatmul.mubr.bf16.gmra.mxu0 %v9229_v56  ;;  %v9224_v56 = vld [vmem:[%s13884_s3 + $0x288] ss:$12 sps:$4 sm:$0xff]  }
 0x1b0   : > { %v825_v16 = vpop.permute.xlu1 %824  ;;  %1828 = vmatprep.mubr.bf16.mxu0 %v9230_v9 }
 0x1b1   : > { %v3399_v20 = vpop.permute.xlu0 %3398  ;;  %v854_v60 = vsel %vm850_vm5, %v823_v13, %v825_v16 }
 0x1b2   : > { %v10596_v21 = vsel %vm606_vm1, %v3399_v20, %v3401_v3  ;;  %2106 = vmatprep.subr.bf16.mxu0 %v854_v60  ;;  %v9246_v60 = vld [vmem:[%s13883_s2 + $0x360] ss:$24 sps:$4 sm:$0xff]  }
 0x1b3   : > { %9002 = vmatpush2.bf16.msra.mxu1 %v10596_v21 }
 0x1b4   : > { %v821_v26 = vpop.permute.xlu1 %820 }
 0x1b5   : > { %v3395_v39 = vpop.permute.xlu0 %3394  ;;  %v853_v48 = vsel %vm850_vm5, %v821_v26, %v823_v13  ;;  %v9248_v26 = vld [vmem:[%s13883_s2 + $0x394] ss:$24 sps:$4 sm:$0xff]  }
 0x1b6   : > { %2107 = vmatpush1.bf16.msra.mxu0 %v853_v48 }
 0x1b7   : > { %1829 = vmatmul.mubr.bf16.gmra.mxu0 %v9234_v24 }
 0x1b8   : > { %v3397_v44 = vpop.permute.xlu1 %3396  ;;  %1838 = vmatprep.mubr.bf16.mxu0 %v9236_v29 }
 0x1b9   : > { %v817_v52 = vpop.permute.xlu0 %816  ;;  %v10607_v54 = vsel %vm606_vm1, %v3395_v39, %v3397_v44 }
 0x1ba   : > { %8987 = vmatprep.subr.bf16.mxu1 %v10607_v54 }
 0x1bc   : > { %v819_v14 = vpop.permute.xlu1 %818 }
 0x1bd   : > { %v3393_v19 = vpop.permute.xlu0 %3392  ;;  %v852_v3 = vsel %vm850_vm5, %v817_v52, %v819_v14  ;;  %v9256_v14 = vld [vmem:[%s13883_s2 + $0x14] ss:$24 sps:$4 sm:$0xff]  }
 0x1be   : > { %v10618_v6 = vsel %vm606_vm1, %v3393_v19, %v3395_v39  ;;  %2108 = vmatprep.subr.bf16.mxu0 %v852_v3 }
 0x1bf   : > { %9003 = vmatpush2.bf16.msra.mxu1 %v10618_v6  ;;  %1839 = vmatmul.mubr.bf16.gmra.mxu0 %v9240_v59 }
 0x1c0   : > { %5739 = vmatprep.subr.bf16.mxu1 %v9959_v22  ;;  %v815_v9 = vpop.permute.xlu1 %814  ;;  %1848 = vmatprep.mubr.bf16.mxu0 %v9242_v55 }
 0x1c1   : > { %v786_v13 = vpop.permute.xlu0 %785  ;;  %v851_v16 = vsel %vm850_vm5, %v815_v9, %v817_v52  ;;  %v9252_v52 = vld [vmem:[%s13883_s2 + $0x390] ss:$24 sps:$4 sm:$0xff]  }
 0x1c2   : > { %3923 = vmatmul.mubr.bf16.vlgmr.msra.gmra.mxu1 %v9224_v56  ;;  %2109 = vmatpush1.bf16.msra.mxu0 %v851_v16  ;;  %v9247_v16 = vld [vmem:[%s13884_s3 + $0x2d0] ss:$12 sps:$4 sm:$0xff]  }
 0x1c3   : > { %5740 = vmatpush1.bf16.msra.mxu1 %v9965_v23  ;;  %3932 = vmatprep.mubr.bf16.mxu1 %v9232_v43  ;;  %v9235_v23 = vld [vmem:[%s13884_s3 + $0x2a0] ss:$12 sps:$4 sm:$0xff]  }
 0x1c4   : > { %5741 = vmatprep.subr.bf16.mxu1 %v9974_v27  ;;  %v788_v20 = vpop.permute.xlu1 %787  ;;  %v9238_v27 = vld [vmem:[%s13884_s3 + $0x2bc] ss:$12 sps:$4 sm:$0xff]  }
 0x1c5   : > { %v784_v24 = vpop.permute.xlu0 %783  ;;  %v801_v22 = vsel %vm789_vm3, %v786_v13, %v788_v20 }
 0x1c6   : > { %v800_v29 = vsel %vm789_vm3, %v784_v24, %v786_v13  ;;  %2110 = vmatprep.subr.bf16.mxu0 %v801_v22 }
 0x1c7   : > { %5742 = vmatpush1.bf16.msra.mxu1 %v9980_v28  ;;  %2111 = vmatpush1.bf16.msra.mxu0 %v800_v29 }
 0x1c8   : > { %5743 = vmatprep.subr.bf16.mxu1 %v9986_v31  ;;  %v780_v39 = vpop.permute.xlu1 %779  ;;  %1849 = vmatmul.mubr.bf16.gmra.mxu0 %v9246_v60 }
 0x1c9   : > { %v782_v48 = vpop.permute.xlu0 %781  ;;  %1858 = vmatprep.mubr.bf16.mxu0 %v9248_v26 }
 0x1ca   : > { %3933 = vmatmul.mubr.bf16.gmra.mxu1 %v9235_v23  ;;  %v799_v44 = vsel %vm789_vm3, %v780_v39, %v782_v48 }
 0x1cb   : > { %5744 = vmatpush1.bf16.msra.mxu1 %v9994_v34  ;;  %3942 = vmatprep.mubr.bf16.mxu1 %v9238_v27  ;;  %v9241_v34 = vld [vmem:[%s13884_s3 + $0x2b8] ss:$12 sps:$4 sm:$0xff]  }
 0x1cc   : > { %5745 = vmatprep.subr.bf16.mxu1 %v10002_v37  ;;  %v778_v28 = vpop.permute.xlu1 %777  ;;  %2112 = vmatprep.subr.bf16.mxu0 %v799_v44  ;;  %v9244_v37 = vld [vmem:[%s13884_s3 + $0x2d4] ss:$12 sps:$4 sm:$0xff]  }
 0x1cd   : > { %v774_v59 = vpop.permute.xlu0 %773  ;;  %v798_v31 = vsel %vm789_vm3, %v778_v28, %v780_v39  ;;  %v9253_v44 = vld [vmem:[%s13884_s3 + $0x2e8] ss:$12 sps:$4 sm:$0xff]   ;;  %v9257_v28 = vld [vmem:[%s13884_s3 + $0x304] ss:$12 sps:$4 sm:$0xff]  }
 0x1ce   : > { %2113 = vmatpush1.bf16.msra.mxu0 %v798_v31 }
 0x1cf   : > { %5746 = vmatpush1.bf16.msra.mxu1 %v10008_v38 }
 0x1d0   : > { %5747 = vmatprep.subr.bf16.mxu1 %v10014_v41  ;;  %v776_v55 = vpop.permute.xlu1 %775  ;;  %1859 = vmatmul.mubr.bf16.gmra.mxu0 %v9252_v52 }
 0x1d1   : > { %v772_v19 = vpop.permute.xlu0 %771  ;;  %v797_v3 = vsel %vm789_vm3, %v774_v59, %v776_v55  ;;  %v10666_v56 = vpop.f32.mrf.mxu1  ;;  %8608 = vmatprep.mubr.msk.bf16.mxu0 %vm1575_vm6, %v9256_v14 }
 0x1d2   : > { %v796_v43 = vsel %vm789_vm3, %v772_v19, %v774_v59  ;;  %3943 = vmatmul.mubr.bf16.gmra.mxu1 %v9241_v34  ;;  %2114 = vmatprep.subr.bf16.mxu0 %v797_v3  ;;  %v9254_v3 = vld [vmem:[%s13883_s2 + $0x10] ss:$24 sps:$4 sm:$0xff]  }
 0x1d3   : > { %5748 = vmatpush1.bf16.msra.mxu1 %v10025_v45  ;;  %3952 = vmatprep.mubr.bf16.mxu1 %v9244_v37  ;;  %v10671_v38 = vpop.f32.mrf.mxu1  ;;  %v9250_v45 = vld [vmem:[%s13884_s3 + $0x2ec] ss:$12 sps:$4 sm:$0xff]  }
 0x1d4   : > { %5749 = vmatprep.subr.bf16.mxu1 %v10042_v51  ;;  %v768_v41 = vpop.permute.xlu1 %767  ;;  %2115 = vmatpush1.bf16.msra.mxu0 %v796_v43 }
 0x1d5   : > { %v770_v9 = vpop.permute.xlu0 %769  ;;  %v10674_v13 = vpop.f32.mrf.mxu1 }
 0x1d6   : > { %v795_v20 = vsel %vm789_vm3, %v768_v41, %v770_v9  ;;  %v9260_v9 = vld [vmem:[%s13883_s2 + $0x44] ss:$24 sps:$4 sm:$0xff]  }
 0x1d7   : > { %5750 = vmatpush1.bf16.msra.mxu1 %v10051_v53  ;;  %2116 = vmatprep.subr.bf16.mxu0 %v795_v20  ;;  %v10684_v60 = vpop.f32.mrf.mxu1  ;;  %v9262_v20 = vld [vmem:[%s13884_s3 + $0x31c] ss:$12 sps:$4 sm:$0xff]  }
 0x1d8   : > { %v766_v51 = vpop.permute.xlu1 %765 }
 0x1d9   : > { %v847_v24 = vpop.permute.xlu0 %846  ;;  %v794_v22 = vsel %vm789_vm3, %v766_v51, %v768_v41  ;;  %v10687_v26 = vpop.f32.mrf.mxu1  ;;  %v9259_v41 = vld [vmem:[%s13884_s3 + $0x300] ss:$12 sps:$4 sm:$0xff]   ;;  %vm7522_vm3 = vcmask 523264  }
 0x1da   : > { %3953 = vmatmul.mubr.bf16.gmra.mxu1 %v9247_v16  ;;  %2117 = vmatpush1.bf16.msra.mxu0 %v794_v22  ;;  %v9264_v51 = vld [vmem:[%s13883_s2 + $0x40] ss:$24 sps:$4 sm:$0xff]  }
 0x1db   : > { %3962 = vmatprep.mubr.bf16.mxu1 %v9250_v45  ;;  %v10689_v29 = vpop.f32.mrf.mxu1  ;;  %v9265_v22 = vld [vmem:[%s13884_s3 + $0x318] ss:$12 sps:$4 sm:$0xff]  }
 0x1dc   : > { %v849_v23 = vpop.permute.xlu1 %848 }
 0x1dd   : > { %v845_v53 = vpop.permute.xlu0 %844  ;;  %v862_v27 = vsel %vm850_vm5, %v847_v24, %v849_v23  ;;  %v10692_v39 = vpop.f32.mrf.mxu1  ;;  %v9268_v23 = vld [vmem:[%s13884_s3 + $0x334] ss:$12 sps:$4 sm:$0xff]  }
 0x1de   : > { %v861_v48 = vsel %vm850_vm5, %v845_v53, %v847_v24  ;;  %2130 = vmatprep.subr.bf16.mxu0 %v862_v27 }
 0x1df   : > { %2131 = vmatpush2.bf16.msra.mxu0 %v861_v48  ;;  %v10701_v52 = vpop.f32.mrf.mxu1  ;;  %v9271_v48 = vld [vmem:[%s13884_s3 + $0x330] ss:$12 sps:$4 sm:$0xff]  }
 0x1e0   : > { %v841_v59 = vpop.permute.xlu1 %840 }
 0x1e1   : > { %v843_v31 = vpop.permute.xlu0 %842  ;;  %v10703_v14 = vpop.f32.mrf.mxu1 }
 0x1e2   : > { %3963 = vmatmul.mubr.bf16.gmra.mxu1 %v9253_v44  ;;  %v860_v34 = vsel %vm850_vm5, %v841_v59, %v843_v31 }
 0x1e3   : > { %2132 = vmatprep.subr.bf16.mxu0 %v860_v34  ;;  %3972 = vmatprep.mubr.bf16.mxu1 %v9257_v28  ;;  %v10706_v37 = vpop.f32.mrf.mxu1 }
 0x1e4   : > { %v839_v55 = vpop.permute.xlu1 %838 }
 0x1e5   : > { %v859_v19 = vsel %vm850_vm5, %v839_v55, %v841_v59  ;;  %v10712_v43 = vpop.f32.mrf.mxu1  ;;  %vm7489_vm5 = vcmask 916480  }
 0x1e6   : > { %2133 = vmatpush2.bf16.msra.mxu0 %v859_v19 }
 0x1e7   : > { %3620 = vmatprep.subr.bf16.mxu0 %v10272_v30  ;;  %v10721_v16 = vpop.f32.mrf.mxu1 }
 0x1e9   : > { %2135 = vmatmul.mubr.bf16.vlgmr.msra.gmra.mxu0 %v9254_v3  ;;  %v10726_v45 = vpop.f32.mrf.mxu1 }
 0x1ea   : > { %3973 = vmatmul.mubr.bf16.gmra.mxu1 %v9259_v41  ;;  %3621 = vmatpush1.bf16.msra.mxu0 %v10276_v33  ;;  %v9266_v33 = vld [vmem:[%s13883_s2 + $0x74] ss:$24 sps:$4 sm:$0xff]  }
 0x1eb   : > { %3622 = vmatprep.subr.bf16.mxu0 %v10300_v62  ;;  %8609 = vmatprep.mubr.msk.bf16.mxu0 %vm1575_vm6, %v9260_v9  ;;  %v10731_v30 = vpop.f32.mrf.mxu1 }
 0x1ec   : > { %3982 = vmatprep.mubr.bf16.mxu1 %v9262_v20 }
 0x1ed   : > { %v10736_v24 = vpop.f32.mrf.mxu1 }
 0x1ee   : > { %3623 = vmatpush1.bf16.msra.mxu0 %v10314_v8  ;;  %v9270_v8 = vld [vmem:[%s13883_s2 + $0x70] ss:$24 sps:$4 sm:$0xff]  }
 0x1ef   : > { %3624 = vmatprep.subr.bf16.mxu0 %v10068_v58  ;;  %v10746_v62 = vpop.f32.mrf.mxu1 }
 0x1f1   : > { %2145 = vmatmul.mubr.bf16.gmra.mxu0 %v9264_v51  ;;  %v10751_v53 = vpop.f32.mrf.mxu1 }
 0x1f2   : > { %3983 = vmatmul.mubr.bf16.gmra.mxu1 %v9265_v22  ;;  %3625 = vmatpush1.bf16.msra.mxu0 %v10080_v0 }
 0x1f3   : > { %3626 = vmatprep.subr.bf16.mxu0 %v10089_v5  ;;  %8610 = vmatprep.mubr.msk.bf16.mxu0 %vm1575_vm6, %v9266_v33  ;;  %v10756_v58 = vpop.f32.mrf.mxu1  ;;  %v9272_v5 = vld [vmem:[%s13883_s2 + $0xa4] ss:$24 sps:$4 sm:$0xff]  }
 0x1f4   : > { %3992 = vmatprep.mubr.bf16.mxu1 %v9268_v23 }
 0x1f5   : > { %v10761_v27 = vpop.f32.mrf.mxu1 }
 0x1f6   : > { %3627 = vmatpush1.bf16.msra.mxu0 %v10096_v10  ;;  %v1670_v0 = vpop.f32.mrf.mxu0  ;;  %v9276_v10 = vld [vmem:[%s13884_s3 + $0x34c] ss:$12 sps:$4 sm:$0xff]  }
 0x1f7   : > { %3628 = vmatprep.subr.bf16.mxu0 %v10148_v18  ;;  %v10771_v44 = vpop.f32.mrf.mxu1  ;;  %v10774_v28 = vadd.f32 %v10666_v56, %v1670_v0 }
 0x1f8   : > { %v1672_v59 = vpop.f32.mrf.mxu0 }
 0x1f9   : > { %2155 = vmatmul.mubr.bf16.gmra.mxu0 %v9270_v8  ;;  %v10779_v31 = vpop.f32.mrf.mxu1  ;;  %v10782_v34 = vadd.f32 %v10671_v38, %v1672_v59  ;;  %v9277_v38 = vld [vmem:[%s13883_s2 + $0xa0] ss:$24 sps:$4 sm:$0xff]  }
 0x1fa   : > { %3993 = vmatmul.mubr.bf16.gmra.mxu1 %v9271_v48  ;;  %3629 = vmatpush1.bf16.msra.mxu0 %v10156_v25  ;;  %v1674_v18 = vpop.f32.mrf.mxu0 }
 0x1fb   : > { %3630 = vmatprep.subr.bf16.mxu0 %v10163_v35  ;;  %8611 = vmatprep.mubr.msk.bf16.mxu0 %vm1575_vm6, %v9272_v5  ;;  %v10787_v56 = vpop.f32.mrf.mxu1  ;;  %v10790_v55 = vadd.f32 %v10674_v13, %v1674_v18  ;;  %v9274_v35 = vld [vmem:[%s13884_s3 + $0x348] ss:$12 sps:$4 sm:$0xff]  }
 0x1fc   : > { %4002 = vmatprep.mubr.bf16.mxu1 %v9276_v10  ;;  %v1676_v19 = vpop.f32.mrf.mxu0  ;;  %v9278_v13 = vld [vmem:[%s13883_s2 + $0xd4] ss:$24 sps:$4 sm:$0xff]  }
 0x1fd   : > { %v10795_v3 = vpop.f32.mrf.mxu1  ;;  %v10798_v25 = vadd.f32 %v10684_v60, %v1676_v19 }
 0x1fe   : > { %3631 = vmatpush1.bf16.msra.mxu0 %v10174_v50  ;;  %v1680_v41 = vpop.f32.mrf.mxu0  ;;  %v9282_v50 = vld [vmem:[%s13884_s3 + $0x364] ss:$12 sps:$4 sm:$0xff]  }
 0x1ff   : > { %3632 = vmatprep.subr.bf16.mxu0 %v10183_v63  ;;  %v10808_v9 = vpop.f32.mrf.mxu1  ;;  %v10811_v20 = vadd.f32 %v10687_v26, %v1680_v41 }
 0x200   : > { %v1682_v60 = vpop.f32.mrf.mxu0 }
 0x201   : > { %2165 = vmatmul.mubr.bf16.gmra.mxu0 %v9277_v38  ;;  %v10816_v51 = vpop.f32.mrf.mxu1  ;;  %v10819_v22 = vadd.f32 %v10689_v29, %v1682_v60  ;;  %v9283_v29 = vld [vmem:[%s13883_s2 + $0xd0] ss:$24 sps:$4 sm:$0xff]  }
 0x202   : > { %4003 = vmatmul.mubr.bf16.gmra.mxu1 %v9274_v35  ;;  %3633 = vmatpush1.bf16.msra.mxu0 %v10190_v2  ;;  %v1684_v63 = vpop.f32.mrf.mxu0 }
 0x203   : > { %3634 = vmatprep.subr.bf16.mxu0 %v10202_v11  ;;  %8612 = vmatprep.mubr.msk.bf16.mxu0 %vm1575_vm6, %v9278_v13  ;;  %v10824_v26 = vpop.f32.mrf.mxu1  ;;  %v10827_v33 = vadd.f32 %v10692_v39, %v1684_v63  ;;  %v9280_v11 = vld [vmem:[%s13884_s3 + $0x360] ss:$12 sps:$4 sm:$0xff]   ;;  %v9284_v39 = vld [vmem:[%s13883_s2 + $0x104] ss:$24 sps:$4 sm:$0xff]  }
 0x204   : > { %4012 = vmatprep.mubr.bf16.mxu1 %v9282_v50  ;;  %v1686_v23 = vpop.f32.mrf.mxu0 }
 0x205   : > { %v10832_v8 = vpop.f32.mrf.mxu1  ;;  %v10835_v2 = vadd.f32 %v10701_v52, %v1686_v23 }
 0x206   : > { %3635 = vmatpush1.bf16.msra.mxu0 %v10205_v12  ;;  %v1690_v48 = vpop.f32.mrf.mxu0  ;;  %v9288_v12 = vld [vmem:[%s13884_s3 + $0x37c] ss:$12 sps:$4 sm:$0xff]  }
 0x207   : > { %3636 = vmatprep.subr.bf16.mxu0 %v10435_v36  ;;  %v10845_v0 = vpop.f32.mrf.mxu1  ;;  %v10848_v5 = vadd.f32 %v10703_v14, %v1690_v48 }
 0x208   : > { %v1692_v52 = vpop.f32.mrf.mxu0 }
 0x209   : > { %2175 = vmatmul.mubr.bf16.gmra.mxu0 %v9283_v29  ;;  %v10853_v10 = vpop.f32.mrf.mxu1  ;;  %v10856_v59 = vadd.f32 %v10706_v37, %v1692_v52  ;;  %v9289_v37 = vld [vmem:[%s13883_s2 + $0x100] ss:$24 sps:$4 sm:$0xff]  }
 0x20a   : > { %4013 = vmatmul.mubr.bf16.gmra.mxu1 %v9280_v11  ;;  %3637 = vmatpush2.bf16.msra.mxu0 %v10450_v1  ;;  %v1694_v36 = vpop.f32.mrf.mxu0 }
 0x20b   : > { %3638 = vmatprep.subr.bf16.mxu0 %v10476_v46  ;;  %8613 = vmatprep.mubr.msk.bf16.mxu0 %vm1575_vm6, %v9284_v39  ;;  %v10861_v14 = vpop.f32.mrf.mxu1  ;;  %v10864_v18 = vadd.f32 %v10712_v43, %v1694_v36  ;;  %v9286_v46 = vld [vmem:[%s13884_s3 + $0x378] ss:$12 sps:$4 sm:$0xff]   ;;  %v9290_v43 = vld [vmem:[%s13883_s2 + $0x134] ss:$24 sps:$4 sm:$0xff]  }
 0x20c   : > { %4022 = vmatprep.mubr.bf16.mxu1 %v9288_v12  ;;  %v1696_v19 = vpop.f32.mrf.mxu0 }
 0x20d   : > { %v10869_v38 = vpop.f32.mrf.mxu1  ;;  %v10872_v1 = vadd.f32 %v10721_v16, %v1696_v19 }
 0x20e   : > { %3639 = vmatpush2.bf16.msra.mxu0 %v10483_v15  ;;  %v1700_v35 = vpop.f32.mrf.mxu0  ;;  %v9294_v15 = vld [vmem:[%s13884_s3 + $0x394] ss:$12 sps:$4 sm:$0xff]  }
 0x20f   : > { %3640 = vmatprep.subr.bf16.mxu0 %v10499_v32  ;;  %v10882_v41 = vpop.f32.mrf.mxu1  ;;  %v10885_v13 = vadd.f32 %v10726_v45, %v1700_v35 }
 0x210   : > { %v1702_v16 = vpop.f32.mrf.mxu0 }
 0x211   : > { %2185 = vmatmul.mubr.bf16.gmra.mxu0 %v9289_v37  ;;  %v10890_v50 = vpop.f32.mrf.mxu1  ;;  %v10893_v60 = vadd.f32 %v10731_v30, %v1702_v16  ;;  %v9295_v30 = vld [vmem:[%s13883_s2 + $0x130] ss:$24 sps:$4 sm:$0xff]   ;;  %v3451_v16 = vpop.permute.xlu1 %3450 }
 0x212   : > { %4023 = vmatmul.mubr.bf16.gmra.mxu1 %v9286_v46  ;;  %3641 = vmatpush2.bf16.msra.mxu0 %v10503_v40  ;;  %v1704_v32 = vpop.f32.mrf.mxu0  ;;  %v9302_v46 = vld [vmem:[%s13883_s2 + $0x194] ss:$24 sps:$4 sm:$0xff]  }
 0x213   : > { %3642 = vmatprep.subr.bf16.mxu0 %v10516_v57  ;;  %8614 = vmatprep.mubr.msk.bf16.mxu0 %vm1575_vm6, %v9290_v43  ;;  %v10898_v45 = vpop.f32.mrf.mxu1  ;;  %v10901_v63 = vadd.f32 %v10736_v24, %v1704_v32  ;;  %v9292_v57 = vld [vmem:[%s13884_s3 + $0x390] ss:$12 sps:$4 sm:$0xff]  }
 0x214   : > { %4032 = vmatprep.mubr.bf16.mxu1 %v9294_v15  ;;  %v1706_v23 = vpop.f32.mrf.mxu0  ;;  %v9296_v24 = vld [vmem:[%s13883_s2 + $0x164] ss:$24 sps:$4 sm:$0xff]   ;;  %v10975_v15 = vld [vmem:[%s10966_s24 + $0x8] ss:$16 sps:$4 sm:$0xff]  }
 0x215   : > { %v10906_v29 = vpop.f32.mrf.mxu1  ;;  %v10909_v40 = vadd.f32 %v10746_v62, %v1706_v23  ;;  %7553 = vrot.lane.b32.xlu1 %v10975_v15, %s9681_s21 }
 0x216   : > { %3643 = vmatpush2.bf16.msra.mxu0 %v10523_v17  ;;  %v1710_v11 = vpop.f32.mrf.mxu0  ;;  %v9300_v17 = vld [vmem:[%s13884_s3 + $0x3ac] ss:$12 sps:$4 sm:$0xff]  }
 0x217   : > { %3644 = vmatprep.subr.bf16.mxu0 %v10533_v42  ;;  %v10919_v48 = vpop.f32.mrf.mxu1  ;;  %v10922_v39 = vadd.f32 %v10751_v53, %v1710_v11 }
 0x218   : > { %v1712_v62 = vpop.f32.mrf.mxu0 }
 0x219   : > { %2195 = vmatmul.mubr.bf16.gmra.mxu0 %v9295_v30  ;;  %v10927_v12 = vpop.f32.mrf.mxu1  ;;  %v10930_v42 = vadd.f32 %v10756_v58, %v1712_v62  ;;  %v9301_v58 = vld [vmem:[%s13883_s2 + $0x160] ss:$24 sps:$4 sm:$0xff]   ;;  %v10990_v30 = vpop.permute.xlu0 %3448 }
 0x21a   : > { %4033 = vmatmul.mubr.bf16.gmra.mxu1 %v9292_v57  ;;  %3645 = vmatpush2.bf16.msra.mxu0 %v10544_v7  ;;  %v1714_v52 = vpop.f32.mrf.mxu0  ;;  %v3475_v11 = vsel %vm606_vm1, %v10990_v30, %v3451_v16 }
 0x21b   : > { %3646 = vmatprep.subr.bf16.mxu0 %v10561_v47  ;;  %8615 = vmatprep.mubr.msk.bf16.mxu0 %vm1575_vm6, %v9296_v24  ;;  %v10935_v53 = vpop.f32.mrf.mxu1  ;;  %v10938_v36 = vadd.f32 %v10761_v27, %v1714_v52  ;;  %v9298_v47 = vld [vmem:[%s13884_s3 + $0x3a8] ss:$12 sps:$4 sm:$0xff]   ;;  %v9305_v24 = vld [vmem:[%s13885_s4] sm:$0xff]  }
 0x21c   : > { %4042 = vmatprep.mubr.bf16.mxu1 %v9300_v17  ;;  %v1716_v19 = vpop.f32.mrf.mxu0  ;;  %v9306_v17 = vld [vmem:[%s13883_s2 + $0x1c4] ss:$24 sps:$4 sm:$0xff]  }
 0x21d   : > { %v10943_v37 = vpop.f32.mrf.mxu1  ;;  %v10946_v7 = vadd.f32 %v10771_v44, %v1716_v19  ;;  %v11018_v19 = vld [vmem:[%s10966_s24] ss:$16 sps:$4 sm:$0xff]  }
 0x21e   : > { %3647 = vmatpush2.bf16.msra.mxu0 %v10575_v49  ;;  %v1720_v27 = vpop.f32.mrf.mxu0 }
 0x21f   : > { %3648 = vmatprep.subr.bf16.mxu0 %v10591_v4  ;;  %v10958_v35 = vpop.f32.mrf.mxu1  ;;  %v10961_v44 = vadd.f32 %v10779_v31, %v1720_v27 }
 0x220   : > { %v1722_v43 = vpop.f32.mrf.mxu0 }
 0x221   : > { %2205 = vmatmul.mubr.bf16.gmra.mxu0 %v9301_v58  ;;  %v10968_v49 = vpop.f32.mrf.mxu1  ;;  %v10971_v4 = vadd.f32 %v10787_v56, %v1722_v43 }
 0x222   : > { %4043 = vmatmul.mubr.bf16.gmra.mxu1 %v9298_v47  ;;  %3649 = vmatpush2.bf16.msra.mxu0 %v10596_v21  ;;  %v1724_v31 = vpop.f32.mrf.mxu0  ;;  %v10988_v21 = vld [vmem:[%s10966_s24 + $0x4] ss:$16 sps:$4 sm:$0xff]  }
 0x223   : > { %3650 = vmatprep.subr.bf16.mxu0 %v10607_v54  ;;  %8616 = vmatprep.mubr.msk.bf16.mxu0 %vm1575_vm6, %v9302_v46  ;;  %v10979_v32 = vpop.f32.mrf.mxu1  ;;  %v10982_v23 = vadd.f32 %v10795_v3, %v1724_v31  ;;  %v9304_v54 = vld [vmem:[%s13883_s2 + $0x190] ss:$24 sps:$4 sm:$0xff]  }
 0x224   : > { %5767 = vmatprep.mubr.bf16.mxu1 %v13900_v61  ;;  %v1726_v56 = vpop.f32.mrf.mxu0  ;;  %7551 = vrot.lane.b32.xlu0 %v10988_v21, %s9681_s21 }
 0x225   : > { %v10995_v57 = vpop.f32.mrf.mxu1  ;;  %v10998_v3 = vadd.f32 %v10808_v9, %v1726_v56  ;;  %7540 = vrot.lane.b32.xlu1 %v10988_v21, %s9682_s18  ;;  %v9310_v56 = vld [vmem:[%s13883_s2 + $0x1f4] ss:$24 sps:$4 sm:$0xff]  }
 0x226   : > { %3651 = vmatpush2.bf16.msra.mxu0 %v10618_v6  ;;  %v1730_v62 = vpop.f32.mrf.mxu0 }
 0x227   : > { %4065 = vmatprep.subr.bf16.mxu0 %v3475_v11  ;;  %v11011_v9 = vpop.f32.mrf.mxu1  ;;  %v11014_v6 = vadd.f32 %v10816_v51, %v1730_v62 }
 0x228   : > { %v1732_v52 = vpop.f32.mrf.mxu0  ;;  %7549 = vrot.lane.b32.xlu0 %v11018_v19, %s9681_s21 }
 0x229   : > { %2215 = vmatmul.mubr.bf16.gmra.mxu0 %v9304_v54  ;;  %v11020_v58 = vpop.f32.mrf.mxu1  ;;  %v11023_v47 = vadd.f32 %v10824_v26, %v1732_v52  ;;  %7538 = vrot.lane.b32.xlu1 %v11018_v19, %s9682_s18  ;;  %v9308_v26 = vld [vmem:[%s13883_s2 + $0x1c0] ss:$24 sps:$4 sm:$0xff]  }
 0x22a   : > { %8868 = vmatmul.mubr.msk.bf16.vlgmr.msra.gmra.mxu1 %vm5494_vm7, %v9305_v24  ;;  %8617 = vmatprep.mubr.msk.bf16.mxu0 %vm1575_vm6, %v9306_v17  ;;  %v1734_v27 = vpop.f32.mrf.mxu0 }
 0x22b   : > { %5777 = vmatprep.mubr.bf16.mxu1 %v13900_v61  ;;  %v11028_v51 = vpop.f32.mrf.mxu1  ;;  %v11031_v46 = vadd.f32 %v10832_v8, %v1734_v27  ;;  %v9309_v8 = vld [vmem:[%s13885_s4 + $0x8] sm:$0xff]  }
 0x22c   : > { %v1736_v43 = vpop.f32.mrf.mxu0  ;;  %7542 = vrot.lane.b32.xlu0 %v10975_v15, %s9682_s18  ;;  %s9687_s18 = smov 112  }
 0x22d   : > { %v11039_v31 = vpop.f32.mrf.mxu1  ;;  %v11042_v16 = vadd.f32 %v10845_v0, %v1736_v43  ;;  %7531 = vrot.lane.b32.xlu1 %v10975_v15, %s9683_s26 }
 0x22e   : > { %v1740_v54 = vpop.f32.mrf.mxu0 }
 0x22f   : > { %v11050_v11 = vpop.f32.mrf.mxu1  ;;  %v11053_v24 = vadd.f32 %v10853_v10, %v1740_v54 }
 0x230   : > { %v1742_v17 = vpop.f32.mrf.mxu0  ;;  %7529 = vrot.lane.b32.xlu0 %v10988_v21, %s9683_s26 }
 0x231   : > { %2225 = vmatmul.mubr.bf16.gmra.mxu0 %v9308_v26  ;;  %v11057_v0 = vpop.f32.mrf.mxu1  ;;  %v11060_v62 = vadd.f32 %v10861_v14, %v1742_v17  ;;  %7518 = vrot.lane.b32.xlu1 %v10988_v21, %s9684_s19  ;;  %v9312_v14 = vld [vmem:[%s13883_s2 + $0x1f0] ss:$24 sps:$4 sm:$0xff]  }
 0x232   : > { %8869 = vmatmul.mubr.msk.bf16.gmra.mxu1 %vm5494_vm7, %v9309_v8  ;;  %8618 = vmatprep.mubr.msk.bf16.mxu0 %vm1575_vm6, %v9310_v56  ;;  %v1744_v52 = vpop.f32.mrf.mxu0  ;;  %v9314_v56 = vld [vmem:[%s13883_s2 + $0x224] ss:$24 sps:$4 sm:$0xff]  }
 0x233   : > { %5787 = vmatprep.mubr.bf16.mxu1 %v13900_v61  ;;  %v11065_v10 = vpop.f32.mrf.mxu1  ;;  %v11068_v27 = vadd.f32 %v10869_v38, %v1744_v52  ;;  %v9313_v38 = vld [vmem:[%s13885_s4 + $0x10] sm:$0xff]  }
 0x234   : > { %v1746_v43 = vpop.f32.mrf.mxu0  ;;  %7527 = vrot.lane.b32.xlu0 %v11018_v19, %s9683_s26  ;;  %s372_s26 = sand.u32 1, %s9648_s10  }
 0x235   : > { %13916 = vst [vmem:[#allocation8_spill] sm:$0xff] %v11068_v27  ;;  %v11075_v26 = vpop.f32.mrf.mxu1  ;;  %v11078_v8 = vadd.f32 %v10882_v41, %v1746_v43  ;;  %7516 = vrot.lane.b32.xlu1 %v11018_v19, %s9684_s19  ;;  %v13920_v27 = vmov 0   ;;  %s8465_s20 = sshll.u32 %s372_s26, 6  ;;  %s13829_s25 = scalar_lea.sflag [#allocation3], %s372_s26 }
 0x236   : > { %v1750_v54 = vpop.f32.mrf.mxu0 }
 0x237   : > { %13917 = vst [vmem:[#allocation9_spill] sm:$0xff] %v11078_v8  ;;  %v11086_v17 = vpop.f32.mrf.mxu1  ;;  %v11089_v52 = vadd.f32 %v10890_v50, %v1750_v54 }
 0x238   : > { %v1752_v61 = vpop.f32.mrf.mxu0  ;;  %7520 = vrot.lane.b32.xlu0 %v10975_v15, %s9684_s19  ;;  %s9686_s19 = smov 96  }
 0x239   : > { %13918 = vst [vmem:[#allocation10_spill] sm:$0xff] %v11089_v52  ;;  %2235 = vmatmul.mubr.bf16.gmra.mxu0 %v9312_v14  ;;  %v11093_v41 = vpop.f32.mrf.mxu1  ;;  %v11096_v43 = vadd.f32 %v10898_v45, %v1752_v61  ;;  %7509 = vrot.lane.b32.xlu1 %v10975_v15, %s9685_s17  ;;  %v9316_v61 = vld [vmem:[%s13883_s2 + $0x220] ss:$24 sps:$4 sm:$0xff]  }
 0x23a   : > { %8870 = vmatmul.mubr.msk.bf16.gmra.mxu1 %vm5494_vm7, %v9313_v38  ;;  %8619 = vmatprep.mubr.msk.bf16.mxu0 %vm1575_vm6, %v9314_v56  ;;  %v1754_v8 = vpop.f32.mrf.mxu0 }
 0x23b   : > { %13919 = vst [vmem:[#allocation11_spill] sm:$0xff] %v11096_v43  ;;  %5797 = vmatprep.mubr.bf16.mxu1 %v13920_v27  ;;  %v11101_v50 = vpop.f32.mrf.mxu1  ;;  %v11104_v54 = vadd.f32 %v10906_v29, %v1754_v8  ;;  %v9317_v29 = vld [vmem:[%s13885_s4 + $0x18] sm:$0xff]   ;;  %v9318_v8 = vld [vmem:[%s13883_s2 + $0x254] ss:$24 sps:$4 sm:$0xff]  }
 0x23c   : > { %v1756_v14 = vpop.f32.mrf.mxu0  ;;  %7507 = vrot.lane.b32.xlu0 %v10988_v21, %s9685_s17 }
 0x23d   : > { %13921 = vst [vmem:[#allocation12_spill] sm:$0xff] %v11104_v54  ;;  %v11111_v45 = vpop.f32.mrf.mxu1  ;;  %v11114_v38 = vadd.f32 %v10919_v48, %v1756_v14  ;;  %7496 = vrot.lane.b32.xlu1 %v10988_v21, %s9686_s19 }
 0x23e   : > { %v1760_v56 = vpop.f32.mrf.mxu0 }
 0x23f   : > { %13922 = vst [vmem:[#allocation13_spill] sm:$0xff] %v11114_v38  ;;  %v11122_v54 = vpop.f32.mrf.mxu1  ;;  %v11125_v43 = vadd.f32 %v10927_v12, %v1760_v56 }
 0x240   : > { %v1762_v52 = vpop.f32.mrf.mxu0  ;;  %7505 = vrot.lane.b32.xlu0 %v11018_v19, %s9685_s17  ;;  %s8968_s17 = sshll.u32 %s9660_s13, 4 }
 0x241   : > { %13923 = vst [vmem:[#allocation14_spill] sm:$0xff] %v11125_v43  ;;  %2245 = vmatmul.mubr.bf16.gmra.mxu0 %v9316_v61  ;;  %v11130_v48 = vpop.f32.mrf.mxu1  ;;  %v11133_v14 = vadd.f32 %v10935_v53, %v1762_v52  ;;  %7494 = vrot.lane.b32.xlu1 %v11018_v19, %s9686_s19  ;;  %v9320_v53 = vld [vmem:[%s13883_s2 + $0x250] ss:$24 sps:$4 sm:$0xff]  }
 0x242   : > { %8871 = vmatmul.mubr.msk.bf16.gmra.mxu1 %vm5494_vm7, %v9317_v29  ;;  %8620 = vmatprep.mubr.msk.bf16.mxu0 %vm1575_vm6, %v9318_v8  ;;  %v1764_v38 = vpop.f32.mrf.mxu0 }
 0x243   : > { %13924 = vst [vmem:[#allocation15_spill] sm:$0xff] %v11133_v14  ;;  %5807 = vmatprep.mubr.bf16.mxu1 %v13920_v27  ;;  %v11138_v12 = vpop.f32.mrf.mxu1  ;;  %v11141_v56 = vadd.f32 %v10943_v37, %v1764_v38  ;;  %v9321_v37 = vld [vmem:[%s13885_s4 + $0x20] sm:$0xff]  }
 0x244   : > { %v1766_v61 = vpop.f32.mrf.mxu0  ;;  %v9322_v38 = vld [vmem:[%s13883_s2 + $0x284] ss:$24 sps:$4 sm:$0xff]   ;;  %7498 = vrot.lane.b32.xlu0 %v10975_v15, %s9686_s19 }
 0x245   : > { %13925 = vst [vmem:[#allocation16_spill] sm:$0xff] %v11141_v56  ;;  %v11149_v52 = vpop.f32.mrf.mxu1  ;;  %v11152_v29 = vadd.f32 %v10958_v35, %v1766_v61  ;;  %7487 = vrot.lane.b32.xlu1 %v10975_v15, %s9687_s18 }
 0x246   : > { %v1770_v8 = vpop.f32.mrf.mxu0 }
 0x247   : > { %13926 = vst [vmem:[#allocation17_spill] sm:$0xff] %v11152_v29  ;;  %v11160_v56 = vpop.f32.mrf.mxu1  ;;  %v11163_v14 = vadd.f32 %v10968_v49, %v1770_v8  ;;  %v9390_v29 = vld [vmem:[%s10966_s24 + $0xc] ss:$16 sps:$4 sm:$0xff]  }
 0x248   : > { %v1772_v43 = vpop.f32.mrf.mxu0  ;;  %7485 = vrot.lane.b32.xlu0 %v10988_v21, %s9687_s18  ;;  %v9326_v21 = vld [vmem:[%s13883_s2 + $0x2b4] ss:$24 sps:$4 sm:$0xff]  }
 0x249   : > { %13927 = vst [vmem:[#allocation18_spill] sm:$0xff] %v11163_v14  ;;  %2255 = vmatmul.mubr.bf16.gmra.mxu0 %v9320_v53  ;;  %v11169_v35 = vpop.f32.mrf.mxu1  ;;  %v11172_v61 = vadd.f32 %v10979_v32, %v1772_v43  ;;  %7568 = vrot.lane.b32.xlu1 %v9390_v29, %s9686_s19  ;;  %v9324_v32 = vld [vmem:[%s13883_s2 + $0x280] ss:$24 sps:$4 sm:$0xff]   ;;  %s8967_s19 = sshll.u32 %s9656_s12, 1 }
 0x24a   : > { %8872 = vmatmul.mubr.msk.bf16.gmra.mxu1 %vm5494_vm7, %v9321_v37  ;;  %8621 = vmatprep.mubr.msk.bf16.mxu0 %vm1575_vm6, %v9322_v38  ;;  %v1774_v49 = vpop.f32.mrf.mxu0  ;;  %v8067_v38 = vld [vmem:[%s13888_s7 + $0x70] sm:$0xff]  ;;  %s8351_s28 = sadd.s32 %s8968_s17, %s8967_s19 }
 0x24b   : > { %13928 = vst [vmem:[#allocation19_spill] sm:$0xff] %v11172_v61  ;;  %5817 = vmatprep.mubr.bf16.mxu1 %v13920_v27  ;;  %v11178_v8 = vpop.f32.mrf.mxu1  ;;  %v11181_v14 = vadd.f32 %v10995_v57, %v1774_v49  ;;  %v9325_v57 = vld [vmem:[%s13885_s4 + $0x28] sm:$0xff]   ;;  %s8969_s12 = sshll.u32 %s8351_s28, 7 }
 0x24c   : > { %v1776_v15 = vpop.f32.mrf.mxu0  ;;  %7483 = vrot.lane.b32.xlu0 %v11018_v19, %s9687_s18  ;;  %s13824_s15 = scalar_lea.hbm %s13890_s9, %s8969_s12 }
 0x24d   : > { %13929 = vst [vmem:[#allocation20_spill] sm:$0xff] %v11181_v14  ;;  %v11189_v43 = vpop.f32.mrf.mxu1  ;;  %v11192_v53 = vadd.f32 %v11011_v9, %v1776_v15  ;;  %8141 = vperm.xlu1 %9093, %v8067_v38  }
 0x24e   : > { %v1780_v37 = vpop.f32.mrf.mxu0 }
 0x24f   : > { %13930 = vst [vmem:[#allocation21_spill] sm:$0xff] %v11192_v53  ;;  %v11203_v49 = vpop.f32.mrf.mxu1  ;;  %v11206_v14 = vadd.f32 %v11020_v58, %v1780_v37  ;;  %v8065_v58 = vld [vmem:[%s13888_s7 + $0x60] sm:$0xff] }
 0x250   : > { %v1782_v9 = vpop.f32.mrf.mxu0  ;;  %7564 = vrot.lane.b32.xlu0 %v9390_v29, %s9687_s18  ;;  %s13807_s18 = scalar_lea.vmem [#allocation2], %s8465_s20  ;;  %s9688_s20 = smov [#allocation2]  }
 0x251   : > { %13931 = vst [vmem:[#allocation22_spill] sm:$0xff] %v11206_v14  ;;  %2265 = vmatmul.mubr.bf16.gmra.mxu0 %v9324_v32  ;;  %v11210_v15 = vpop.f32.mrf.mxu1  ;;  %v11213_v53 = vadd.f32 %v11028_v51, %v1782_v9  ;;  %8131 = vperm.xlu1 %9093, %v8065_v58   ;;  %v8068_v9 = vld [vmem:[%s13888_s7 + $0x78] sm:$0xff]  ;;  %s9584_s19 = sshll.u32 %s9688_s20, 4  ;;  %s9585_s19 = int_to_ptr.vmem [resolvable:$false] %s9584_s19 }
 0x252   : > { %8873 = vmatmul.mubr.msk.bf16.gmra.mxu1 %vm5494_vm7, %v9325_v57  ;;  %8622 = vmatprep.mubr.msk.bf16.mxu0 %vm1575_vm6, %v9326_v21  ;;  %v1784_v61 = vpop.f32.mrf.mxu0  ;;  %v9328_v57 = vld [vmem:[%s13883_s2 + $0x2b0] ss:$24 sps:$4 sm:$0xff]   ;;  %v8064_v14 = vld [vmem:[%s13888_s7 + $0x58] sm:$0xff]  ;;  %s9586_s17 = scalar_lea.vmem %s9585_s19, 2048 }
 0x253   : > { %13932 = vst [vmem:[#allocation23_spill] sm:$0xff] %v11213_v53  ;;  %5827 = vmatprep.mubr.bf16.mxu1 %v13920_v27  ;;  %v11221_v19 = vpop.f32.mrf.mxu1  ;;  %v11224_v32 = vadd.f32 %v11039_v31, %v1784_v61  ;;  %v9329_v21 = vld [vmem:[%s13885_s4 + $0x30] sm:$0xff]   ;;  %v9330_v31 = vld [vmem:[%s13883_s2 + $0x2e4] ss:$24 sps:$4 sm:$0xff]   ;;  %v8066_v61 = vld [vmem:[%s13888_s7 + $0x68] sm:$0xff] }
 0x254   : > { %v1786_v51 = vpop.f32.mrf.mxu0  ;;  %8146 = vperm.xlu0 %9094, %v8068_v9  }
 0x255   : > { %13933 = vst [vmem:[#allocation24_spill] sm:$0xff] %v11224_v32  ;;  %v11233_v37 = vpop.f32.mrf.mxu1  ;;  %v11236_v38 = vadd.f32 %v11050_v11, %v1786_v51  ;;  %8136 = vperm.xlu1 %9093, %v8066_v61  }
 0x256   : > { %v1790_v29 = vpop.f32.mrf.mxu0 }
 0x257   : > { %13934 = vst [vmem:[#allocation25_spill] sm:$0xff] %v11236_v38  ;;  %v11247_v58 = vpop.f32.mrf.mxu1  ;;  %v11250_v32 = vadd.f32 %v11057_v0, %v1790_v29  ;;  %v8063_v0 = vld [vmem:[%s13888_s7 + $0x50] sm:$0xff]  ;;  %v9332_v29 = vld [vmem:[%s13883_s2 + $0x2e0] ss:$24 sps:$4 sm:$0xff]  }
 0x258   : > { %v1792_v11 = vpop.f32.mrf.mxu0  ;;  %8121 = vperm.xlu0 %9094, %v8063_v0  }
 0x259   : > { %2275 = vmatmul.mubr.bf16.gmra.mxu0 %v9328_v57  ;;  %v11252_v51 = vpop.f32.mrf.mxu1  ;;  %v11255_v38 = vadd.f32 %v11065_v10, %v1792_v11  ;;  %8126 = vperm.xlu1 %9093, %v8064_v14   ;;  %v9333_v14 = vld [vmem:[%s13885_s4 + $0x38] sm:$0xff]  }
 0x25a   : > { %8874 = vmatmul.mubr.msk.bf16.gmra.mxu1 %vm5494_vm7, %v9329_v21  ;;  %8623 = vmatprep.mubr.msk.bf16.mxu0 %vm1575_vm6, %v9330_v31  ;;  %v1794_v53 = vpop.f32.mrf.mxu0  ;;  %v8061_v31 = vld [vmem:[%s13888_s7 + $0x40] sm:$0xff] }
 0x25b   : > { %13935 = vst [vmem:[#allocation26_spill] sm:$0xff] %v11255_v38  ;;  %5837 = vmatprep.mubr.bf16.mxu1 %v13920_v27  ;;  %v11266_v57 = vpop.f32.mrf.mxu1  ;;  %v11269_v10 = vadd.f32 %v11075_v26, %v1794_v53  ;;  %v8062_v26 = vld [vmem:[%s13888_s7 + $0x48] sm:$0xff]  ;;  %v8059_v38 = vld [vmem:[%s13888_s7 + $0x30] sm:$0xff] }
 0x25c   : > { %v1796_v21 = vpop.f32.mrf.mxu0  ;;  %v9334_v53 = vld [vmem:[%s13883_s2 + $0x314] ss:$24 sps:$4 sm:$0xff]   ;;  %8111 = vperm.xlu0 %9094, %v8061_v31  }
 0x25d   : > { %13936 = vst [vmem:[#allocation27_spill] sm:$0xff] %v11269_v10  ;;  %v11277_v61 = vpop.f32.mrf.mxu1  ;;  %v11280_v9 = vadd.f32 %v11086_v17, %v1796_v21  ;;  %8116 = vperm.xlu1 %9093, %v8062_v26   ;;  %v9336_v26 = vld [vmem:[%s13883_s2 + $0x310] ss:$24 sps:$4 sm:$0xff]  }
 0x25f   : > { %13937 = vst [vmem:[#allocation28_spill] sm:$0xff] %v11280_v9  ;;  %v11291_v11 = vpop.f32.mrf.mxu1  ;;  %v1800_v0 = vpop.f32.mrf.mxu0 }
 0x260   : > { %v11294_v10 = vadd.f32 %v11093_v41, %v1800_v0  ;;  %v8060_v41 = vld [vmem:[%s13888_s7 + $0x38] sm:$0xff]  ;;  %8101 = vperm.xlu0 %9094, %v8059_v38   ;;  %v9337_v38 = vld [vmem:[%s13885_s4 + $0x40] sm:$0xff]  }
 0x261   : > { %2285 = vmatmul.mubr.bf16.gmra.mxu0 %v9332_v29  ;;  %v1802_v17 = vpop.f32.mrf.mxu0  ;;  %v11298_v21 = vpop.f32.mrf.mxu1  ;;  %8106 = vperm.xlu1 %9093, %v8060_v41  }
 0x262   : > { %13938 = vst [vmem:[#allocation29_spill] sm:$0xff] %v11294_v10  ;;  %8875 = vmatmul.mubr.msk.bf16.gmra.mxu1 %vm5494_vm7, %v9333_v14  ;;  %8624 = vmatprep.mubr.msk.bf16.mxu0 %vm1575_vm6, %v9334_v53  ;;  %v11301_v9 = vadd.f32 %v11101_v50, %v1802_v17  ;;  %v8057_v50 = vld [vmem:[%s13888_s7 + $0x20] sm:$0xff]  ;;  %v8058_v53 = vld [vmem:[%s13888_s7 + $0x28] sm:$0xff] }
 0x263   : > { %5847 = vmatprep.mubr.bf16.mxu1 %v13920_v27  ;;  %v1804_v31 = vpop.f32.mrf.mxu0  ;;  %v11328_v0 = vpop.f32.mrf.mxu1 }
 0x264   : > { %13939 = vst [vmem:[#allocation30_spill] sm:$0xff] %v11301_v9  ;;  %v11311_v29 = vadd.f32 %v11111_v45, %v1804_v31  ;;  %v9338_v45 = vld [vmem:[%s13883_s2 + $0x344] ss:$24 sps:$4 sm:$0xff]   ;;  %8091 = vperm.xlu0 %9094, %v8057_v50  }
 0x265   : > { %v1806_v14 = vpop.f32.mrf.mxu0  ;;  %8096 = vperm.xlu1 %9093, %v8058_v53   ;;  %v11338_v9 = vpop.f32.mrf.mxu1 }
 0x266   : > { %13940 = vst [vmem:[#allocation31_spill] sm:$0xff] %v11311_v29  ;;  %v11331_v17 = vadd.f32 %v11122_v54, %v1806_v14  ;;  %v8055_v54 = vld [vmem:[%s13888_s7 + $0x10] sm:$0xff] }
 0x267   : > { %v1810_v41 = vpop.f32.mrf.mxu0  ;;  %v11359_v53 = vpop.f32.mrf.mxu1 }
 0x268   : > { %v11334_v31 = vadd.f32 %v11130_v48, %v1810_v41  ;;  %v8056_v48 = vld [vmem:[%s13888_s7 + $0x18] sm:$0xff]  ;;  %8081 = vperm.xlu0 %9094, %v8055_v54   ;;  %v8054_v41 = vld [vmem:[%s13888_s7 + $0x8] sm:$0xff] }
 0x269   : > { %2295 = vmatmul.mubr.bf16.gmra.mxu0 %v9336_v26  ;;  %v1812_v29 = vpop.f32.mrf.mxu0  ;;  %8086 = vperm.xlu1 %9093, %v8056_v48  }
 0x26a   : > { %8876 = vmatmul.mubr.msk.bf16.gmra.mxu1 %vm5494_vm7, %v9337_v38  ;;  %8625 = vmatprep.mubr.msk.bf16.mxu0 %vm1575_vm6, %v9338_v45  ;;  %v11341_v10 = vadd.f32 %v11138_v12, %v1812_v29  ;;  %v9340_v12 = vld [vmem:[%s13883_s2 + $0x340] ss:$24 sps:$4 sm:$0xff]   ;;  %v9341_v29 = vld [vmem:[%s13885_s4 + $0x48] sm:$0xff]  }
 0x26b   : > { %5857 = vmatprep.mubr.bf16.mxu1 %v13920_v27  ;;  %v1814_v50 = vpop.f32.mrf.mxu0  ;;  %v9342_v38 = vld [vmem:[%s13883_s2 + $0x374] ss:$24 sps:$4 sm:$0xff]  }
 0x26c   : > { %v11351_v26 = vadd.f32 %v11149_v52, %v1814_v50  ;;  %v8053_v52 = vld [vmem:[%s13888_s7] sm:$0xff] }
 0x26d   : > { %v1816_v14 = vpop.f32.mrf.mxu0  ;;  %8071 = vperm.xlu0 %9094, %v8053_v52   ;;  %8076 = vperm.xlu1 %9093, %v8054_v41  }
 0x26e   : > { %v11365_v45 = vadd.f32 %v11160_v56, %v1816_v14  ;;  %v11378_v56 = vpop.f32.mrf.mxu1 }
 0x26f   : > { %v1820_v54 = vpop.f32.mrf.mxu0 }
 0x270   : > { %13941 = vst [vmem:[#allocation32_spill] sm:$0xff] %v11365_v45  ;;  %v11374_v48 = vadd.f32 %v11169_v35, %v1820_v54  ;;  %v9344_v35 = vld [vmem:[%s13883_s2 + $0x370] ss:$24 sps:$4 sm:$0xff]  }
 0x271   : > { %2305 = vmatmul.mubr.bf16.gmra.mxu0 %v9340_v12  ;;  %v1822_v50 = vpop.f32.mrf.mxu0 }
 0x272   : > { %8877 = vmatmul.mubr.msk.bf16.gmra.mxu1 %vm5494_vm7, %v9341_v29  ;;  %8626 = vmatprep.mubr.msk.bf16.mxu0 %vm1575_vm6, %v9342_v38  ;;  %v11381_v14 = vadd.f32 %v11178_v8, %v1822_v50  ;;  %v9345_v29 = vld [vmem:[%s13885_s4 + $0x50] sm:$0xff]   ;;  %v11393_v38 = vpop.f32.mrf.mxu1  ;;  %v9346_v8 = vld [vmem:[%s13883_s2 + $0x3a4] ss:$24 sps:$4 sm:$0xff]  }
 0x273   : > { %5867 = vmatprep.mubr.bf16.mxu1 %v13920_v27  ;;  %v1824_v45 = vpop.f32.mrf.mxu0 }
 0x274   : > { %13942 = vst [vmem:[#allocation33_spill] sm:$0xff] %v11381_v14  ;;  %v11385_v52 = vadd.f32 %v11189_v43, %v1824_v45  ;;  %v11405_v50 = vpop.f32.mrf.mxu1 }
 0x275   : > { %v1826_v12 = vpop.f32.mrf.mxu0 }
 0x276   : > { %13943 = vst [vmem:[#allocation34_spill] sm:$0xff] %v11385_v52  ;;  %v11399_v41 = vadd.f32 %v11203_v49, %v1826_v12  ;;  %v11418_v12 = vpop.f32.mrf.mxu1 }
 0x277   : > { %v1830_v43 = vpop.f32.mrf.mxu0 }
 0x278   : > { %v11402_v45 = vadd.f32 %v11210_v15, %v1830_v43  ;;  %v9348_v15 = vld [vmem:[%s13883_s2 + $0x3a0] ss:$24 sps:$4 sm:$0xff]   ;;  %v3447_v43 = vpop.permute.xlu0 %3446 }
 0x279   : > { %2315 = vmatmul.mubr.bf16.gmra.mxu0 %v9344_v35  ;;  %v1832_v54 = vpop.f32.mrf.mxu0 }
 0x27a   : > { %13944 = vst [vmem:[#allocation35_spill] sm:$0xff] %v11402_v45  ;;  %8878 = vmatmul.mubr.msk.bf16.gmra.mxu1 %vm5494_vm7, %v9345_v29  ;;  %8627 = vmatprep.mubr.msk.bf16.mxu0 %vm1575_vm6, %v9346_v8  ;;  %v11409_v52 = vadd.f32 %v11221_v19, %v1832_v54  ;;  %v9349_v29 = vld [vmem:[%s13885_s4 + $0x58] sm:$0xff]   ;;  %v9352_v19 = vld [vmem:[%s13884_s3 + $0x4] ss:$12 sps:$4 sm:$0xff]   ;;  %v3443_v45 = vpop.permute.xlu1 %3442 }
 0x27b   : > { %5877 = vmatprep.mubr.bf16.mxu1 %v13920_v27  ;;  %v1834_v14 = vpop.f32.mrf.mxu0 }
 0x27c   : > { %13945 = vst [vmem:[#allocation36_spill] sm:$0xff] %v11409_v52  ;;  %v11413_v49 = vadd.f32 %v11233_v37, %v1834_v14 }
 0x27d   : > { %v1836_v35 = vpop.f32.mrf.mxu0 }
 0x27e   : > { %13946 = vst [vmem:[#allocation37_spill] sm:$0xff] %v11413_v49  ;;  %v11427_v8 = vadd.f32 %v11247_v58, %v1836_v35 }
 0x27f   : > { %v1840_v37 = vpop.f32.mrf.mxu0 }
 0x280   : > { %v11430_v14 = vadd.f32 %v11252_v51, %v1840_v37 }
 0x281   : > { %2325 = vmatmul.mubr.bf16.gmra.mxu0 %v9348_v15  ;;  %v1842_v54 = vpop.f32.mrf.mxu0  ;;  %v9350_v15 = vld [vmem:[%s13884_s3] ss:$12 sps:$4 sm:$0xff]  }
 0x282   : > { %v11432_v49 = vpop.f32.mrf.mxu1  ;;  %8879 = vmatmul.mubr.msk.bf16.gmra.mxu1 %vm5494_vm7, %v9349_v29  ;;  %3652 = vmatprep.mubr.bf16.mxu0 %v9352_v19  ;;  %v11436_v52 = vadd.f32 %v11266_v57, %v1842_v54  ;;  %v9353_v57 = vld [vmem:[%s13885_s4 + $0x60] sm:$0xff]   ;;  %v3445_v19 = vpop.permute.xlu0 %3444 }
 0x283   : > { %13947 = vst [vmem:[#allocation38_spill] sm:$0xff] %v11432_v49  ;;  %5887 = vmatprep.mubr.bf16.mxu1 %v13920_v27  ;;  %v1844_v58 = vpop.f32.mrf.mxu0 }
 0x284   : > { %13948 = vst [vmem:[#allocation39_spill] sm:$0xff] %v11436_v52  ;;  %v11439_v35 = vpop.f32.mrf.mxu1  ;;  %v11442_v51 = vadd.f32 %v11277_v61, %v1844_v58  ;;  %v9356_v61 = vld [vmem:[%s13884_s3 + $0x1c] ss:$12 sps:$4 sm:$0xff]  }
 0x285   : > { %13949 = vst [vmem:[#allocation40_spill] sm:$0xff] %v11439_v35  ;;  %v1846_v37 = vpop.f32.mrf.mxu0  ;;  %v3474_v35 = vsel %vm606_vm1, %v3447_v43, %v10990_v30  ;;  %v9354_v43 = vld [vmem:[%s13884_s3 + $0x18] ss:$12 sps:$4 sm:$0xff]  }
 0x286   : > { %13950 = vst [vmem:[#allocation41_spill] sm:$0xff] %v11442_v51  ;;  %v11447_v49 = vpop.f32.mrf.mxu1  ;;  %v11453_v29 = vadd.f32 %v11291_v11, %v1846_v37  ;;  %v3441_v51 = vpop.permute.xlu1 %3440  ;;  %v3473_v11 = vsel %vm606_vm1, %v3443_v45, %v3445_v19 }
 0x287   : > { %13951 = vst [vmem:[#allocation42_spill] sm:$0xff] %v11447_v49 }
 0x288   : > { %13952 = vst [vmem:[#allocation43_spill] sm:$0xff] %v11453_v29  ;;  %v11458_v54 = vpop.f32.mrf.mxu1  ;;  %v1850_v58 = vpop.f32.mrf.mxu0 }
 0x289   : > { %13953 = vst [vmem:[#allocation44_spill] sm:$0xff] %v11458_v54  ;;  %3653 = vmatmul.mubr.bf16.vlgmr.msra.gmra.mxu0 %v9350_v15  ;;  %v11463_v49 = vadd.f32 %v11298_v21, %v1850_v58  ;;  %v3472_v21 = vsel %vm606_vm1, %v3441_v51, %v3443_v45  ;;  %vm7755_vm1 = vcmask 1047559  }
 0x28a   : > { %v11465_v52 = vpop.f32.mrf.mxu1  ;;  %4066 = vmatpush1.bf16.msra.mxu0 %v3474_v35  ;;  %8880 = vmatmul.mubr.msk.bf16.gmra.mxu1 %vm5494_vm7, %v9353_v57  ;;  %v1852_v37 = vpop.f32.mrf.mxu0  ;;  %v9360_v57 = vld [vmem:[%s13884_s3 + $0x34] ss:$12 sps:$4 sm:$0xff]  }
 0x28b   : > { %13954 = vst [vmem:[#allocation45_spill] sm:$0xff] %v11465_v52  ;;  %4067 = vmatprep.subr.bf16.mxu0 %v3473_v11  ;;  %3662 = vmatprep.mubr.bf16.mxu0 %v9356_v61  ;;  %v11470_v54 = vadd.f32 %v11328_v0, %v1852_v37  ;;  %v9357_v0 = vld [vmem:[%s13885_s4 + $0x68] sm:$0xff]  }
 0x28c   : > { %v11472_v29 = vpop.f32.mrf.mxu1  ;;  %5897 = vmatprep.mubr.bf16.mxu1 %v13920_v27  ;;  %v1854_v30 = vpop.f32.mrf.mxu0 }
 0x28d   : > { %13955 = vst [vmem:[#allocation46_spill] sm:$0xff] %v11472_v29  ;;  %v11480_v35 = vadd.f32 %v11338_v9, %v1854_v30 }
 0x28e   : > { %v11482_v15 = vpop.f32.mrf.mxu1  ;;  %4068 = vmatpush1.bf16.msra.mxu0 %v3472_v21  ;;  %v1856_v19 = vpop.f32.mrf.mxu0  ;;  %v9358_v21 = vld [vmem:[%s13884_s3 + $0x30] ss:$12 sps:$4 sm:$0xff]  }
 0x28f   : > { %13956 = vst [vmem:[#allocation47_spill] sm:$0xff] %v11482_v15  ;;  %v11491_v45 = vadd.f32 %v11359_v53, %v1856_v19 }
 0x290   : > { %v11493_v51 = vpop.f32.mrf.mxu1  ;;  %v1860_v61 = vpop.f32.mrf.mxu0 }
 0x291   : > { %13957 = vst [vmem:[#allocation48_spill] sm:$0xff] %v11493_v51  ;;  %3663 = vmatmul.mubr.bf16.gmra.mxu0 %v9354_v43  ;;  %v11496_v9 = vadd.f32 %v11378_v56, %v1860_v61 }
 0x292   : > { %v11498_v58 = vpop.f32.mrf.mxu1  ;;  %8881 = vmatmul.mubr.msk.bf16.gmra.mxu1 %vm5494_vm7, %v9357_v0  ;;  %3672 = vmatprep.mubr.bf16.mxu0 %v9360_v57  ;;  %v1862_v11 = vpop.f32.mrf.mxu0  ;;  %v9361_v0 = vld [vmem:[%s13885_s4 + $0x70] sm:$0xff]  }
 0x293   : > { %13958 = vst [vmem:[#allocation49_spill] sm:$0xff] %v11498_v58  ;;  %5907 = vmatprep.mubr.bf16.mxu1 %v13920_v27  ;;  %v11503_v37 = vadd.f32 %v11393_v38, %v1862_v11  ;;  %v9364_v38 = vld [vmem:[%s13884_s3 + $0x4c] ss:$12 sps:$4 sm:$0xff]  }
 0x294   : > { %v11505_v53 = vpop.f32.mrf.mxu1  ;;  %v1864_v30 = vpop.f32.mrf.mxu0 }
 0x295   : > { %13959 = vst [vmem:[#allocation50_spill] sm:$0xff] %v11505_v53  ;;  %v11511_v56 = vadd.f32 %v11405_v50, %v1864_v30  ;;  %v9362_v30 = vld [vmem:[%s13884_s3 + $0x48] ss:$12 sps:$4 sm:$0xff]  }
 0x296   : > { %v11513_v43 = vpop.f32.mrf.mxu1  ;;  %v1866_v57 = vpop.f32.mrf.mxu0 }
 0x297   : > { %13960 = vst [vmem:[#allocation51_spill] sm:$0xff] %v11513_v43  ;;  %v11522_v19 = vadd.f32 %v11418_v12, %v1866_v57  ;;  %v9367_v12 = vld [vmem:[%s13885_s4 + $0x78] sm:$0xff]  }
 0x298   : > { %v11524_v61 = vpop.f32.mrf.mxu1 }
 0x299   : > { %13961 = vst [vmem:[#allocation52_spill] sm:$0xff] %v11524_v61  ;;  %3673 = vmatmul.mubr.bf16.gmra.mxu0 %v9358_v21  ;;  %v9372_v21 = vld [vmem:[%s13884_s3 + $0x64] ss:$12 sps:$4 sm:$0xff]  }
 0x29a   : > { %v11526_v11 = vpop.f32.mrf.mxu1  ;;  %8882 = vmatmul.mubr.msk.bf16.gmra.mxu1 %vm5494_vm7, %v9361_v0  ;;  %3682 = vmatprep.mubr.bf16.mxu0 %v9364_v38 }
 0x29b   : > { %13962 = vst [vmem:[#allocation53_spill] sm:$0xff] %v11526_v11  ;;  %5917 = vmatprep.mubr.bf16.mxu1 %v13920_v27 }
 0x29c   : > { %v11530_v50 = vpop.f32.mrf.mxu1 }
 0x29d   : > { %13963 = vst [vmem:[#allocation54_spill] sm:$0xff] %v11530_v50  ;;  %v9370_v50 = vld [vmem:[%s13884_s3 + $0x60] ss:$12 sps:$4 sm:$0xff]  }
 0x29e   : > { %v11535_v53 = vpop.f32.mrf.mxu1 }
 0x29f   : > { %13964 = vst [vmem:[#allocation55_spill] sm:$0xff] %v11535_v53 }
 0x2a0   : > { %v11543_v0 = vpop.f32.mrf.mxu1 }
 0x2a1   : > { %13965 = vst [vmem:[#allocation56_spill] sm:$0xff] %v11543_v0  ;;  %3683 = vmatmul.mubr.bf16.gmra.mxu0 %v9362_v30  ;;  %v9374_v0 = vld [vmem:[%s13885_s4 + $0x80] sm:$0xff]   ;;  %v9377_v30 = vld [vmem:[%s13884_s3 + $0x7c] ss:$12 sps:$4 sm:$0xff]  }
 0x2a2   : > { %v11545_v38 = vpop.f32.mrf.mxu1  ;;  %8883 = vmatmul.mubr.msk.bf16.gmra.mxu1 %vm5494_vm7, %v9367_v12  ;;  %3692 = vmatprep.mubr.bf16.mxu0 %v9372_v21 }
 0x2a3   : > { %13966 = vst [vmem:[#allocation57_spill] sm:$0xff] %v11545_v38  ;;  %5927 = vmatprep.mubr.bf16.mxu1 %v13920_v27 }
 0x2a4   : > { %v11549_v57 = vpop.f32.mrf.mxu1 }
 0x2a5   : > { %13967 = vst [vmem:[#allocation58_spill] sm:$0xff] %v11549_v57 }
 0x2a6   : > { %v11554_v53 = vpop.f32.mrf.mxu1 }
 0x2a7   : > { %13968 = vst [vmem:[#allocation59_spill] sm:$0xff] %v11554_v53 }
 0x2a8   : > { %v11562_v12 = vpop.f32.mrf.mxu1 }
 0x2a9   : > { %13969 = vst [vmem:[#allocation60_spill] sm:$0xff] %v11562_v12  ;;  %v2136_v21 = vpop.f32.mrf.mxu0  ;;  %3693 = vmatmul.mubr.bf16.gmra.mxu0 %v9370_v50  ;;  %v9375_v12 = vld [vmem:[%s13884_s3 + $0x78] ss:$12 sps:$4 sm:$0xff]  }
 0x2aa   : > { %v2137_v57 = vadd.f32 %v2136_v21, %v10774_v28  ;;  %v11565_v38 = vpop.f32.mrf.mxu1  ;;  %8884 = vmatmul.mubr.msk.bf16.gmra.mxu1 %vm5494_vm7, %v9374_v0  ;;  %3702 = vmatprep.mubr.bf16.mxu0 %v9377_v30  ;;  %v9378_v0 = vld [vmem:[%s13885_s4 + $0x88] sm:$0xff]   ;;  %v9381_v30 = vld [vmem:[%s13884_s3 + $0x94] ss:$12 sps:$4 sm:$0xff]  }
 0x2ab   : > { %13970 = vst [vmem:[#allocation61_spill] sm:$0xff] %v11565_v38  ;;  %v2138_v53 = vpop.f32.mrf.mxu0  ;;  %5937 = vmatprep.mubr.bf16.mxu1 %v13920_v27 }
 0x2ac   : > { %v2139_v11 = vadd.f32 %v2138_v53, %v10782_v34  ;;  %v11570_v61 = vpop.f32.mrf.mxu1 }
 0x2ad   : > { %13971 = vst [vmem:[#allocation62_spill] sm:$0xff] %v11570_v61  ;;  %v2140_v43 = vpop.f32.mrf.mxu0 }
 0x2ae   : > { %v2141_v50 = vadd.f32 %v2140_v43, %v10790_v55  ;;  %v11576_v28 = vpop.f32.mrf.mxu1 }
 0x2af   : > { %13972 = vst [vmem:[#allocation63_spill] sm:$0xff] %v11576_v28  ;;  %v2142_v34 = vpop.f32.mrf.mxu0 }
 0x2b0   : > { %v2335_v53 = vpack.c.bf16 %v2141_v50, %v2137_v57  ;;  %v2143_v21 = vadd.f32 %v2142_v34, %v10798_v25  ;;  %v11585_v61 = vpop.f32.mrf.mxu1 }
 0x2b1   : > { %13973 = vst [vmem:[#allocation64_spill] sm:$0xff] %v11585_v61  ;;  %v2146_v38 = vpop.f32.mrf.mxu0  ;;  %3703 = vmatmul.mubr.bf16.gmra.mxu0 %v9375_v12 }
 0x2b2   : > { %v2375_v58 = vunpack.i.l.bf16 %v2335_v53  ;;  %v2376_v55 = vunpack.i.h.bf16 %v2335_v53  ;;  %v2336_v43 = vpack.c.bf16 %v2143_v21, %v2139_v11  ;;  %v2147_v28 = vadd.f32 %v2146_v38, %v10811_v20  ;;  %v11588_v51 = vpop.f32.mrf.mxu1  ;;  %8885 = vmatmul.mubr.msk.bf16.gmra.mxu1 %vm5494_vm7, %v9378_v0  ;;  %3712 = vmatprep.mubr.bf16.mxu0 %v9381_v30  ;;  %v9379_v20 = vld [vmem:[%s13884_s3 + $0x90] ss:$12 sps:$4 sm:$0xff]  }
 0x2b3   : > { %13974 = vst [vmem:[#allocation65_spill] sm:$0xff] %v11588_v51  ;;  %v2148_v29 = vpop.f32.mrf.mxu0  ;;  %5947 = vmatprep.mubr.bf16.mxu1 %v13920_v27 }
 0x2b4   : > { %v2377_v57 = vmax.f32 %v2375_v58, %v2376_v55  ;;  %v2385_v50 = vunpack.i.l.bf16 %v2336_v43  ;;  %v2386_v25 = vunpack.i.h.bf16 %v2336_v43  ;;  %v2149_v34 = vadd.f32 %v2148_v29, %v10819_v22  ;;  %v11593_v61 = vpop.f32.mrf.mxu1  ;;  %v9382_v58 = vld [vmem:[%s13885_s4 + $0x90] sm:$0xff]   ;;  %v9385_v22 = vld [vmem:[%s13884_s3 + $0xac] ss:$12 sps:$4 sm:$0xff]  }
 0x2b5   : > { %13975 = vst [vmem:[#allocation66_spill] sm:$0xff] %v11593_v61  ;;  %v2150_v12 = vpop.f32.mrf.mxu0 }
 0x2b6   : > { %v2378_v11 = vrot.slane %v2377_v57, 4  ;;  %v2387_v38 = vmax.f32 %v2385_v50, %v2386_v25  ;;  %v2151_v0 = vadd.f32 %v2150_v12, %v10827_v33  ;;  %v11599_v30 = vpop.f32.mrf.mxu1 }
 0x2b7   : > { %13976 = vst [vmem:[#allocation67_spill] sm:$0xff] %v11599_v30  ;;  %v2152_v29 = vpop.f32.mrf.mxu0 }
 0x2b8   : > { %v2379_v53 = vmax.f32 %v2377_v57, %v2378_v11  ;;  %v2388_v21 = vrot.slane %v2387_v38, 4  ;;  %v2337_v55 = vpack.c.bf16 %v2151_v0, %v2147_v28  ;;  %v2153_v43 = vadd.f32 %v2152_v29, %v10835_v2  ;;  %v11608_v61 = vpop.f32.mrf.mxu1 }
 0x2b9   : > { %13977 = vst [vmem:[#allocation68_spill] sm:$0xff] %v11608_v61  ;;  %v2156_v50 = vpop.f32.mrf.mxu0  ;;  %3713 = vmatmul.mubr.bf16.gmra.mxu0 %v9379_v20 }
 0x2ba   : > { %v2380_v33 = vrot.slane %v2379_v53, 2  ;;  %v2389_v25 = vmax.f32 %v2387_v38, %v2388_v21  ;;  %v2395_v12 = vunpack.i.l.bf16 %v2337_v55  ;;  %v2396_v30 = vunpack.i.h.bf16 %v2337_v55  ;;  %v11610_v51 = vpop.f32.mrf.mxu1  ;;  %8886 = vmatmul.mubr.msk.bf16.gmra.mxu1 %vm5494_vm7, %v9382_v58  ;;  %3722 = vmatprep.mubr.bf16.mxu0 %v9385_v22  ;;  %v9383_v58 = vld [vmem:[%s13884_s3 + $0xa8] ss:$12 sps:$4 sm:$0xff]  }
 0x2bb   : > { %13978 = vst [vmem:[#allocation69_spill] sm:$0xff] %v11610_v51  ;;  %v2338_v15 = vpack.c.bf16 %v2153_v43, %v2149_v34  ;;  %v2157_v57 = vadd.f32 %v2156_v50, %v10848_v5  ;;  %v2158_v11 = vpop.f32.mrf.mxu0  ;;  %5957 = vmatprep.mubr.bf16.mxu1 %v13920_v27 }
 0x2bc   : > { %v2381_v2 = vmax.f32 %v2379_v53, %v2380_v33  ;;  %v2390_v28 = vrot.slane %v2389_v25, 2  ;;  %v2397_v0 = vmax.f32 %v2395_v12, %v2396_v30  ;;  %v2159_v20 = vadd.f32 %v2158_v11, %v10856_v59  ;;  %v11616_v29 = vpop.f32.mrf.mxu1  ;;  %v9386_v59 = vld [vmem:[%s13885_s4 + $0x98] sm:$0xff]  }
 0x2bd   : > { %13979 = vst [vmem:[#allocation70_spill] sm:$0xff] %v11616_v29  ;;  %v2405_v38 = vunpack.i.l.bf16 %v2338_v15  ;;  %v2406_v21 = vunpack.i.h.bf16 %v2338_v15  ;;  %v2160_v55 = vpop.f32.mrf.mxu0  ;;  %v9389_v15 = vld [vmem:[%s13884_s3 + $0xc4] ss:$12 sps:$4 sm:$0xff]  }
 0x2be   : > { %v2382_v34 = vrot.slane %v2381_v2, 1  ;;  %v2391_v22 = vmax.f32 %v2389_v25, %v2390_v28  ;;  %v2398_v5 = vrot.slane %v2397_v0, 4  ;;  %v2161_v43 = vadd.f32 %v2160_v55, %v10864_v18  ;;  %v11622_v50 = vpop.f32.mrf.mxu1 }
 0x2bf   : > { %13980 = vst [vmem:[#allocation71_spill] sm:$0xff] %v11622_v50  ;;  %v2407_v30 = vmax.f32 %v2405_v38, %v2406_v21  ;;  %v2162_v53 = vpop.f32.mrf.mxu0 }
 0x2c0   : > { %v2383_v33 = vmax.f32 %v2381_v2, %v2382_v34  ;;  %v2392_v12 = vrot.slane %v2391_v22, 1  ;;  %v2399_v11 = vmax.f32 %v2397_v0, %v2398_v5  ;;  %v2339_v29 = vpack.c.bf16 %v2161_v43, %v2157_v57  ;;  %v11630_v25 = vpop.f32.mrf.mxu1 }
 0x2c1   : > { %13981 = vst [vmem:[#allocation72_spill] sm:$0xff] %v11630_v25  ;;  %v2408_v28 = vrot.slane %v2407_v30, 4  ;;  %v2163_v18 = vadd.f32 %v2162_v53, %v10872_v1  ;;  %v2166_v55 = vpop.f32.mrf.mxu0  ;;  %3723 = vmatmul.mubr.bf16.gmra.mxu0 %v9383_v58 }
 0x2c2   : > { %v2400_v50 = vrot.slane %v2399_v11, 2  ;;  %v2415_v51 = vunpack.i.l.bf16 %v2339_v29  ;;  %v11633_v61 = vpop.f32.mrf.mxu1  ;;  %8887 = vmatmul.mubr.msk.bf16.gmra.mxu1 %vm5494_vm7, %v9386_v59  ;;  %3732 = vmatprep.mubr.bf16.mxu0 %v9389_v15  ;;  %v2416_v21 = vunpack.i.h.bf16 %v2339_v29  ;;  %v2167_v0 = vadd.f32 %v2166_v55, %v10885_v13  ;;  %v9387_v13 = vld [vmem:[%s13884_s3 + $0xc0] ss:$12 sps:$4 sm:$0xff]  }
 0x2c3   : > { %13982 = vst [vmem:[#allocation73_spill] sm:$0xff] %v11633_v61  ;;  %v2409_v38 = vmax.f32 %v2407_v30, %v2408_v28  ;;  %v2340_v2 = vpack.c.bf16 %v2163_v18, %v2159_v20  ;;  %v2168_v57 = vpop.f32.mrf.mxu0  ;;  %5967 = vmatprep.mubr.bf16.mxu1 %v13920_v27  ;;  %v2384_v34 = vpack.i.bf16 %v2383_v33, %v2383_v33 }
 0x2c4   : > { %v11638_v5 = vmax.f32 %v2391_v22, %v2392_v12  ;;  %v2401_v1 = vmax.f32 %v2399_v11, %v2400_v50  ;;  %v2169_v58 = vadd.f32 %v2168_v57, %v10893_v60  ;;  %v11641_v43 = vpop.f32.mrf.mxu1  ;;  %v2417_v61 = vmax.f32 %v2415_v51, %v2416_v21  ;;  %v9391_v60 = vld [vmem:[%s13885_s4 + $0xa0] sm:$0xff]   ;;  %v9394_v51 = vld [vmem:[%s13884_s3 + $0xdc] ss:$12 sps:$4 sm:$0xff]  }
 0x2c5   : > { %13983 = vst [vmem:[#allocation74_spill] sm:$0xff] %v11641_v43  ;;  %v2410_v53 = vrot.slane %v2409_v38, 2  ;;  %v2425_v59 = vunpack.i.l.bf16 %v2340_v2  ;;  %v2426_v15 = vunpack.i.h.bf16 %v2340_v2  ;;  %v2170_v30 = vpop.f32.mrf.mxu0  ;;  %v2463_v28 = vunpack.c.l.b16 %v2384_v34 }
 0x2c6   : > { %v2402_v20 = vrot.slane %v2401_v1, 1  ;;  %v2171_v29 = vadd.f32 %v2170_v30, %v10901_v63  ;;  %v11647_v33 = vpop.f32.mrf.mxu1  ;;  %v2418_v50 = vrot.slane %v2417_v61, 4  ;;  %v2394_v2 = vpack.i.bf16 %v11638_v5, %v11638_v5 }
 0x2c7   : > { %13984 = vst [vmem:[#allocation75_spill] sm:$0xff] %v11647_v33  ;;  %v2411_v22 = vmax.f32 %v2409_v38, %v2410_v53  ;;  %v2427_v12 = vmax.f32 %v2425_v59, %v2426_v15  ;;  %v2172_v11 = vpop.f32.mrf.mxu0 }
 0x2c8   : > { %v2403_v18 = vmax.f32 %v2401_v1, %v2402_v20  ;;  %v2341_v55 = vpack.c.bf16 %v2171_v29, %v2167_v0  ;;  %v2173_v63 = vadd.f32 %v2172_v11, %v10909_v40  ;;  %v11656_v21 = vpop.f32.mrf.mxu1  ;;  %v2419_v30 = vmax.f32 %v2417_v61, %v2418_v50 }
 0x2c9   : > { %13985 = vst [vmem:[#allocation76_spill] sm:$0xff] %v11656_v21  ;;  %v2412_v57 = vrot.slane %v2411_v22, 1  ;;  %v2428_v43 = vrot.slane %v2427_v12, 4  ;;  %v2176_v33 = vpop.f32.mrf.mxu0  ;;  %3733 = vmatmul.mubr.bf16.gmra.mxu0 %v9387_v13 }
 0x2ca   : > { %v2404_v38 = vpack.i.bf16 %v2403_v18, %v2403_v18  ;;  %v2435_v53 = vunpack.i.l.bf16 %v2341_v55  ;;  %v2436_v59 = vunpack.i.h.bf16 %v2341_v55  ;;  %v2342_v15 = vpack.c.bf16 %v2173_v63, %v2169_v58  ;;  %v11660_v25 = vpop.f32.mrf.mxu1  ;;  %8888 = vmatmul.mubr.msk.bf16.gmra.mxu1 %vm5494_vm7, %v9391_v60  ;;  %3742 = vmatprep.mubr.bf16.mxu0 %v9394_v51  ;;  %v9395_v55 = vld [vmem:[%s13885_s4 + $0xa8] sm:$0xff]  }
 0x2cb   : > { %13986 = vst [vmem:[#allocation77_spill] sm:$0xff] %v11660_v25  ;;  %v2413_v40 = vmax.f32 %v2411_v22, %v2412_v57  ;;  %v2420_v0 = vrot.slane %v2419_v30, 2  ;;  %v2429_v34 = vmax.f32 %v2427_v12, %v2428_v43  ;;  %v11664_v1 = vadd.f32 %v2176_v33, %v10922_v39  ;;  %v2178_v5 = vpop.f32.mrf.mxu0  ;;  %5977 = vmatprep.mubr.bf16.mxu1 %v13920_v27  ;;  %v9392_v39 = vld [vmem:[%s13884_s3 + $0xd8] ss:$12 sps:$4 sm:$0xff]  }
 0x2cc   : > { %v2465_v61 = vunpack.c.l.b16 %v2404_v38  ;;  %v2437_v13 = vmax.f32 %v2435_v53, %v2436_v59  ;;  %v2445_v20 = vunpack.i.l.bf16 %v2342_v15  ;;  %v2446_v29 = vunpack.i.h.bf16 %v2342_v15  ;;  %v11667_v50 = vpop.f32.mrf.mxu1 }
 0x2cd   : > { %13987 = vst [vmem:[#allocation78_spill] sm:$0xff] %v11667_v50  ;;  %v2414_v58 = vpack.i.bf16 %v2413_v40, %v2413_v40  ;;  %v2421_v11 = vmax.f32 %v2419_v30, %v2420_v0  ;;  %v2430_v18 = vrot.slane %v2429_v34, 2  ;;  %v11670_v60 = vadd.f32 %v2178_v5, %v10930_v42  ;;  %v2180_v51 = vpop.f32.mrf.mxu0  ;;  %v9398_v42 = vld [vmem:[%s13884_s3 + $0xf4] ss:$12 sps:$4 sm:$0xff]  }
 0x2ce   : > { %v2438_v43 = vrot.slane %v2437_v13, 4  ;;  %v2447_v33 = vmax.f32 %v2445_v20, %v2446_v29  ;;  %v2181_v22 = vadd.f32 %v2180_v51, %v10938_v36  ;;  %v11676_v12 = vpop.f32.mrf.mxu1  ;;  %v2472_v63 = vsel %vm2471_vm8, %v2465_v61, %v2463_v28 }
 0x2cf   : > { %13988 = vst [vmem:[#allocation79_spill] sm:$0xff] %v11676_v12  ;;  %v2464_v57 = vunpack.c.l.b16 %v2394_v2  ;;  %v2466_v30 = vunpack.c.l.b16 %v2414_v58  ;;  %v2422_v38 = vrot.slane %v2421_v11, 1  ;;  %v2431_v53 = vmax.f32 %v2429_v34, %v2430_v18  ;;  %v2182_v59 = vpop.f32.mrf.mxu0 }
 0x2d0   : > { %v2439_v15 = vmax.f32 %v2437_v13, %v2438_v43  ;;  %v2448_v40 = vrot.slane %v2447_v33, 4  ;;  %v2343_v36 = vpack.c.bf16 %v2181_v22, %v11664_v1  ;;  %v2183_v0 = vadd.f32 %v2182_v59, %v10946_v7  ;;  %v11687_v5 = vpop.f32.mrf.mxu1  ;;  %v9396_v22 = vld [vmem:[%s13884_s3 + $0xf0] ss:$12 sps:$4 sm:$0xff]   ;;  %v9402_v59 = vld [vmem:[%s13884_s3 + $0x10c] ss:$12 sps:$4 sm:$0xff]  }
 0x2d1   : > { %13989 = vst [vmem:[#allocation80_spill] sm:$0xff] %v11687_v5  ;;  %v2423_v20 = vmax.f32 %v2421_v11, %v2422_v38  ;;  %v2432_v29 = vrot.slane %v2431_v53, 1  ;;  %v2186_v51 = vpop.f32.mrf.mxu0  ;;  %3743 = vmatmul.mubr.bf16.gmra.mxu0 %v9392_v39  ;;  %v2477_v50 = vsel %vm2471_vm8, %v2466_v30, %v2464_v57 }
 0x2d2   : > { %v2440_v28 = vrot.slane %v2439_v15, 2  ;;  %v2449_v2 = vmax.f32 %v2447_v33, %v2448_v40  ;;  %v2344_v61 = vpack.c.bf16 %v2183_v0, %v11670_v60  ;;  %v2187_v34 = vadd.f32 %v2186_v51, %v10961_v44  ;;  %v11692_v13 = vpop.f32.mrf.mxu1  ;;  %8889 = vmatmul.mubr.msk.bf16.gmra.mxu1 %vm5494_vm7, %v9395_v55  ;;  %3752 = vmatprep.mubr.bf16.mxu0 %v9398_v42 }
 0x2d3   : > { %13990 = vst [vmem:[#allocation81_spill] sm:$0xff] %v11692_v13  ;;  %v2424_v7 = vpack.i.bf16 %v2423_v20, %v2423_v20  ;;  %v2433_v1 = vmax.f32 %v2431_v53, %v2432_v29  ;;  %v2188_v58 = vpop.f32.mrf.mxu0  ;;  %5987 = vmatprep.mubr.bf16.mxu1 %v13920_v27 }
 0x2d4   : > { %v2441_v11 = vmax.f32 %v2439_v15, %v2440_v28  ;;  %v2450_v18 = vrot.slane %v2449_v2, 2  ;;  %v2189_v39 = vadd.f32 %v2188_v58, %v10971_v4  ;;  %v11697_v43 = vpop.f32.mrf.mxu1  ;;  %v9399_v4 = vld [vmem:[%s13885_s4 + $0xb0] sm:$0xff]  }
 0x2d5   : > { %13991 = vst [vmem:[#allocation82_spill] sm:$0xff] %v11697_v43  ;;  %v2467_v60 = vunpack.c.l.b16 %v2424_v7  ;;  %v2434_v33 = vpack.i.bf16 %v2433_v1, %v2433_v1  ;;  %v2190_v44 = vpop.f32.mrf.mxu0 }
 0x2d6   : > { %v2442_v55 = vrot.slane %v2441_v11, 1  ;;  %v2451_v42 = vmax.f32 %v2449_v2, %v2450_v18  ;;  %v2191_v57 = vadd.f32 %v2190_v44, %v10982_v23  ;;  %v11703_v30 = vpop.f32.mrf.mxu1 }
 0x2d7   : > { %13992 = vst [vmem:[#allocation83_spill] sm:$0xff] %v11703_v30  ;;  %v2468_v38 = vunpack.c.l.b16 %v2434_v33  ;;  %v2192_v53 = vpop.f32.mrf.mxu0  ;;  %v2474_v15 = vsel %vm2473_vm9, %v2467_v60, %v2472_v63 }
 0x2d8   : > { %v2443_v40 = vmax.f32 %v2441_v11, %v2442_v55  ;;  %v2452_v0 = vrot.slane %v2451_v42, 1  ;;  %v2345_v20 = vpack.c.bf16 %v2191_v57, %v2187_v34  ;;  %v2193_v29 = vadd.f32 %v2192_v53, %v10998_v3  ;;  %v11713_v23 = vpop.f32.mrf.mxu1 }
 0x2d9   : > { %13993 = vst [vmem:[#allocation84_spill] sm:$0xff] %v11713_v23  ;;  %v2196_v51 = vpop.f32.mrf.mxu0  ;;  %3753 = vmatmul.mubr.bf16.gmra.mxu0 %v9396_v22  ;;  %v2478_v28 = vsel %vm2473_vm9, %v2468_v38, %v2477_v50  ;;  %v9403_v22 = vld [vmem:[%s13885_s4 + $0xb8] sm:$0xff]  }
 0x2da   : > { %v2444_v2 = vpack.i.bf16 %v2443_v40, %v2443_v40  ;;  %v2453_v7 = vmax.f32 %v2451_v42, %v2452_v0  ;;  %v2488_v1 = vmax.bf16 %v2345_v20, %v2343_v36  ;;  %v2346_v58 = vpack.c.bf16 %v2193_v29, %v2189_v39  ;;  %v11716_v18 = vpop.f32.mrf.mxu1  ;;  %8890 = vmatmul.mubr.msk.bf16.gmra.mxu1 %vm5494_vm7, %v9399_v4  ;;  %v9400_v39 = vld [vmem:[%s13884_s3 + $0x108] ss:$12 sps:$4 sm:$0xff]  }
 0x2db   : > { %13994 = vst [vmem:[#allocation85_spill] sm:$0xff] %v11716_v18  ;;  %v2197_v63 = vadd.f32 %v2196_v51, %v11014_v6  ;;  %v2198_v11 = vpop.f32.mrf.mxu0  ;;  %3762 = vmatprep.mubr.bf16.mxu0 %v9402_v59  ;;  %5997 = vmatprep.mubr.bf16.mxu1 %v13920_v27 }
 0x2dc   : > { %v2469_v3 = vunpack.c.l.b16 %v2444_v2  ;;  %v2501_v34 = vmax.bf16 %v2346_v58, %v2344_v61  ;;  %v2199_v60 = vadd.f32 %v2198_v11, %v11023_v47  ;;  %v11722_v50 = vpop.f32.mrf.mxu1  ;;  %v2454_v33 = vpack.i.bf16 %v2453_v7, %v2453_v7  ;;  %v9406_v47 = vld [vmem:[%s13884_s3 + $0x124] ss:$12 sps:$4 sm:$0xff]   ;;  %v9404_v2 = vld [vmem:[%s13884_s3 + $0x120] ss:$12 sps:$4 sm:$0xff]  }
 0x2dd   : > { %13995 = vst [vmem:[#allocation86_spill] sm:$0xff] %v11722_v50  ;;  %v2200_v36 = vpop.f32.mrf.mxu0  ;;  %v14000_v7 = vld [vmem:[#allocation8_spill] sm:$0xff] }
 0x2de   : > { %v2201_v44 = vadd.f32 %v2200_v36, %v11031_v46  ;;  %v11728_v6 = vpop.f32.mrf.mxu1  ;;  %v2470_v61 = vunpack.c.l.b16 %v2454_v33  ;;  %v11737_v55 = vsel %vm2475_vm10, %v2469_v3, %v2474_v15  ;;  %v9407_v58 = vld [vmem:[%s13885_s4 + $0xc0] sm:$0xff]   ;;  %v14002_v3 = vld [vmem:[#allocation9_spill] sm:$0xff] }
 0x2df   : > { %13996 = vst [vmem:[#allocation87_spill] sm:$0xff] %v11728_v6  ;;  %v2202_v42 = vpop.f32.mrf.mxu0 }
 0x2e0   : > { %v2347_v57 = vpack.c.bf16 %v2201_v44, %v2197_v63  ;;  %v2203_v4 = vadd.f32 %v2202_v42, %v11042_v16  ;;  %v11740_v38 = vpop.f32.mrf.mxu1  ;;  %v11743_v46 = vsel %vm2475_vm10, %v2470_v61, %v2478_v28  ;;  %v9410_v63 = vld [vmem:[%s13884_s3 + $0x13c] ss:$12 sps:$4 sm:$0xff]   ;;  %v14004_v44 = vld [vmem:[#allocation10_spill] sm:$0xff] }
 0x2e1   : > { %13997 = vst [vmem:[#allocation88_spill] sm:$0xff] %v11740_v38  ;;  %v2206_v53 = vpop.f32.mrf.mxu0  ;;  %3763 = vmatmul.mubr.bf16.gmra.mxu0 %v9400_v39 }
 0x2e2   : > { %v2489_v59 = vmax.bf16 %v2488_v1, %v2347_v57  ;;  %v2348_v40 = vpack.c.bf16 %v2203_v4, %v2199_v60  ;;  %v2207_v0 = vadd.f32 %v2206_v53, %v11053_v24  ;;  %v11746_v20 = vpop.f32.mrf.mxu1  ;;  %8891 = vmatmul.mubr.msk.bf16.gmra.mxu1 %vm5494_vm7, %v9403_v22  ;;  %3772 = vmatprep.mubr.bf16.mxu0 %v9406_v47  ;;  %v14005_v57 = vld [vmem:[#allocation11_spill] sm:$0xff] }
 0x2e3   : > { %13998 = vst [vmem:[#allocation89_spill] sm:$0xff] %v11746_v20  ;;  %v2208_v15 = vpop.f32.mrf.mxu0  ;;  %6007 = vmatprep.mubr.bf16.mxu1 %v13920_v27 }
 0x2e4   : > { %v2502_v16 = vmax.bf16 %v2501_v34, %v2348_v40  ;;  %v2209_v29 = vadd.f32 %v2208_v15, %v11060_v62  ;;  %v11751_v51 = vpop.f32.mrf.mxu1 }
 0x2e5   : > { %13999 = vst [vmem:[#allocation90_spill] sm:$0xff] %v11751_v51  ;;  %v2210_v28 = vpop.f32.mrf.mxu0 }
 0x2e6   : > { %v2211_v24 = vadd.f32 %v2210_v28, %v14000_v7  ;;  %v11757_v1 = vpop.f32.mrf.mxu1  ;;  %v9411_v7 = vld [vmem:[%s13885_s4 + $0xc8] sm:$0xff]  }
 0x2e7   : > { %14001 = vst [vmem:[#allocation8_spill] sm:$0xff] %v11757_v1  ;;  %v2212_v62 = vpop.f32.mrf.mxu0 }
 0x2e8   : > { %v2349_v11 = vpack.c.bf16 %v2211_v24, %v2207_v0  ;;  %v2213_v34 = vadd.f32 %v2212_v62, %v14002_v3  ;;  %v11766_v60 = vpop.f32.mrf.mxu1  ;;  %v14007_v62 = vld [vmem:[#allocation13_spill] sm:$0xff] }
 0x2e9   : > { %14003 = vst [vmem:[#allocation9_spill] sm:$0xff] %v11766_v60  ;;  %v2216_v33 = vpop.f32.mrf.mxu0  ;;  %3773 = vmatmul.mubr.bf16.gmra.mxu0 %v9404_v2 }
 0x2ea   : > { %v2490_v36 = vmax.bf16 %v2489_v59, %v2349_v11  ;;  %v2350_v39 = vpack.c.bf16 %v2213_v34, %v2209_v29  ;;  %v11769_v22 = vadd.f32 %v2216_v33, %v14004_v44  ;;  %v5769_v47 = vpop.f32.mrf.mxu1  ;;  %8892 = vmatmul.mubr.msk.bf16.gmra.mxu1 %vm5494_vm7, %v9407_v58  ;;  %3782 = vmatprep.mubr.bf16.mxu0 %v9410_v63  ;;  %v9408_v59 = vld [vmem:[%s13884_s3 + $0x138] ss:$12 sps:$4 sm:$0xff]  }
 0x2eb   : > { %v2218_v61 = vpop.f32.mrf.mxu0  ;;  %6017 = vmatprep.mubr.bf16.mxu1 %v13920_v27  ;;  %v14006_v29 = vld [vmem:[#allocation12_spill] sm:$0xff] }
 0x2ec   : > { %v2503_v42 = vmax.bf16 %v2502_v16, %v2350_v39  ;;  %v11774_v4 = vadd.f32 %v2218_v61, %v14005_v57  ;;  %v5771_v53 = vpop.f32.mrf.mxu1  ;;  %v2491_v0 = vunpack.i.l.bf16 %v2490_v36  ;;  %v2492_v15 = vunpack.i.h.bf16 %v2490_v36  ;;  %v9414_v16 = vld [vmem:[%s13884_s3 + $0x154] ss:$12 sps:$4 sm:$0xff]  }
 0x2ed   : > { %v2220_v40 = vpop.f32.mrf.mxu0  ;;  %v14008_v57 = vld [vmem:[#allocation14_spill] sm:$0xff] }
 0x2ee   : > { %v2221_v28 = vadd.f32 %v2220_v40, %v14006_v29  ;;  %v5773_v2 = vpop.f32.mrf.mxu1  ;;  %v2493_v44 = vmax.f32 %v2491_v0, %v2492_v15 }
 0x2ef   : > { %v6568_v24 = vpack.c.bf16 %v5773_v2, %v5769_v47  ;;  %v2222_v58 = vpop.f32.mrf.mxu0 }
 0x2f0   : > { %v2351_v63 = vpack.c.bf16 %v2221_v28, %v11769_v22  ;;  %v2223_v11 = vadd.f32 %v2222_v58, %v14007_v62  ;;  %v5775_v3 = vpop.f32.mrf.mxu1  ;;  %v2504_v58 = vunpack.i.l.bf16 %v2503_v42 }
 0x2f1   : > { %v6728_v34 = vunpack.i.l.bf16 %v6568_v24  ;;  %v6729_v33 = vunpack.i.h.bf16 %v6568_v24  ;;  %v6569_v36 = vpack.c.bf16 %v5775_v3, %v5771_v53  ;;  %v2226_v39 = vpop.f32.mrf.mxu0  ;;  %3783 = vmatmul.mubr.bf16.gmra.mxu0 %v9408_v59  ;;  %v2505_v24 = vunpack.i.h.bf16 %v2503_v42  ;;  %v14009_v53 = vld [vmem:[#allocation15_spill] sm:$0xff] }
 0x2f2   : > { %v2352_v61 = vpack.c.bf16 %v2223_v11, %v11774_v4  ;;  %v2227_v40 = vadd.f32 %v2226_v39, %v14008_v57  ;;  %v5779_v29 = vpop.f32.mrf.mxu1  ;;  %8893 = vmatmul.mubr.msk.bf16.gmra.mxu1 %vm5494_vm7, %v9411_v7  ;;  %3792 = vmatprep.mubr.bf16.mxu0 %v9414_v16  ;;  %v9412_v11 = vld [vmem:[%s13884_s3 + $0x150] ss:$12 sps:$4 sm:$0xff]   ;;  %v2494_v7 = vrot.slane %v2493_v44, 4  ;;  %v14010_v16 = vld [vmem:[#allocation16_spill] sm:$0xff]  ;;  %v9418_v42 = vld [vmem:[%s13884_s3 + $0x16c] ss:$12 sps:$4 sm:$0xff]  }
 0x2f3   : > { %v6730_v47 = vmax.f32 %v6728_v34, %v6729_v33  ;;  %v6738_v2 = vunpack.i.l.bf16 %v6569_v36  ;;  %v6739_v22 = vunpack.i.h.bf16 %v6569_v36  ;;  %v2228_v28 = vpop.f32.mrf.mxu0  ;;  %6027 = vmatprep.mubr.bf16.mxu1 %v13920_v27  ;;  %v9415_v33 = vld [vmem:[%s13885_s4 + $0xd0] sm:$0xff]  }
 0x2f4   : > { %v2229_v62 = vadd.f32 %v2228_v28, %v14009_v53  ;;  %v5781_v59 = vpop.f32.mrf.mxu1  ;;  %v14011_v53 = vld [vmem:[#allocation17_spill] sm:$0xff]  ;;  %v2495_v38 = vmax.f32 %v2493_v44, %v2494_v7 }
 0x2f5   : > { %v6731_v0 = vrot.slane %v6730_v47, 4  ;;  %v6740_v15 = vmax.f32 %v6738_v2, %v6739_v22  ;;  %v2230_v4 = vpop.f32.mrf.mxu0  ;;  %v2506_v22 = vmax.f32 %v2504_v58, %v2505_v24 }
 0x2f6   : > { %v2231_v3 = vadd.f32 %v2230_v4, %v14010_v16  ;;  %v5783_v34 = vpop.f32.mrf.mxu1 }
 0x2f7   : > { %v6732_v36 = vmax.f32 %v6730_v47, %v6731_v0  ;;  %v6741_v39 = vrot.slane %v6740_v15, 4  ;;  %v6570_v57 = vpack.c.bf16 %v5783_v34, %v5779_v29  ;;  %v2232_v2 = vpop.f32.mrf.mxu0  ;;  %v2507_v0 = vrot.slane %v2506_v22, 4 }
 0x2f8   : > { %v2353_v28 = vpack.c.bf16 %v2231_v3, %v2227_v40  ;;  %v2233_v60 = vadd.f32 %v2232_v2, %v14011_v53  ;;  %v5785_v51 = vpop.f32.mrf.mxu1  ;;  %v14012_v3 = vld [vmem:[#allocation18_spill] sm:$0xff]  ;;  %v14014_v2 = vld [vmem:[#allocation20_spill] sm:$0xff] }
 0x2f9   : > { %v6733_v1 = vrot.slane %v6732_v36, 2  ;;  %v6742_v4 = vmax.f32 %v6740_v15, %v6741_v39  ;;  %v6748_v16 = vunpack.i.l.bf16 %v6570_v57  ;;  %v6749_v20 = vunpack.i.h.bf16 %v6570_v57  ;;  %v2236_v50 = vpop.f32.mrf.mxu0  ;;  %3793 = vmatmul.mubr.bf16.gmra.mxu0 %v9412_v11 }
 0x2fa   : > { %v2514_v18 = vmax.bf16 %v2353_v28, %v2351_v63  ;;  %v2354_v43 = vpack.c.bf16 %v2233_v60, %v2229_v62  ;;  %v5789_v5 = vpop.f32.mrf.mxu1  ;;  %8894 = vmatmul.mubr.msk.bf16.gmra.mxu1 %vm5494_vm7, %v9415_v33  ;;  %3802 = vmatprep.mubr.bf16.mxu0 %v9418_v42  ;;  %v6571_v58 = vpack.c.bf16 %v5785_v51, %v5781_v59  ;;  %v2496_v51 = vrot.slane %v2495_v38, 2  ;;  %v14013_v59 = vld [vmem:[#allocation19_spill] sm:$0xff] }
 0x2fb   : > { %v6734_v29 = vmax.f32 %v6732_v36, %v6733_v1  ;;  %v6743_v47 = vrot.slane %v6742_v4, 2  ;;  %v6750_v40 = vmax.f32 %v6748_v16, %v6749_v20  ;;  %v2238_v24 = vpop.f32.mrf.mxu0  ;;  %6037 = vmatprep.mubr.bf16.mxu1 %v13920_v27  ;;  %v2237_v34 = vadd.f32 %v2236_v50, %v14012_v3  ;;  %v9416_v20 = vld [vmem:[%s13884_s3 + $0x168] ss:$12 sps:$4 sm:$0xff]   ;;  %v9419_v50 = vld [vmem:[%s13885_s4 + $0xd8] sm:$0xff]  }
 0x2fc   : > { %v2527_v15 = vmax.bf16 %v2354_v43, %v2352_v61  ;;  %v5791_v11 = vpop.f32.mrf.mxu1  ;;  %v2480_v60 = vpack.c.b16 %v11737_v55, %v11737_v55  ;;  %v6758_v7 = vunpack.i.l.bf16 %v6571_v58  ;;  %v6759_v1 = vunpack.i.h.bf16 %v6571_v58  ;;  %v9422_v55 = vld [vmem:[%s13884_s3 + $0x184] ss:$12 sps:$4 sm:$0xff]  }
 0x2fd   : > { %v6735_v63 = vrot.slane %v6734_v29, 1  ;;  %v6744_v44 = vmax.f32 %v6742_v4, %v6743_v47  ;;  %v6751_v62 = vrot.slane %v6750_v40, 4  ;;  %v2240_v33 = vpop.f32.mrf.mxu0  ;;  %v2239_v42 = vadd.f32 %v2238_v24, %v14013_v59  ;;  %v14015_v47 = vld [vmem:[#allocation21_spill] sm:$0xff] }
 0x2fe   : > { %v5793_v43 = vpop.f32.mrf.mxu1  ;;  %v2241_v28 = vadd.f32 %v2240_v33, %v14014_v2  ;;  %v6760_v4 = vmax.f32 %v6758_v7, %v6759_v1  ;;  %v11824_v3 = vsel %vm2482_vm11, %v2480_v60, 0  ;;  %v11826_v59 = vmax.f32 %v2506_v22, %v2507_v0 }
 0x2ff   : > { %v6736_v36 = vmax.f32 %v6734_v29, %v6735_v63  ;;  %v6745_v39 = vrot.slane %v6744_v44, 1  ;;  %v6752_v57 = vmax.f32 %v6750_v40, %v6751_v62  ;;  %v2242_v53 = vpop.f32.mrf.mxu0  ;;  %v6572_v16 = vpack.c.bf16 %v5793_v43, %v5789_v5 }
 0x300   : > { %v2243_v58 = vadd.f32 %v2242_v53, %v14015_v47  ;;  %v5795_v24 = vpop.f32.mrf.mxu1  ;;  %v2355_v23 = vpack.c.bf16 %v2241_v28, %v2237_v34  ;;  %v6761_v29 = vrot.slane %v6760_v4, 4  ;;  %v11829_v5 = vmax.f32 %v2495_v38, %v2496_v51  ;;  %v14016_v28 = vld [vmem:[#allocation22_spill] sm:$0xff] }
 0x301   : > { %v6737_v6 = vpack.i.bf16 %v6736_v36, %v6736_v36  ;;  %v6753_v25 = vrot.slane %v6752_v57, 2  ;;  %v2246_v61 = vpop.f32.mrf.mxu0  ;;  %3803 = vmatmul.mubr.bf16.gmra.mxu0 %v9416_v20  ;;  %v6768_v40 = vunpack.i.l.bf16 %v6572_v16  ;;  %v6769_v63 = vunpack.i.h.bf16 %v6572_v16 }
 0x302   : > { %v2356_v62 = vpack.c.bf16 %v2243_v58, %v2239_v42  ;;  %v5799_v33 = vpop.f32.mrf.mxu1  ;;  %8895 = vmatmul.mubr.msk.bf16.gmra.mxu1 %vm5494_vm7, %v9419_v50  ;;  %3812 = vmatprep.mubr.bf16.mxu0 %v9422_v55  ;;  %v11831_v7 = vmax.f32 %v6744_v44, %v6745_v39  ;;  %v2515_v22 = vmax.bf16 %v2514_v18, %v2355_v23  ;;  %v14017_v50 = vld [vmem:[#allocation23_spill] sm:$0xff] }
 0x303   : > { %v6754_v60 = vmax.f32 %v6752_v57, %v6753_v25  ;;  %v2248_v0 = vpop.f32.mrf.mxu0  ;;  %6047 = vmatprep.mubr.bf16.mxu1 %v13920_v27  ;;  %v6762_v34 = vmax.f32 %v6760_v4, %v6761_v29  ;;  %v6770_v1 = vmax.f32 %v6768_v40, %v6769_v63  ;;  %v6573_v43 = vpack.c.bf16 %v5795_v24, %v5791_v11  ;;  %v9420_v25 = vld [vmem:[%s13884_s3 + $0x180] ss:$12 sps:$4 sm:$0xff]  }
 0x304   : > { %v2528_v20 = vmax.bf16 %v2527_v15, %v2356_v62  ;;  %v5801_v36 = vpop.f32.mrf.mxu1  ;;  %v7846_v2 = vunpack.c.l.b16 %v6737_v6  ;;  %v2247_v53 = vadd.f32 %v2246_v61, %v14016_v28  ;;  %v2249_v55 = vadd.f32 %v2248_v0, %v14017_v50  ;;  %v9423_v15 = vld [vmem:[%s13885_s4 + $0xe0] sm:$0xff]   ;;  %v9426_v6 = vld [vmem:[%s13884_s3 + $0x19c] ss:$12 sps:$4 sm:$0xff]  }
 0x305   : > { %v6755_v42 = vrot.slane %v6754_v60, 1  ;;  %v2250_v38 = vpop.f32.mrf.mxu0  ;;  %v6763_v23 = vrot.slane %v6762_v34, 2  ;;  %v6771_v18 = vrot.slane %v6770_v1, 4  ;;  %v6778_v44 = vunpack.i.l.bf16 %v6573_v43  ;;  %v14018_v57 = vld [vmem:[#allocation24_spill] sm:$0xff]  ;;  %v14019_v40 = vld [vmem:[#allocation25_spill] sm:$0xff] }
 0x306   : > { %v6779_v51 = vunpack.i.h.bf16 %v6573_v43  ;;  %v5803_v39 = vpop.f32.mrf.mxu1  ;;  %v6747_v11 = vpack.i.bf16 %v11831_v7, %v11831_v7  ;;  %v2251_v4 = vadd.f32 %v2250_v38, %v14018_v57 }
 0x307   : > { %v6756_v61 = vmax.f32 %v6754_v60, %v6755_v42  ;;  %v6574_v16 = vpack.c.bf16 %v5803_v39, %v5799_v33  ;;  %v2252_v47 = vpop.f32.mrf.mxu0  ;;  %v6764_v58 = vmax.f32 %v6762_v34, %v6763_v23  ;;  %v6772_v24 = vmax.f32 %v6770_v1, %v6771_v18 }
 0x308   : > { %v6780_v29 = vmax.f32 %v6778_v44, %v6779_v51  ;;  %v2253_v63 = vadd.f32 %v2252_v47, %v14019_v40  ;;  %v5805_v62 = vpop.f32.mrf.mxu1  ;;  %v2357_v43 = vpack.c.bf16 %v2251_v4, %v2247_v53  ;;  %v2509_v39 = vrot.slane %v11826_v59, 2  ;;  %v9427_v4 = vld [vmem:[%s13885_s4 + $0xe8] sm:$0xff]  }
 0x309   : > { %v6757_v0 = vpack.i.bf16 %v6756_v61, %v6756_v61  ;;  %v6788_v28 = vunpack.i.l.bf16 %v6574_v16  ;;  %v6789_v50 = vunpack.i.h.bf16 %v6574_v16  ;;  %v2256_v13 = vpop.f32.mrf.mxu0  ;;  %3813 = vmatmul.mubr.bf16.gmra.mxu0 %v9420_v25  ;;  %v6765_v12 = vrot.slane %v6764_v58, 1  ;;  %v9430_v16 = vld [vmem:[%s13884_s3 + $0x1b4] ss:$12 sps:$4 sm:$0xff]  }
 0x30a   : > { %v6773_v30 = vrot.slane %v6772_v24, 2  ;;  %v6781_v7 = vrot.slane %v6780_v29, 4  ;;  %v2358_v60 = vpack.c.bf16 %v2253_v63, %v2249_v55  ;;  %v11849_v42 = vpop.f32.mrf.mxu1  ;;  %8896 = vmatmul.mubr.msk.bf16.gmra.mxu1 %vm5494_vm7, %v9423_v15  ;;  %3822 = vmatprep.mubr.bf16.mxu0 %v9426_v6  ;;  %v2516_v34 = vmax.bf16 %v2515_v22, %v2357_v43 }
 0x30b   : > { %v7848_v33 = vunpack.c.l.b16 %v6757_v0  ;;  %v6790_v1 = vmax.f32 %v6788_v28, %v6789_v50  ;;  %v6575_v38 = vpack.c.bf16 %v5805_v62, %v5801_v36  ;;  %v2258_v23 = vpop.f32.mrf.mxu0  ;;  %6057 = vmatprep.mubr.bf16.mxu1 %v13920_v27  ;;  %v6766_v53 = vmax.f32 %v6764_v58, %v6765_v12  ;;  %v9424_v36 = vld [vmem:[%s13884_s3 + $0x198] ss:$12 sps:$4 sm:$0xff]  }
 0x30c   : > { %v6774_v18 = vmax.f32 %v6772_v24, %v6773_v30  ;;  %v6782_v44 = vmax.f32 %v6780_v29, %v6781_v7  ;;  %v11853_v25 = vmax.bf16 %v2528_v20, %v2358_v60  ;;  %v11855_v51 = vpop.f32.mrf.mxu1  ;;  %v2498_v55 = vrot.slane %v11829_v5, 1 }
 0x30d   : > { %v7878_v15 = vsel %vm2471_vm8, %v7848_v33, %v7846_v2  ;;  %v6791_v6 = vrot.slane %v6790_v1, 4  ;;  %v2260_v22 = vpop.f32.mrf.mxu0  ;;  %v7847_v61 = vunpack.c.l.b16 %v6747_v11  ;;  %v6767_v12 = vpack.i.bf16 %v6766_v53, %v6766_v53 }
 0x30e   : > { %v6775_v30 = vrot.slane %v6774_v18, 1  ;;  %v6783_v57 = vrot.slane %v6782_v44, 2  ;;  %v5813_v20 = vpop.f32.mrf.mxu1  ;;  %v2517_v2 = vunpack.i.l.bf16 %v2516_v34  ;;  %v2518_v47 = vunpack.i.h.bf16 %v2516_v34 }
 0x30f   : > { %v6792_v58 = vmax.f32 %v6790_v1, %v6791_v6  ;;  %v6798_v24 = vunpack.i.l.bf16 %v6575_v38  ;;  %v2262_v29 = vpop.f32.mrf.mxu0  ;;  %v7849_v40 = vunpack.c.l.b16 %v6767_v12  ;;  %v6799_v62 = vunpack.i.h.bf16 %v6575_v38  ;;  %v14023_v12 = vld [vmem:[#allocation27_spill] sm:$0xff] }
 0x310   : > { %v6776_v63 = vmax.f32 %v6774_v18, %v6775_v30  ;;  %v6784_v11 = vmax.f32 %v6782_v44, %v6783_v57  ;;  %v5815_v0 = vpop.f32.mrf.mxu1  ;;  %v2510_v43 = vmax.f32 %v11826_v59, %v2509_v39  ;;  %v11871_v50 = vadd.f32 %v2256_v13, %v11250_v32  ;;  %v14022_v44 = vld [vmem:[#allocation26_spill] sm:$0xff] }
 0x311   : > { %v6793_v28 = vrot.slane %v6792_v58, 2  ;;  %v11873_v7 = vpop.f32.mrf.mxu0  ;;  %3823 = vmatmul.mubr.bf16.gmra.mxu0 %v9424_v36  ;;  %v14020_v60 = vpack.c.b16 %v11743_v46, %v11743_v46  ;;  %v7885_v34 = vsel %vm2471_vm8, %v7849_v40, %v7847_v61  ;;  %v6800_v53 = vmax.f32 %v6798_v24, %v6799_v62 }
 0x312   : > { %v6777_v1 = vpack.i.bf16 %v6776_v63, %v6776_v63  ;;  %v6785_v38 = vrot.slane %v6784_v11, 1  ;;  %v11882_v18 = vpop.f32.mrf.mxu1  ;;  %8897 = vmatmul.mubr.msk.bf16.gmra.mxu1 %vm5494_vm7, %v9427_v4  ;;  %3832 = vmatprep.mubr.bf16.mxu0 %v9430_v16  ;;  %v2499_v32 = vmax.f32 %v11829_v5, %v2498_v55  ;;  %v2519_v13 = vmax.f32 %v2517_v2, %v2518_v47  ;;  %v9428_v2 = vld [vmem:[%s13884_s3 + $0x1b0] ss:$12 sps:$4 sm:$0xff]  }
 0x313   : > { %v11879_v33 = vsel %vm2482_vm11, %v14020_v60, 0  ;;  %v6794_v59 = vmax.f32 %v6792_v58, %v6793_v28  ;;  %v11887_v39 = vadd.f32 %v2258_v23, %v14022_v44  ;;  %v2268_v46 = vpop.f32.mrf.mxu0  ;;  %6067 = vmatprep.mubr.bf16.mxu1 %v13920_v27  ;;  %v6801_v61 = vrot.slane %v6800_v53, 4  ;;  %v9431_v63 = vld [vmem:[%s13885_s4 + $0xf0] sm:$0xff]   ;;  %v9434_v28 = vld [vmem:[%s13884_s3 + $0x1cc] ss:$12 sps:$4 sm:$0xff]  }
 0x314   : > { %14021 = vst [vmem:[#allocation10_spill] sm:$0xff] %v11879_v33  ;;  %v7850_v6 = vunpack.c.l.b16 %v6777_v1  ;;  %v6786_v36 = vmax.f32 %v6784_v11, %v6785_v38  ;;  %v11891_v30 = vadd.f32 %v2260_v22, %v14023_v12  ;;  %v11893_v57 = vpop.f32.mrf.mxu1  ;;  %v2530_v16 = vunpack.i.l.bf16 %v11853_v25  ;;  %v14024_v38 = vld [vmem:[#allocation28_spill] sm:$0xff] }
 0x315   : > { %v6795_v4 = vrot.slane %v6794_v59, 1  ;;  %v2531_v5 = vunpack.i.h.bf16 %v11853_v25  ;;  %v6576_v55 = vpack.c.bf16 %v5813_v20, %v11849_v42  ;;  %v2270_v23 = vpop.f32.mrf.mxu0  ;;  %v6802_v24 = vmax.f32 %v6800_v53, %v6801_v61 }
 0x316   : > { %v7879_v47 = vsel %vm2473_vm9, %v7850_v6, %v7878_v15  ;;  %v6787_v58 = vpack.i.bf16 %v6786_v36, %v6786_v36  ;;  %v5823_v40 = vpop.f32.mrf.mxu1  ;;  %v2511_v25 = vrot.slane %v2510_v43, 1  ;;  %v2520_v11 = vrot.slane %v2519_v13, 4 }
 0x317   : > { %v6796_v42 = vmax.f32 %v6794_v59, %v6795_v4  ;;  %v6808_v20 = vunpack.i.l.bf16 %v6576_v55  ;;  %v2272_v62 = vpop.f32.mrf.mxu0  ;;  %v6803_v60 = vrot.slane %v6802_v24, 2  ;;  %v6809_v1 = vunpack.i.h.bf16 %v6576_v55 }
 0x318   : > { %v7851_v15 = vunpack.c.l.b16 %v6787_v58  ;;  %v11911_v53 = vadd.f32 %v2262_v29, %v14024_v38  ;;  %v11913_v44 = vpop.f32.mrf.mxu1  ;;  %v2500_v6 = vpack.i.bf16 %v2499_v32, %v2499_v32  ;;  %v2532_v61 = vmax.f32 %v2530_v16, %v2531_v5  ;;  %v14027_v38 = vld [vmem:[#allocation31_spill] sm:$0xff] }
 0x319   : > { %v6797_v36 = vpack.i.bf16 %v6796_v42, %v6796_v42  ;;  %v6577_v12 = vpack.c.bf16 %v5815_v0, %v11855_v51  ;;  %v2276_v59 = vpop.f32.mrf.mxu0  ;;  %3833 = vmatmul.mubr.bf16.gmra.mxu0 %v9428_v2  ;;  %v6804_v22 = vmax.f32 %v6802_v24, %v6803_v60  ;;  %v6810_v21 = vmax.f32 %v6808_v20, %v6809_v1  ;;  %v14025_v2 = vld [vmem:[#allocation29_spill] sm:$0xff] }
 0x31a   : > { %v7886_v4 = vsel %vm2473_vm9, %v7851_v15, %v7885_v34  ;;  %v2360_v58 = vpack.c.bf16 %v11911_v53, %v11887_v39  ;;  %v11919_v55 = vpop.f32.mrf.mxu1  ;;  %8898 = vmatmul.mubr.msk.bf16.gmra.mxu1 %vm5494_vm7, %v9431_v63  ;;  %v11922_v29 = vmax.f32 %v2510_v43, %v2511_v25  ;;  %v2521_v32 = vmax.f32 %v2519_v13, %v2520_v11  ;;  %v14026_v63 = vld [vmem:[#allocation30_spill] sm:$0xff] }
 0x31b   : > { %v7852_v42 = vunpack.c.l.b16 %v6797_v36  ;;  %v6818_v16 = vunpack.i.l.bf16 %v6577_v12  ;;  %v2278_v5 = vpop.f32.mrf.mxu0  ;;  %3842 = vmatprep.mubr.bf16.mxu0 %v9434_v28  ;;  %6077 = vmatprep.mubr.bf16.mxu1 %v13920_v27  ;;  %v6805_v51 = vrot.slane %v6804_v22, 1  ;;  %v6811_v0 = vrot.slane %v6810_v21, 4  ;;  %v9432_v28 = vld [vmem:[%s13884_s3 + $0x1c8] ss:$12 sps:$4 sm:$0xff]  }
 0x31c   : > { %v6819_v34 = vunpack.i.h.bf16 %v6577_v12  ;;  %v2267_v24 = vadd.f32 %v11873_v7, %v14025_v2  ;;  %v11927_v39 = vpop.f32.mrf.mxu1  ;;  %v11929_v20 = vunpack.c.l.b16 %v2500_v6  ;;  %v2533_v13 = vrot.slane %v2532_v61, 4  ;;  %v9435_v6 = vld [vmem:[%s13885_s4 + $0xf8] sm:$0xff]  }
 0x31d   : > { %v11932_v43 = vsel %vm2475_vm10, %v7852_v42, %v7879_v47  ;;  %v2269_v25 = vadd.f32 %v2268_v46, %v14026_v63  ;;  %v2280_v11 = vpop.f32.mrf.mxu0  ;;  %v6806_v15 = vmax.f32 %v6804_v22, %v6805_v51  ;;  %v6812_v60 = vmax.f32 %v6810_v21, %v6811_v0  ;;  %v9438_v47 = vld [vmem:[%s13884_s3 + $0x1e4] ss:$12 sps:$4 sm:$0xff]  }
 0x31e   : > { %v6820_v1 = vmax.f32 %v6818_v16, %v6819_v34  ;;  %v2271_v7 = vadd.f32 %v2270_v23, %v14027_v38  ;;  %v5833_v53 = vpop.f32.mrf.mxu1  ;;  %v2522_v36 = vrot.slane %v2521_v32, 2  ;;  %v6578_v12 = vpack.c.bf16 %v5823_v40, %v11882_v18 }
 0x31f   : > { %v2273_v21 = vadd.f32 %v2272_v62, %v11331_v17  ;;  %v2282_v22 = vpop.f32.mrf.mxu0  ;;  %v6807_v42 = vpack.i.bf16 %v6806_v15, %v6806_v15  ;;  %v6813_v23 = vrot.slane %v6812_v60, 2  ;;  %v11949_v34 = vmax.f32 %v2532_v61, %v2533_v13 }
 0x320   : > { %v6821_v16 = vrot.slane %v6820_v1, 4  ;;  %v2361_v51 = vpack.c.bf16 %v2271_v7, %v2267_v24  ;;  %v5835_v0 = vpop.f32.mrf.mxu1  ;;  %v6828_v2 = vunpack.i.l.bf16 %v6578_v12  ;;  %v6829_v63 = vunpack.i.h.bf16 %v6578_v12 }
 0x321   : > { %v2362_v38 = vpack.c.bf16 %v2273_v21, %v2269_v25  ;;  %v11951_v52 = vpop.f32.mrf.mxu0  ;;  %3843 = vmatmul.mubr.bf16.gmra.mxu0 %v9432_v28  ;;  %v7853_v46 = vunpack.c.l.b16 %v6807_v42  ;;  %v6814_v33 = vmax.f32 %v6812_v60, %v6813_v23  ;;  %v14028_v17 = vpack.c.bf16 %v11891_v30, %v11871_v50 }
 0x322   : > { %v6822_v18 = vmax.f32 %v6820_v1, %v6821_v16  ;;  %v11956_v62 = vpop.f32.mrf.mxu1  ;;  %8899 = vmatmul.mubr.msk.bf16.gmra.mxu1 %vm5494_vm7, %v9435_v6  ;;  %3852 = vmatprep.mubr.bf16.mxu0 %v9438_v47  ;;  %v6830_v61 = vmax.f32 %v6828_v2, %v6829_v63  ;;  %v6579_v13 = vpack.c.bf16 %v11913_v44, %v11893_v57  ;;  %v2535_v16 = vrot.slane %v11949_v34, 2 }
 0x323   : > { %v2540_v40 = vmax.bf16 %v2361_v51, %v14028_v17  ;;  %v2553_v24 = vmax.bf16 %v2362_v38, %v2360_v58  ;;  %v2277_v25 = vadd.f32 %v2276_v59, %v11334_v31  ;;  %v2288_v28 = vpop.f32.mrf.mxu0  ;;  %6087 = vmatprep.mubr.bf16.mxu1 %v13920_v27  ;;  %v11964_v15 = vsel %vm2475_vm10, %v7853_v46, %v7886_v4  ;;  %v9436_v31 = vld [vmem:[%s13884_s3 + $0x1e0] ss:$12 sps:$4 sm:$0xff]  }
 0x324   : > { %v6815_v50 = vrot.slane %v6814_v33, 1  ;;  %v6823_v30 = vrot.slane %v6822_v18, 2  ;;  %v2279_v60 = vadd.f32 %v2278_v5, %v11341_v10  ;;  %v11967_v1 = vpop.f32.mrf.mxu1  ;;  %v11969_v7 = vmax.f32 %v2521_v32, %v2522_v36  ;;  %v14029_v46 = vld [vmem:[#allocation32_spill] sm:$0xff] }
 0x325   : > { %v6831_v58 = vrot.slane %v6830_v61, 4  ;;  %v6838_v6 = vunpack.i.l.bf16 %v6579_v13  ;;  %v2281_v57 = vadd.f32 %v2280_v11, %v11351_v26  ;;  %v2290_v44 = vpop.f32.mrf.mxu0  ;;  %v6580_v47 = vpack.c.bf16 %v5833_v53, %v11919_v55  ;;  %v9439_v32 = vld [vmem:[%s13885_s4 + $0x100] sm:$0xff]   ;;  %v9442_v26 = vld [vmem:[%s13884_s3 + $0x1fc] ss:$12 sps:$4 sm:$0xff]  }
 0x326   : > { %v6816_v59 = vmax.f32 %v6814_v33, %v6815_v50  ;;  %v6824_v4 = vmax.f32 %v6822_v18, %v6823_v30  ;;  %v2283_v12 = vadd.f32 %v2282_v22, %v14029_v46  ;;  %v5843_v10 = vpop.f32.mrf.mxu1  ;;  %v6839_v11 = vunpack.i.h.bf16 %v6579_v13 }
 0x327   : > { %v6832_v5 = vmax.f32 %v6830_v61, %v6831_v58  ;;  %v2363_v36 = vpack.c.bf16 %v2281_v57, %v2277_v25  ;;  %v6581_v21 = vpack.c.bf16 %v5835_v0, %v11927_v39  ;;  %v2292_v33 = vpop.f32.mrf.mxu0  ;;  %v6848_v55 = vunpack.i.l.bf16 %v6580_v47 }
 0x328   : > { %v6817_v42 = vpack.i.bf16 %v6816_v59, %v6816_v59  ;;  %v6825_v23 = vrot.slane %v6824_v4, 1  ;;  %v6849_v53 = vunpack.i.h.bf16 %v6580_v47  ;;  %v5845_v22 = vpop.f32.mrf.mxu1  ;;  %v2364_v63 = vpack.c.bf16 %v2283_v12, %v2279_v60 }
 0x329   : > { %v6833_v51 = vrot.slane %v6832_v5, 2  ;;  %v2541_v2 = vmax.bf16 %v2540_v40, %v2363_v36  ;;  %v11985_v38 = vpop.f32.mrf.mxu0  ;;  %3853 = vmatmul.mubr.bf16.gmra.mxu0 %v9436_v31  ;;  %v6858_v13 = vunpack.i.l.bf16 %v6581_v21  ;;  %v6840_v25 = vmax.f32 %v6838_v6, %v6839_v11  ;;  %v9443_v36 = vld [vmem:[%s13885_s4 + $0x108] sm:$0xff]  }
 0x32a   : > { %v7854_v18 = vunpack.c.l.b16 %v6817_v42  ;;  %v6826_v17 = vmax.f32 %v6824_v4, %v6825_v23  ;;  %v6850_v61 = vmax.f32 %v6848_v55, %v6849_v53  ;;  %v11987_v39 = vpop.f32.mrf.mxu1  ;;  %8900 = vmatmul.mubr.msk.bf16.gmra.mxu1 %vm5494_vm7, %v9439_v32  ;;  %3862 = vmatprep.mubr.bf16.mxu0 %v9442_v26  ;;  %v2554_v50 = vmax.bf16 %v2553_v24, %v2364_v63  ;;  %v14030_v24 = vld [vmem:[#allocation33_spill] sm:$0xff]  ;;  %v9440_v32 = vld [vmem:[%s13884_s3 + $0x1f8] ss:$12 sps:$4 sm:$0xff]  }
 0x32b   : > { %v6834_v0 = vmax.f32 %v6832_v5, %v6833_v51  ;;  %v6859_v30 = vunpack.i.h.bf16 %v6581_v21  ;;  %v11990_v58 = vpop.f32.mrf.mxu0  ;;  %6097 = vmatprep.mubr.bf16.mxu1 %v13920_v27  ;;  %v2287_v31 = vadd.f32 %v11951_v52, %v11374_v48  ;;  %v2524_v4 = vrot.slane %v11969_v7, 1  ;;  %v14031_v5 = vld [vmem:[#allocation34_spill] sm:$0xff] }
 0x32c   : > { %v7881_v40 = vsel %vm7749_vm12, %v7854_v18, %v11932_v43  ;;  %v6827_v60 = vpack.i.bf16 %v6826_v17, %v6826_v17  ;;  %v6851_v57 = vrot.slane %v6850_v61, 4  ;;  %v11997_v59 = vpop.f32.mrf.mxu1  ;;  %v2289_v46 = vadd.f32 %v2288_v28, %v14030_v24 }
 0x32d   : > { %v6835_v47 = vrot.slane %v6834_v0, 1  ;;  %v6860_v6 = vmax.f32 %v6858_v13, %v6859_v30  ;;  %v12001_v12 = vpop.f32.mrf.mxu0  ;;  %v2291_v11 = vadd.f32 %v2290_v44, %v14031_v5  ;;  %v6582_v48 = vpack.c.bf16 %v5843_v10, %v11956_v62  ;;  %v9446_v44 = vld [vmem:[%s13884_s3 + $0x214] ss:$12 sps:$4 sm:$0xff]   ;;  %v9444_v5 = vld [vmem:[%s13884_s3 + $0x210] ss:$12 sps:$4 sm:$0xff]  }
 0x32e   : > { %v7855_v43 = vunpack.c.l.b16 %v6827_v60  ;;  %v6852_v26 = vmax.f32 %v6850_v61, %v6851_v57  ;;  %v12008_v52 = vpop.f32.mrf.mxu1  ;;  %v2536_v28 = vmax.f32 %v11949_v34, %v2535_v16  ;;  %v6841_v42 = vrot.slane %v6840_v25, 4 }
 0x32f   : > { %v6836_v21 = vmax.f32 %v6834_v0, %v6835_v47  ;;  %v2293_v23 = vadd.f32 %v2292_v33, %v11399_v41  ;;  %v12015_v55 = vpop.f32.mrf.mxu0  ;;  %v2365_v53 = vpack.c.bf16 %v2291_v11, %v2287_v31  ;;  %v6868_v51 = vunpack.i.l.bf16 %v6582_v48 }
 0x330   : > { %v12022_v62 = vsel %vm7749_vm12, %v7855_v43, %v11964_v15  ;;  %v6853_v10 = vrot.slane %v6852_v26, 2  ;;  %v12024_v63 = vpop.f32.mrf.mxu1  ;;  %v12027_v34 = vmax.f32 %v11969_v7, %v2524_v4  ;;  %v6861_v41 = vrot.slane %v6860_v6, 4 }
 0x331   : > { %v6837_v16 = vpack.i.bf16 %v6836_v21, %v6836_v21  ;;  %v6869_v33 = vunpack.i.h.bf16 %v6582_v48  ;;  %v12029_v18 = vpop.f32.mrf.mxu0  ;;  %3863 = vmatmul.mubr.bf16.gmra.mxu0 %v9440_v32  ;;  %v2542_v61 = vmax.bf16 %v2541_v2, %v2365_v53  ;;  %v2366_v13 = vpack.c.bf16 %v2293_v23, %v2289_v46 }
 0x332   : > { %v6854_v17 = vmax.f32 %v6852_v26, %v6853_v10  ;;  %v6583_v15 = vpack.c.bf16 %v5845_v22, %v11967_v1  ;;  %v12032_v0 = vpop.f32.mrf.mxu1  ;;  %8901 = vmatmul.mubr.msk.bf16.gmra.mxu1 %vm5494_vm7, %v9443_v36  ;;  %v2537_v30 = vrot.slane %v2536_v28, 1  ;;  %v6842_v7 = vmax.f32 %v6840_v25, %v6841_v42  ;;  %3872 = vmatprep.mubr.bf16.mxu0 %v9446_v44 }
 0x333   : > { %v7856_v60 = vunpack.c.l.b16 %v6837_v16  ;;  %v6870_v57 = vmax.f32 %v6868_v51, %v6869_v33  ;;  %v12035_v31 = vpop.f32.mrf.mxu0  ;;  %6107 = vmatprep.mubr.bf16.mxu1 %v13920_v27  ;;  %v2543_v47 = vunpack.i.l.bf16 %v2542_v61  ;;  %v2544_v24 = vunpack.i.h.bf16 %v2542_v61 }
 0x334   : > { %v6855_v4 = vrot.slane %v6854_v17, 1  ;;  %v2555_v2 = vmax.bf16 %v2554_v50, %v2366_v13  ;;  %v12038_v46 = vpop.f32.mrf.mxu1  ;;  %v14032_v1 = vpack.i.bf16 %v11922_v29, %v11922_v29  ;;  %v6862_v25 = vmax.f32 %v6860_v6, %v6861_v41  ;;  %v9447_v29 = vld [vmem:[%s13885_s4 + $0x110] sm:$0xff]   ;;  %v14033_v13 = vld [vmem:[#allocation35_spill] sm:$0xff] }
 0x335   : > { %v7882_v32 = vsel %vm7751_vm13, %v7856_v60, %v7881_v40  ;;  %v6871_v43 = vrot.slane %v6870_v57, 4  ;;  %v12046_v26 = vpop.f32.mrf.mxu0  ;;  %v2545_v48 = vmax.f32 %v2543_v47, %v2544_v24  ;;  %v9450_v40 = vld [vmem:[%s13884_s3 + $0x22c] ss:$12 sps:$4 sm:$0xff]   ;;  %v2526_v6 = vpack.i.bf16 %v12027_v34, %v12027_v34 }
 0x336   : > { %v12043_v22 = vunpack.c.l.b16 %v14032_v1  ;;  %v6856_v11 = vmax.f32 %v6854_v17, %v6855_v4  ;;  %v2556_v50 = vunpack.i.l.bf16 %v2555_v2  ;;  %v2557_v36 = vunpack.i.h.bf16 %v2555_v2  ;;  %v12051_v21 = vpop.f32.mrf.mxu1  ;;  %v14034_v4 = vld [vmem:[#allocation36_spill] sm:$0xff]  ;;  %v14035_v1 = vld [vmem:[#allocation37_spill] sm:$0xff] }
 0x337   : > { %v12061_v42 = vmax.f32 %v2536_v28, %v2537_v30  ;;  %v6843_v23 = vrot.slane %v6842_v7, 2  ;;  %v6878_v44 = vunpack.i.l.bf16 %v6583_v15  ;;  %v12063_v10 = vpop.f32.mrf.mxu0  ;;  %v2546_v51 = vrot.slane %v2545_v48, 4 }
 0x338   : > { %v6857_v53 = vpack.i.bf16 %v6856_v11, %v6856_v11  ;;  %v2558_v16 = vmax.f32 %v2556_v50, %v2557_v36  ;;  %v6879_v41 = vunpack.i.h.bf16 %v6583_v15  ;;  %v12065_v33 = vpop.f32.mrf.mxu1  ;;  %v6863_v17 = vrot.slane %v6862_v25, 2 }
 0x339   : > { %v6872_v61 = vmax.f32 %v6870_v57, %v6871_v43  ;;  %v12069_v60 = vadd.f32 %v11985_v38, %v14033_v13  ;;  %v12073_v28 = vadd.f32 %v11990_v58, %v14034_v4  ;;  %v12075_v34 = vpop.f32.mrf.mxu0  ;;  %3873 = vmatmul.mubr.bf16.gmra.mxu0 %v9444_v5  ;;  %v2547_v47 = vmax.f32 %v2545_v48, %v2546_v51 }
 0x33a   : > { %v7858_v30 = vunpack.c.l.b16 %v6857_v53  ;;  %v2559_v24 = vrot.slane %v2558_v16, 4  ;;  %v6880_v2 = vmax.f32 %v6878_v44, %v6879_v41  ;;  %v12077_v15 = vpop.f32.mrf.mxu1  ;;  %8902 = vmatmul.mubr.msk.bf16.gmra.mxu1 %vm5494_vm7, %v9447_v29  ;;  %3882 = vmatprep.mubr.bf16.mxu0 %v9450_v40  ;;  %v2539_v38 = vpack.i.bf16 %v12061_v42, %v12061_v42 }
 0x33b   : > { %v6844_v57 = vmax.f32 %v6842_v7, %v6843_v23  ;;  %v12084_v58 = vadd.f32 %v12001_v12, %v14035_v1  ;;  %v6584_v43 = vpack.c.bf16 %v12008_v52, %v11987_v39  ;;  %v12088_v5 = vpop.f32.mrf.mxu0  ;;  %6117 = vmatprep.mubr.bf16.mxu1 %v13920_v27  ;;  %v2548_v48 = vrot.slane %v2547_v47, 2  ;;  %v9448_v39 = vld [vmem:[%s13884_s3 + $0x228] ss:$12 sps:$4 sm:$0xff]  }
 0x33c   : > { %v12092_v11 = vsel %vm7753_vm14, %v7858_v30, %v7882_v32  ;;  %v2560_v50 = vmax.f32 %v2558_v16, %v2559_v24  ;;  %v6881_v36 = vrot.slane %v6880_v2, 4  ;;  %v12094_v29 = vpop.f32.mrf.mxu1  ;;  %v6864_v7 = vmax.f32 %v6862_v25, %v6863_v17  ;;  %v9451_v25 = vld [vmem:[%s13885_s4 + $0x118] sm:$0xff]   ;;  %v9454_v16 = vld [vmem:[%s13884_s3 + $0x244] ss:$12 sps:$4 sm:$0xff]  }
 0x33d   : > { %v6873_v40 = vrot.slane %v6872_v61, 2  ;;  %v2367_v12 = vpack.c.bf16 %v12084_v58, %v12069_v60  ;;  %v6888_v42 = vunpack.i.l.bf16 %v6584_v43  ;;  %v12098_v23 = vpop.f32.mrf.mxu0  ;;  %v2549_v52 = vmax.f32 %v2547_v47, %v2548_v48 }
 0x33e   : > { %v2561_v32 = vrot.slane %v2560_v50, 2  ;;  %v6882_v44 = vmax.f32 %v6880_v2, %v6881_v36  ;;  %v6889_v53 = vunpack.i.h.bf16 %v6584_v43  ;;  %v12103_v51 = vpop.f32.mrf.mxu1  ;;  %v6845_v41 = vrot.slane %v6844_v57, 1 }
 0x33f   : > { %v12113_v17 = vadd.f32 %v12015_v55, %v11427_v8  ;;  %v6585_v13 = vpack.c.bf16 %v12024_v63, %v11997_v59  ;;  %v2307_v60 = vadd.f32 %v12029_v18, %v11430_v14  ;;  %v12119_v4 = vpop.f32.mrf.mxu0  ;;  %v2550_v30 = vrot.slane %v2549_v52, 1 }
 0x340   : > { %v2562_v47 = vmax.f32 %v2560_v50, %v2561_v32  ;;  %v6883_v24 = vrot.slane %v6882_v44, 2  ;;  %v6890_v2 = vmax.f32 %v6888_v42, %v6889_v53  ;;  %v12121_v1 = vpop.f32.mrf.mxu1  ;;  %v12123_v58 = vunpack.c.l.b16 %v2526_v6  ;;  %v14036_v42 = vld [vmem:[#allocation39_spill] sm:$0xff]  ;;  %v14037_v32 = vld [vmem:[#allocation41_spill] sm:$0xff] }
 0x341   : > { %v2368_v8 = vpack.c.bf16 %v12113_v17, %v12073_v28  ;;  %v6898_v55 = vunpack.i.l.bf16 %v6585_v13  ;;  %v6899_v43 = vunpack.i.h.bf16 %v6585_v13  ;;  %v12127_v48 = vpop.f32.mrf.mxu0  ;;  %3883 = vmatmul.mubr.bf16.gmra.mxu0 %v9448_v39  ;;  %v6865_v59 = vrot.slane %v6864_v7, 1 }
 0x342   : > { %v12129_v14 = vmax.f32 %v6872_v61, %v6873_v40  ;;  %v2563_v63 = vrot.slane %v2562_v47, 1  ;;  %v6891_v18 = vrot.slane %v6890_v2, 4  ;;  %v12131_v50 = vpop.f32.mrf.mxu1  ;;  %8903 = vmatmul.mubr.msk.bf16.gmra.mxu1 %vm5494_vm7, %v9451_v25  ;;  %3892 = vmatprep.mubr.bf16.mxu0 %v9454_v16  ;;  %v12134_v6 = vunpack.c.l.b16 %v2539_v38 }
 0x343   : > { %v6900_v36 = vmax.f32 %v6898_v55, %v6899_v43  ;;  %v2309_v28 = vadd.f32 %v12035_v31, %v14036_v42  ;;  %v2311_v53 = vadd.f32 %v12046_v26, %v14037_v32  ;;  %v12140_v39 = vpop.f32.mrf.mxu0  ;;  %6127 = vmatprep.mubr.bf16.mxu1 %v13920_v27  ;;  %v12143_v61 = vmax.f32 %v6844_v57, %v6845_v41  ;;  %v14038_v55 = vld [vmem:[#allocation43_spill] sm:$0xff]  ;;  %v9452_v57 = vld [vmem:[%s13884_s3 + $0x240] ss:$12 sps:$4 sm:$0xff]  }
 0x344   : > { %v12145_v40 = vmax.f32 %v2549_v52, %v2550_v30  ;;  %v12147_v17 = vmax.f32 %v6882_v44, %v6883_v24  ;;  %v6892_v25 = vmax.f32 %v6890_v2, %v6891_v18  ;;  %v12149_v38 = vpop.f32.mrf.mxu1  ;;  %v6586_v31 = vpack.c.bf16 %v12051_v21, %v12032_v0  ;;  %v9455_v0 = vld [vmem:[%s13885_s4 + $0x120] sm:$0xff]   ;;  %v9458_v21 = vld [vmem:[%s13884_s3 + $0x25c] ss:$12 sps:$4 sm:$0xff]  }
 0x345   : > { %v6901_v16 = vrot.slane %v6900_v36, 4  ;;  %v2369_v13 = vpack.c.bf16 %v2311_v53, %v2307_v60  ;;  %v2313_v26 = vadd.f32 %v12063_v10, %v14038_v55  ;;  %v12155_v43 = vpop.f32.mrf.mxu0  ;;  %v12160_v52 = vmax.f32 %v6864_v7, %v6865_v59 }
 0x346   : > { %v12163_v41 = vmax.f32 %v2562_v47, %v2563_v63  ;;  %v6893_v30 = vrot.slane %v6892_v25, 2  ;;  %v12165_v60 = vpop.f32.mrf.mxu1  ;;  %v6908_v2 = vunpack.i.l.bf16 %v6586_v31  ;;  %v6909_v7 = vunpack.i.h.bf16 %v6586_v31 }
 0x347   : > { %v6902_v10 = vmax.f32 %v6900_v36, %v6901_v16  ;;  %v2566_v24 = vmax.bf16 %v2369_v13, %v2367_v12  ;;  %v12173_v59 = vpop.f32.mrf.mxu0  ;;  %v2370_v42 = vpack.c.bf16 %v2313_v26, %v2309_v28  ;;  %v6587_v44 = vpack.c.bf16 %v12065_v33, %v12038_v46 }
 0x348   : > { %v6894_v18 = vmax.f32 %v6892_v25, %v6893_v30  ;;  %v12178_v32 = vpop.f32.mrf.mxu1  ;;  %v6910_v55 = vmax.f32 %v6908_v2, %v6909_v7  ;;  %v2317_v12 = vadd.f32 %v12075_v34, %v11463_v49  ;;  %v2319_v28 = vadd.f32 %v12088_v5, %v11470_v54 }
 0x349   : > { %v6903_v53 = vrot.slane %v6902_v10, 2  ;;  %v12184_v36 = vpop.f32.mrf.mxu0  ;;  %3893 = vmatmul.mubr.bf16.gmra.mxu0 %v9452_v57  ;;  %v2579_v31 = vmax.bf16 %v2370_v42, %v2368_v8  ;;  %v6918_v26 = vunpack.i.l.bf16 %v6587_v44  ;;  %v6919_v49 = vunpack.i.h.bf16 %v6587_v44 }
 0x34a   : > { %v6895_v13 = vrot.slane %v6894_v18, 1  ;;  %v12190_v25 = vpop.f32.mrf.mxu1  ;;  %8904 = vmatmul.mubr.msk.bf16.gmra.mxu1 %vm5494_vm7, %v9455_v0  ;;  %3902 = vmatprep.mubr.bf16.mxu0 %v9458_v21  ;;  %v6911_v33 = vrot.slane %v6910_v55, 4  ;;  %v2321_v8 = vadd.f32 %v12098_v23, %v11480_v35  ;;  %v6588_v54 = vpack.c.bf16 %v12103_v51, %v12077_v15  ;;  %v9456_v35 = vld [vmem:[%s13884_s3 + $0x258] ss:$12 sps:$4 sm:$0xff]  }
 0x34b   : > { %v6904_v46 = vmax.f32 %v6902_v10, %v6903_v53  ;;  %v12193_v34 = vpop.f32.mrf.mxu0  ;;  %6137 = vmatprep.mubr.bf16.mxu1 %v13920_v27  ;;  %v2323_v5 = vadd.f32 %v12119_v4, %v11491_v45  ;;  %v6920_v10 = vmax.f32 %v6918_v26, %v6919_v49  ;;  %v6589_v44 = vpack.c.bf16 %v12121_v1, %v12094_v29  ;;  %v9459_v45 = vld [vmem:[%s13885_s4 + $0x128] sm:$0xff]   ;;  %v9462_v29 = vld [vmem:[%s13884_s3 + $0x274] ss:$12 sps:$4 sm:$0xff]  }
 0x34c   : > { %v6896_v57 = vmax.f32 %v6894_v18, %v6895_v13  ;;  %v12202_v30 = vpop.f32.mrf.mxu1  ;;  %v6912_v21 = vmax.f32 %v6910_v55, %v6911_v33  ;;  %v2371_v7 = vpack.c.bf16 %v2321_v8, %v2317_v12  ;;  %v6928_v15 = vunpack.i.l.bf16 %v6588_v54 }
 0x34d   : > { %v6905_v0 = vrot.slane %v6904_v46, 1  ;;  %v12206_v2 = vpop.f32.mrf.mxu0  ;;  %v6929_v51 = vunpack.i.h.bf16 %v6588_v54  ;;  %v6921_v42 = vrot.slane %v6920_v10, 4  ;;  %v2372_v53 = vpack.c.bf16 %v2323_v5, %v2319_v28 }
 0x34e   : > { %v6897_v23 = vpack.i.bf16 %v6896_v57, %v6896_v57  ;;  %v12211_v18 = vpop.f32.mrf.mxu1  ;;  %v6913_v1 = vrot.slane %v6912_v21, 2  ;;  %v2567_v12 = vmax.bf16 %v2566_v24, %v2371_v7  ;;  %v6938_v26 = vunpack.i.l.bf16 %v6589_v44 }
 0x34f   : > { %v6906_v4 = vmax.f32 %v6904_v46, %v6905_v0  ;;  %v12219_v55 = vpop.f32.mrf.mxu0  ;;  %v6930_v33 = vmax.f32 %v6928_v15, %v6929_v51  ;;  %v6922_v54 = vmax.f32 %v6920_v10, %v6921_v42  ;;  %v2580_v63 = vmax.bf16 %v2579_v31, %v2372_v53 }
 0x350   : > { %v12221_v13 = vunpack.c.l.b16 %v6897_v23  ;;  %v12223_v49 = vpop.f32.mrf.mxu1  ;;  %v6914_v8 = vmax.f32 %v6912_v21, %v6913_v1  ;;  %v6939_v0 = vunpack.i.h.bf16 %v6589_v44  ;;  %v2327_v28 = vadd.f32 %v12127_v48, %v11496_v9 }
 0x351   : > { %v6907_v57 = vpack.i.bf16 %v6906_v4, %v6906_v4  ;;  %v12225_v16 = vpop.f32.mrf.mxu0  ;;  %3903 = vmatmul.mubr.bf16.gmra.mxu0 %v9456_v35  ;;  %v6931_v46 = vrot.slane %v6930_v33, 4  ;;  %v2329_v5 = vadd.f32 %v12140_v39, %v11503_v37  ;;  %v6923_v31 = vrot.slane %v6922_v54, 2 }
 0x352   : > { %v12231_v24 = vpop.f32.mrf.mxu1  ;;  %8905 = vmatmul.mubr.msk.bf16.gmra.mxu1 %vm5494_vm7, %v9459_v45  ;;  %3912 = vmatprep.mubr.bf16.mxu0 %v9462_v29  ;;  %v6915_v21 = vrot.slane %v6914_v8, 1  ;;  %v2331_v10 = vadd.f32 %v12155_v43, %v11511_v56  ;;  %v6940_v48 = vmax.f32 %v6938_v26, %v6939_v0  ;;  %v6590_v37 = vpack.c.bf16 %v12165_v60, %v12131_v50  ;;  %v9460_v45 = vld [vmem:[%s13884_s3 + $0x270] ss:$12 sps:$4 sm:$0xff]  }
 0x353   : > { %v12234_v23 = vunpack.c.l.b16 %v6907_v57  ;;  %v12238_v35 = vpop.f32.mrf.mxu0  ;;  %6147 = vmatprep.mubr.bf16.mxu1 %v13920_v27  ;;  %v6932_v9 = vmax.f32 %v6930_v33, %v6931_v46  ;;  %v2333_v39 = vadd.f32 %v12173_v59, %v11522_v19  ;;  %v6924_v15 = vmax.f32 %v6922_v54, %v6923_v31  ;;  %v9463_v19 = vld [vmem:[%s13885_s4 + $0x130] sm:$0xff]  }
 0x354   : > { %v12245_v44 = vpop.f32.mrf.mxu1  ;;  %v6916_v7 = vmax.f32 %v6914_v8, %v6915_v21  ;;  %v2373_v51 = vpack.c.bf16 %v2331_v10, %v2327_v28  ;;  %v6591_v56 = vpack.c.bf16 %v12178_v32, %v12149_v38  ;;  %v6941_v4 = vrot.slane %v6940_v48, 4 }
 0x355   : > { %v12249_v43 = vpop.f32.mrf.mxu0  ;;  %v6933_v29 = vrot.slane %v6932_v9, 2  ;;  %v6948_v50 = vunpack.i.l.bf16 %v6590_v37  ;;  %v6949_v60 = vunpack.i.h.bf16 %v6590_v37  ;;  %v6925_v42 = vrot.slane %v6924_v15, 1 }
 0x356   : > { %v12254_v1 = vpop.f32.mrf.mxu1  ;;  %v6917_v59 = vpack.i.bf16 %v6916_v7, %v6916_v7  ;;  %v2568_v53 = vmax.bf16 %v2567_v12, %v2373_v51  ;;  %v2374_v38 = vpack.c.bf16 %v2333_v39, %v2329_v5  ;;  %v6942_v26 = vmax.f32 %v6940_v48, %v6941_v4 }
 0x357   : > { %v12259_v32 = vpop.f32.mrf.mxu0  ;;  %v6934_v33 = vmax.f32 %v6932_v9, %v6933_v29  ;;  %v6950_v57 = vmax.f32 %v6948_v50, %v6949_v60  ;;  %v6958_v8 = vunpack.i.l.bf16 %v6591_v56  ;;  %v6926_v0 = vmax.f32 %v6924_v15, %v6925_v42 }
 0x358   : > { %v12261_v54 = vpop.f32.mrf.mxu1  ;;  %v7864_v46 = vunpack.c.l.b16 %v6917_v59  ;;  %v2569_v28 = vunpack.i.l.bf16 %v2568_v53  ;;  %v2570_v21 = vunpack.i.h.bf16 %v2568_v53  ;;  %v6943_v37 = vrot.slane %v6942_v26, 2 }
 0x359   : > { %v12263_v31 = vpop.f32.mrf.mxu0  ;;  %3913 = vmatmul.mubr.bf16.gmra.mxu0 %v9460_v45  ;;  %v6935_v10 = vrot.slane %v6934_v33, 1  ;;  %v6951_v7 = vrot.slane %v6950_v57, 4  ;;  %v2581_v12 = vmax.bf16 %v2580_v63, %v2374_v38  ;;  %v6927_v48 = vpack.i.bf16 %v6926_v0, %v6926_v0 }
 0x35a   : > { %v12265_v5 = vpop.f32.mrf.mxu1  ;;  %8906 = vmatmul.mubr.msk.bf16.gmra.mxu1 %vm5494_vm7, %v9463_v19  ;;  %4085 = vmatprep.mubr.bf16.mxu0 %v13920_v27  ;;  %v7892_v9 = vsel %vm2471_vm8, %v7864_v46, %v12221_v13  ;;  %v2571_v39 = vmax.f32 %v2569_v28, %v2570_v21  ;;  %v6959_v15 = vunpack.i.h.bf16 %v6591_v56  ;;  %v6944_v29 = vmax.f32 %v6942_v26, %v6943_v37  ;;  %v9464_v13 = vld [vmem:[%s13884_s3 + $0x8] ss:$12 sps:$4 sm:$0xff]  }
 0x35b   : > { %v12271_v51 = vpop.f32.mrf.mxu0  ;;  %6157 = vmatprep.mubr.bf16.mxu1 %v13920_v27  ;;  %v6936_v45 = vmax.f32 %v6934_v33, %v6935_v10  ;;  %v6952_v4 = vmax.f32 %v6950_v57, %v6951_v7  ;;  %v2582_v63 = vunpack.i.l.bf16 %v2581_v12  ;;  %v7865_v60 = vunpack.c.l.b16 %v6927_v48  ;;  %v9465_v57 = vld [vmem:[%s13885_s4 + $0x138] sm:$0xff]  }
 0x35c   : > { %14039 = vst [vmem:[#allocation11_spill] sm:$0xff] %v12271_v51  ;;  %v12274_v50 = vpop.f32.mrf.mxu1  ;;  %v2572_v19 = vrot.slane %v2571_v39, 4  ;;  %v2583_v59 = vunpack.i.h.bf16 %v2581_v12  ;;  %v6960_v42 = vmax.f32 %v6958_v8, %v6959_v15  ;;  %v6945_v38 = vrot.slane %v6944_v29, 1 }
 0x35d   : > { %v12276_v53 = vpop.f32.mrf.mxu0  ;;  %v6937_v56 = vpack.i.bf16 %v6936_v45, %v6936_v45  ;;  %v6953_v46 = vrot.slane %v6952_v4, 2  ;;  %v6592_v33 = vpack.c.bf16 %v12211_v18, %v12190_v25  ;;  %v7899_v8 = vsel %vm2471_vm8, %v7865_v60, %v12234_v23 }
 0x35e   : > { %v12283_v26 = vpop.f32.mrf.mxu1  ;;  %v2573_v0 = vmax.f32 %v2571_v39, %v2572_v19  ;;  %v2584_v28 = vmax.f32 %v2582_v63, %v2583_v59  ;;  %v6961_v21 = vrot.slane %v6960_v42, 4  ;;  %v6946_v7 = vmax.f32 %v6944_v29, %v6945_v38 }
 0x35f   : > { %v12290_v10 = vpop.f32.mrf.mxu0  ;;  %v7866_v37 = vunpack.c.l.b16 %v6937_v56  ;;  %v6954_v12 = vmax.f32 %v6952_v4, %v6953_v46  ;;  %v6968_v48 = vunpack.i.l.bf16 %v6592_v33  ;;  %v6969_v47 = vunpack.i.h.bf16 %v6592_v33 }
 0x360   : > { %v12292_v15 = vpop.f32.mrf.mxu1  ;;  %v2574_v25 = vrot.slane %v2573_v0, 2  ;;  %v2585_v18 = vrot.slane %v2584_v28, 4  ;;  %v6962_v45 = vmax.f32 %v6960_v42, %v6961_v21  ;;  %v6947_v39 = vpack.i.bf16 %v6946_v7, %v6946_v7 }
 0x361   : > { %v12294_v51 = vpop.f32.mrf.mxu0  ;;  %8748 = vmatmul.mubr.msk.bf16.vlgmr.msra.gmra.mxu0 %vm1575_vm6, %v9464_v13  ;;  %v7893_v23 = vsel %vm2473_vm9, %v7866_v37, %v7892_v9  ;;  %v6955_v63 = vrot.slane %v6954_v12, 1  ;;  %v6593_v60 = vpack.c.bf16 %v12223_v49, %v12202_v30  ;;  %v6970_v42 = vmax.f32 %v6968_v48, %v6969_v47  ;;  %v9466_v47 = vld [vmem:[%s13884_s3 + $0x20] ss:$12 sps:$4 sm:$0xff]  }
 0x362   : > { %v12300_v29 = vpop.f32.mrf.mxu1  ;;  %8907 = vmatmul.mubr.msk.bf16.gmra.mxu1 %vm5494_vm7, %v9465_v57  ;;  %4095 = vmatprep.mubr.bf16.mxu0 %v13920_v27  ;;  %v2575_v4 = vmax.f32 %v2573_v0, %v2574_v25  ;;  %v2586_v19 = vmax.f32 %v2584_v28, %v2585_v18  ;;  %v6963_v59 = vrot.slane %v6962_v45, 2  ;;  %v7867_v9 = vunpack.c.l.b16 %v6947_v39  ;;  %v9467_v25 = vld [vmem:[%s13885_s4 + $0x140] sm:$0xff]  }
 0x363   : > { %v12304_v56 = vpop.f32.mrf.mxu0  ;;  %6167 = vmatprep.mubr.bf16.mxu1 %v13920_v27  ;;  %v6956_v13 = vmax.f32 %v6954_v12, %v6955_v63  ;;  %v6978_v38 = vunpack.i.l.bf16 %v6593_v60  ;;  %v6979_v46 = vunpack.i.h.bf16 %v6593_v60  ;;  %v6971_v57 = vrot.slane %v6970_v42, 4 }
 0x364   : > { %14040 = vst [vmem:[#allocation12_spill] sm:$0xff] %v12304_v56  ;;  %v12307_v33 = vpop.f32.mrf.mxu1  ;;  %v2576_v30 = vrot.slane %v2575_v4, 1  ;;  %v2587_v49 = vrot.slane %v2586_v19, 2  ;;  %v6964_v21 = vmax.f32 %v6962_v45, %v6963_v59  ;;  %v7900_v0 = vsel %vm2473_vm9, %v7867_v9, %v7899_v8 }
 0x365   : > { %v12309_v37 = vpop.f32.mrf.mxu0  ;;  %v6957_v28 = vpack.i.bf16 %v6956_v13, %v6956_v13  ;;  %v6980_v7 = vmax.f32 %v6978_v38, %v6979_v46  ;;  %v6594_v12 = vpack.c.bf16 %v12254_v1, %v12231_v24  ;;  %v6972_v63 = vmax.f32 %v6970_v42, %v6971_v57 }
 0x366   : > { %14041 = vst [vmem:[#allocation13_spill] sm:$0xff] %v12309_v37  ;;  %v5923_v48 = vpop.f32.mrf.mxu1  ;;  %v12320_v18 = vmax.f32 %v2575_v4, %v2576_v30  ;;  %v2588_v45 = vmax.f32 %v2586_v19, %v2587_v49  ;;  %v6965_v39 = vrot.slane %v6964_v21, 1  ;;  %v14042_v24 = vpack.i.bf16 %v12145_v40, %v12145_v40 }
 0x367   : > { %v12322_v60 = vpop.f32.mrf.mxu0  ;;  %v7868_v59 = vunpack.c.l.b16 %v6957_v28  ;;  %v6981_v37 = vrot.slane %v6980_v7, 4  ;;  %v6988_v8 = vunpack.i.l.bf16 %v6594_v12  ;;  %v6989_v9 = vunpack.i.h.bf16 %v6594_v12 }
 0x368   : > { %v5925_v13 = vpop.f32.mrf.mxu1  ;;  %v12327_v1 = vunpack.c.l.b16 %v14042_v24  ;;  %v2589_v38 = vrot.slane %v2588_v45, 1  ;;  %v6966_v46 = vmax.f32 %v6964_v21, %v6965_v39  ;;  %v6973_v56 = vrot.slane %v6972_v63, 2 }
 0x369   : > { %v12329_v4 = vpop.f32.mrf.mxu0  ;;  %8749 = vmatmul.mubr.msk.bf16.gmra.mxu0 %vm1575_vm6, %v9466_v47  ;;  %v12333_v19 = vsel %vm2475_vm10, %v7868_v59, %v7893_v23  ;;  %v6982_v42 = vmax.f32 %v6980_v7, %v6981_v37  ;;  %v6990_v30 = vmax.f32 %v6988_v8, %v6989_v9  ;;  %v6595_v49 = vpack.c.bf16 %v12261_v54, %v12245_v44 }
 0x36a   : > { %14043 = vst [vmem:[#allocation14_spill] sm:$0xff] %v12329_v4  ;;  %v12337_v57 = vpop.f32.mrf.mxu1  ;;  %8908 = vmatmul.mubr.msk.bf16.gmra.mxu1 %vm5494_vm7, %v9467_v25  ;;  %v14044_v40 = vpack.i.bf16 %v12163_v41, %v12163_v41  ;;  %v6967_v28 = vpack.i.bf16 %v6966_v46, %v6966_v46  ;;  %v6974_v23 = vmax.f32 %v6972_v63, %v6973_v56  ;;  %v9468_v63 = vld [vmem:[%s13884_s3 + $0x38] ss:$12 sps:$4 sm:$0xff]  }
 0x36b   : > { %v12347_v12 = vpop.f32.mrf.mxu0  ;;  %4105 = vmatprep.mubr.bf16.mxu0 %v13920_v27  ;;  %6177 = vmatprep.mubr.bf16.mxu1 %v13920_v27  ;;  %v6983_v44 = vrot.slane %v6982_v42, 2  ;;  %v6991_v54 = vrot.slane %v6990_v30, 4  ;;  %v6998_v37 = vunpack.i.l.bf16 %v6595_v49  ;;  %v6999_v7 = vunpack.i.h.bf16 %v6595_v49 }
 0x36c   : > { %v12343_v21 = vunpack.c.l.b16 %v14044_v40  ;;  %14045 = vst [vmem:[#allocation15_spill] sm:$0xff] %v12347_v12  ;;  %v12351_v25 = vpop.f32.mrf.mxu1  ;;  %v12353_v41 = vmax.f32 %v2588_v45, %v2589_v38  ;;  %v7869_v39 = vunpack.c.l.b16 %v6967_v28  ;;  %v6975_v59 = vrot.slane %v6974_v23, 1  ;;  %v9469_v45 = vld [vmem:[%s13885_s4 + $0x148] sm:$0xff]  }
 0x36d   : > { %v6596_v8 = vpack.c.bf16 %v12283_v26, %v12265_v5  ;;  %v12357_v56 = vpop.f32.mrf.mxu0  ;;  %v6984_v9 = vmax.f32 %v6982_v42, %v6983_v44  ;;  %v6992_v24 = vmax.f32 %v6990_v30, %v6991_v54  ;;  %v7000_v46 = vmax.f32 %v6998_v37, %v6999_v7 }
 0x36e   : > { %14046 = vst [vmem:[#allocation16_spill] sm:$0xff] %v12357_v56  ;;  %v6597_v49 = vpack.c.bf16 %v12292_v15, %v12274_v50  ;;  %v12364_v40 = vpop.f32.mrf.mxu1  ;;  %v7901_v5 = vsel %vm2475_vm10, %v7869_v39, %v7900_v0  ;;  %v6976_v26 = vmax.f32 %v6974_v23, %v6975_v59  ;;  %v6598_v7 = vpack.c.bf16 %v5923_v48, %v12300_v29 }
 0x36f   : > { %v7008_v38 = vunpack.i.l.bf16 %v6596_v8  ;;  %v7009_v28 = vunpack.i.h.bf16 %v6596_v8  ;;  %v12370_v47 = vpop.f32.mrf.mxu0  ;;  %v6985_v56 = vrot.slane %v6984_v9, 1  ;;  %v6993_v42 = vrot.slane %v6992_v24, 2 }
 0x370   : > { %14047 = vst [vmem:[#allocation17_spill] sm:$0xff] %v12370_v47  ;;  %v7001_v30 = vrot.slane %v7000_v46, 4  ;;  %v7018_v44 = vunpack.i.l.bf16 %v6597_v49  ;;  %v12372_v54 = vpop.f32.mrf.mxu1  ;;  %v6977_v50 = vpack.i.bf16 %v6976_v26, %v6976_v26  ;;  %v7019_v37 = vunpack.i.h.bf16 %v6597_v49 }
 0x371   : > { %v7010_v15 = vmax.f32 %v7008_v38, %v7009_v28  ;;  %v12375_v12 = vpop.f32.mrf.mxu0  ;;  %8750 = vmatmul.mubr.msk.bf16.gmra.mxu0 %vm1575_vm6, %v9468_v63  ;;  %v6986_v0 = vmax.f32 %v6984_v9, %v6985_v56  ;;  %v6994_v23 = vmax.f32 %v6992_v24, %v6993_v42  ;;  %v6599_v59 = vpack.c.bf16 %v5925_v13, %v12307_v33  ;;  %v9470_v28 = vld [vmem:[%s13884_s3 + $0x50] ss:$12 sps:$4 sm:$0xff]  }
 0x372   : > { %14048 = vst [vmem:[#allocation18_spill] sm:$0xff] %v12375_v12  ;;  %v7002_v39 = vmax.f32 %v7000_v46, %v7001_v30  ;;  %v12379_v8 = vpop.f32.mrf.mxu1  ;;  %8909 = vmatmul.mubr.msk.bf16.gmra.mxu1 %vm5494_vm7, %v9469_v45  ;;  %v7870_v47 = vunpack.c.l.b16 %v6977_v50  ;;  %v7020_v26 = vmax.f32 %v7018_v44, %v7019_v37  ;;  %v7028_v38 = vunpack.i.l.bf16 %v6598_v7  ;;  %4115 = vmatprep.mubr.bf16.mxu0 %v13920_v27 }
 0x373   : > { %v7011_v4 = vrot.slane %v7010_v15, 4  ;;  %v12382_v49 = vpop.f32.mrf.mxu0  ;;  %6187 = vmatprep.mubr.bf16.mxu1 %v13920_v27  ;;  %v6987_v29 = vpack.i.bf16 %v6986_v0, %v6986_v0  ;;  %v6995_v48 = vrot.slane %v6994_v23, 1  ;;  %v7029_v63 = vunpack.i.h.bf16 %v6598_v7 }
 0x374   : > { %14049 = vst [vmem:[#allocation19_spill] sm:$0xff] %v12382_v49  ;;  %v7003_v56 = vrot.slane %v7002_v39, 2  ;;  %v12386_v9 = vpop.f32.mrf.mxu1  ;;  %v7895_v33 = vsel %vm7749_vm12, %v7870_v47, %v12333_v19  ;;  %v7021_v24 = vrot.slane %v7020_v26, 4  ;;  %v7038_v46 = vunpack.i.l.bf16 %v6599_v59 }
 0x375   : > { %v7012_v13 = vmax.f32 %v7010_v15, %v7011_v4  ;;  %v12390_v45 = vpop.f32.mrf.mxu0  ;;  %v2591_v42 = vpack.i.bf16 %v12353_v41, %v12353_v41  ;;  %v7871_v30 = vunpack.c.l.b16 %v6987_v29  ;;  %v6996_v44 = vmax.f32 %v6994_v23, %v6995_v48  ;;  %v9471_v4 = vld [vmem:[%s13885_s4 + $0x150] sm:$0xff]  }
 0x376   : > { %14050 = vst [vmem:[#allocation20_spill] sm:$0xff] %v12390_v45  ;;  %v7030_v50 = vmax.f32 %v7028_v38, %v7029_v63  ;;  %v12397_v37 = vpop.f32.mrf.mxu1  ;;  %v14051_v19 = vpack.i.bf16 %v12320_v18, %v12320_v18  ;;  %v7022_v7 = vmax.f32 %v7020_v26, %v7021_v24  ;;  %v7039_v0 = vunpack.i.h.bf16 %v6599_v59 }
 0x377   : > { %v7013_v15 = vrot.slane %v7012_v13, 2  ;;  %v12405_v45 = vpop.f32.mrf.mxu0  ;;  %v12408_v41 = vsel %vm7749_vm12, %v7871_v30, %v7901_v5  ;;  %v6997_v23 = vpack.i.bf16 %v6996_v44, %v6996_v44  ;;  %v7004_v38 = vmax.f32 %v7002_v39, %v7003_v56 }
 0x378   : > { %v2606_v47 = vunpack.c.l.b16 %v14051_v19  ;;  %v7031_v29 = vrot.slane %v7030_v50, 4  ;;  %v12410_v48 = vpop.f32.mrf.mxu1  ;;  %v7023_v49 = vrot.slane %v7022_v7, 2  ;;  %v7040_v12 = vmax.f32 %v7038_v46, %v7039_v0 }
 0x379   : > { %v7014_v63 = vmax.f32 %v7012_v13, %v7013_v15  ;;  %v2608_v18 = vsel %vm2471_vm8, %v12123_v58, %v11929_v20  ;;  %v12415_v26 = vpop.f32.mrf.mxu0  ;;  %8751 = vmatmul.mubr.msk.bf16.gmra.mxu0 %vm1575_vm6, %v9470_v28  ;;  %v7872_v59 = vunpack.c.l.b16 %v6997_v23  ;;  %v2607_v24 = vunpack.c.l.b16 %v2591_v42  ;;  %v12424_v13 = vpop.permute.xlu0 %7551 }
 0x37a   : > { %v7032_v5 = vmax.f32 %v7030_v50, %v7031_v29  ;;  %v2609_v39 = vsel %vm2473_vm9, %v12327_v1, %v2608_v18  ;;  %v12420_v56 = vpop.f32.mrf.mxu1  ;;  %8910 = vmatmul.mubr.msk.bf16.gmra.mxu1 %vm5494_vm7, %v9471_v4  ;;  %4125 = vmatprep.mubr.bf16.mxu0 %v13920_v27  ;;  %v7024_v20 = vmax.f32 %v7022_v7, %v7023_v49  ;;  %v7041_v58 = vrot.slane %v7040_v12, 4 }
 0x37b   : > { %v7015_v46 = vrot.slane %v7014_v63, 1  ;;  %v2610_v30 = vsel %vm2475_vm10, %v2606_v47, %v2609_v39  ;;  %v12427_v28 = vpop.f32.mrf.mxu0  ;;  %6197 = vmatprep.mubr.bf16.mxu1 %v13920_v27  ;;  %v14053_v1 = vrot.slane %v12129_v14, 1  ;;  %v7896_v44 = vsel %vm7751_vm13, %v7872_v59, %v7895_v33  ;;  %v12448_v33 = vpop.permute.xlu1 %7553 }
 0x37c   : > { %14052 = vst [vmem:[#allocation21_spill] sm:$0xff] %v12427_v28  ;;  %v7033_v50 = vrot.slane %v7032_v5, 2  ;;  %v2611_v49 = vsel %vm2471_vm8, %v12134_v6, %v12043_v22  ;;  %v12439_v4 = vpop.f32.mrf.mxu1  ;;  %v7005_v19 = vrot.slane %v7004_v38, 1  ;;  %v7042_v15 = vmax.f32 %v7040_v12, %v7041_v58 }
 0x37d   : > { %v12433_v42 = vmax.f32 %v12129_v14, %v14053_v1  ;;  %v7016_v47 = vmax.f32 %v7014_v63, %v7015_v46  ;;  %v2612_v7 = vsel %vm2473_vm9, %v12343_v21, %v2611_v49  ;;  %v12443_v0 = vpop.f32.mrf.mxu0  ;;  %v9472_v14 = vld [vmem:[%s13884_s3 + $0x68] ss:$12 sps:$4 sm:$0xff]   ;;  %v14054_v23 = vrot.slane %v12147_v17, 1  ;;  %v9473_v21 = vld [vmem:[%s13885_s4 + $0x158] sm:$0xff]  }
 0x37e   : > { %v7034_v6 = vmax.f32 %v7032_v5, %v7033_v50  ;;  %v2613_v29 = vsel %vm2475_vm10, %v2607_v24, %v2612_v7  ;;  %v2614_v12 = vpack.c.b16 %v2610_v30, %v2610_v30  ;;  %v5953_v63 = vpop.f32.mrf.mxu1  ;;  %v7025_v59 = vrot.slane %v7024_v20, 1  ;;  %v7550_v30 = vpop.permute.xlu0 %7549 }
 0x37f   : > { %v12453_v22 = vmax.f32 %v12147_v17, %v14054_v23  ;;  %v7017_v18 = vpack.i.bf16 %v7016_v47, %v7016_v47  ;;  %v7043_v39 = vrot.slane %v7042_v15, 2  ;;  %v2615_v46 = vpack.c.b16 %v2613_v29, %v2613_v29  ;;  %v12459_v58 = vpop.f32.mrf.mxu0 }
 0x380   : > { %14055 = vst [vmem:[#allocation22_spill] sm:$0xff] %v12459_v58  ;;  %v7035_v1 = vrot.slane %v7034_v6, 1  ;;  %v2617_v49 = vsel %vm2482_vm11, %v2614_v12, 0  ;;  %v6600_v17 = vpack.c.bf16 %v12364_v40, %v12337_v57  ;;  %v6601_v5 = vpack.c.bf16 %v12372_v54, %v12351_v25  ;;  %v5955_v24 = vpop.f32.mrf.mxu1 }
 0x381   : > { %v7006_v50 = vmax.f32 %v7004_v38, %v7005_v19  ;;  %v7874_v7 = vunpack.c.l.b16 %v7017_v18  ;;  %v7044_v23 = vmax.f32 %v7042_v15, %v7043_v39  ;;  %v2619_v47 = vsel %vm2482_vm11, %v2615_v46, 0  ;;  %v12467_v28 = vpop.f32.mrf.mxu0  ;;  %8752 = vmatmul.mubr.msk.bf16.gmra.mxu0 %vm1575_vm6, %v9472_v14 }
 0x382   : > { %v7036_v29 = vmax.f32 %v7034_v6, %v7035_v1  ;;  %v7712_v58 = vrot.slane %v2617_v49, 4  ;;  %v7713_v12 = vrot.slane %v2619_v47, 4  ;;  %v6602_v57 = vpack.c.bf16 %v12397_v37, %v12379_v8  ;;  %v5959_v40 = vpop.f32.mrf.mxu1  ;;  %8911 = vmatmul.mubr.msk.bf16.gmra.mxu1 %vm5494_vm7, %v9473_v21  ;;  %4135 = vmatprep.mubr.bf16.mxu0 %v13920_v27  ;;  %v12484_v37 = vpop.permute.xlu1 %7540 }
 0x383   : > { %v12475_v25 = vsel %vm7753_vm14, %v7874_v7, %v7896_v44  ;;  %v7026_v54 = vmax.f32 %v7024_v20, %v7025_v59  ;;  %v7045_v38 = vrot.slane %v7044_v23, 1  ;;  %v6603_v19 = vpack.c.bf16 %v12410_v48, %v12386_v9  ;;  %v12479_v15 = vpop.f32.mrf.mxu0  ;;  %6207 = vmatprep.mubr.bf16.mxu1 %v13920_v27  ;;  %v14057_v44 = vld [vmem:[#allocation10_spill] sm:$0xff] }
 0x384   : > { %v6847_v8 = vpack.i.bf16 %v12143_v61, %v12143_v61  ;;  %v12488_v14 = vsel %vm8006_vm15, %v11824_v3, %v7712_v58  ;;  %v12492_v20 = vsel %vm8006_vm15, %v14057_v44, %v7713_v12  ;;  %v7048_v6 = vmax.bf16 %v6602_v57, %v6600_v17  ;;  %v5961_v21 = vpop.f32.mrf.mxu1  ;;  %v9474_v61 = vld [vmem:[%s13884_s3 + $0x80] ss:$12 sps:$4 sm:$0xff]  }
 0x385   : > { %14056 = vst [vmem:[#allocation23_spill] sm:$0xff] %v12488_v14  ;;  %14058 = vst [vmem:[#allocation24_spill] sm:$0xff] %v12492_v20  ;;  %v6877_v9 = vpack.i.bf16 %v12433_v42, %v12433_v42  ;;  %v7007_v48 = vpack.i.bf16 %v7006_v50, %v7006_v50  ;;  %v7037_v18 = vpack.i.bf16 %v7036_v29, %v7036_v29  ;;  %v12496_v39 = vpop.f32.mrf.mxu0  ;;  %v9475_v42 = vld [vmem:[%s13885_s4 + $0x160] sm:$0xff]   ;;  %v7543_v50 = vpop.permute.xlu0 %7542 }
 0x386   : > { %v7046_v59 = vmax.f32 %v7044_v23, %v7045_v38  ;;  %v6867_v3 = vpack.i.bf16 %v12160_v52, %v12160_v52  ;;  %v7061_v46 = vmax.bf16 %v6603_v19, %v6601_v5  ;;  %v6604_v58 = vpack.c.bf16 %v5953_v63, %v12420_v56  ;;  %v5963_v1 = vpop.f32.mrf.mxu1 }
 0x387   : > { %v7556_v49 = vsel %vm7555_vm0, %v7550_v30, %v12424_v13  ;;  %v6887_v17 = vpack.i.bf16 %v12453_v22, %v12453_v22  ;;  %v7027_v7 = vpack.i.bf16 %v7026_v54, %v7026_v54  ;;  %v12511_v23 = vpop.f32.mrf.mxu0  ;;  %v6605_v5 = vpack.c.bf16 %v5955_v24, %v12439_v4  ;;  %v7539_v22 = vpop.permute.xlu1 %7538 }
 0x388   : > { %v7047_v47 = vpack.i.bf16 %v7046_v59, %v7046_v59  ;;  %v7049_v52 = vmax.bf16 %v7048_v6, %v6604_v58  ;;  %v6606_v56 = vpack.c.bf16 %v5963_v1, %v5959_v40  ;;  %v5965_v63 = vpop.f32.mrf.mxu1  ;;  %v7857_v29 = vunpack.c.l.b16 %v6847_v8  ;;  %v9477_v1 = vld [vmem:[%s13885_s4 + $0x168] sm:$0xff]  }
 0x389   : > { %v7860_v12 = vunpack.c.l.b16 %v6877_v9  ;;  %v7873_v57 = vunpack.c.l.b16 %v7007_v48  ;;  %v7876_v38 = vunpack.c.l.b16 %v7037_v18  ;;  %v12514_v19 = vpop.f32.mrf.mxu0  ;;  %8753 = vmatmul.mubr.msk.bf16.gmra.mxu0 %vm1575_vm6, %v9474_v61  ;;  %v7859_v30 = vunpack.c.l.b16 %v6867_v3  ;;  %v7530_v18 = vpop.permute.xlu0 %7529  ;;  %v9476_v3 = vld [vmem:[%s13884_s3 + $0x98] ss:$12 sps:$4 sm:$0xff]  }
 0x38a   : > { %v7062_v44 = vmax.bf16 %v7061_v46, %v6605_v5  ;;  %v12517_v54 = vmax.bf16 %v7049_v52, %v6606_v56  ;;  %v6607_v14 = vpack.c.bf16 %v5965_v63, %v5961_v21  ;;  %v12519_v59 = vpop.f32.mrf.mxu1  ;;  %8912 = vmatmul.mubr.msk.bf16.gmra.mxu1 %vm5494_vm7, %v9475_v42  ;;  %4145 = vmatprep.mubr.bf16.mxu0 %v13920_v27  ;;  %v7861_v4 = vunpack.c.l.b16 %v6887_v17 }
 0x38b   : > { %v7875_v24 = vunpack.c.l.b16 %v7027_v7  ;;  %v12523_v40 = vpop.f32.mrf.mxu0  ;;  %6217 = vmatprep.mubr.bf16.mxu1 %v13920_v27  ;;  %v7557_v8 = vsel %vm7555_vm0, %v12424_v13, %v12448_v33  ;;  %v7546_v6 = vsel %vm1575_vm6, %v12484_v37, %v7543_v50  ;;  %v7877_v21 = vunpack.c.l.b16 %v7047_v47  ;;  %v7532_v50 = vpop.permute.xlu1 %7531 }
 0x38c   : > { %v12531_v9 = vmax.bf16 %v7062_v44, %v6607_v14  ;;  %v5971_v48 = vpop.f32.mrf.mxu1  ;;  %7629 = vmatprep.subr.bf16.mxu0 %v7557_v8  ;;  %v7889_v13 = vsel %vm7751_vm13, %v7857_v29, %v12022_v62  ;;  %v7903_v33 = vsel %vm7751_vm13, %v7873_v57, %v12408_v41  ;;  %v7884_v14 = vsel %vm7755_vm1, %v7860_v12, %v12092_v11 }
 0x38d   : > { %v12533_v61 = vpop.f32.mrf.mxu0  ;;  %7630 = vmatpush1.bf16.msra.mxu0 %v7556_v49  ;;  %v7898_v46 = vsel %vm7755_vm1, %v7876_v38, %v12475_v25  ;;  %v7890_v42 = vsel %vm7753_vm14, %v7859_v30, %v7889_v13  ;;  %v7904_v11 = vsel %vm7753_vm14, %v7875_v24, %v7903_v33  ;;  %v7545_v25 = vsel %vm1575_vm6, %v7539_v22, %v12484_v37  ;;  %v7528_v12 = vpop.permute.xlu0 %7527  ;;  %v9478_v22 = vld [vmem:[%s13884_s3 + $0xb0] ss:$12 sps:$4 sm:$0xff]  }
 0x38e   : > { %v5973_v58 = vpop.f32.mrf.mxu1  ;;  %7631 = vmatprep.subr.bf16.mxu0 %v7546_v6  ;;  %v7891_v41 = vsel %vm7755_vm1, %v7861_v4, %v7890_v42  ;;  %v12555_v17 = vpack.c.b16 %v7898_v46, %v7884_v14  ;;  %v7905_v47 = vsel %vm7755_vm1, %v7877_v21, %v7904_v11  ;;  %v7535_v56 = vsel %vm7533_vm2, %v7530_v18, %v7532_v50  ;;  %v9481_v50 = vld [vmem:[%s13885_s4 + $0x178] sm:$0xff]  }
 0x38f   : > { %v6608_v62 = vpack.c.bf16 %v5973_v58, %v12519_v59  ;;  %v12551_v49 = vpop.f32.mrf.mxu0  ;;  %v12564_v63 = vpack.c.b16 %v7905_v47, %v7891_v41  ;;  %v7534_v57 = vsel %vm7533_vm2, %v7528_v12, %v7530_v18  ;;  %v9479_v59 = vld [vmem:[%s13885_s4 + $0x170] sm:$0xff]   ;;  %v7051_v8 = vunpack.i.l.bf16 %v12517_v54 }
 0x390   : > { %14059 = vst [vmem:[#allocation25_spill] sm:$0xff] %v12555_v17  ;;  %v5975_v7 = vpop.f32.mrf.mxu1  ;;  %v7052_v6 = vunpack.i.h.bf16 %v12517_v54  ;;  %v7064_v33 = vunpack.i.l.bf16 %v12531_v9  ;;  %v7065_v14 = vunpack.i.h.bf16 %v12531_v9  ;;  %v9480_v41 = vld [vmem:[%s13884_s3 + $0xc8] ss:$12 sps:$4 sm:$0xff]  }
 0x391   : > { %v6609_v52 = vpack.c.bf16 %v5975_v7, %v5971_v48  ;;  %v12560_v5 = vpop.f32.mrf.mxu0  ;;  %8754 = vmatmul.mubr.msk.bf16.gmra.mxu0 %vm1575_vm6, %v9476_v3  ;;  %14060 = vst [vmem:[#allocation26_spill] sm:$0xff] %v12564_v63  ;;  %v7519_v48 = vpop.permute.xlu1 %7518 }
 0x392   : > { %v5979_v29 = vpop.f32.mrf.mxu1  ;;  %8913 = vmatmul.mubr.msk.bf16.gmra.mxu1 %vm5494_vm7, %v9477_v1  ;;  %4155 = vmatprep.mubr.bf16.mxu0 %v13920_v27  ;;  %v7053_v54 = vmax.f32 %v7051_v8, %v7052_v6  ;;  %v7521_v9 = vpop.permute.xlu0 %7520  ;;  %v7066_v11 = vmax.f32 %v7064_v33, %v7065_v14 }
 0x393   : > { %v12568_v37 = vpop.f32.mrf.mxu0  ;;  %6227 = vmatprep.mubr.bf16.mxu1 %v13920_v27  ;;  %7632 = vmatpush1.bf16.msra.mxu0 %v7545_v25 }
 0x394   : > { %v5981_v38 = vpop.f32.mrf.mxu1  ;;  %7633 = vmatprep.subr.bf16.mxu0 %v7535_v56  ;;  %v7524_v56 = vsel %vm7522_vm3, %v7519_v48, %v7521_v9  ;;  %v7054_v12 = vrot.slane %v7053_v54, 4 }
 0x395   : > { %v12572_v30 = vpop.f32.mrf.mxu0  ;;  %v7517_v7 = vpop.permute.xlu1 %7516 }
 0x396   : > { %v5983_v44 = vpop.f32.mrf.mxu1 }
 0x397   : > { %v6610_v4 = vpack.c.bf16 %v5983_v44, %v5979_v29  ;;  %v12580_v24 = vpop.f32.mrf.mxu0  ;;  %7634 = vmatpush1.bf16.msra.mxu0 %v7534_v57  ;;  %v7523_v29 = vsel %vm7522_vm3, %v7517_v7, %v7519_v48 }
 0x398   : > { %v5985_v21 = vpop.f32.mrf.mxu1  ;;  %7635 = vmatprep.subr.bf16.mxu0 %v7524_v56 }
 0x399   : > { %v7074_v18 = vmax.bf16 %v6610_v4, %v6608_v62  ;;  %v6611_v3 = vpack.c.bf16 %v5985_v21, %v5981_v38  ;;  %v12584_v13 = vpop.f32.mrf.mxu0  ;;  %8755 = vmatmul.mubr.msk.bf16.gmra.mxu0 %vm1575_vm6, %v9478_v22  ;;  %v7055_v21 = vmax.f32 %v7053_v54, %v7054_v12 }
 0x39a   : > { %v5989_v46 = vpop.f32.mrf.mxu1  ;;  %8914 = vmatmul.mubr.msk.bf16.gmra.mxu1 %vm5494_vm7, %v9479_v59  ;;  %4165 = vmatprep.mubr.bf16.mxu0 %v13920_v27  ;;  %v7067_v59 = vrot.slane %v7066_v11, 4 }
 0x39b   : > { %v7087_v58 = vmax.bf16 %v6611_v3, %v6609_v52  ;;  %v12591_v1 = vpop.f32.mrf.mxu0  ;;  %6237 = vmatprep.mubr.bf16.mxu1 %v13920_v27  ;;  %7636 = vmatpush1.bf16.msra.mxu0 %v7523_v29  ;;  %v9482_v3 = vld [vmem:[%s13884_s3 + $0xe0] ss:$12 sps:$4 sm:$0xff]  }
 0x39c   : > { %v5991_v42 = vpop.f32.mrf.mxu1  ;;  %v7068_v33 = vmax.f32 %v7066_v11, %v7067_v59 }
 0x39d   : > { %v12594_v62 = vpop.f32.mrf.mxu0 }
 0x39e   : > { %v5993_v25 = vpop.f32.mrf.mxu1  ;;  %v7069_v7 = vrot.slane %v7068_v33, 2 }
 0x39f   : > { %v6612_v47 = vpack.c.bf16 %v5993_v25, %v5989_v46  ;;  %v12602_v52 = vpop.f32.mrf.mxu0  ;;  %v9483_v46 = vld [vmem:[%s13885_s4 + $0x180] sm:$0xff]  }
 0x3a0   : > { %v5995_v57 = vpop.f32.mrf.mxu1 }
 0x3a1   : > { %v7075_v38 = vmax.bf16 %v7074_v18, %v6612_v47  ;;  %v6613_v22 = vpack.c.bf16 %v5995_v57, %v5991_v42  ;;  %v12604_v44 = vpop.f32.mrf.mxu0  ;;  %8756 = vmatmul.mubr.msk.bf16.gmra.mxu0 %vm1575_vm6, %v9480_v41  ;;  %v7056_v41 = vrot.slane %v7055_v21, 2 }
 0x3a2   : > { %v5999_v4 = vpop.f32.mrf.mxu1  ;;  %8915 = vmatmul.mubr.msk.bf16.gmra.mxu1 %vm5494_vm7, %v9481_v50  ;;  %4175 = vmatprep.mubr.bf16.mxu0 %v13920_v27 }
 0x3a3   : > { %v7088_v8 = vmax.bf16 %v7087_v58, %v6613_v22  ;;  %v12609_v6 = vpop.f32.mrf.mxu0  ;;  %6247 = vmatprep.mubr.bf16.mxu1 %v13920_v27  ;;  %v7057_v57 = vmax.f32 %v7055_v21, %v7056_v41 }
 0x3a4   : > { %14061 = vst [vmem:[#allocation27_spill] sm:$0xff] %v12609_v6  ;;  %v6001_v48 = vpop.f32.mrf.mxu1 }
 0x3a5   : > { %v12612_v18 = vpop.f32.mrf.mxu0  ;;  %v7058_v41 = vrot.slane %v7057_v57, 1 }
 0x3a6   : > { %14062 = vst [vmem:[#allocation28_spill] sm:$0xff] %v12612_v18  ;;  %v6003_v14 = vpop.f32.mrf.mxu1 }
 0x3a7   : > { %v6614_v58 = vpack.c.bf16 %v6003_v14, %v5999_v4  ;;  %v12620_v42 = vpop.f32.mrf.mxu0  ;;  %v7070_v14 = vmax.f32 %v7068_v33, %v7069_v7 }
 0x3a8   : > { %14063 = vst [vmem:[#allocation29_spill] sm:$0xff] %v12620_v42  ;;  %v6005_v9 = vpop.f32.mrf.mxu1 }
 0x3a9   : > { %v7076_v25 = vmax.bf16 %v7075_v38, %v6614_v58  ;;  %v6615_v54 = vpack.c.bf16 %v6005_v9, %v6001_v48  ;;  %v12622_v50 = vpop.f32.mrf.mxu0  ;;  %8757 = vmatmul.mubr.msk.bf16.gmra.mxu0 %vm1575_vm6, %v9482_v3  ;;  %v9484_v3 = vld [vmem:[%s13884_s3 + $0xf8] ss:$12 sps:$4 sm:$0xff]   ;;  %v7071_v33 = vrot.slane %v7070_v14, 1 }
 0x3aa   : > { %14064 = vst [vmem:[#allocation30_spill] sm:$0xff] %v12622_v50  ;;  %v6009_v47 = vpop.f32.mrf.mxu1  ;;  %8916 = vmatmul.mubr.msk.bf16.gmra.mxu1 %vm5494_vm7, %v9483_v46  ;;  %4185 = vmatprep.mubr.bf16.mxu0 %v13920_v27 }
 0x3ab   : > { %v7077_v11 = vunpack.i.l.bf16 %v7076_v25  ;;  %v7078_v56 = vunpack.i.h.bf16 %v7076_v25  ;;  %v7089_v29 = vmax.bf16 %v7088_v8, %v6615_v54  ;;  %v12627_v12 = vpop.f32.mrf.mxu0  ;;  %6257 = vmatprep.mubr.bf16.mxu1 %v13920_v27  ;;  %v9485_v8 = vld [vmem:[%s13885_s4 + $0x188] sm:$0xff]  }
 0x3ac   : > { %14065 = vst [vmem:[#allocation31_spill] sm:$0xff] %v12627_v12  ;;  %v6011_v38 = vpop.f32.mrf.mxu1 }
 0x3ad   : > { %v7079_v22 = vmax.f32 %v7077_v11, %v7078_v56  ;;  %v7090_v59 = vunpack.i.l.bf16 %v7089_v29  ;;  %v7091_v4 = vunpack.i.h.bf16 %v7089_v29  ;;  %v12630_v48 = vpop.f32.mrf.mxu0 }
 0x3ae   : > { %14066 = vst [vmem:[#allocation32_spill] sm:$0xff] %v12630_v48  ;;  %v6013_v46 = vpop.f32.mrf.mxu1 }
 0x3af   : > { %v7080_v58 = vrot.slane %v7079_v22, 4  ;;  %v7092_v9 = vmax.f32 %v7090_v59, %v7091_v4  ;;  %v6616_v25 = vpack.c.bf16 %v6013_v46, %v6009_v47  ;;  %v12638_v21 = vpop.f32.mrf.mxu0  ;;  %v7059_v4 = vmax.f32 %v7057_v57, %v7058_v41  ;;  %v7508_v41 = vpop.permute.xlu0 %7507 }
 0x3b0   : > { %14067 = vst [vmem:[#allocation33_spill] sm:$0xff] %v12638_v21  ;;  %v6015_v54 = vpop.f32.mrf.mxu1 }
 0x3b1   : > { %v7081_v11 = vmax.f32 %v7079_v22, %v7080_v58  ;;  %v7093_v56 = vrot.slane %v7092_v9, 4  ;;  %v6617_v29 = vpack.c.bf16 %v6015_v54, %v6011_v38  ;;  %v12640_v20 = vpop.f32.mrf.mxu0  ;;  %8758 = vmatmul.mubr.msk.bf16.gmra.mxu0 %vm1575_vm6, %v9484_v3  ;;  %v9486_v3 = vld [vmem:[%s13884_s3 + $0x110] ss:$12 sps:$4 sm:$0xff]   ;;  %v7072_v54 = vmax.f32 %v7070_v14, %v7071_v33 }
 0x3b2   : > { %14068 = vst [vmem:[#allocation34_spill] sm:$0xff] %v12640_v20  ;;  %v6019_v7 = vpop.f32.mrf.mxu1  ;;  %8917 = vmatmul.mubr.msk.bf16.gmra.mxu1 %vm5494_vm7, %v9485_v8  ;;  %4195 = vmatprep.mubr.bf16.mxu0 %v13920_v27  ;;  %v7060_v57 = vpack.i.bf16 %v7059_v4, %v7059_v4 }
 0x3b3   : > { %v7082_v17 = vrot.slane %v7081_v11, 2  ;;  %v7094_v59 = vmax.f32 %v7092_v9, %v7093_v56  ;;  %v12645_v47 = vpop.f32.mrf.mxu0  ;;  %6267 = vmatprep.mubr.bf16.mxu1 %v13920_v27  ;;  %v9487_v9 = vld [vmem:[%s13885_s4 + $0x190] sm:$0xff]   ;;  %v7073_v14 = vpack.i.bf16 %v7072_v54, %v7072_v54  ;;  %v7510_v54 = vpop.permute.xlu1 %7509 }
 0x3b4   : > { %14069 = vst [vmem:[#allocation35_spill] sm:$0xff] %v12645_v47  ;;  %v6021_v22 = vpop.f32.mrf.mxu1 }
 0x3b5   : > { %v7083_v46 = vmax.f32 %v7081_v11, %v7082_v17  ;;  %v7095_v38 = vrot.slane %v7094_v59, 2  ;;  %v12648_v58 = vpop.f32.mrf.mxu0 }
 0x3b6   : > { %14070 = vst [vmem:[#allocation36_spill] sm:$0xff] %v12648_v58  ;;  %v6023_v8 = vpop.f32.mrf.mxu1 }
 0x3b7   : > { %v7084_v56 = vrot.slane %v7083_v46, 1  ;;  %v7096_v63 = vmax.f32 %v7094_v59, %v7095_v38  ;;  %v6618_v47 = vpack.c.bf16 %v6023_v8, %v6019_v7  ;;  %v12656_v20 = vpop.f32.mrf.mxu0 }
 0x3b8   : > { %14071 = vst [vmem:[#allocation37_spill] sm:$0xff] %v12656_v20  ;;  %v6025_v17 = vpop.f32.mrf.mxu1 }
 0x3b9   : > { %v7085_v11 = vmax.f32 %v7083_v46, %v7084_v56  ;;  %v7097_v58 = vrot.slane %v7096_v63, 1  ;;  %v7100_v21 = vmax.bf16 %v6618_v47, %v6616_v25  ;;  %v6619_v48 = vpack.c.bf16 %v6025_v17, %v6021_v22  ;;  %v12658_v12 = vpop.f32.mrf.mxu0  ;;  %8759 = vmatmul.mubr.msk.bf16.gmra.mxu0 %vm1575_vm6, %v9486_v3  ;;  %v9488_v3 = vld [vmem:[%s13884_s3 + $0x128] ss:$12 sps:$4 sm:$0xff]  }
 0x3ba   : > { %14072 = vst [vmem:[#allocation39_spill] sm:$0xff] %v12658_v12  ;;  %v6029_v33 = vpop.f32.mrf.mxu1  ;;  %8918 = vmatmul.mubr.msk.bf16.gmra.mxu1 %vm5494_vm7, %v9487_v9  ;;  %4205 = vmatprep.mubr.bf16.mxu0 %v13920_v27  ;;  %v7942_v47 = vunpack.c.l.b16 %v7060_v57  ;;  %v7943_v9 = vunpack.c.l.b16 %v7073_v14 }
 0x3bb   : > { %v7086_v7 = vpack.i.bf16 %v7085_v11, %v7085_v11  ;;  %v7098_v59 = vmax.f32 %v7096_v63, %v7097_v58  ;;  %v7113_v38 = vmax.bf16 %v6619_v48, %v6617_v29  ;;  %v12663_v4 = vpop.f32.mrf.mxu0  ;;  %6277 = vmatprep.mubr.bf16.mxu1 %v13920_v27  ;;  %v9489_v63 = vld [vmem:[%s13885_s4 + $0x198] sm:$0xff]   ;;  %v7506_v48 = vpop.permute.xlu0 %7505  ;;  %v7513_v11 = vsel %vm7511_vm4, %v7508_v41, %v7510_v54 }
 0x3bc   : > { %14073 = vst [vmem:[#allocation41_spill] sm:$0xff] %v12663_v4  ;;  %v6031_v25 = vpop.f32.mrf.mxu1  ;;  %7637 = vmatprep.subr.bf16.mxu0 %v7513_v11  ;;  %v7497_v54 = vpop.permute.xlu1 %7496 }
 0x3bd   : > { %v7944_v22 = vunpack.c.l.b16 %v7086_v7  ;;  %v7099_v46 = vpack.i.bf16 %v7098_v59, %v7098_v59  ;;  %v12666_v8 = vpop.f32.mrf.mxu0  ;;  %v7512_v7 = vsel %vm7511_vm4, %v7506_v48, %v7508_v41 }
 0x3be   : > { %14074 = vst [vmem:[#allocation43_spill] sm:$0xff] %v12666_v8  ;;  %v6033_v56 = vpop.f32.mrf.mxu1  ;;  %7638 = vmatpush1.bf16.msra.mxu0 %v7512_v7 }
 0x3bf   : > { %v12675_v29 = vsel %vm2471_vm8, %v7944_v22, %v7942_v47  ;;  %v7945_v58 = vunpack.c.l.b16 %v7099_v46  ;;  %v6620_v57 = vpack.c.bf16 %v6033_v56, %v6029_v33  ;;  %v12677_v17 = vpop.f32.mrf.mxu0 }
 0x3c0   : > { %14075 = vst [vmem:[#allocation10_spill] sm:$0xff] %v12677_v17  ;;  %v6035_v59 = vpop.f32.mrf.mxu1 }
 0x3c1   : > { %v12682_v14 = vsel %vm2471_vm8, %v7945_v58, %v7943_v9  ;;  %v7101_v4 = vmax.bf16 %v7100_v21, %v6620_v57  ;;  %v6621_v8 = vpack.c.bf16 %v6035_v59, %v6031_v25  ;;  %v12684_v12 = vpop.f32.mrf.mxu0  ;;  %8760 = vmatmul.mubr.msk.bf16.gmra.mxu0 %vm1575_vm6, %v9488_v3  ;;  %v9490_v21 = vld [vmem:[%s13884_s3 + $0x140] ss:$12 sps:$4 sm:$0xff]   ;;  %v12707_v57 = vpop.permute.xlu0 %7498 }
 0x3c2   : > { %14076 = vst [vmem:[#allocation91_spill] sm:$0xff] %v12684_v12  ;;  %v6039_v47 = vpop.f32.mrf.mxu1  ;;  %8919 = vmatmul.mubr.msk.bf16.gmra.mxu1 %vm5494_vm7, %v9489_v63  ;;  %4215 = vmatprep.mubr.bf16.mxu0 %v13920_v27  ;;  %v9491_v3 = vld [vmem:[%s13885_s4 + $0x1a0] sm:$0xff]  }
 0x3c3   : > { %v7114_v33 = vmax.bf16 %v7113_v38, %v6621_v8  ;;  %v12689_v22 = vpop.f32.mrf.mxu0  ;;  %6287 = vmatprep.mubr.bf16.mxu1 %v13920_v27 }
 0x3c4   : > { %14077 = vst [vmem:[#allocation92_spill] sm:$0xff] %v12689_v22  ;;  %v6041_v41 = vpop.f32.mrf.mxu1 }
 0x3c5   : > { %v12692_v46 = vpop.f32.mrf.mxu0 }
 0x3c6   : > { %14078 = vst [vmem:[#allocation93_spill] sm:$0xff] %v12692_v46  ;;  %v6043_v25 = vpop.f32.mrf.mxu1 }
 0x3c7   : > { %v6622_v9 = vpack.c.bf16 %v6043_v25, %v6039_v47  ;;  %v12700_v38 = vpop.f32.mrf.mxu0 }
 0x3c8   : > { %14079 = vst [vmem:[#allocation94_spill] sm:$0xff] %v12700_v38  ;;  %v6045_v8 = vpop.f32.mrf.mxu1 }
 0x3c9   : > { %v7102_v56 = vmax.bf16 %v7101_v4, %v6622_v9  ;;  %v6623_v63 = vpack.c.bf16 %v6045_v8, %v6041_v41  ;;  %v12702_v48 = vpop.f32.mrf.mxu0  ;;  %8761 = vmatmul.mubr.msk.bf16.gmra.mxu0 %vm1575_vm6, %v9490_v21  ;;  %v7495_v41 = vpop.permute.xlu1 %7494 }
 0x3ca   : > { %14080 = vst [vmem:[#allocation95_spill] sm:$0xff] %v12702_v48  ;;  %v6049_v58 = vpop.f32.mrf.mxu1  ;;  %8920 = vmatmul.mubr.msk.bf16.gmra.mxu1 %vm5494_vm7, %v9491_v3  ;;  %4225 = vmatprep.mubr.bf16.mxu0 %v13920_v27  ;;  %v9492_v3 = vld [vmem:[%s13884_s3 + $0x158] ss:$12 sps:$4 sm:$0xff]  }
 0x3cb   : > { %v7103_v11 = vunpack.i.l.bf16 %v7102_v56  ;;  %v7104_v7 = vunpack.i.h.bf16 %v7102_v56  ;;  %v7115_v59 = vmax.bf16 %v7114_v33, %v6623_v63  ;;  %v12709_v47 = vpop.f32.mrf.mxu0  ;;  %6297 = vmatprep.mubr.bf16.mxu1 %v13920_v27  ;;  %v9493_v33 = vld [vmem:[%s13885_s4 + $0x1a8] sm:$0xff]  }
 0x3cc   : > { %14081 = vst [vmem:[#allocation96_spill] sm:$0xff] %v12709_v47  ;;  %v6051_v4 = vpop.f32.mrf.mxu1 }
 0x3cd   : > { %v7105_v25 = vmax.f32 %v7103_v11, %v7104_v7  ;;  %v7116_v9 = vunpack.i.l.bf16 %v7115_v59  ;;  %v7117_v8 = vunpack.i.h.bf16 %v7115_v59  ;;  %v12712_v21 = vpop.f32.mrf.mxu0  ;;  %v7486_v11 = vpop.permute.xlu0 %7485 }
 0x3ce   : > { %14082 = vst [vmem:[#allocation97_spill] sm:$0xff] %v12712_v21  ;;  %v6053_v48 = vpop.f32.mrf.mxu1 }
 0x3cf   : > { %v7106_v56 = vrot.slane %v7105_v25, 4  ;;  %v7118_v63 = vmax.f32 %v7116_v9, %v7117_v8  ;;  %v6624_v47 = vpack.c.bf16 %v6053_v48, %v6049_v58  ;;  %v12720_v38 = vpop.f32.mrf.mxu0  ;;  %v7501_v9 = vsel %vm5494_vm7, %v7495_v41, %v7497_v54  ;;  %v12728_v48 = vpop.permute.xlu1 %7487  ;;  %v9494_v41 = vld [vmem:[%s13884_s3 + $0x170] ss:$12 sps:$4 sm:$0xff]  }
 0x3d0   : > { %14083 = vst [vmem:[#allocation98_spill] sm:$0xff] %v12720_v38  ;;  %v6055_v22 = vpop.f32.mrf.mxu1 }
 0x3d1   : > { %v7107_v7 = vmax.f32 %v7105_v25, %v7106_v56  ;;  %v7119_v59 = vrot.slane %v7118_v63, 4  ;;  %v6625_v21 = vpack.c.bf16 %v6055_v22, %v6051_v4  ;;  %v12722_v46 = vpop.f32.mrf.mxu0  ;;  %8762 = vmatmul.mubr.msk.bf16.gmra.mxu0 %vm1575_vm6, %v9492_v3  ;;  %v7502_v4 = vsel %vm5494_vm7, %v7497_v54, %v12707_v57  ;;  %v7484_v54 = vpop.permute.xlu0 %7483 }
 0x3d2   : > { %14084 = vst [vmem:[#allocation99_spill] sm:$0xff] %v12722_v46  ;;  %v6059_v12 = vpop.f32.mrf.mxu1  ;;  %8921 = vmatmul.mubr.msk.bf16.gmra.mxu1 %vm5494_vm7, %v9493_v33  ;;  %4235 = vmatprep.mubr.bf16.mxu0 %v13920_v27  ;;  %v12737_v25 = vsel %vm7489_vm5, %v7486_v11, %v12728_v48 }
 0x3d3   : > { %v7108_v58 = vrot.slane %v7107_v7, 2  ;;  %v7120_v8 = vmax.f32 %v7118_v63, %v7119_v59  ;;  %v12730_v38 = vpop.f32.mrf.mxu0  ;;  %6307 = vmatprep.mubr.bf16.mxu1 %v13920_v27  ;;  %7639 = vmatprep.subr.bf16.mxu0 %v7502_v4  ;;  %v9495_v59 = vld [vmem:[%s13885_s4 + $0x1b0] sm:$0xff]  }
 0x3d4   : > { %14085 = vst [vmem:[#allocation100_spill] sm:$0xff] %v12730_v38  ;;  %v6061_v22 = vpop.f32.mrf.mxu1  ;;  %7640 = vmatpush1.bf16.msra.mxu0 %v7501_v9 }
 0x3d5   : > { %v7109_v3 = vmax.f32 %v7107_v7, %v7108_v58  ;;  %v7121_v33 = vrot.slane %v7120_v8, 2  ;;  %v12739_v56 = vpop.f32.mrf.mxu0  ;;  %7641 = vmatprep.subr.bf16.mxu0 %v12737_v25  ;;  %v7490_v7 = vsel %vm7489_vm5, %v7484_v54, %v7486_v11 }
 0x3d6   : > { %14086 = vst [vmem:[#allocation101_spill] sm:$0xff] %v12739_v56  ;;  %v6063_v63 = vpop.f32.mrf.mxu1 }
 0x3d7   : > { %v7110_v38 = vrot.slane %v7109_v3, 1  ;;  %v7122_v46 = vmax.f32 %v7120_v8, %v7121_v33  ;;  %v6626_v17 = vpack.c.bf16 %v6063_v63, %v6059_v12  ;;  %v12747_v20 = vpop.f32.mrf.mxu0 }
 0x3d8   : > { %14087 = vst [vmem:[#allocation102_spill] sm:$0xff] %v12747_v20  ;;  %v6065_v58 = vpop.f32.mrf.mxu1  ;;  %7642 = vmatpush1.bf16.msra.mxu0 %v7490_v7  ;;  %v9578_v7 = vld [vmem:[%s10966_s24] ss:$16 sps:$4 sm:$0xff]  }
 0x3d9   : > { %v7111_v56 = vmax.f32 %v7109_v3, %v7110_v38  ;;  %v7123_v50 = vrot.slane %v7122_v46, 1  ;;  %v7126_v42 = vmax.bf16 %v6626_v17, %v6624_v47  ;;  %v6627_v18 = vpack.c.bf16 %v6065_v58, %v6061_v22  ;;  %v12751_v6 = vpop.f32.mrf.mxu0  ;;  %8763 = vmatmul.mubr.msk.bf16.gmra.mxu0 %vm1575_vm6, %v9494_v41  ;;  %v7569_v17 = vpop.permute.xlu1 %7568  ;;  %v12760_v47 = vld [vmem:[%s10966_s24 + $0x4] ss:$16 sps:$4 sm:$0xff]  }
 0x3da   : > { %14088 = vst [vmem:[#allocation103_spill] sm:$0xff] %v12751_v6  ;;  %v6069_v9 = vpop.f32.mrf.mxu1  ;;  %8922 = vmatmul.mubr.msk.bf16.gmra.mxu1 %vm5494_vm7, %v9495_v59  ;;  %4245 = vmatprep.mubr.bf16.mxu0 %v13920_v27 }
 0x3db   : > { %v7112_v12 = vpack.i.bf16 %v7111_v56, %v7111_v56  ;;  %v7124_v8 = vmax.f32 %v7122_v46, %v7123_v50  ;;  %v7139_v33 = vmax.bf16 %v6627_v18, %v6625_v21  ;;  %v12756_v63 = vpop.f32.mrf.mxu0  ;;  %6317 = vmatprep.mubr.bf16.mxu1 %v13920_v27  ;;  %7643 = vmatprep.subr.bf16.mxu0 %v12760_v47  ;;  %v9496_v18 = vld [vmem:[%s13884_s3 + $0x188] ss:$12 sps:$4 sm:$0xff]   ;;  %v9497_v21 = vld [vmem:[%s13885_s4 + $0x1b8] sm:$0xff]  }
 0x3dc   : > { %14089 = vst [vmem:[#allocation104_spill] sm:$0xff] %v12756_v63  ;;  %v6071_v38 = vpop.f32.mrf.mxu1  ;;  %v7570_v50 = vsel %vm5494_vm7, %v12707_v57, %v7569_v17  ;;  %7644 = vmatpush1.bf16.msra.mxu0 %v9578_v7 }
 0x3dd   : > { %v7946_v11 = vunpack.c.l.b16 %v7112_v12  ;;  %v7125_v22 = vpack.i.bf16 %v7124_v8, %v7124_v8  ;;  %v12763_v3 = vpop.f32.mrf.mxu0  ;;  %7655 = vmatprep.subr.bf16.mxu0 %v7570_v50 }
 0x3de   : > { %14090 = vst [vmem:[#allocation105_spill] sm:$0xff] %v12763_v3  ;;  %v6073_v46 = vpop.f32.mrf.mxu1 }
 0x3df   : > { %v12775_v56 = vsel %vm2473_vm9, %v7946_v11, %v12675_v29  ;;  %v7947_v41 = vunpack.c.l.b16 %v7125_v22  ;;  %v6628_v59 = vpack.c.bf16 %v6073_v46, %v6069_v9  ;;  %v12777_v54 = vpop.f32.mrf.mxu0 }
 0x3e0   : > { %14091 = vst [vmem:[#allocation106_spill] sm:$0xff] %v12777_v54  ;;  %v6075_v58 = vpop.f32.mrf.mxu1  ;;  %7656 = vmatpush2.bf16.msra.mxu0 %v7502_v4 }
 0x3e1   : > { %v12782_v57 = vsel %vm2473_vm9, %v7947_v41, %v12682_v14  ;;  %v7127_v12 = vmax.bf16 %v7126_v42, %v6628_v59  ;;  %v6629_v8 = vpack.c.bf16 %v6075_v58, %v6071_v38  ;;  %v12784_v17 = vpop.f32.mrf.mxu0  ;;  %8764 = vmatmul.mubr.msk.bf16.gmra.mxu0 %vm1575_vm6, %v9496_v18  ;;  %v9498_v42 = vld [vmem:[%s13884_s3 + $0x1a0] ss:$12 sps:$4 sm:$0xff]  }
 0x3e2   : > { %14092 = vst [vmem:[#allocation107_spill] sm:$0xff] %v12784_v17  ;;  %v6079_v29 = vpop.f32.mrf.mxu1  ;;  %8923 = vmatmul.mubr.msk.bf16.gmra.mxu1 %vm5494_vm7, %v9497_v21  ;;  %4255 = vmatprep.mubr.bf16.mxu0 %v13920_v27  ;;  %v9499_v18 = vld [vmem:[%s13885_s4 + $0x1c0] sm:$0xff]  }
 0x3e3   : > { %v7140_v9 = vmax.bf16 %v7139_v33, %v6629_v8  ;;  %v12789_v11 = vpop.f32.mrf.mxu0  ;;  %6327 = vmatprep.mubr.bf16.mxu1 %v13920_v27 }
 0x3e4   : > { %14093 = vst [vmem:[#allocation108_spill] sm:$0xff] %v12789_v11  ;;  %v6081_v22 = vpop.f32.mrf.mxu1 }
 0x3e5   : > { %v12792_v14 = vpop.f32.mrf.mxu0 }
 0x3e6   : > { %14094 = vst [vmem:[#allocation109_spill] sm:$0xff] %v12792_v14  ;;  %v6083_v38 = vpop.f32.mrf.mxu1 }
 0x3e7   : > { %v6630_v50 = vpack.c.bf16 %v6083_v38, %v6079_v29  ;;  %v12800_v46 = vpop.f32.mrf.mxu0 }
 0x3e8   : > { %14095 = vst [vmem:[#allocation110_spill] sm:$0xff] %v12800_v46  ;;  %v6085_v33 = vpop.f32.mrf.mxu1 }
 0x3e9   : > { %v7128_v21 = vmax.bf16 %v7127_v12, %v6630_v50  ;;  %v6631_v41 = vpack.c.bf16 %v6085_v33, %v6081_v22  ;;  %v12802_v59 = vpop.f32.mrf.mxu0  ;;  %8765 = vmatmul.mubr.msk.bf16.gmra.mxu0 %vm1575_vm6, %v9498_v42  ;;  %v9500_v42 = vld [vmem:[%s13884_s3 + $0x1b8] ss:$12 sps:$4 sm:$0xff]   ;;  %v9501_v33 = vld [vmem:[%s13885_s4 + $0x1c8] sm:$0xff]  }
 0x3ea   : > { %14096 = vst [vmem:[#allocation111_spill] sm:$0xff] %v12802_v59  ;;  %v6089_v4 = vpop.f32.mrf.mxu1  ;;  %8924 = vmatmul.mubr.msk.bf16.gmra.mxu1 %vm5494_vm7, %v9499_v18  ;;  %4265 = vmatprep.mubr.bf16.mxu0 %v13920_v27 }
 0x3eb   : > { %v7129_v7 = vunpack.i.l.bf16 %v7128_v21  ;;  %v7130_v58 = vunpack.i.h.bf16 %v7128_v21  ;;  %v7141_v8 = vmax.bf16 %v7140_v9, %v6631_v41  ;;  %v12807_v11 = vpop.f32.mrf.mxu0  ;;  %6337 = vmatprep.mubr.bf16.mxu1 %v13920_v27 }
 0x3ec   : > { %14097 = vst [vmem:[#allocation112_spill] sm:$0xff] %v12807_v11  ;;  %v6091_v29 = vpop.f32.mrf.mxu1 }
 0x3ed   : > { %v7131_v38 = vmax.f32 %v7129_v7, %v7130_v58  ;;  %v7142_v12 = vunpack.i.l.bf16 %v7141_v8  ;;  %v7143_v22 = vunpack.i.h.bf16 %v7141_v8  ;;  %v12810_v50 = vpop.f32.mrf.mxu0 }
 0x3ee   : > { %14098 = vst [vmem:[#allocation113_spill] sm:$0xff] %v12810_v50  ;;  %v6093_v18 = vpop.f32.mrf.mxu1 }
 0x3ef   : > { %v7132_v9 = vrot.slane %v7131_v38, 4  ;;  %v7144_v21 = vmax.f32 %v7142_v12, %v7143_v22  ;;  %v6632_v41 = vpack.c.bf16 %v6093_v18, %v6089_v4  ;;  %v12818_v11 = vpop.f32.mrf.mxu0 }
 0x3f0   : > { %14099 = vst [vmem:[#allocation114_spill] sm:$0xff] %v12818_v11  ;;  %v6095_v59 = vpop.f32.mrf.mxu1 }
 0x3f1   : > { %v7133_v7 = vmax.f32 %v7131_v38, %v7132_v9  ;;  %v7145_v58 = vrot.slane %v7144_v21, 4  ;;  %v6633_v8 = vpack.c.bf16 %v6095_v59, %v6091_v29  ;;  %v12820_v46 = vpop.f32.mrf.mxu0  ;;  %8766 = vmatmul.mubr.msk.bf16.gmra.mxu0 %vm1575_vm6, %v9500_v42  ;;  %v9502_v59 = vld [vmem:[%s13884_s3 + $0x1d0] ss:$12 sps:$4 sm:$0xff]  }
 0x3f2   : > { %14100 = vst [vmem:[#allocation115_spill] sm:$0xff] %v12820_v46  ;;  %v6099_v50 = vpop.f32.mrf.mxu1  ;;  %8925 = vmatmul.mubr.msk.bf16.gmra.mxu1 %vm5494_vm7, %v9501_v33  ;;  %4275 = vmatprep.mubr.bf16.mxu0 %v13920_v27  ;;  %v9503_v42 = vld [vmem:[%s13885_s4 + $0x1d0] sm:$0xff]  }
 0x3f3   : > { %v7134_v14 = vrot.slane %v7133_v7, 2  ;;  %v7146_v17 = vmax.f32 %v7144_v21, %v7145_v58  ;;  %v12825_v54 = vpop.f32.mrf.mxu0  ;;  %6347 = vmatprep.mubr.bf16.mxu1 %v13920_v27 }
 0x3f4   : > { %14101 = vst [vmem:[#allocation116_spill] sm:$0xff] %v12825_v54  ;;  %v6101_v4 = vpop.f32.mrf.mxu1 }
 0x3f5   : > { %v7135_v12 = vmax.f32 %v7133_v7, %v7134_v14  ;;  %v7147_v38 = vrot.slane %v7146_v17, 2  ;;  %v12828_v22 = vpop.f32.mrf.mxu0 }
 0x3f6   : > { %14102 = vst [vmem:[#allocation117_spill] sm:$0xff] %v12828_v22  ;;  %v6103_v29 = vpop.f32.mrf.mxu1 }
 0x3f7   : > { %v7136_v18 = vrot.slane %v7135_v12, 1  ;;  %v7148_v33 = vmax.f32 %v7146_v17, %v7147_v38  ;;  %v6634_v9 = vpack.c.bf16 %v6103_v29, %v6099_v50  ;;  %v12836_v21 = vpop.f32.mrf.mxu0  ;;  %v7565_v38 = vpop.permute.xlu0 %7564 }
 0x3f8   : > { %14103 = vst [vmem:[#allocation118_spill] sm:$0xff] %v12836_v21  ;;  %v6105_v58 = vpop.f32.mrf.mxu1 }
 0x3f9   : > { %v7137_v54 = vmax.f32 %v7135_v12, %v7136_v18  ;;  %v7149_v14 = vrot.slane %v7148_v33, 1  ;;  %v7152_v7 = vmax.bf16 %v6634_v9, %v6632_v41  ;;  %v6635_v46 = vpack.c.bf16 %v6105_v58, %v6101_v4  ;;  %v12838_v22 = vpop.f32.mrf.mxu0  ;;  %8767 = vmatmul.mubr.msk.bf16.gmra.mxu0 %vm1575_vm6, %v9502_v59  ;;  %v9504_v59 = vld [vmem:[%s13884_s3 + $0x1e8] ss:$12 sps:$4 sm:$0xff]  }
 0x3fa   : > { %14104 = vst [vmem:[#allocation119_spill] sm:$0xff] %v12838_v22  ;;  %v6109_v11 = vpop.f32.mrf.mxu1  ;;  %8926 = vmatmul.mubr.msk.bf16.gmra.mxu1 %vm5494_vm7, %v9503_v42  ;;  %4285 = vmatprep.mubr.bf16.mxu0 %v13920_v27 }
 0x3fb   : > { %v7138_v63 = vpack.i.bf16 %v7137_v54, %v7137_v54  ;;  %v7150_v3 = vmax.f32 %v7148_v33, %v7149_v14  ;;  %v7165_v17 = vmax.bf16 %v6635_v46, %v6633_v8  ;;  %v12843_v50 = vpop.f32.mrf.mxu0  ;;  %6357 = vmatprep.mubr.bf16.mxu1 %v13920_v27  ;;  %v9505_v54 = vld [vmem:[%s13885_s4 + $0x1d8] sm:$0xff]   ;;  %v7566_v46 = vsel %vm7489_vm5, %v12728_v48, %v7565_v38 }
 0x3fc   : > { %14105 = vst [vmem:[#allocation120_spill] sm:$0xff] %v12843_v50  ;;  %v6111_v12 = vpop.f32.mrf.mxu1  ;;  %7657 = vmatprep.subr.bf16.mxu0 %v7566_v46  ;;  %v9579_v48 = vld [vmem:[%s10966_s24 + $0x8] ss:$16 sps:$4 sm:$0xff]   ;;  %s8354_s24 = sshll.u32 %s13807_s18, 4  ;;  %s13818_s24 = int_to_ptr.vmem [resolvable:$true] %s8354_s24 }
 0x3fd   : > { %v7948_v41 = vunpack.c.l.b16 %v7138_v63  ;;  %v7151_v4 = vpack.i.bf16 %v7150_v3, %v7150_v3  ;;  %v12846_v29 = vpop.f32.mrf.mxu0  ;;  %7658 = vmatpush2.bf16.msra.mxu0 %v12737_v25  ;;  %s9580_s0 = scalar_lea.vmem %s13818_s24, 1024  ;;  %p9587_p4 = scmp.lt.s32.totalorder %s13818_s24, %s9585_s19 }
 0x3fe   : > { %14106 = vst [vmem:[#allocation121_spill] sm:$0xff] %v12846_v29  ;;  %v6113_v42 = vpop.f32.mrf.mxu1  ;;  %7659 = vmatprep.subr.bf16.mxu0 %v9579_v48  ;;  %p9581_p0 = scmp.ne.s32.totalorder %s13818_s24, %s9580_s0  ;;  %p9588_p5 = scmp.lt.s32.totalorder %s9586_s17, %s9580_s0 }
 0x3ff   : > { %v12858_v8 = vsel %vm2475_vm10, %v7948_v41, %v12775_v56  ;;  %v7949_v63 = vunpack.c.l.b16 %v7151_v4  ;;  %v6636_v3 = vpack.c.bf16 %v6113_v42, %v6109_v11  ;;  %v12860_v18 = vpop.f32.mrf.mxu0  ;;  %v9507_v41 = vld [vmem:[%s13885_s4 + $0x1e0] sm:$0xff]  }
 0x400   : > { %14107 = vst [vmem:[#allocation122_spill] sm:$0xff] %v12860_v18  ;;  %v6115_v33 = vpop.f32.mrf.mxu1  ;;  %p9582_p1 = pnand %p9581_p0, %p9792_p3  ;;  %p9589_p6 = por %p9588_p5, %p9587_p4 }
 0x401   : > { %v12865_v9 = vsel %vm2475_vm10, %v7949_v63, %v12782_v57  ;;  %v7153_v58 = vmax.bf16 %v7152_v7, %v6636_v3  ;;  %v6637_v14 = vpack.c.bf16 %v6115_v33, %v6111_v12  ;;  %v12867_v50 = vpop.f32.mrf.mxu0  ;;  %8768 = vmatmul.mubr.msk.bf16.gmra.mxu0 %vm1575_vm6, %v9504_v59  ;;  %v9506_v7 = vld [vmem:[%s13884_s3 + $0x200] ss:$12 sps:$4 sm:$0xff]  }
 0x402   : > { %14108 = vst [vmem:[#allocation123_spill] sm:$0xff] %v12867_v50  ;;  %v6119_v56 = vpop.f32.mrf.mxu1  ;;  %8927 = vmatmul.mubr.msk.bf16.gmra.mxu1 %vm5494_vm7, %v9505_v54  ;;  %4295 = vmatprep.mubr.bf16.mxu0 %v13920_v27  ;;  %p9583_p2 = pneg %p9582_p1 }
 0x403   : > { %v7166_v11 = vmax.bf16 %v7165_v17, %v6637_v14  ;;  %v12873_v38 = vpop.f32.mrf.mxu0  ;;  %6367 = vmatprep.mubr.bf16.mxu1 %v13920_v27  ;;  %7660 = vmatpush2.bf16.msra.mxu0 %v12760_v47 }
 0x404   : > { %14109 = vst [vmem:[#allocation124_spill] sm:$0xff] %v12873_v38  ;;  %v6121_v25 = vpop.f32.mrf.mxu1  ;;  %p9590_p7 = pnand %p9589_p6, %p9583_p2 }
 0x405   : > { %v12877_v57 = vpop.f32.mrf.mxu0 }
 0x406   : > { %14110 = vst [vmem:[#allocation125_spill] sm:$0xff] %v12877_v57  ;;  %v6123_v12 = vpop.f32.mrf.mxu1 }
 0x407   : > { %v6638_v4 = vpack.c.bf16 %v6123_v12, %v6119_v56  ;;  %v12885_v17 = vpop.f32.mrf.mxu0 }
 0x408   : > { %14111 = vst [vmem:[#allocation126_spill] sm:$0xff] %v12885_v17  ;;  %v6125_v59 = vpop.f32.mrf.mxu1 }
 0x409   : > { %v7154_v42 = vmax.bf16 %v7153_v58, %v6638_v4  ;;  %v6639_v54 = vpack.c.bf16 %v6125_v59, %v6121_v25  ;;  %v12887_v46 = vpop.f32.mrf.mxu0  ;;  %8769 = vmatmul.mubr.msk.bf16.gmra.mxu0 %vm1575_vm6, %v9506_v7  ;;  %v9508_v7 = vld [vmem:[%s13884_s3 + $0x218] ss:$12 sps:$4 sm:$0xff]   ;;  %v9509_v4 = vld [vmem:[%s13885_s4 + $0x1e8] sm:$0xff]  }
 0x40a   : > { %14112 = vst [vmem:[#allocation127_spill] sm:$0xff] %v12887_v46  ;;  %v6129_v47 = vpop.f32.mrf.mxu1  ;;  %8928 = vmatmul.mubr.msk.bf16.gmra.mxu1 %vm5494_vm7, %v9507_v41  ;;  %4305 = vmatprep.mubr.bf16.mxu0 %v13920_v27 }
 0x40b   : > { %v7155_v63 = vunpack.i.l.bf16 %v7154_v42  ;;  %v7156_v3 = vunpack.i.h.bf16 %v7154_v42  ;;  %v7167_v33 = vmax.bf16 %v7166_v11, %v6639_v54  ;;  %v12892_v14 = vpop.f32.mrf.mxu0  ;;  %6377 = vmatprep.mubr.bf16.mxu1 %v13920_v27 }
 0x40c   : > { %14113 = vst [vmem:[#allocation128_spill] sm:$0xff] %v12892_v14  ;;  %v6131_v48 = vpop.f32.mrf.mxu1 }
 0x40d   : > { %v7157_v56 = vmax.f32 %v7155_v63, %v7156_v3  ;;  %v7168_v58 = vunpack.i.l.bf16 %v7167_v33  ;;  %v7169_v25 = vunpack.i.h.bf16 %v7167_v33  ;;  %v12895_v12 = vpop.f32.mrf.mxu0 }
 0x40e   : > { %14114 = vst [vmem:[#allocation129_spill] sm:$0xff] %v12895_v12  ;;  %v6133_v41 = vpop.f32.mrf.mxu1 }
 0x40f   : > { %v7158_v11 = vrot.slane %v7157_v56, 4  ;;  %v7170_v59 = vmax.f32 %v7168_v58, %v7169_v25  ;;  %v6640_v42 = vpack.c.bf16 %v6133_v41, %v6129_v47  ;;  %v12903_v54 = vpop.f32.mrf.mxu0 }
 0x410   : > { %14115 = vst [vmem:[#allocation130_spill] sm:$0xff] %v12903_v54  ;;  %v6135_v14 = vpop.f32.mrf.mxu1 }
 0x411   : > { %v7159_v63 = vmax.f32 %v7157_v56, %v7158_v11  ;;  %v7171_v3 = vrot.slane %v7170_v59, 4  ;;  %v6641_v33 = vpack.c.bf16 %v6135_v14, %v6131_v48  ;;  %v12905_v46 = vpop.f32.mrf.mxu0  ;;  %8770 = vmatmul.mubr.msk.bf16.gmra.mxu0 %vm1575_vm6, %v9508_v7  ;;  %v9510_v14 = vld [vmem:[%s13884_s3 + $0x230] ss:$12 sps:$4 sm:$0xff]  }
 0x412   : > { %14116 = vst [vmem:[#allocation131_spill] sm:$0xff] %v12905_v46  ;;  %v6139_v12 = vpop.f32.mrf.mxu1  ;;  %8929 = vmatmul.mubr.msk.bf16.gmra.mxu1 %vm5494_vm7, %v9509_v4  ;;  %4315 = vmatprep.mubr.bf16.mxu0 %v13920_v27  ;;  %v9511_v7 = vld [vmem:[%s13885_s4 + $0x1f0] sm:$0xff]  }
 0x413   : > { %v7160_v17 = vrot.slane %v7159_v63, 2  ;;  %v7172_v38 = vmax.f32 %v7170_v59, %v7171_v3  ;;  %v12910_v57 = vpop.f32.mrf.mxu0  ;;  %6387 = vmatprep.mubr.bf16.mxu1 %v13920_v27 }
 0x414   : > { %14117 = vst [vmem:[#allocation132_spill] sm:$0xff] %v12910_v57  ;;  %v6141_v47 = vpop.f32.mrf.mxu1 }
 0x415   : > { %v7161_v58 = vmax.f32 %v7159_v63, %v7160_v17  ;;  %v7173_v56 = vrot.slane %v7172_v38, 2  ;;  %v12913_v25 = vpop.f32.mrf.mxu0 }
 0x416   : > { %14118 = vst [vmem:[#allocation133_spill] sm:$0xff] %v12913_v25  ;;  %v6143_v48 = vpop.f32.mrf.mxu1 }
 0x417   : > { %v7162_v41 = vrot.slane %v7161_v58, 1  ;;  %v7174_v4 = vmax.f32 %v7172_v38, %v7173_v56  ;;  %v6642_v11 = vpack.c.bf16 %v6143_v48, %v6139_v12  ;;  %v12921_v59 = vpop.f32.mrf.mxu0 }
 0x418   : > { %14119 = vst [vmem:[#allocation134_spill] sm:$0xff] %v12921_v59  ;;  %v6145_v3 = vpop.f32.mrf.mxu1 }
 0x419   : > { %v7163_v57 = vmax.f32 %v7161_v58, %v7162_v41  ;;  %v7175_v17 = vrot.slane %v7174_v4, 1  ;;  %v7178_v63 = vmax.bf16 %v6642_v11, %v6640_v42  ;;  %v6643_v46 = vpack.c.bf16 %v6145_v3, %v6141_v47  ;;  %v12923_v25 = vpop.f32.mrf.mxu0  ;;  %8771 = vmatmul.mubr.msk.bf16.gmra.mxu0 %vm1575_vm6, %v9510_v14  ;;  %v9512_v14 = vld [vmem:[%s13884_s3 + $0x248] ss:$12 sps:$4 sm:$0xff]  }
 0x41a   : > { %14120 = vst [vmem:[#allocation135_spill] sm:$0xff] %v12923_v25  ;;  %v6149_v54 = vpop.f32.mrf.mxu1  ;;  %8930 = vmatmul.mubr.msk.bf16.gmra.mxu1 %vm5494_vm7, %v9511_v7  ;;  %4325 = vmatprep.mubr.bf16.mxu0 %v13920_v27 }
 0x41b   : > { %v7164_v50 = vpack.i.bf16 %v7163_v57, %v7163_v57  ;;  %v7176_v18 = vmax.f32 %v7174_v4, %v7175_v17  ;;  %v7191_v38 = vmax.bf16 %v6643_v46, %v6641_v33  ;;  %v12928_v12 = vpop.f32.mrf.mxu0  ;;  %6397 = vmatprep.mubr.bf16.mxu1 %v13920_v27  ;;  %v9513_v57 = vld [vmem:[%s13885_s4 + $0x1f8] sm:$0xff]  }
 0x41c   : > { %14121 = vst [vmem:[#allocation136_spill] sm:$0xff] %v12928_v12  ;;  %v6151_v58 = vpop.f32.mrf.mxu1 }
 0x41d   : > { %v7950_v56 = vunpack.c.l.b16 %v7164_v50  ;;  %v7177_v42 = vpack.i.bf16 %v7176_v18, %v7176_v18  ;;  %v12931_v47 = vpop.f32.mrf.mxu0 }
 0x41e   : > { %14122 = vst [vmem:[#allocation137_spill] sm:$0xff] %v12931_v47  ;;  %v6153_v48 = vpop.f32.mrf.mxu1 }
 0x41f   : > { %v12941_v46 = vsel %vm7749_vm12, %v7950_v56, %v12858_v8  ;;  %v7951_v33 = vunpack.c.l.b16 %v7177_v42  ;;  %v6644_v7 = vpack.c.bf16 %v6153_v48, %v6149_v54  ;;  %v12943_v41 = vpop.f32.mrf.mxu0  ;;  %v9515_v48 = vld [vmem:[%s13885_s4 + $0x200] sm:$0xff]  }
 0x420   : > { %14123 = vst [vmem:[#allocation138_spill] sm:$0xff] %v12943_v41  ;;  %v6155_v50 = vpop.f32.mrf.mxu1 }
 0x421   : > { %v7179_v18 = vmax.bf16 %v7178_v63, %v6644_v7  ;;  %v6645_v4 = vpack.c.bf16 %v6155_v50, %v6151_v58  ;;  %v4087_v11 = vpop.f32.mrf.mxu0  ;;  %8772 = vmatmul.mubr.msk.bf16.gmra.mxu0 %vm1575_vm6, %v9512_v14  ;;  %v12948_v3 = vsel %vm7749_vm12, %v7951_v33, %v12865_v9  ;;  %v9514_v63 = vld [vmem:[%s13884_s3 + $0x260] ss:$12 sps:$4 sm:$0xff]  }
 0x422   : > { %14124 = vst [vmem:[#allocation139_spill] sm:$0xff] %v12948_v3  ;;  %v6159_v17 = vpop.f32.mrf.mxu1  ;;  %8931 = vmatmul.mubr.msk.bf16.gmra.mxu1 %vm5494_vm7, %v9513_v57  ;;  %4335 = vmatprep.mubr.bf16.mxu0 %v13920_v27  ;;  %v4088_v58 = vadd.f32 %v4087_v11, %v12184_v36 }
 0x423   : > { %v7192_v8 = vmax.bf16 %v7191_v38, %v6645_v4  ;;  %v4089_v56 = vpop.f32.mrf.mxu0  ;;  %6407 = vmatprep.mubr.bf16.mxu1 %v13920_v27 }
 0x424   : > { %v6161_v54 = vpop.f32.mrf.mxu1  ;;  %v4090_v33 = vadd.f32 %v4089_v56, %v12193_v34 }
 0x425   : > { %v4091_v42 = vpop.f32.mrf.mxu0 }
 0x426   : > { %v4092_v9 = vadd.f32 %v4091_v42, %v12206_v2  ;;  %v6163_v14 = vpop.f32.mrf.mxu1 }
 0x427   : > { %v6646_v57 = vpack.c.bf16 %v6163_v14, %v6159_v17  ;;  %v4093_v38 = vpop.f32.mrf.mxu0 }
 0x428   : > { %v4486_v7 = vpack.c.bf16 %v4092_v9, %v4088_v58  ;;  %v4094_v50 = vadd.f32 %v4093_v38, %v12219_v55  ;;  %v6165_v4 = vpop.f32.mrf.mxu1 }
 0x429   : > { %v7180_v41 = vmax.bf16 %v7179_v18, %v6646_v57  ;;  %v6647_v12 = vpack.c.bf16 %v6165_v4, %v6161_v54  ;;  %v4097_v47 = vpop.f32.mrf.mxu0  ;;  %8773 = vmatmul.mubr.msk.bf16.gmra.mxu0 %vm1575_vm6, %v9514_v63 }
 0x42a   : > { %v4566_v36 = vunpack.i.l.bf16 %v4486_v7  ;;  %v4567_v2 = vunpack.i.h.bf16 %v4486_v7  ;;  %v4487_v11 = vpack.c.bf16 %v4094_v50, %v4090_v33  ;;  %v12964_v42 = vpop.f32.mrf.mxu1  ;;  %8932 = vmatmul.mubr.msk.bf16.gmra.mxu1 %vm5494_vm7, %v9515_v48  ;;  %4345 = vmatprep.mubr.bf16.mxu0 %v13920_v27  ;;  %v9516_v48 = vld [vmem:[%s13884_s3 + $0x278] ss:$12 sps:$4 sm:$0xff]   ;;  %v9517_v50 = vld [vmem:[%s13885_s4 + $0x208] sm:$0xff]  }
 0x42b   : > { %v7181_v17 = vunpack.i.l.bf16 %v7180_v41  ;;  %v7182_v34 = vunpack.i.h.bf16 %v7180_v41  ;;  %v7193_v56 = vmax.bf16 %v7192_v8, %v6647_v12  ;;  %v4099_v58 = vpop.f32.mrf.mxu0  ;;  %6417 = vmatprep.mubr.bf16.mxu1 %v13920_v27  ;;  %v4098_v12 = vadd.f32 %v4097_v47, %v12225_v16 }
 0x42c   : > { %v4568_v55 = vmax.f32 %v4566_v36, %v4567_v2  ;;  %v4576_v18 = vunpack.i.l.bf16 %v4487_v11  ;;  %v4577_v54 = vunpack.i.h.bf16 %v4487_v11  ;;  %v12969_v9 = vpop.f32.mrf.mxu1 }
 0x42d   : > { %v7183_v63 = vmax.f32 %v7181_v17, %v7182_v34  ;;  %v7194_v14 = vunpack.i.l.bf16 %v7193_v56  ;;  %v7195_v57 = vunpack.i.h.bf16 %v7193_v56  ;;  %v4101_v38 = vpop.f32.mrf.mxu0 }
 0x42e   : > { %v4569_v33 = vrot.slane %v4568_v55, 4  ;;  %v4578_v7 = vmax.f32 %v4576_v18, %v4577_v54  ;;  %v4102_v41 = vadd.f32 %v4101_v38, %v12249_v43  ;;  %v6173_v8 = vpop.f32.mrf.mxu1  ;;  %v4100_v43 = vadd.f32 %v4099_v58, %v12238_v35 }
 0x42f   : > { %v7184_v4 = vrot.slane %v7183_v63, 4  ;;  %v7196_v36 = vmax.f32 %v7194_v14, %v7195_v57  ;;  %v6648_v2 = vpack.c.bf16 %v6173_v8, %v12964_v42  ;;  %v4103_v11 = vpop.f32.mrf.mxu0 }
 0x430   : > { %v4570_v17 = vmax.f32 %v4568_v55, %v4569_v33  ;;  %v4579_v34 = vrot.slane %v4578_v7, 4  ;;  %v4488_v56 = vpack.c.bf16 %v4102_v41, %v4098_v12  ;;  %v4104_v25 = vadd.f32 %v4103_v11, %v12259_v32  ;;  %v12981_v18 = vpop.f32.mrf.mxu1 }
 0x431   : > { %v7185_v16 = vmax.f32 %v7183_v63, %v7184_v4  ;;  %v7197_v47 = vrot.slane %v7196_v36, 4  ;;  %v4107_v38 = vpop.f32.mrf.mxu0  ;;  %8774 = vmatmul.mubr.msk.bf16.gmra.mxu0 %vm1575_vm6, %v9516_v48 }
 0x432   : > { %v4571_v14 = vrot.slane %v4570_v17, 2  ;;  %v4580_v42 = vmax.f32 %v4578_v7, %v4579_v34  ;;  %v4586_v57 = vunpack.i.l.bf16 %v4488_v56  ;;  %v4587_v55 = vunpack.i.h.bf16 %v4488_v56  ;;  %v6179_v33 = vpop.f32.mrf.mxu1  ;;  %8933 = vmatmul.mubr.msk.bf16.gmra.mxu1 %vm5494_vm7, %v9517_v50  ;;  %4355 = vmatprep.mubr.bf16.mxu0 %v13920_v27 }
 0x433   : > { %v7186_v32 = vrot.slane %v7185_v16, 2  ;;  %v7198_v63 = vmax.f32 %v7196_v36, %v7197_v47  ;;  %v4489_v12 = vpack.c.bf16 %v4104_v25, %v4100_v43  ;;  %v4109_v41 = vpop.f32.mrf.mxu0  ;;  %6427 = vmatprep.mubr.bf16.mxu1 %v13920_v27  ;;  %v4108_v48 = vadd.f32 %v4107_v38, %v12263_v31  ;;  %v9518_v36 = vld [vmem:[%s13884_s3 + $0x290] ss:$12 sps:$4 sm:$0xff]  }
 0x434   : > { %v4572_v35 = vmax.f32 %v4570_v17, %v4571_v14  ;;  %v4581_v58 = vrot.slane %v4580_v42, 2  ;;  %v4588_v8 = vmax.f32 %v4586_v57, %v4587_v55  ;;  %v12991_v4 = vpop.f32.mrf.mxu1  ;;  %v9519_v31 = vld [vmem:[%s13885_s4 + $0x210] sm:$0xff]  }
 0x435   : > { %v7187_v7 = vmax.f32 %v7185_v16, %v7186_v32  ;;  %v7199_v11 = vrot.slane %v7198_v63, 2  ;;  %v4596_v34 = vunpack.i.l.bf16 %v4489_v12  ;;  %v4597_v56 = vunpack.i.h.bf16 %v4489_v12  ;;  %v4111_v50 = vpop.f32.mrf.mxu0 }
 0x436   : > { %v4573_v25 = vrot.slane %v4572_v35, 1  ;;  %v4582_v47 = vmax.f32 %v4580_v42, %v4581_v58  ;;  %v4589_v43 = vrot.slane %v4588_v8, 4  ;;  %v4112_v17 = vadd.f32 %v4111_v50, %v12276_v53  ;;  %v6183_v14 = vpop.f32.mrf.mxu1 }
 0x437   : > { %v7188_v38 = vrot.slane %v7187_v7, 1  ;;  %v7200_v16 = vmax.f32 %v7198_v63, %v7199_v11  ;;  %v4598_v57 = vmax.f32 %v4596_v34, %v4597_v56  ;;  %v6650_v55 = vpack.c.bf16 %v6183_v14, %v6179_v33  ;;  %v4113_v32 = vpop.f32.mrf.mxu0  ;;  %v14125_v56 = vld [vmem:[#allocation11_spill] sm:$0xff] }
 0x438   : > { %v4574_v12 = vmax.f32 %v4572_v35, %v4573_v25  ;;  %v4583_v54 = vrot.slane %v4582_v47, 1  ;;  %v4590_v59 = vmax.f32 %v4588_v8, %v4589_v43  ;;  %v4490_v29 = vpack.c.bf16 %v4112_v17, %v4108_v48  ;;  %v6185_v22 = vpop.f32.mrf.mxu1 }
 0x439   : > { %v7189_v21 = vmax.f32 %v7187_v7, %v7188_v38  ;;  %v7201_v42 = vrot.slane %v7200_v16, 1  ;;  %v4599_v58 = vrot.slane %v4598_v57, 4  ;;  %v13000_v6 = vmax.bf16 %v6650_v55, %v6648_v2  ;;  %v4117_v53 = vpop.f32.mrf.mxu0  ;;  %8775 = vmatmul.mubr.msk.bf16.gmra.mxu0 %vm1575_vm6, %v9518_v36 }
 0x43a   : > { %v4575_v50 = vpack.i.bf16 %v4574_v12, %v4574_v12  ;;  %v4584_v20 = vmax.f32 %v4582_v47, %v4583_v54  ;;  %v4591_v3 = vrot.slane %v4590_v59, 2  ;;  %v4606_v63 = vunpack.i.l.bf16 %v4490_v29  ;;  %v6189_v11 = vpop.f32.mrf.mxu1  ;;  %8934 = vmatmul.mubr.msk.bf16.gmra.mxu1 %vm5494_vm7, %v9519_v31  ;;  %4365 = vmatprep.mubr.bf16.mxu0 %v13920_v27 }
 0x43b   : > { %v7190_v33 = vpack.i.bf16 %v7189_v21, %v7189_v21  ;;  %v13005_v35 = vmax.f32 %v7200_v16, %v7201_v42  ;;  %v4600_v8 = vmax.f32 %v4598_v57, %v4599_v58  ;;  %v4607_v48 = vunpack.i.h.bf16 %v4490_v29  ;;  %v4119_v7 = vpop.f32.mrf.mxu0  ;;  %6437 = vmatprep.mubr.bf16.mxu1 %v13920_v27  ;;  %v9520_v21 = vld [vmem:[%s13884_s3 + $0x2a8] ss:$12 sps:$4 sm:$0xff]  }
 0x43c   : > { %v4585_v2 = vpack.i.bf16 %v4584_v20, %v4584_v20  ;;  %v4592_v34 = vmax.f32 %v4590_v59, %v4591_v3  ;;  %v4110_v36 = vadd.f32 %v4109_v41, %v14125_v56  ;;  %v4114_v54 = vadd.f32 %v4113_v32, %v12290_v10  ;;  %v6191_v25 = vpop.f32.mrf.mxu1  ;;  %v9521_v10 = vld [vmem:[%s13885_s4 + $0x218] sm:$0xff]   ;;  %v14127_v56 = vld [vmem:[#allocation12_spill] sm:$0xff] }
 0x43d   : > { %v7730_v47 = vunpack.c.l.b16 %v4575_v50  ;;  %v7952_v43 = vunpack.c.l.b16 %v7190_v33  ;;  %v4601_v17 = vrot.slane %v4600_v8, 2  ;;  %v4608_v14 = vmax.f32 %v4606_v63, %v4607_v48  ;;  %v4121_v31 = vpop.f32.mrf.mxu0 }
 0x43e   : > { %v4593_v38 = vrot.slane %v4592_v34, 1  ;;  %v4491_v20 = vpack.c.bf16 %v4114_v54, %v4110_v36  ;;  %v6651_v59 = vpack.c.bf16 %v6185_v22, %v12991_v4  ;;  %v6193_v3 = vpop.f32.mrf.mxu1  ;;  %v7731_v16 = vunpack.c.l.b16 %v4585_v2  ;;  %v14128_v54 = vld [vmem:[#allocation13_spill] sm:$0xff] }
 0x43f   : > { %v13021_v41 = vsel %vm7751_vm13, %v7952_v43, %v12941_v46  ;;  %v4602_v57 = vmax.f32 %v4600_v8, %v4601_v17  ;;  %v4609_v55 = vrot.slane %v4608_v14, 4  ;;  %v4123_v32 = vpop.f32.mrf.mxu0  ;;  %v14126_v50 = vpack.c.bf16 %v12981_v18, %v12969_v9 }
 0x440   : > { %v4594_v12 = vmax.f32 %v4592_v34, %v4593_v38  ;;  %v4616_v42 = vunpack.i.l.bf16 %v4491_v20  ;;  %v4617_v58 = vunpack.i.h.bf16 %v4491_v20  ;;  %v6195_v4 = vpop.f32.mrf.mxu1  ;;  %v4118_v48 = vadd.f32 %v4117_v53, %v12294_v51 }
 0x441   : > { %v7217_v22 = vmax.bf16 %v6651_v59, %v14126_v50  ;;  %v4603_v63 = vrot.slane %v4602_v57, 1  ;;  %v4610_v33 = vmax.f32 %v4608_v14, %v4609_v55  ;;  %v4120_v36 = vadd.f32 %v4119_v7, %v14127_v56  ;;  %v4127_v46 = vpop.f32.mrf.mxu0  ;;  %8776 = vmatmul.mubr.msk.bf16.gmra.mxu0 %vm1575_vm6, %v9520_v21  ;;  %v14129_v56 = vld [vmem:[#allocation14_spill] sm:$0xff] }
 0x442   : > { %v4595_v8 = vpack.i.bf16 %v4594_v12, %v4594_v12  ;;  %v4618_v2 = vmax.f32 %v4616_v42, %v4617_v58  ;;  %v4122_v34 = vadd.f32 %v4121_v31, %v14128_v54  ;;  %v6652_v43 = vpack.c.bf16 %v6193_v3, %v6189_v11  ;;  %v6199_v17 = vpop.f32.mrf.mxu1  ;;  %8935 = vmatmul.mubr.msk.bf16.gmra.mxu1 %vm5494_vm7, %v9521_v10 }
 0x443   : > { %v4604_v9 = vmax.f32 %v4602_v57, %v4603_v63  ;;  %v4611_v18 = vrot.slane %v4610_v33, 2  ;;  %v4124_v38 = vadd.f32 %v4123_v32, %v12322_v60  ;;  %v6653_v14 = vpack.c.bf16 %v6195_v4, %v6191_v25  ;;  %v4129_v20 = vpop.f32.mrf.mxu0  ;;  %4375 = vmatprep.mubr.bf16.mxu0 %v13920_v27  ;;  %6447 = vmatprep.mubr.bf16.mxu1 %v13920_v27  ;;  %v9522_v60 = vld [vmem:[%s13884_s3 + $0x2c0] ss:$12 sps:$4 sm:$0xff]  }
 0x444   : > { %v7732_v51 = vunpack.c.l.b16 %v4595_v8  ;;  %v4619_v53 = vrot.slane %v4618_v2, 4  ;;  %v4492_v7 = vpack.c.bf16 %v4122_v34, %v4118_v48  ;;  %v7205_v21 = vmax.bf16 %v13000_v6, %v6652_v43  ;;  %v13035_v31 = vpop.f32.mrf.mxu1  ;;  %v9523_v6 = vld [vmem:[%s13885_s4 + $0x220] sm:$0xff]   ;;  %v14130_v8 = vld [vmem:[#allocation15_spill] sm:$0xff] }
 0x445   : > { %v4605_v11 = vpack.i.bf16 %v4604_v9, %v4604_v9  ;;  %v4612_v59 = vmax.f32 %v4610_v33, %v4611_v18  ;;  %v4493_v3 = vpack.c.bf16 %v4124_v38, %v4120_v36  ;;  %v13037_v10 = vmax.bf16 %v7217_v22, %v6653_v14  ;;  %v4131_v57 = vpop.f32.mrf.mxu0  ;;  %v14131_v9 = vld [vmem:[#allocation16_spill] sm:$0xff] }
 0x446   : > { %v7746_v25 = vsel %vm2471_vm8, %v7732_v51, %v7730_v47  ;;  %v4620_v55 = vmax.f32 %v4618_v2, %v4619_v53  ;;  %v4626_v32 = vunpack.i.l.bf16 %v4492_v7  ;;  %v4627_v12 = vunpack.i.h.bf16 %v4492_v7  ;;  %v6203_v42 = vpop.f32.mrf.mxu1  ;;  %v14132_v7 = vld [vmem:[#allocation17_spill] sm:$0xff] }
 0x447   : > { %v7733_v58 = vunpack.c.l.b16 %v4605_v11  ;;  %v4613_v50 = vrot.slane %v4612_v59, 1  ;;  %v4636_v4 = vunpack.i.l.bf16 %v4493_v3  ;;  %v4637_v22 = vunpack.i.h.bf16 %v4493_v3  ;;  %v4133_v63 = vpop.f32.mrf.mxu0 }
 0x448   : > { %v4621_v33 = vrot.slane %v4620_v55, 2  ;;  %v4628_v48 = vmax.f32 %v4626_v32, %v4627_v12  ;;  %v4128_v36 = vadd.f32 %v4127_v46, %v14129_v56  ;;  %v4130_v54 = vadd.f32 %v4129_v20, %v14130_v8  ;;  %v6205_v47 = vpop.f32.mrf.mxu1 }
 0x449   : > { %v13049_v2 = vsel %vm2471_vm8, %v7733_v58, %v7731_v16  ;;  %v4614_v34 = vmax.f32 %v4612_v59, %v4613_v50  ;;  %v4638_v43 = vmax.f32 %v4636_v4, %v4637_v22  ;;  %v4132_v18 = vadd.f32 %v4131_v57, %v14131_v9  ;;  %v4137_v38 = vpop.f32.mrf.mxu0  ;;  %8777 = vmatmul.mubr.msk.bf16.gmra.mxu0 %vm1575_vm6, %v9522_v60  ;;  %v9524_v22 = vld [vmem:[%s13884_s3 + $0x2d8] ss:$12 sps:$4 sm:$0xff]  }
 0x44a   : > { %v4622_v14 = vmax.f32 %v4620_v55, %v4621_v33  ;;  %v4629_v51 = vrot.slane %v4628_v48, 4  ;;  %v6654_v53 = vpack.c.bf16 %v6203_v42, %v6199_v17  ;;  %v4134_v11 = vadd.f32 %v4133_v63, %v14132_v7  ;;  %v13054_v3 = vpop.f32.mrf.mxu1  ;;  %8936 = vmatmul.mubr.msk.bf16.gmra.mxu1 %vm5494_vm7, %v9523_v6  ;;  %4385 = vmatprep.mubr.bf16.mxu0 %v13920_v27 }
 0x44b   : > { %v4615_v16 = vpack.i.bf16 %v4614_v34, %v4614_v34  ;;  %v4639_v46 = vrot.slane %v4638_v43, 4  ;;  %v4494_v20 = vpack.c.bf16 %v4132_v18, %v4128_v36  ;;  %v6655_v59 = vpack.c.bf16 %v6205_v47, %v13035_v31  ;;  %v4139_v57 = vpop.f32.mrf.mxu0  ;;  %6457 = vmatprep.mubr.bf16.mxu1 %v13920_v27 }
 0x44c   : > { %v4623_v60 = vrot.slane %v4622_v14, 1  ;;  %v4630_v55 = vmax.f32 %v4628_v48, %v4629_v51  ;;  %v7206_v32 = vmax.bf16 %v7205_v21, %v6654_v53  ;;  %v4495_v17 = vpack.c.bf16 %v4134_v11, %v4130_v54  ;;  %v13060_v12 = vpop.f32.mrf.mxu1  ;;  %v9525_v21 = vld [vmem:[%s13885_s4 + $0x228] sm:$0xff]  }
 0x44d   : > { %v7734_v42 = vunpack.c.l.b16 %v4615_v16  ;;  %v4640_v58 = vmax.f32 %v4638_v43, %v4639_v46  ;;  %v4646_v50 = vunpack.i.l.bf16 %v4494_v20  ;;  %v4647_v6 = vunpack.i.h.bf16 %v4494_v20  ;;  %v4141_v4 = vpop.f32.mrf.mxu0  ;;  %v14133_v16 = vld [vmem:[#allocation18_spill] sm:$0xff] }
 0x44e   : > { %v4624_v63 = vmax.f32 %v4622_v14, %v4623_v60  ;;  %v4631_v31 = vrot.slane %v4630_v55, 2  ;;  %v7207_v33 = vunpack.i.l.bf16 %v7206_v32  ;;  %v7208_v56 = vunpack.i.h.bf16 %v7206_v32  ;;  %v13065_v36 = vpop.f32.mrf.mxu1 }
 0x44f   : > { %v13071_v48 = vsel %vm2473_vm9, %v7734_v42, %v7746_v25  ;;  %v4641_v8 = vrot.slane %v4640_v58, 2  ;;  %v4648_v54 = vmax.f32 %v4646_v50, %v4647_v6  ;;  %v4656_v47 = vunpack.i.l.bf16 %v4495_v17  ;;  %v4143_v34 = vpop.f32.mrf.mxu0 }
 0x450   : > { %v4625_v43 = vpack.i.bf16 %v4624_v63, %v4624_v63  ;;  %v4632_v9 = vmax.f32 %v4630_v55, %v4631_v31  ;;  %v7209_v18 = vmax.f32 %v7207_v33, %v7208_v56  ;;  %v4657_v14 = vunpack.i.h.bf16 %v4495_v17  ;;  %v13073_v51 = vpop.f32.mrf.mxu1 }
 0x451   : > { %v4642_v53 = vmax.f32 %v4640_v58, %v4641_v8  ;;  %v4649_v7 = vrot.slane %v4648_v54, 4  ;;  %v7219_v11 = vmax.bf16 %v13037_v10, %v6655_v59  ;;  %v4138_v46 = vadd.f32 %v4137_v38, %v14133_v16  ;;  %v13077_v20 = vpop.f32.mrf.mxu0  ;;  %8778 = vmatmul.mubr.msk.bf16.gmra.mxu0 %vm1575_vm6, %v9524_v22  ;;  %v14134_v8 = vld [vmem:[#allocation19_spill] sm:$0xff]  ;;  %v14135_v16 = vld [vmem:[#allocation20_spill] sm:$0xff] }
 0x452   : > { %v7735_v25 = vunpack.c.l.b16 %v4625_v43  ;;  %v4633_v60 = vrot.slane %v4632_v9, 1  ;;  %v7210_v32 = vrot.slane %v7209_v18, 4  ;;  %v4658_v42 = vmax.f32 %v4656_v47, %v4657_v14  ;;  %v13080_v50 = vpop.f32.mrf.mxu1  ;;  %8937 = vmatmul.mubr.msk.bf16.gmra.mxu1 %vm5494_vm7, %v9525_v21  ;;  %4395 = vmatprep.mubr.bf16.mxu0 %v13920_v27  ;;  %v9526_v43 = vld [vmem:[%s13884_s3 + $0x2f0] ss:$12 sps:$4 sm:$0xff]  }
 0x453   : > { %v4643_v55 = vrot.slane %v4642_v53, 1  ;;  %v4650_v17 = vmax.f32 %v4648_v54, %v4649_v7  ;;  %v7220_v58 = vunpack.i.l.bf16 %v7219_v11  ;;  %v7221_v10 = vunpack.i.h.bf16 %v7219_v11  ;;  %v13084_v59 = vpop.f32.mrf.mxu0  ;;  %6467 = vmatprep.mubr.bf16.mxu1 %v13920_v27 }
 0x454   : > { %v7758_v38 = vsel %vm2473_vm9, %v7735_v25, %v13049_v2  ;;  %v4634_v6 = vmax.f32 %v4632_v9, %v4633_v60  ;;  %v7211_v22 = vmax.f32 %v7209_v18, %v7210_v32  ;;  %v4659_v63 = vrot.slane %v4658_v42, 4  ;;  %v13089_v31 = vpop.f32.mrf.mxu1  ;;  %v9527_v18 = vld [vmem:[%s13885_s4 + $0x230] sm:$0xff]  }
 0x455   : > { %v4644_v33 = vmax.f32 %v4642_v53, %v4643_v55  ;;  %v4651_v56 = vrot.slane %v4650_v17, 2  ;;  %v7222_v21 = vmax.f32 %v7220_v58, %v7221_v10  ;;  %v4140_v47 = vadd.f32 %v4139_v57, %v14134_v8  ;;  %v4151_v54 = vpop.f32.mrf.mxu0 }
 0x456   : > { %v4635_v14 = vpack.i.bf16 %v4634_v6, %v4634_v6  ;;  %v7212_v7 = vrot.slane %v7211_v22, 2  ;;  %v4660_v11 = vmax.f32 %v4658_v42, %v4659_v63  ;;  %v4142_v2 = vadd.f32 %v4141_v4, %v14135_v16  ;;  %v13096_v9 = vpop.f32.mrf.mxu1 }
 0x457   : > { %v4645_v53 = vpack.i.bf16 %v4644_v33, %v4644_v33  ;;  %v4652_v25 = vmax.f32 %v4650_v17, %v4651_v56  ;;  %v7223_v60 = vrot.slane %v7222_v21, 4  ;;  %v6656_v57 = vpack.c.bf16 %v13065_v36, %v13054_v3  ;;  %v4153_v32 = vpop.f32.mrf.mxu0 }
 0x458   : > { %v7736_v55 = vunpack.c.l.b16 %v4635_v14  ;;  %v7213_v58 = vmax.f32 %v7211_v22, %v7212_v7  ;;  %v4661_v10 = vrot.slane %v4660_v11, 2  ;;  %v4496_v6 = vpack.c.bf16 %v4142_v2, %v4138_v46  ;;  %v13103_v42 = vpop.f32.mrf.mxu1 }
 0x459   : > { %v7737_v4 = vunpack.c.l.b16 %v4645_v53  ;;  %v4653_v63 = vrot.slane %v4652_v25, 1  ;;  %v7224_v8 = vmax.f32 %v7222_v21, %v7223_v60  ;;  %v4144_v16 = vadd.f32 %v4143_v34, %v12405_v45  ;;  %v13106_v29 = vpop.f32.mrf.mxu0  ;;  %8779 = vmatmul.mubr.msk.bf16.gmra.mxu0 %vm1575_vm6, %v9526_v43 }
 0x45a   : > { %v7748_v17 = vsel %vm2475_vm10, %v7736_v55, %v13071_v48  ;;  %v7214_v33 = vrot.slane %v7213_v58, 1  ;;  %v4662_v56 = vmax.f32 %v4660_v11, %v4661_v10  ;;  %v4666_v14 = vunpack.i.l.bf16 %v4496_v6  ;;  %v13111_v22 = vpop.f32.mrf.mxu1  ;;  %8938 = vmatmul.mubr.msk.bf16.gmra.mxu1 %vm5494_vm7, %v9527_v18  ;;  %4405 = vmatprep.mubr.bf16.mxu0 %v13920_v27 }
 0x45b   : > { %v7759_v46 = vsel %vm2475_vm10, %v7737_v4, %v7758_v38  ;;  %v4654_v21 = vmax.f32 %v4652_v25, %v4653_v63  ;;  %v7225_v45 = vrot.slane %v7224_v8, 2  ;;  %v4667_v34 = vunpack.i.h.bf16 %v4496_v6  ;;  %v4159_v7 = vpop.f32.mrf.mxu0  ;;  %6477 = vmatprep.mubr.bf16.mxu1 %v13920_v27  ;;  %v9528_v38 = vld [vmem:[%s13884_s3 + $0x308] ss:$12 sps:$4 sm:$0xff]  }
 0x45c   : > { %v4663_v43 = vrot.slane %v4662_v56, 1  ;;  %v4497_v2 = vpack.c.bf16 %v4144_v16, %v4140_v47  ;;  %v6657_v48 = vpack.c.bf16 %v13073_v51, %v13060_v12  ;;  %v13119_v11 = vpop.f32.mrf.mxu1  ;;  %v13121_v60 = vmax.f32 %v7213_v58, %v7214_v33  ;;  %v9529_v12 = vld [vmem:[%s13885_s4 + $0x238] sm:$0xff]  }
 0x45d   : > { %v4655_v53 = vpack.i.bf16 %v4654_v21, %v4654_v21  ;;  %v4668_v18 = vmax.f32 %v4666_v14, %v4667_v34  ;;  %v4161_v55 = vpop.f32.mrf.mxu0  ;;  %v14136_v51 = vpack.i.bf16 %v13005_v35, %v13005_v35  ;;  %v13136_v63 = vmax.f32 %v7224_v8, %v7225_v45 }
 0x45e   : > { %v4664_v25 = vmax.f32 %v4662_v56, %v4663_v43  ;;  %v4676_v10 = vunpack.i.l.bf16 %v4497_v2  ;;  %v4677_v6 = vunpack.i.h.bf16 %v4497_v2  ;;  %v13126_v4 = vpop.f32.mrf.mxu1  ;;  %v4148_v21 = vadd.f32 %v13077_v20, %v12415_v26 }
 0x45f   : > { %v13134_v47 = vunpack.c.l.b16 %v14136_v51  ;;  %v7738_v58 = vunpack.c.l.b16 %v4655_v53  ;;  %v4669_v16 = vrot.slane %v4668_v18, 4  ;;  %v4163_v33 = vpop.f32.mrf.mxu0  ;;  %v4152_v34 = vadd.f32 %v4151_v54, %v12443_v0  ;;  %v14137_v0 = vld [vmem:[#allocation22_spill] sm:$0xff] }
 0x460   : > { %v4665_v14 = vpack.i.bf16 %v4664_v25, %v4664_v25  ;;  %v4678_v56 = vmax.f32 %v4676_v10, %v4677_v6  ;;  %v13141_v43 = vpop.f32.mrf.mxu1  ;;  %v7216_v35 = vpack.i.bf16 %v13121_v60, %v13121_v60  ;;  %v6658_v8 = vpack.c.bf16 %v13096_v9, %v13080_v50 }
 0x461   : > { %v13144_v2 = vsel %vm7749_vm12, %v7738_v58, %v7748_v17  ;;  %v4670_v53 = vmax.f32 %v4668_v18, %v4669_v16  ;;  %v13150_v45 = vpop.f32.mrf.mxu0  ;;  %8780 = vmatmul.mubr.msk.bf16.gmra.mxu0 %vm1575_vm6, %v9528_v38  ;;  %v4498_v20 = vpack.c.bf16 %v4152_v34, %v4148_v21  ;;  %v4154_v54 = vadd.f32 %v4153_v32, %v14137_v0  ;;  %v14138_v18 = vld [vmem:[#allocation21_spill] sm:$0xff] }
 0x462   : > { %v7739_v25 = vunpack.c.l.b16 %v4665_v14  ;;  %v4679_v26 = vrot.slane %v4678_v56, 4  ;;  %v13154_v10 = vpop.f32.mrf.mxu1  ;;  %8939 = vmatmul.mubr.msk.bf16.gmra.mxu1 %vm5494_vm7, %v9529_v12  ;;  %4415 = vmatprep.mubr.bf16.mxu0 %v13920_v27  ;;  %v4150_v6 = vadd.f32 %v13084_v59, %v14138_v18  ;;  %v7230_v50 = vmax.bf16 %v6658_v8, %v6656_v57 }
 0x463   : > { %v4671_v17 = vrot.slane %v4670_v53, 2  ;;  %v6659_v9 = vpack.c.bf16 %v13103_v42, %v13089_v31  ;;  %v13165_v38 = vpop.f32.mrf.mxu0  ;;  %6487 = vmatprep.mubr.bf16.mxu1 %v13920_v27  ;;  %v4686_v51 = vunpack.i.l.bf16 %v4498_v20  ;;  %v4687_v58 = vunpack.i.h.bf16 %v4498_v20  ;;  %v9530_v31 = vld [vmem:[%s13884_s3 + $0x320] ss:$12 sps:$4 sm:$0xff]  }
 0x464   : > { %v13169_v32 = vsel %vm7749_vm12, %v7739_v25, %v7759_v46  ;;  %v4680_v12 = vmax.f32 %v4678_v56, %v4679_v26  ;;  %v13171_v16 = vpop.f32.mrf.mxu1  ;;  %v7227_v59 = vrot.slane %v13136_v63, 1  ;;  %v4499_v3 = vpack.c.bf16 %v4154_v54, %v4150_v6 }
 0x465   : > { %v4672_v14 = vmax.f32 %v4670_v53, %v4671_v17  ;;  %v7243_v36 = vmax.bf16 %v6659_v9, %v6657_v48  ;;  %v4171_v57 = vpop.f32.mrf.mxu0  ;;  %v4688_v21 = vmax.f32 %v4686_v51, %v4687_v58  ;;  %v4158_v46 = vadd.f32 %v13106_v29, %v12467_v28  ;;  %v9531_v53 = vld [vmem:[%s13885_s4 + $0x240] sm:$0xff]  }
 0x466   : > { %v4681_v42 = vrot.slane %v4680_v12, 2  ;;  %v4160_v56 = vadd.f32 %v4159_v7, %v12479_v15  ;;  %v13180_v34 = vpop.f32.mrf.mxu1  ;;  %v4696_v48 = vunpack.i.l.bf16 %v4499_v3  ;;  %v4697_v25 = vunpack.i.h.bf16 %v4499_v3 }
 0x467   : > { %v4673_v8 = vrot.slane %v4672_v14, 1  ;;  %v4162_v26 = vadd.f32 %v4161_v55, %v12496_v39  ;;  %v4173_v20 = vpop.f32.mrf.mxu0  ;;  %v4689_v54 = vrot.slane %v4688_v21, 4  ;;  %v6660_v17 = vpack.c.bf16 %v13126_v4, %v13111_v22 }
 0x468   : > { %v4682_v0 = vmax.f32 %v4680_v12, %v4681_v42  ;;  %v4164_v28 = vadd.f32 %v4163_v33, %v12511_v23  ;;  %v13189_v15 = vpop.f32.mrf.mxu1  ;;  %v4698_v7 = vmax.f32 %v4696_v48, %v4697_v25  ;;  %v6661_v6 = vpack.c.bf16 %v13141_v43, %v13119_v11 }
 0x469   : > { %v4674_v29 = vmax.f32 %v4672_v14, %v4673_v8  ;;  %v4500_v18 = vpack.c.bf16 %v4162_v26, %v4158_v46  ;;  %v13193_v9 = vpop.f32.mrf.mxu0  ;;  %8781 = vmatmul.mubr.msk.bf16.gmra.mxu0 %vm1575_vm6, %v9530_v31  ;;  %v4690_v55 = vmax.f32 %v4688_v21, %v4689_v54  ;;  %v7231_v12 = vmax.bf16 %v7230_v50, %v6660_v17  ;;  %v9532_v8 = vld [vmem:[%s13884_s3 + $0x338] ss:$12 sps:$4 sm:$0xff]   ;;  %v9533_v54 = vld [vmem:[%s13885_s4 + $0x248] sm:$0xff]  }
 0x46a   : > { %v4683_v39 = vrot.slane %v4682_v0, 1  ;;  %v4501_v51 = vpack.c.bf16 %v4164_v28, %v4160_v56  ;;  %v13196_v58 = vpop.f32.mrf.mxu1  ;;  %8940 = vmatmul.mubr.msk.bf16.gmra.mxu1 %vm5494_vm7, %v9531_v53  ;;  %4425 = vmatprep.mubr.bf16.mxu0 %v13920_v27  ;;  %v4699_v22 = vrot.slane %v4698_v7, 4  ;;  %v13206_v11 = vunpack.c.l.b16 %v7216_v35 }
 0x46b   : > { %v4675_v23 = vpack.i.bf16 %v4674_v29, %v4674_v29  ;;  %v4706_v4 = vunpack.i.l.bf16 %v4500_v18  ;;  %v4707_v33 = vunpack.i.h.bf16 %v4500_v18  ;;  %v13200_v14 = vpop.f32.mrf.mxu0  ;;  %6497 = vmatprep.mubr.bf16.mxu1 %v13920_v27  ;;  %v4691_v43 = vrot.slane %v4690_v55, 2 }
 0x46c   : > { %v4716_v50 = vunpack.i.l.bf16 %v4501_v51  ;;  %v4717_v3 = vunpack.i.h.bf16 %v4501_v51  ;;  %v13208_v31 = vpop.f32.mrf.mxu1  ;;  %v4700_v21 = vmax.f32 %v4698_v7, %v4699_v22  ;;  %v7244_v56 = vmax.bf16 %v7243_v36, %v6661_v6 }
 0x46d   : > { %v7740_v42 = vunpack.c.l.b16 %v4675_v23  ;;  %v4708_v46 = vmax.f32 %v4706_v4, %v4707_v33  ;;  %v4181_v53 = vpop.f32.mrf.mxu0  ;;  %v7228_v48 = vmax.f32 %v13136_v63, %v7227_v59  ;;  %v13214_v25 = vmax.f32 %v4682_v0, %v4683_v39 }
 0x46e   : > { %v4692_v60 = vmax.f32 %v4690_v55, %v4691_v43  ;;  %v4718_v35 = vmax.f32 %v4716_v50, %v4717_v3  ;;  %v13216_v26 = vpop.f32.mrf.mxu1  ;;  %v4701_v17 = vrot.slane %v4700_v21, 2  ;;  %v13225_v29 = vadd.f32 %v13150_v45, %v12514_v19 }
 0x46f   : > { %v7752_v36 = vsel %vm7751_vm13, %v7740_v42, %v13144_v2  ;;  %v4709_v28 = vrot.slane %v4708_v46, 4  ;;  %v4183_v63 = vpop.f32.mrf.mxu0  ;;  %v13229_v7 = vadd.f32 %v13165_v38, %v12523_v40  ;;  %v13232_v18 = vadd.f32 %v4171_v57, %v12533_v61 }
 0x470   : > { %v4693_v59 = vrot.slane %v4692_v60, 1  ;;  %v4719_v0 = vrot.slane %v4718_v35, 4  ;;  %v13234_v6 = vpop.f32.mrf.mxu1  ;;  %v4702_v39 = vmax.f32 %v4700_v21, %v4701_v17  ;;  %v6662_v55 = vpack.c.bf16 %v13180_v34, %v13154_v10  ;;  %v9534_v21 = vld [vmem:[%s13884_s3 + $0x350] ss:$12 sps:$4 sm:$0xff]  }
 0x471   : > { %v4710_v2 = vmax.f32 %v4708_v46, %v4709_v28  ;;  %v13239_v19 = vadd.f32 %v4173_v20, %v12551_v49  ;;  %v13241_v45 = vpop.f32.mrf.mxu0  ;;  %8782 = vmatmul.mubr.msk.bf16.gmra.mxu0 %vm1575_vm6, %v9532_v8  ;;  %v4502_v61 = vpack.c.bf16 %v13232_v18, %v13225_v29  ;;  %v6663_v38 = vpack.c.bf16 %v13189_v15, %v13171_v16 }
 0x472   : > { %v4694_v51 = vmax.f32 %v4692_v60, %v4693_v59  ;;  %v4720_v40 = vmax.f32 %v4718_v35, %v4719_v0  ;;  %v13248_v57 = vpop.f32.mrf.mxu1  ;;  %8941 = vmatmul.mubr.msk.bf16.gmra.mxu1 %vm5494_vm7, %v9533_v54  ;;  %v4703_v10 = vrot.slane %v4702_v39, 1  ;;  %v7232_v49 = vmax.bf16 %v7231_v12, %v6662_v55  ;;  %4435 = vmatprep.mubr.bf16.mxu0 %v13920_v27 }
 0x473   : > { %v4711_v34 = vrot.slane %v4710_v2, 2  ;;  %v4503_v20 = vpack.c.bf16 %v13239_v19, %v13229_v7  ;;  %v4189_v23 = vpop.f32.mrf.mxu0  ;;  %6507 = vmatprep.mubr.bf16.mxu1 %v13920_v27  ;;  %v7229_v22 = vpack.i.bf16 %v7228_v48, %v7228_v48  ;;  %v7245_v43 = vmax.bf16 %v7244_v56, %v6663_v38  ;;  %v9535_v56 = vld [vmem:[%s13885_s4 + $0x250] sm:$0xff]  }
 0x474   : > { %v4695_v4 = vpack.i.bf16 %v4694_v51, %v4694_v51  ;;  %v4721_v33 = vrot.slane %v4720_v40, 2  ;;  %v13255_v16 = vpop.f32.mrf.mxu1  ;;  %v4685_v15 = vpack.i.bf16 %v13214_v25, %v13214_v25  ;;  %v7233_v3 = vunpack.i.l.bf16 %v7232_v49 }
 0x475   : > { %v4712_v50 = vmax.f32 %v4710_v2, %v4711_v34  ;;  %v7234_v12 = vunpack.i.h.bf16 %v7232_v49  ;;  %v4191_v42 = vpop.f32.mrf.mxu0  ;;  %v7246_v60 = vunpack.i.l.bf16 %v7245_v43  ;;  %v7247_v48 = vunpack.i.h.bf16 %v7245_v43 }
 0x476   : > { %v7742_v46 = vunpack.c.l.b16 %v4695_v4  ;;  %v4722_v8 = vmax.f32 %v4720_v40, %v4721_v33  ;;  %v6263_v35 = vpop.f32.mrf.mxu1  ;;  %v13265_v54 = vmax.f32 %v4702_v39, %v4703_v10  ;;  %v4178_v28 = vadd.f32 %v13193_v9, %v12560_v5 }
 0x477   : > { %v4713_v25 = vrot.slane %v4712_v50, 1  ;;  %v7235_v17 = vmax.f32 %v7233_v3, %v7234_v12  ;;  %v4193_v29 = vpop.f32.mrf.mxu0  ;;  %v7248_v7 = vmax.f32 %v7246_v60, %v7247_v48  ;;  %v4182_v18 = vadd.f32 %v4181_v53, %v12572_v30  ;;  %v14139_v48 = vld [vmem:[#allocation27_spill] sm:$0xff] }
 0x478   : > { %v13270_v59 = vsel %vm7753_vm14, %v7742_v46, %v7752_v36  ;;  %v4723_v0 = vrot.slane %v4722_v8, 1  ;;  %v6265_v2 = vpop.f32.mrf.mxu1  ;;  %v13273_v55 = vunpack.c.l.b16 %v7229_v22  ;;  %v4180_v39 = vadd.f32 %v13200_v14, %v12568_v37 }
 0x479   : > { %v7236_v19 = vrot.slane %v7235_v17, 4  ;;  %v6664_v51 = vpack.c.bf16 %v13216_v26, %v13196_v58  ;;  %v4197_v40 = vpop.f32.mrf.mxu0  ;;  %8783 = vmatmul.mubr.msk.bf16.gmra.mxu0 %vm1575_vm6, %v9534_v21  ;;  %v7249_v9 = vrot.slane %v7248_v7, 4  ;;  %v4504_v36 = vpack.c.bf16 %v4182_v18, %v4178_v28  ;;  %v9537_v21 = vld [vmem:[%s13885_s4 + $0x258] sm:$0xff]  }
 0x47a   : > { %v13280_v5 = vmax.f32 %v4722_v8, %v4723_v0  ;;  %v4184_v38 = vadd.f32 %v4183_v63, %v12580_v24  ;;  %v6269_v30 = vpop.f32.mrf.mxu1  ;;  %8942 = vmatmul.mubr.msk.bf16.gmra.mxu1 %vm5494_vm7, %v9535_v56  ;;  %4445 = vmatprep.mubr.bf16.mxu0 %v13920_v27  ;;  %v13285_v53 = vunpack.c.l.b16 %v4685_v15  ;;  %v4705_v37 = vpack.i.bf16 %v13265_v54, %v13265_v54  ;;  %v14140_v0 = vld [vmem:[#allocation28_spill] sm:$0xff] }
 0x47b   : > { %v7237_v58 = vmax.f32 %v7235_v17, %v7236_v19  ;;  %v6665_v14 = vpack.c.bf16 %v13234_v6, %v13208_v31  ;;  %v4199_v26 = vpop.f32.mrf.mxu0  ;;  %6517 = vmatprep.mubr.bf16.mxu1 %v13920_v27  ;;  %v13292_v10 = vmax.f32 %v4712_v50, %v4713_v25  ;;  %v7250_v24 = vmax.f32 %v7248_v7, %v7249_v9  ;;  %v9536_v31 = vld [vmem:[%s13884_s3 + $0x368] ss:$12 sps:$4 sm:$0xff]  }
 0x47c   : > { %v4726_v63 = vmax.bf16 %v4504_v36, %v4502_v61  ;;  %v4505_v34 = vpack.c.bf16 %v4184_v38, %v4180_v39  ;;  %v6271_v49 = vpop.f32.mrf.mxu1  ;;  %v4725_v22 = vpack.i.bf16 %v13280_v5, %v13280_v5  ;;  %v4188_v33 = vadd.f32 %v13241_v45, %v12584_v13  ;;  %v14142_v39 = vld [vmem:[#allocation30_spill] sm:$0xff] }
 0x47d   : > { %v7238_v4 = vrot.slane %v7237_v58, 2  ;;  %v4192_v43 = vadd.f32 %v4191_v42, %v12594_v62  ;;  %v4201_v15 = vpop.f32.mrf.mxu0  ;;  %v7251_v6 = vrot.slane %v7250_v24, 2  ;;  %v4190_v61 = vadd.f32 %v4189_v23, %v12591_v1 }
 0x47e   : > { %v4739_v50 = vmax.bf16 %v4505_v34, %v4503_v20  ;;  %v6666_v3 = vpack.c.bf16 %v6263_v35, %v13248_v57  ;;  %v6273_v12 = vpop.f32.mrf.mxu1  ;;  %v4194_v62 = vadd.f32 %v4193_v29, %v12602_v52  ;;  %v6667_v45 = vpack.c.bf16 %v6265_v2, %v13255_v16  ;;  %v14141_v16 = vld [vmem:[#allocation29_spill] sm:$0xff] }
 0x47f   : > { %v7239_v46 = vmax.f32 %v7237_v58, %v7238_v4  ;;  %v4506_v13 = vpack.c.bf16 %v4192_v43, %v4188_v33  ;;  %v4203_v42 = vpop.f32.mrf.mxu0  ;;  %v7252_v8 = vmax.f32 %v7250_v24, %v7251_v6  ;;  %v4198_v20 = vadd.f32 %v4197_v40, %v12604_v44  ;;  %v14143_v24 = vld [vmem:[#allocation31_spill] sm:$0xff]  ;;  %v14145_v6 = vld [vmem:[#allocation32_spill] sm:$0xff] }
 0x480   : > { %v7256_v60 = vmax.bf16 %v6666_v3, %v6664_v51  ;;  %v4200_v1 = vadd.f32 %v4199_v26, %v14139_v48  ;;  %v6275_v23 = vpop.f32.mrf.mxu1  ;;  %v4507_v56 = vpack.c.bf16 %v4194_v62, %v4190_v61  ;;  %v7269_v25 = vmax.bf16 %v6667_v45, %v6665_v14  ;;  %v14144_v4 = vld [vmem:[#allocation139_spill] sm:$0xff]  ;;  %v9539_v3 = vld [vmem:[%s13885_s4 + $0x260] sm:$0xff]  }
 0x481   : > { %v7240_v57 = vrot.slane %v7239_v46, 1  ;;  %v4727_v35 = vmax.bf16 %v4726_v63, %v4506_v13  ;;  %v4207_v17 = vpop.f32.mrf.mxu0  ;;  %8784 = vmatmul.mubr.msk.bf16.gmra.mxu0 %vm1575_vm6, %v9536_v31  ;;  %v7253_v28 = vrot.slane %v7252_v8, 1  ;;  %v4202_v52 = vadd.f32 %v4201_v15, %v14140_v0 }
 0x482   : > { %v6668_v29 = vpack.c.bf16 %v6273_v12, %v6269_v30  ;;  %v4204_v7 = vadd.f32 %v4203_v42, %v14141_v16  ;;  %v6279_v18 = vpop.f32.mrf.mxu1  ;;  %8943 = vmatmul.mubr.msk.bf16.gmra.mxu1 %vm5494_vm7, %v9537_v21  ;;  %4455 = vmatprep.mubr.bf16.mxu0 %v13920_v27  ;;  %v4740_v2 = vmax.bf16 %v4739_v50, %v4507_v56 }
 0x483   : > { %v7241_v44 = vmax.f32 %v7239_v46, %v7240_v57  ;;  %v6669_v19 = vpack.c.bf16 %v6275_v23, %v6271_v49  ;;  %v13317_v51 = vadd.f32 %v4207_v17, %v14142_v39  ;;  %v4209_v40 = vpop.f32.mrf.mxu0  ;;  %6527 = vmatprep.mubr.bf16.mxu1 %v13920_v27  ;;  %v7254_v9 = vmax.f32 %v7252_v8, %v7253_v28  ;;  %v9538_v49 = vld [vmem:[%s13884_s3 + $0x380] ss:$12 sps:$4 sm:$0xff]  }
 0x484   : > { %v4508_v36 = vpack.c.bf16 %v4202_v52, %v4198_v20  ;;  %v7257_v38 = vmax.bf16 %v7256_v60, %v6668_v29  ;;  %v4509_v30 = vpack.c.bf16 %v4204_v7, %v4200_v1  ;;  %v6281_v58 = vpop.f32.mrf.mxu1  ;;  %v13321_v63 = vadd.f32 %v4209_v40, %v14143_v24  ;;  %v14146_v23 = vld [vmem:[#allocation33_spill] sm:$0xff]  ;;  %v9540_v7 = vld [vmem:[%s13884_s3 + $0x398] ss:$12 sps:$4 sm:$0xff]  }
 0x485   : > { %v7242_v14 = vpack.i.bf16 %v7241_v44, %v7241_v44  ;;  %v7270_v26 = vmax.bf16 %v7269_v25, %v6669_v19  ;;  %v4211_v34 = vpop.f32.mrf.mxu0  ;;  %v7985_v33 = vsel %vm7751_vm13, %v13134_v47, %v14144_v4  ;;  %v7255_v43 = vpack.i.bf16 %v7254_v9, %v7254_v9  ;;  %v14148_v44 = vld [vmem:[#allocation36_spill] sm:$0xff]  ;;  %v9541_v39 = vld [vmem:[%s13885_s4 + $0x268] sm:$0xff]  }
 0x486   : > { %v4728_v15 = vmax.bf16 %v4727_v35, %v4508_v36  ;;  %v4741_v31 = vmax.bf16 %v4740_v2, %v4509_v30  ;;  %v4212_v50 = vadd.f32 %v4211_v34, %v14145_v6  ;;  %v6283_v61 = vpop.f32.mrf.mxu1  ;;  %v7986_v13 = vsel %vm7753_vm14, %v13273_v55, %v7985_v33 }
 0x487   : > { %v7956_v12 = vunpack.c.l.b16 %v7242_v14  ;;  %v6670_v21 = vpack.c.bf16 %v6283_v61, %v6279_v18  ;;  %v4213_v46 = vpop.f32.mrf.mxu0  ;;  %v7979_v47 = vsel %vm7753_vm14, %v13206_v11, %v13021_v41  ;;  %v7957_v62 = vunpack.c.l.b16 %v7255_v43 }
 0x488   : > { %v4729_v45 = vunpack.i.l.bf16 %v4728_v15  ;;  %v4730_v42 = vunpack.i.h.bf16 %v4728_v15  ;;  %v4742_v8 = vunpack.i.l.bf16 %v4741_v31  ;;  %v6285_v60 = vpop.f32.mrf.mxu1  ;;  %v4743_v20 = vunpack.i.h.bf16 %v4741_v31 }
 0x489   : > { %v4510_v48 = vpack.c.bf16 %v4212_v50, %v13317_v51  ;;  %v7258_v1 = vmax.bf16 %v7257_v38, %v6670_v21  ;;  %v4214_v57 = vadd.f32 %v4213_v46, %v14146_v23  ;;  %v4217_v35 = vpop.f32.mrf.mxu0  ;;  %8785 = vmatmul.mubr.msk.bf16.gmra.mxu0 %vm1575_vm6, %v9538_v49  ;;  %v6671_v56 = vpack.c.bf16 %v6285_v60, %v6281_v58  ;;  %v14149_v58 = vld [vmem:[#allocation35_spill] sm:$0xff]  ;;  %v9546_v23 = vld [vmem:[%s13886_s5 + $0x4] ss:$8 sps:$4 sm:$0xff]  }
 0x48a   : > { %v13341_v55 = vpop.f32.mrf.mxu1  ;;  %8944 = vmatmul.mubr.msk.bf16.gmra.mxu1 %vm5494_vm7, %v9539_v3  ;;  %4465 = vmatprep.mubr.bf16.mxu0 %v13920_v27  ;;  %v7743_v41 = vunpack.c.l.b16 %v4705_v37  ;;  %v4715_v17 = vpack.i.bf16 %v13292_v10, %v13292_v10  ;;  %v7745_v28 = vunpack.c.l.b16 %v4725_v22  ;;  %v13358_v29 = vsel %vm7755_vm1, %v7957_v62, %v7986_v13  ;;  %v14147_v10 = vld [vmem:[#allocation34_spill] sm:$0xff]  ;;  %v14152_v60 = vld [vmem:[#allocation43_spill] sm:$0xff] }
 0x48b   : > { %v4511_v11 = vpack.c.bf16 %v4214_v57, %v13321_v63  ;;  %v4219_v25 = vpop.f32.mrf.mxu0  ;;  %6537 = vmatprep.mubr.bf16.mxu1 %v13920_v27  ;;  %v7271_v0 = vmax.bf16 %v7270_v26, %v6671_v56  ;;  %v4731_v54 = vmax.f32 %v4729_v45, %v4730_v42  ;;  %v4744_v37 = vmax.f32 %v4742_v8, %v4743_v20  ;;  %v9542_v62 = vld [vmem:[%s13884_s3 + $0x3b0] ss:$12 sps:$4 sm:$0xff]  }
 0x48c   : > { %v13355_v52 = vpop.f32.mrf.mxu1  ;;  %v13364_v18 = vsel %vm7755_vm1, %v7956_v12, %v7979_v47  ;;  %v7761_v5 = vsel %vm7751_vm13, %v13285_v53, %v13169_v32  ;;  %v4218_v22 = vadd.f32 %v4217_v35, %v14147_v10  ;;  %v7259_v51 = vunpack.i.l.bf16 %v7258_v1  ;;  %v14150_v53 = vld [vmem:[#allocation37_spill] sm:$0xff]  ;;  %v14151_v42 = vld [vmem:[#allocation39_spill] sm:$0xff] }
 0x48d   : > { %v4221_v16 = vpop.f32.mrf.mxu0  ;;  %v7260_v40 = vunpack.i.h.bf16 %v7258_v1  ;;  %v7762_v38 = vsel %vm7753_vm14, %v7743_v41, %v7761_v5  ;;  %v7744_v30 = vunpack.c.l.b16 %v4715_v17  ;;  %v4220_v14 = vadd.f32 %v4219_v25, %v14149_v58  ;;  %v9543_v1 = vld [vmem:[%s13885_s4 + $0x270] sm:$0xff]   ;;  %v14153_v41 = vld [vmem:[#allocation41_spill] sm:$0xff] }
 0x48e   : > { %v4222_v2 = vadd.f32 %v4221_v16, %v14148_v44  ;;  %v6293_v19 = vpop.f32.mrf.mxu1  ;;  %v4732_v63 = vrot.slane %v4731_v54, 4  ;;  %v4745_v34 = vrot.slane %v4744_v37, 4  ;;  %v13381_v33 = vsel %vm7755_vm1, %v7745_v28, %v7762_v38  ;;  %v14154_v25 = vld [vmem:[#allocation10_spill] sm:$0xff]  ;;  %v9544_v38 = vld [vmem:[%s13886_s5] ss:$8 sps:$4 sm:$0xff]  }
 0x48f   : > { %v6672_v9 = vpack.c.bf16 %v6293_v19, %v13341_v55  ;;  %v4223_v36 = vpop.f32.mrf.mxu0  ;;  %v7261_v6 = vmax.f32 %v7259_v51, %v7260_v40  ;;  %v7272_v61 = vunpack.i.l.bf16 %v7271_v0  ;;  %v7273_v3 = vunpack.i.h.bf16 %v7271_v0 }
 0x490   : > { %v4512_v32 = vpack.c.bf16 %v4222_v2, %v4218_v22  ;;  %v4224_v26 = vadd.f32 %v4223_v36, %v14150_v53  ;;  %v6295_v24 = vpop.f32.mrf.mxu1  ;;  %v4733_v46 = vmax.f32 %v4731_v54, %v4732_v63  ;;  %v4746_v13 = vmax.f32 %v4744_v37, %v4745_v34 }
 0x491   : > { %v6673_v49 = vpack.c.bf16 %v6295_v24, %v13355_v52  ;;  %v4227_v4 = vpop.f32.mrf.mxu0  ;;  %8786 = vmatmul.mubr.msk.bf16.gmra.mxu0 %vm1575_vm6, %v9540_v7  ;;  %v13391_v45 = vsel %vm7755_vm1, %v7744_v30, %v13270_v59  ;;  %v7262_v57 = vrot.slane %v7261_v6, 4  ;;  %v7274_v55 = vmax.f32 %v7272_v61, %v7273_v3  ;;  %v14155_v30 = vld [vmem:[#allocation91_spill] sm:$0xff] }
 0x492   : > { %v4752_v43 = vmax.bf16 %v4512_v32, %v4510_v48  ;;  %v4513_v15 = vpack.c.bf16 %v4224_v26, %v4220_v14  ;;  %v6299_v31 = vpop.f32.mrf.mxu1  ;;  %8945 = vmatmul.mubr.msk.bf16.gmra.mxu1 %vm5494_vm7, %v9541_v39  ;;  %4475 = vmatprep.mubr.bf16.mxu0 %v13920_v27  ;;  %v4228_v8 = vadd.f32 %v4227_v4, %v14151_v42  ;;  %v4734_v0 = vrot.slane %v4733_v46, 2  ;;  %v14156_v14 = vld [vmem:[#allocation93_spill] sm:$0xff]  ;;  %v9547_v26 = vld [vmem:[%s13885_s4 + $0x278] sm:$0xff]  }
 0x493   : > { %v4229_v50 = vpop.f32.mrf.mxu0  ;;  %6547 = vmatprep.mubr.bf16.mxu1 %v13920_v27  ;;  %v4747_v52 = vrot.slane %v4746_v13, 2  ;;  %v7263_v22 = vmax.f32 %v7261_v6, %v7262_v57  ;;  %v7275_v19 = vrot.slane %v7274_v55, 4  ;;  %v9548_v24 = vld [vmem:[%s13886_s5 + $0x14] ss:$8 sps:$4 sm:$0xff]  }
 0x494   : > { %v4765_v12 = vmax.bf16 %v4513_v15, %v4511_v11  ;;  %v6301_v21 = vpop.f32.mrf.mxu1  ;;  %v4230_v59 = vadd.f32 %v4229_v50, %v14153_v41  ;;  %v4735_v40 = vmax.f32 %v4733_v46, %v4734_v0  ;;  %v14158_v6 = vld [vmem:[#allocation94_spill] sm:$0xff]  ;;  %v14159_v41 = vld [vmem:[#allocation95_spill] sm:$0xff] }
 0x495   : > { %v4231_v47 = vpop.f32.mrf.mxu0  ;;  %v7264_v63 = vrot.slane %v7263_v22, 2  ;;  %v7276_v4 = vmax.f32 %v7274_v55, %v7275_v19 }
 0x496   : > { %v4232_v20 = vadd.f32 %v4231_v47, %v14152_v60  ;;  %v6303_v48 = vpop.f32.mrf.mxu1  ;;  %v4736_v3 = vrot.slane %v4735_v40, 1 }
 0x497   : > { %v6674_v35 = vpack.c.bf16 %v6303_v48, %v6299_v31  ;;  %v4233_v56 = vpop.f32.mrf.mxu0  ;;  %v7277_v48 = vrot.slane %v7276_v4, 2 }
 0x498   : > { %v4514_v11 = vpack.c.bf16 %v4232_v20, %v4228_v8  ;;  %v4234_v17 = vadd.f32 %v4233_v56, %v14154_v25  ;;  %v6305_v28 = vpop.f32.mrf.mxu1  ;;  %v7265_v8 = vmax.f32 %v7263_v22, %v7264_v63  ;;  %v13422_v56 = vmax.f32 %v4735_v40, %v4736_v3  ;;  %v9550_v25 = vld [vmem:[%s13886_s5 + $0x10] ss:$8 sps:$4 sm:$0xff]  }
 0x499   : > { %v7282_v54 = vmax.bf16 %v6674_v35, %v6672_v9  ;;  %v6675_v37 = vpack.c.bf16 %v6305_v28, %v6301_v21  ;;  %v4237_v16 = vpop.f32.mrf.mxu0  ;;  %8787 = vmatmul.mubr.msk.bf16.gmra.mxu0 %vm1575_vm6, %v9542_v62  ;;  %v4748_v9 = vmax.f32 %v4746_v13, %v4747_v52  ;;  %v14160_v52 = vld [vmem:[#allocation97_spill] sm:$0xff]  ;;  %v13436_v22 = vmax.f32 %v7276_v4, %v7277_v48 }
 0x49a   : > { %v4753_v7 = vmax.bf16 %v4752_v43, %v4514_v11  ;;  %v4515_v5 = vpack.c.bf16 %v4234_v17, %v4230_v59  ;;  %v6309_v10 = vpop.f32.mrf.mxu1  ;;  %8946 = vmatmul.mubr.msk.bf16.gmra.mxu1 %vm5494_vm7, %v9543_v1  ;;  %8960 = vmatprep.mubr.msk.bf16.mxu0 %vm7533_vm2, %v9546_v23  ;;  %v4238_v58 = vadd.f32 %v4237_v16, %v14155_v30  ;;  %v14157_v43 = vld [vmem:[#allocation92_spill] sm:$0xff] }
 0x49b   : > { %v7295_v44 = vmax.bf16 %v6675_v37, %v6673_v49  ;;  %v4239_v2 = vpop.f32.mrf.mxu0  ;;  %6557 = vmatprep.mubr.bf16.mxu1 %v13920_v27  ;;  %v9551_v16 = vld [vmem:[%s13886_s5 + $0x24] ss:$8 sps:$4 sm:$0xff]  }
 0x49c   : > { %v4766_v39 = vmax.bf16 %v4765_v12, %v4515_v5  ;;  %v6311_v51 = vpop.f32.mrf.mxu1  ;;  %v4240_v15 = vadd.f32 %v4239_v2, %v14157_v43  ;;  %v4749_v12 = vrot.slane %v4748_v9, 1  ;;  %v14161_v43 = vld [vmem:[#allocation96_spill] sm:$0xff] }
 0x49d   : > { %v4241_v36 = vpop.f32.mrf.mxu0 }
 0x49e   : > { %v4242_v32 = vadd.f32 %v4241_v36, %v14156_v14  ;;  %v6313_v53 = vpop.f32.mrf.mxu1  ;;  %v13424_v55 = vmax.f32 %v4748_v9, %v4749_v12  ;;  %v4738_v36 = vpack.i.bf16 %v13422_v56, %v13422_v56 }
 0x49f   : > { %v6676_v34 = vpack.c.bf16 %v6313_v53, %v6309_v10  ;;  %v4243_v49 = vpop.f32.mrf.mxu0 }
 0x4a0   : > { %v4516_v31 = vpack.c.bf16 %v4242_v32, %v4238_v58  ;;  %v4244_v50 = vadd.f32 %v4243_v49, %v14158_v6  ;;  %v6315_v61 = vpop.f32.mrf.mxu1 }
 0x4a1   : > { %v7283_v21 = vmax.bf16 %v7282_v54, %v6676_v34  ;;  %v6677_v46 = vpack.c.bf16 %v6315_v61, %v6311_v51  ;;  %v4247_v13 = vpop.f32.mrf.mxu0  ;;  %7662 = vmatmul.mubr.bf16.vlgmr.msra.gmra.mxu0 %v9544_v38  ;;  %v4751_v38 = vpack.i.bf16 %v13424_v55, %v13424_v55  ;;  %v7279_v34 = vrot.slane %v13436_v22, 1 }
 0x4a2   : > { %v4754_v47 = vmax.bf16 %v4753_v7, %v4516_v31  ;;  %v4517_v62 = vpack.c.bf16 %v4244_v50, %v4240_v15  ;;  %v6319_v42 = vpop.f32.mrf.mxu1  ;;  %8947 = vmatmul.mubr.msk.bf16.gmra.mxu1 %vm5494_vm7, %v9547_v26  ;;  %8961 = vmatprep.mubr.msk.bf16.mxu0 %vm7533_vm2, %v9548_v24  ;;  %v13427_v59 = vadd.f32 %v4247_v13, %v14159_v41  ;;  %v7266_v7 = vrot.slane %v7265_v8, 1  ;;  %v14162_v50 = vld [vmem:[#allocation98_spill] sm:$0xff] }
 0x4a3   : > { %v7296_v60 = vmax.bf16 %v7295_v44, %v6677_v46  ;;  %v4249_v20 = vpop.f32.mrf.mxu0  ;;  %v9553_v46 = vld [vmem:[%s13886_s5 + $0x20] ss:$8 sps:$4 sm:$0xff]  }
 0x4a4   : > { %v4755_v1 = vunpack.i.l.bf16 %v4754_v47  ;;  %v4756_v23 = vunpack.i.h.bf16 %v4754_v47  ;;  %v4767_v57 = vmax.bf16 %v4766_v39, %v4517_v62  ;;  %v6321_v35 = vpop.f32.mrf.mxu1  ;;  %v13446_v32 = vmax.f32 %v7265_v8, %v7266_v7  ;;  %v14163_v62 = vld [vmem:[#allocation99_spill] sm:$0xff]  ;;  %v14164_v8 = vld [vmem:[#allocation101_spill] sm:$0xff] }
 0x4a5   : > { %v4251_v11 = vpop.f32.mrf.mxu0  ;;  %v4250_v15 = vadd.f32 %v4249_v20, %v14161_v43  ;;  %v9554_v20 = vld [vmem:[%s13886_s5 + $0x34] ss:$8 sps:$4 sm:$0xff]  }
 0x4a6   : > { %v4757_v17 = vmax.f32 %v4755_v1, %v4756_v23  ;;  %v4768_v28 = vunpack.i.l.bf16 %v4767_v57  ;;  %v4769_v0 = vunpack.i.h.bf16 %v4767_v57  ;;  %v4252_v54 = vadd.f32 %v4251_v11, %v14160_v52  ;;  %v6323_v37 = vpop.f32.mrf.mxu1  ;;  %v14165_v57 = vld [vmem:[#allocation100_spill] sm:$0xff] }
 0x4a7   : > { %v6678_v5 = vpack.c.bf16 %v6323_v37, %v6319_v42  ;;  %v4253_v10 = vpop.f32.mrf.mxu0 }
 0x4a8   : > { %v4758_v44 = vrot.slane %v4757_v17, 4  ;;  %v4770_v2 = vmax.f32 %v4768_v28, %v4769_v0  ;;  %v4518_v19 = vpack.c.bf16 %v4252_v54, %v13427_v59  ;;  %v6325_v39 = vpop.f32.mrf.mxu1  ;;  %v4254_v61 = vadd.f32 %v4253_v10, %v14162_v50 }
 0x4a9   : > { %v7284_v51 = vmax.bf16 %v7283_v21, %v6678_v5  ;;  %v6679_v40 = vpack.c.bf16 %v6325_v39, %v6321_v35  ;;  %v4257_v9 = vpop.f32.mrf.mxu0  ;;  %7672 = vmatmul.mubr.bf16.gmra.mxu0 %v9550_v25  ;;  %v14166_v25 = vld [vmem:[#allocation102_spill] sm:$0xff]  ;;  %v7782_v39 = vunpack.c.l.b16 %v4738_v36 }
 0x4aa   : > { %v4759_v30 = vmax.f32 %v4757_v17, %v4758_v44  ;;  %v4771_v58 = vrot.slane %v4770_v2, 4  ;;  %v13443_v14 = vpop.f32.mrf.mxu1  ;;  %8962 = vmatprep.mubr.msk.bf16.mxu0 %vm7533_vm2, %v9551_v16  ;;  %v4258_v42 = vadd.f32 %v4257_v9, %v14163_v62  ;;  %v4519_v52 = vpack.c.bf16 %v4254_v61, %v4250_v15  ;;  %v9556_v36 = vld [vmem:[%s13886_s5 + $0x30] ss:$8 sps:$4 sm:$0xff]  }
 0x4ab   : > { %v7285_v53 = vunpack.i.l.bf16 %v7284_v51  ;;  %v7286_v26 = vunpack.i.h.bf16 %v7284_v51  ;;  %v7297_v24 = vmax.bf16 %v7296_v60, %v6679_v40  ;;  %v4259_v63 = vpop.f32.mrf.mxu0  ;;  %v14170_v62 = vld [vmem:[#allocation106_spill] sm:$0xff] }
 0x4ac   : > { %v4760_v49 = vrot.slane %v4759_v30, 2  ;;  %v4772_v4 = vmax.f32 %v4770_v2, %v4771_v58  ;;  %v13450_v31 = vpop.f32.mrf.mxu1  ;;  %v4260_v35 = vadd.f32 %v4259_v63, %v14165_v57  ;;  %v7280_v63 = vmax.f32 %v13436_v22, %v7279_v34 }
 0x4ad   : > { %v7287_v6 = vmax.f32 %v7285_v53, %v7286_v26  ;;  %v7298_v3 = vunpack.i.l.bf16 %v7297_v24  ;;  %v7299_v12 = vunpack.i.h.bf16 %v7297_v24  ;;  %v4261_v21 = vpop.f32.mrf.mxu0  ;;  %v7268_v24 = vpack.i.bf16 %v13446_v32, %v13446_v32 }
 0x4ae   : > { %v4761_v13 = vmax.f32 %v4759_v30, %v4760_v49  ;;  %v4773_v47 = vrot.slane %v4772_v4, 2  ;;  %v4262_v60 = vadd.f32 %v4261_v21, %v14164_v8  ;;  %v6333_v48 = vpop.f32.mrf.mxu1  ;;  %v7783_v30 = vunpack.c.l.b16 %v4751_v38  ;;  %v14169_v21 = vld [vmem:[#allocation104_spill] sm:$0xff] }
 0x4af   : > { %v7288_v1 = vrot.slane %v7287_v6, 4  ;;  %v7300_v23 = vmax.f32 %v7298_v3, %v7299_v12  ;;  %v6680_v56 = vpack.c.bf16 %v6333_v48, %v13443_v14  ;;  %v4263_v55 = vpop.f32.mrf.mxu0 }
 0x4b0   : > { %v4762_v41 = vrot.slane %v4761_v13, 1  ;;  %v4774_v59 = vmax.f32 %v4772_v4, %v4773_v47  ;;  %v4520_v11 = vpack.c.bf16 %v4262_v60, %v4258_v42  ;;  %v4264_v17 = vadd.f32 %v4263_v55, %v14166_v25  ;;  %v6335_v28 = vpop.f32.mrf.mxu1 }
 0x4b1   : > { %v7289_v0 = vmax.f32 %v7287_v6, %v7288_v1  ;;  %v7301_v54 = vrot.slane %v7300_v23, 4  ;;  %v6681_v37 = vpack.c.bf16 %v6335_v28, %v13450_v31  ;;  %v4267_v16 = vpop.f32.mrf.mxu0  ;;  %7682 = vmatmul.mubr.bf16.gmra.mxu0 %v9553_v46  ;;  %v14167_v31 = vld [vmem:[#allocation103_spill] sm:$0xff]  ;;  %v14168_v6 = vld [vmem:[#allocation105_spill] sm:$0xff] }
 0x4b2   : > { %v4763_v7 = vmax.f32 %v4761_v13, %v4762_v41  ;;  %v4775_v5 = vrot.slane %v4774_v59, 1  ;;  %v4778_v10 = vmax.bf16 %v4520_v11, %v4518_v19  ;;  %v4521_v44 = vpack.c.bf16 %v4264_v17, %v4260_v35  ;;  %v6339_v2 = vpop.f32.mrf.mxu1  ;;  %8963 = vmatprep.mubr.msk.bf16.mxu0 %vm7533_vm2, %v9554_v20 }
 0x4b3   : > { %v7290_v51 = vrot.slane %v7289_v0, 2  ;;  %v7302_v40 = vmax.f32 %v7300_v23, %v7301_v54  ;;  %v4269_v9 = vpop.f32.mrf.mxu0  ;;  %v4268_v38 = vadd.f32 %v4267_v16, %v14167_v31  ;;  %v7958_v54 = vunpack.c.l.b16 %v7268_v24 }
 0x4b4   : > { %v4764_v58 = vpack.i.bf16 %v4763_v7, %v4763_v7  ;;  %v4776_v14 = vmax.f32 %v4774_v59, %v4775_v5  ;;  %v4791_v53 = vmax.bf16 %v4521_v44, %v4519_v52  ;;  %v6341_v26 = vpop.f32.mrf.mxu1  ;;  %v4270_v32 = vadd.f32 %v4269_v9, %v14169_v21  ;;  %v14171_v5 = vld [vmem:[#allocation107_spill] sm:$0xff] }
 0x4b5   : > { %v7291_v49 = vmax.f32 %v7289_v0, %v7290_v51  ;;  %v7303_v19 = vrot.slane %v7302_v40, 2  ;;  %v4271_v4 = vpop.f32.mrf.mxu0  ;;  %v7281_v59 = vpack.i.bf16 %v7280_v63, %v7280_v63  ;;  %v14175_v21 = vld [vmem:[#allocation111_spill] sm:$0xff] }
 0x4b6   : > { %v7784_v43 = vunpack.c.l.b16 %v4764_v58  ;;  %v4777_v15 = vpack.i.bf16 %v4776_v14, %v4776_v14  ;;  %v4272_v50 = vadd.f32 %v4271_v4, %v14168_v6  ;;  %v6343_v61 = vpop.f32.mrf.mxu1 }
 0x4b7   : > { %v7292_v3 = vrot.slane %v7291_v49, 1  ;;  %v7304_v12 = vmax.f32 %v7302_v40, %v7303_v19  ;;  %v6682_v46 = vpack.c.bf16 %v6343_v61, %v6339_v2  ;;  %v4273_v22 = vpop.f32.mrf.mxu0  ;;  %v14172_v2 = vld [vmem:[#allocation109_spill] sm:$0xff]  ;;  %v7959_v51 = vunpack.c.l.b16 %v7281_v59 }
 0x4b8   : > { %v13476_v34 = vsel %vm2471_vm8, %v7784_v43, %v7782_v39  ;;  %v7785_v13 = vunpack.c.l.b16 %v4777_v15  ;;  %v4522_v47 = vpack.c.bf16 %v4272_v50, %v4268_v38  ;;  %v4274_v42 = vadd.f32 %v4273_v22, %v14170_v62  ;;  %v6345_v8 = vpop.f32.mrf.mxu1  ;;  %v14176_v62 = vld [vmem:[#allocation113_spill] sm:$0xff] }
 0x4b9   : > { %v7293_v60 = vmax.f32 %v7291_v49, %v7292_v3  ;;  %v7305_v48 = vrot.slane %v7304_v12, 1  ;;  %v7308_v20 = vmax.bf16 %v6682_v46, %v6680_v56  ;;  %v6683_v1 = vpack.c.bf16 %v6345_v8, %v6341_v26  ;;  %v4277_v23 = vpop.f32.mrf.mxu0  ;;  %7692 = vmatmul.mubr.bf16.gmra.mxu0 %v9556_v36  ;;  %v14174_v26 = vld [vmem:[#allocation110_spill] sm:$0xff] }
 0x4ba   : > { %v13480_v57 = vsel %vm2471_vm8, %v7785_v13, %v7783_v30  ;;  %v4779_v35 = vmax.bf16 %v4778_v10, %v4522_v47  ;;  %v4523_v55 = vpack.c.bf16 %v4274_v42, %v4270_v32  ;;  %v6349_v41 = vpop.f32.mrf.mxu1  ;;  %8301 = vmatprep.mubr.bf16.mxu0 %v13920_v27  ;;  %v4278_v44 = vadd.f32 %v4277_v23, %v14171_v5 }
 0x4bb   : > { %v7294_v11 = vpack.i.bf16 %v7293_v60, %v7293_v60  ;;  %v7306_v25 = vmax.f32 %v7304_v12, %v7305_v48  ;;  %v7321_v17 = vmax.bf16 %v6683_v1, %v6681_v37  ;;  %v4279_v28 = vpop.f32.mrf.mxu0  ;;  %v14173_v37 = vld [vmem:[#allocation108_spill] sm:$0xff] }
 0x4bc   : > { %v4792_v0 = vmax.bf16 %v4791_v53, %v4523_v55  ;;  %v6351_v52 = vpop.f32.mrf.mxu1  ;;  %v4280_v14 = vadd.f32 %v4279_v28, %v14173_v37  ;;  %v14177_v60 = vld [vmem:[#allocation112_spill] sm:$0xff] }
 0x4bd   : > { %v7960_v56 = vunpack.c.l.b16 %v7294_v11  ;;  %v7307_v16 = vpack.i.bf16 %v7306_v25, %v7306_v25  ;;  %v4281_v7 = vpop.f32.mrf.mxu0 }
 0x4be   : > { %v4282_v39 = vadd.f32 %v4281_v7, %v14172_v2  ;;  %v6353_v10 = vpop.f32.mrf.mxu1 }
 0x4bf   : > { %v13486_v40 = vsel %vm2471_vm8, %v7960_v56, %v7958_v54  ;;  %v7961_v9 = vunpack.c.l.b16 %v7307_v16  ;;  %v6684_v30 = vpack.c.bf16 %v6353_v10, %v6349_v41  ;;  %v4283_v58 = vpop.f32.mrf.mxu0  ;;  %v14178_v41 = vld [vmem:[#allocation114_spill] sm:$0xff] }
 0x4c0   : > { %v4524_v53 = vpack.c.bf16 %v4282_v39, %v4278_v44  ;;  %v4284_v24 = vadd.f32 %v4283_v58, %v14174_v26  ;;  %v6355_v63 = vpop.f32.mrf.mxu1 }
 0x4c1   : > { %v13491_v49 = vsel %vm2471_vm8, %v7961_v9, %v7959_v51  ;;  %v7309_v19 = vmax.bf16 %v7308_v20, %v6684_v30  ;;  %v6685_v4 = vpack.c.bf16 %v6355_v63, %v6351_v52  ;;  %v4287_v36 = vpop.f32.mrf.mxu0 }
 0x4c2   : > { %v4780_v43 = vmax.bf16 %v4779_v35, %v4524_v53  ;;  %v4525_v15 = vpack.c.bf16 %v4284_v24, %v4280_v14  ;;  %v6359_v31 = vpop.f32.mrf.mxu1  ;;  %v4288_v32 = vadd.f32 %v4287_v36, %v14175_v21  ;;  %v14179_v53 = vld [vmem:[#allocation115_spill] sm:$0xff]  ;;  %v14180_v24 = vld [vmem:[#allocation117_spill] sm:$0xff] }
 0x4c3   : > { %v7322_v38 = vmax.bf16 %v7321_v17, %v6685_v4  ;;  %v4289_v6 = vpop.f32.mrf.mxu0 }
 0x4c4   : > { %v4781_v50 = vunpack.i.l.bf16 %v4780_v43  ;;  %v4782_v61 = vunpack.i.h.bf16 %v4780_v43  ;;  %v4793_v3 = vmax.bf16 %v4792_v0, %v4525_v15  ;;  %v6361_v12 = vpop.f32.mrf.mxu1  ;;  %v4290_v48 = vadd.f32 %v4289_v6, %v14177_v60  ;;  %v14181_v43 = vld [vmem:[#allocation116_spill] sm:$0xff] }
 0x4c5   : > { %v4291_v46 = vpop.f32.mrf.mxu0 }
 0x4c6   : > { %v4783_v22 = vmax.f32 %v4781_v50, %v4782_v61  ;;  %v4794_v13 = vunpack.i.l.bf16 %v4793_v3  ;;  %v4795_v47 = vunpack.i.h.bf16 %v4793_v3  ;;  %v4292_v42 = vadd.f32 %v4291_v46, %v14176_v62  ;;  %v6363_v8 = vpop.f32.mrf.mxu1  ;;  %v14182_v3 = vld [vmem:[#allocation118_spill] sm:$0xff] }
 0x4c7   : > { %v6686_v20 = vpack.c.bf16 %v6363_v8, %v6359_v31  ;;  %v4293_v1 = vpop.f32.mrf.mxu0 }
 0x4c8   : > { %v4784_v23 = vrot.slane %v4783_v22, 4  ;;  %v4796_v35 = vmax.f32 %v4794_v13, %v4795_v47  ;;  %v4526_v55 = vpack.c.bf16 %v4292_v42, %v4288_v32  ;;  %v4294_v59 = vadd.f32 %v4293_v1, %v14178_v41  ;;  %v6365_v11 = vpop.f32.mrf.mxu1 }
 0x4c9   : > { %v7310_v25 = vmax.bf16 %v7309_v19, %v6686_v20  ;;  %v6687_v17 = vpack.c.bf16 %v6365_v11, %v6361_v12  ;;  %v4297_v28 = vpop.f32.mrf.mxu0 }
 0x4ca   : > { %v4785_v0 = vmax.f32 %v4783_v22, %v4784_v23  ;;  %v4797_v52 = vrot.slane %v4796_v35, 4  ;;  %v4527_v54 = vpack.c.bf16 %v4294_v59, %v4290_v48  ;;  %v13497_v56 = vpop.f32.mrf.mxu1  ;;  %v4298_v26 = vadd.f32 %v4297_v28, %v14179_v53 }
 0x4cb   : > { %v7311_v16 = vunpack.i.l.bf16 %v7310_v25  ;;  %v7312_v7 = vunpack.i.h.bf16 %v7310_v25  ;;  %v7323_v5 = vmax.bf16 %v7322_v38, %v6687_v17  ;;  %v4299_v44 = vpop.f32.mrf.mxu0 }
 0x4cc   : > { %v4786_v2 = vrot.slane %v4785_v0, 2  ;;  %v4798_v39 = vmax.f32 %v4796_v35, %v4797_v52  ;;  %v13499_v10 = vpop.f32.mrf.mxu1  ;;  %v4300_v15 = vadd.f32 %v4299_v44, %v14181_v43  ;;  %v14183_v52 = vld [vmem:[#allocation119_spill] sm:$0xff] }
 0x4cd   : > { %v7313_v51 = vmax.f32 %v7311_v16, %v7312_v7  ;;  %v7324_v9 = vunpack.i.l.bf16 %v7323_v5  ;;  %v7325_v30 = vunpack.i.h.bf16 %v7323_v5  ;;  %v4301_v58 = vpop.f32.mrf.mxu0  ;;  %v14184_v16 = vld [vmem:[#allocation121_spill] sm:$0xff] }
 0x4ce   : > { %v4787_v37 = vmax.f32 %v4785_v0, %v4786_v2  ;;  %v4799_v14 = vrot.slane %v4798_v39, 2  ;;  %v4302_v63 = vadd.f32 %v4301_v58, %v14180_v24  ;;  %v6373_v19 = vpop.f32.mrf.mxu1  ;;  %v14185_v2 = vld [vmem:[#allocation120_spill] sm:$0xff]  ;;  %v14186_v58 = vld [vmem:[#allocation122_spill] sm:$0xff] }
 0x4cf   : > { %v7314_v4 = vrot.slane %v7313_v51, 4  ;;  %v7326_v36 = vmax.f32 %v7324_v9, %v7325_v30  ;;  %v6688_v31 = vpack.c.bf16 %v6373_v19, %v13497_v56  ;;  %v4303_v38 = vpop.f32.mrf.mxu0 }
 0x4d0   : > { %v4788_v6 = vrot.slane %v4787_v37, 1  ;;  %v4800_v50 = vmax.f32 %v4798_v39, %v4799_v14  ;;  %v4528_v61 = vpack.c.bf16 %v4302_v63, %v4298_v26  ;;  %v4304_v12 = vadd.f32 %v4303_v38, %v14182_v3  ;;  %v6375_v21 = vpop.f32.mrf.mxu1 }
 0x4d1   : > { %v7315_v32 = vmax.f32 %v7313_v51, %v7314_v4  ;;  %v7327_v46 = vrot.slane %v7326_v36, 4  ;;  %v6689_v22 = vpack.c.bf16 %v6375_v21, %v13499_v10  ;;  %v4307_v13 = vpop.f32.mrf.mxu0  ;;  %v8234_v4 = vld [vmem:[%s13889_s8 + $0x8] sm:$0xff] }
 0x4d2   : > { %v4789_v47 = vmax.f32 %v4787_v37, %v4788_v6  ;;  %v4801_v62 = vrot.slane %v4800_v50, 1  ;;  %v4804_v42 = vmax.bf16 %v4528_v61, %v4526_v55  ;;  %v4529_v8 = vpack.c.bf16 %v4304_v12, %v4300_v15  ;;  %v6379_v60 = vpop.f32.mrf.mxu1  ;;  %8244 = vperm.xlu1 %9093, %v8234_v4  }
 0x4d3   : > { %v7316_v48 = vrot.slane %v7315_v32, 2  ;;  %v7328_v20 = vmax.f32 %v7326_v36, %v7327_v46  ;;  %v4309_v1 = vpop.f32.mrf.mxu0  ;;  %v4308_v56 = vadd.f32 %v4307_v13, %v14183_v52  ;;  %v8233_v46 = vld [vmem:[%s13889_s8] sm:$0xff]  ;;  %v14187_v13 = vld [vmem:[#allocation123_spill] sm:$0xff] }
 0x4d4   : > { %v4790_v23 = vpack.i.bf16 %v4789_v47, %v4789_v47  ;;  %v4802_v35 = vmax.f32 %v4800_v50, %v4801_v62  ;;  %v4817_v41 = vmax.bf16 %v4529_v8, %v4527_v54  ;;  %v6381_v59 = vpop.f32.mrf.mxu1  ;;  %v4310_v39 = vadd.f32 %v4309_v1, %v14185_v2  ;;  %v14188_v62 = vld [vmem:[#allocation125_spill] sm:$0xff]  ;;  %8239 = vperm.xlu0 %9094, %v8233_v46   ;;  %v8235_v1 = vld [vmem:[%s13889_s8 + $0x10] sm:$0xff] }
 0x4d5   : > { %v7317_v11 = vmax.f32 %v7315_v32, %v7316_v48  ;;  %v7329_v25 = vrot.slane %v7328_v20, 2  ;;  %v4311_v17 = vpop.f32.mrf.mxu0 }
 0x4d6   : > { %v7786_v28 = vunpack.c.l.b16 %v4790_v23  ;;  %v4803_v0 = vpack.i.bf16 %v4802_v35, %v4802_v35  ;;  %v4312_v7 = vadd.f32 %v4311_v17, %v14184_v16  ;;  %v6383_v5 = vpop.f32.mrf.mxu1  ;;  %v14189_v23 = vld [vmem:[#allocation124_spill] sm:$0xff] }
 0x4d7   : > { %v7318_v55 = vrot.slane %v7317_v11, 1  ;;  %v7330_v44 = vmax.f32 %v7328_v20, %v7329_v25  ;;  %v6690_v10 = vpack.c.bf16 %v6383_v5, %v6379_v60  ;;  %v4313_v51 = vpop.f32.mrf.mxu0 }
 0x4d8   : > { %v13512_v54 = vsel %vm2473_vm9, %v7786_v28, %v13476_v34  ;;  %v7787_v9 = vunpack.c.l.b16 %v4803_v0  ;;  %v4530_v30 = vpack.c.bf16 %v4312_v7, %v4308_v56  ;;  %v4314_v37 = vadd.f32 %v4313_v51, %v14186_v58  ;;  %v6385_v14 = vpop.f32.mrf.mxu1  ;;  %8249 = vperm.xlu0 %9094, %v8235_v1  }
 0x4d9   : > { %v7319_v53 = vmax.f32 %v7317_v11, %v7318_v55  ;;  %v7331_v26 = vrot.slane %v7330_v44, 1  ;;  %v7334_v24 = vmax.bf16 %v6690_v10, %v6688_v31  ;;  %v6691_v63 = vpack.c.bf16 %v6385_v14, %v6381_v59  ;;  %v4317_v19 = vpop.f32.mrf.mxu0  ;;  %v14190_v59 = vld [vmem:[#allocation126_spill] sm:$0xff]  ;;  %v14191_v10 = vld [vmem:[#allocation127_spill] sm:$0xff] }
 0x4da   : > { %v13520_v36 = vsel %vm2473_vm9, %v7787_v9, %v13480_v57  ;;  %v4805_v34 = vmax.bf16 %v4804_v42, %v4530_v30  ;;  %v4531_v43 = vpack.c.bf16 %v4314_v37, %v4310_v39  ;;  %v6389_v15 = vpop.f32.mrf.mxu1  ;;  %v8236_v57 = vld [vmem:[%s13889_s8 + $0x18] sm:$0xff]  ;;  %v4318_v47 = vadd.f32 %v4317_v19, %v14187_v13  ;;  %v14192_v37 = vld [vmem:[#allocation129_spill] sm:$0xff] }
 0x4db   : > { %v7320_v38 = vpack.i.bf16 %v7319_v53, %v7319_v53  ;;  %v7332_v6 = vmax.f32 %v7330_v44, %v7331_v26  ;;  %v7347_v50 = vmax.bf16 %v6691_v63, %v6689_v22  ;;  %v4319_v61 = vpop.f32.mrf.mxu0  ;;  %8254 = vperm.xlu1 %9093, %v8236_v57   ;;  %v14193_v26 = vld [vmem:[#allocation128_spill] sm:$0xff] }
 0x4dc   : > { %v4818_v3 = vmax.bf16 %v4817_v41, %v4531_v43  ;;  %v6391_v31 = vpop.f32.mrf.mxu1  ;;  %v4320_v35 = vadd.f32 %v4319_v61, %v14189_v23 }
 0x4dd   : > { %v7962_v12 = vunpack.c.l.b16 %v7320_v38  ;;  %v7333_v21 = vpack.i.bf16 %v7332_v6, %v7332_v6  ;;  %v4321_v32 = vpop.f32.mrf.mxu0 }
 0x4de   : > { %v4322_v42 = vadd.f32 %v4321_v32, %v14188_v62  ;;  %v6393_v8 = vpop.f32.mrf.mxu1 }
 0x4df   : > { %v13532_v22 = vsel %vm2473_vm9, %v7962_v12, %v13486_v40  ;;  %v7963_v60 = vunpack.c.l.b16 %v7333_v21  ;;  %v6692_v48 = vpack.c.bf16 %v6393_v8, %v6389_v15  ;;  %v4323_v20 = vpop.f32.mrf.mxu0  ;;  %v14194_v15 = vld [vmem:[#allocation130_spill] sm:$0xff] }
 0x4e0   : > { %v4532_v41 = vpack.c.bf16 %v4322_v42, %v4318_v47  ;;  %v4324_v11 = vadd.f32 %v4323_v20, %v14190_v59  ;;  %v6395_v25 = vpop.f32.mrf.mxu1 }
 0x4e1   : > { %v13541_v17 = vsel %vm2473_vm9, %v7963_v60, %v13491_v49  ;;  %v7335_v28 = vmax.bf16 %v7334_v24, %v6692_v48  ;;  %v6693_v40 = vpack.c.bf16 %v6395_v25, %v6391_v31  ;;  %v4327_v0 = vpop.f32.mrf.mxu0 }
 0x4e2   : > { %v4806_v52 = vmax.bf16 %v4805_v34, %v4532_v41  ;;  %v4533_v56 = vpack.c.bf16 %v4324_v11, %v4320_v35  ;;  %v6399_v16 = vpop.f32.mrf.mxu1  ;;  %v4328_v51 = vadd.f32 %v4327_v0, %v14191_v10  ;;  %v14195_v41 = vld [vmem:[#allocation131_spill] sm:$0xff]  ;;  %v14196_v11 = vld [vmem:[#allocation133_spill] sm:$0xff] }
 0x4e3   : > { %v7348_v7 = vmax.bf16 %v7347_v50, %v6693_v40  ;;  %v4329_v5 = vpop.f32.mrf.mxu0 }
 0x4e4   : > { %v4807_v55 = vunpack.i.l.bf16 %v4806_v52  ;;  %v4808_v44 = vunpack.i.h.bf16 %v4806_v52  ;;  %v4819_v2 = vmax.bf16 %v4818_v3, %v4533_v56  ;;  %v6401_v39 = vpop.f32.mrf.mxu1  ;;  %v4330_v24 = vadd.f32 %v4329_v5, %v14193_v26  ;;  %v14197_v52 = vld [vmem:[#allocation132_spill] sm:$0xff] }
 0x4e5   : > { %v4331_v9 = vpop.f32.mrf.mxu0 }
 0x4e6   : > { %v4809_v30 = vmax.f32 %v4807_v55, %v4808_v44  ;;  %v4820_v58 = vunpack.i.l.bf16 %v4819_v2  ;;  %v4821_v49 = vunpack.i.h.bf16 %v4819_v2  ;;  %v4332_v14 = vadd.f32 %v4331_v9, %v14192_v37  ;;  %v6403_v53 = vpop.f32.mrf.mxu1  ;;  %v14198_v2 = vld [vmem:[#allocation134_spill] sm:$0xff] }
 0x4e7   : > { %v6694_v63 = vpack.c.bf16 %v6403_v53, %v6399_v16  ;;  %v4333_v19 = vpop.f32.mrf.mxu0 }
 0x4e8   : > { %v4810_v4 = vrot.slane %v4809_v30, 4  ;;  %v4822_v34 = vmax.f32 %v4820_v58, %v4821_v49  ;;  %v4534_v43 = vpack.c.bf16 %v4332_v14, %v4328_v51  ;;  %v4334_v38 = vadd.f32 %v4333_v19, %v14194_v15  ;;  %v6405_v6 = vpop.f32.mrf.mxu1 }
 0x4e9   : > { %v7336_v50 = vmax.bf16 %v7335_v28, %v6694_v63  ;;  %v6695_v61 = vpack.c.bf16 %v6405_v6, %v6401_v39  ;;  %v4337_v3 = vpop.f32.mrf.mxu0 }
 0x4ea   : > { %v4811_v31 = vmax.f32 %v4809_v30, %v4810_v4  ;;  %v4823_v12 = vrot.slane %v4822_v34, 4  ;;  %v4535_v21 = vpack.c.bf16 %v4334_v38, %v4330_v24  ;;  %v13547_v32 = vpop.f32.mrf.mxu1  ;;  %v4338_v59 = vadd.f32 %v4337_v3, %v14195_v41 }
 0x4eb   : > { %v7337_v46 = vunpack.i.l.bf16 %v7336_v50  ;;  %v7338_v57 = vunpack.i.h.bf16 %v7336_v50  ;;  %v7349_v13 = vmax.bf16 %v7348_v7, %v6695_v61  ;;  %v4339_v47 = vpop.f32.mrf.mxu0 }
 0x4ec   : > { %v4812_v62 = vrot.slane %v4811_v31, 2  ;;  %v4824_v42 = vmax.f32 %v4822_v34, %v4823_v12  ;;  %v13549_v8 = vpop.f32.mrf.mxu1  ;;  %v4340_v56 = vadd.f32 %v4339_v47, %v14197_v52  ;;  %v14199_v12 = vld [vmem:[#allocation135_spill] sm:$0xff] }
 0x4ed   : > { %v7339_v60 = vmax.f32 %v7337_v46, %v7338_v57  ;;  %v7350_v48 = vunpack.i.l.bf16 %v7349_v13  ;;  %v7351_v20 = vunpack.i.h.bf16 %v7349_v13  ;;  %v4341_v1 = vpop.f32.mrf.mxu0  ;;  %v14200_v46 = vld [vmem:[#allocation137_spill] sm:$0xff] }
 0x4ee   : > { %v4813_v23 = vmax.f32 %v4811_v31, %v4812_v62  ;;  %v4825_v35 = vrot.slane %v4824_v42, 2  ;;  %v4342_v25 = vadd.f32 %v4341_v1, %v14196_v11  ;;  %v6413_v28 = vpop.f32.mrf.mxu1  ;;  %v14201_v62 = vld [vmem:[#allocation136_spill] sm:$0xff]  ;;  %v14202_v1 = vld [vmem:[#allocation138_spill] sm:$0xff] }
 0x4ef   : > { %v7340_v40 = vrot.slane %v7339_v60, 4  ;;  %v7352_v0 = vmax.f32 %v7350_v48, %v7351_v20  ;;  %v6696_v16 = vpack.c.bf16 %v6413_v28, %v13547_v32  ;;  %v4343_v7 = vpop.f32.mrf.mxu0 }
 0x4f0   : > { %v4814_v5 = vrot.slane %v4813_v23, 1  ;;  %v4826_v55 = vmax.f32 %v4824_v42, %v4825_v35  ;;  %v4536_v44 = vpack.c.bf16 %v4342_v25, %v4338_v59  ;;  %v4344_v39 = vadd.f32 %v4343_v7, %v14198_v2  ;;  %v6415_v10 = vpop.f32.mrf.mxu1 }
 0x4f1   : > { %v7341_v51 = vmax.f32 %v7339_v60, %v7340_v40  ;;  %v7353_v9 = vrot.slane %v7352_v0, 4  ;;  %v6697_v30 = vpack.c.bf16 %v6415_v10, %v13549_v8  ;;  %v4347_v58 = vpop.f32.mrf.mxu0 }
 0x4f2   : > { %v4815_v49 = vmax.f32 %v4813_v23, %v4814_v5  ;;  %v4827_v37 = vrot.slane %v4826_v55, 1  ;;  %v4830_v14 = vmax.bf16 %v4536_v44, %v4534_v43  ;;  %v4537_v53 = vpack.c.bf16 %v4344_v39, %v4340_v56  ;;  %v6419_v26 = vpop.f32.mrf.mxu1 }
 0x4f3   : > { %v7342_v24 = vrot.slane %v7341_v51, 2  ;;  %v7354_v63 = vmax.f32 %v7352_v0, %v7353_v9  ;;  %v4349_v19 = vpop.f32.mrf.mxu0  ;;  %v4348_v32 = vadd.f32 %v4347_v58, %v14199_v12  ;;  %v14203_v9 = vld [vmem:[#allocation38_spill] sm:$0xff] }
 0x4f4   : > { %v4816_v4 = vpack.i.bf16 %v4815_v49, %v4815_v49  ;;  %v4828_v34 = vmax.f32 %v4826_v55, %v4827_v37  ;;  %v4843_v15 = vmax.bf16 %v4537_v53, %v4535_v21  ;;  %v6421_v38 = vpop.f32.mrf.mxu1  ;;  %v4350_v42 = vadd.f32 %v4349_v19, %v14201_v62  ;;  %v14204_v58 = vld [vmem:[#allocation42_spill] sm:$0xff]  ;;  %v14206_v19 = vld [vmem:[#allocation44_spill] sm:$0xff] }
 0x4f5   : > { %v7343_v6 = vmax.f32 %v7341_v51, %v7342_v24  ;;  %v7355_v50 = vrot.slane %v7354_v63, 2  ;;  %v4351_v61 = vpop.f32.mrf.mxu0  ;;  %v14205_v24 = vld [vmem:[#allocation40_spill] sm:$0xff] }
 0x4f6   : > { %v7788_v3 = vunpack.c.l.b16 %v4816_v4  ;;  %v4829_v31 = vpack.i.bf16 %v4828_v34, %v4828_v34  ;;  %v4352_v57 = vadd.f32 %v4351_v61, %v14200_v46  ;;  %v6423_v13 = vpop.f32.mrf.mxu1 }
 0x4f7   : > { %v7344_v43 = vrot.slane %v7343_v6, 1  ;;  %v7356_v47 = vmax.f32 %v7354_v63, %v7355_v50  ;;  %v6698_v8 = vpack.c.bf16 %v6423_v13, %v6419_v26  ;;  %v4353_v60 = vpop.f32.mrf.mxu0 }
 0x4f8   : > { %v13562_v21 = vsel %vm2475_vm10, %v7788_v3, %v13512_v54  ;;  %v7789_v48 = vunpack.c.l.b16 %v4829_v31  ;;  %v4538_v20 = vpack.c.bf16 %v4352_v57, %v4348_v32  ;;  %v4354_v23 = vadd.f32 %v4353_v60, %v14202_v1  ;;  %v6425_v35 = vpop.f32.mrf.mxu1  ;;  %v14209_v1 = vld [vmem:[#allocation46_spill] sm:$0xff] }
 0x4f9   : > { %v7345_v41 = vmax.f32 %v7343_v6, %v7344_v43  ;;  %v7357_v59 = vrot.slane %v7356_v47, 1  ;;  %v7360_v11 = vmax.bf16 %v6698_v8, %v6696_v16  ;;  %v6699_v25 = vpack.c.bf16 %v6425_v35, %v6421_v38  ;;  %v4357_v28 = vpop.f32.mrf.mxu0  ;;  %v14207_v43 = vld [vmem:[#allocation45_spill] sm:$0xff] }
 0x4fa   : > { %v13567_v40 = vsel %vm2475_vm10, %v7789_v48, %v13520_v36  ;;  %v4831_v0 = vmax.bf16 %v4830_v14, %v4538_v20  ;;  %v4539_v52 = vpack.c.bf16 %v4354_v23, %v4350_v42  ;;  %v6429_v56 = vpop.f32.mrf.mxu1  ;;  %v4358_v16 = vadd.f32 %v4357_v28, %v14203_v9  ;;  %v14210_v28 = vld [vmem:[#allocation48_spill] sm:$0xff] }
 0x4fb   : > { %v7346_v7 = vpack.i.bf16 %v7345_v41, %v7345_v41  ;;  %v7358_v54 = vmax.f32 %v7356_v47, %v7357_v59  ;;  %v7373_v5 = vmax.bf16 %v6699_v25, %v6697_v30  ;;  %v4359_v55 = vpop.f32.mrf.mxu0 }
 0x4fc   : > { %v4844_v44 = vmax.bf16 %v4843_v15, %v4539_v52  ;;  %v6431_v2 = vpop.f32.mrf.mxu1  ;;  %v4360_v30 = vadd.f32 %v4359_v55, %v14205_v24 }
 0x4fd   : > { %v7964_v39 = vunpack.c.l.b16 %v7346_v7  ;;  %v7359_v10 = vpack.i.bf16 %v7358_v54, %v7358_v54  ;;  %v4361_v51 = vpop.f32.mrf.mxu0 }
 0x4fe   : > { %v4362_v49 = vadd.f32 %v4361_v51, %v14204_v58  ;;  %v6433_v37 = vpop.f32.mrf.mxu1 }
 0x4ff   : > { %v13573_v36 = vsel %vm2475_vm10, %v7964_v39, %v13532_v22  ;;  %v7965_v14 = vunpack.c.l.b16 %v7359_v10  ;;  %v6700_v53 = vpack.c.bf16 %v6433_v37, %v6429_v56  ;;  %v4363_v26 = vpop.f32.mrf.mxu0 }
 0x500   : > { %v4540_v63 = vpack.c.bf16 %v4362_v49, %v4358_v16  ;;  %v4364_v4 = vadd.f32 %v4363_v26, %v14206_v19  ;;  %v6435_v34 = vpop.f32.mrf.mxu1 }
 0x501   : > { %v13579_v15 = vsel %vm2475_vm10, %v7965_v14, %v13541_v17  ;;  %v7361_v38 = vmax.bf16 %v7360_v11, %v6700_v53  ;;  %v6701_v6 = vpack.c.bf16 %v6435_v34, %v6431_v2  ;;  %v4367_v50 = vpop.f32.mrf.mxu0  ;;  %v14208_v17 = vld [vmem:[#allocation47_spill] sm:$0xff] }
 0x502   : > { %v4832_v61 = vmax.bf16 %v4831_v0, %v4540_v63  ;;  %v4541_v3 = vpack.c.bf16 %v4364_v4, %v4360_v30  ;;  %v6439_v22 = vpop.f32.mrf.mxu1  ;;  %v4368_v47 = vadd.f32 %v4367_v50, %v14207_v43  ;;  %v14211_v63 = vld [vmem:[#allocation49_spill] sm:$0xff]  ;;  %v14212_v4 = vld [vmem:[#allocation51_spill] sm:$0xff] }
 0x503   : > { %v7374_v31 = vmax.bf16 %v7373_v5, %v6701_v6  ;;  %v4369_v12 = vpop.f32.mrf.mxu0 }
 0x504   : > { %v4833_v32 = vunpack.i.l.bf16 %v4832_v61  ;;  %v4834_v46 = vunpack.i.h.bf16 %v4832_v61  ;;  %v4845_v57 = vmax.bf16 %v4844_v44, %v4541_v3  ;;  %v6441_v13 = vpop.f32.mrf.mxu1  ;;  %v4370_v23 = vadd.f32 %v4369_v12, %v14209_v1  ;;  %v14213_v61 = vld [vmem:[#allocation50_spill] sm:$0xff] }
 0x505   : > { %v4371_v62 = vpop.f32.mrf.mxu0 }
 0x506   : > { %v4835_v42 = vmax.f32 %v4833_v32, %v4834_v46  ;;  %v4846_v8 = vunpack.i.l.bf16 %v4845_v57  ;;  %v4847_v60 = vunpack.i.h.bf16 %v4845_v57  ;;  %v4372_v48 = vadd.f32 %v4371_v62, %v14208_v17  ;;  %v6443_v20 = vpop.f32.mrf.mxu1  ;;  %v14214_v57 = vld [vmem:[#allocation52_spill] sm:$0xff] }
 0x507   : > { %v6702_v35 = vpack.c.bf16 %v6443_v20, %v6439_v22  ;;  %v4373_v41 = vpop.f32.mrf.mxu0 }
 0x508   : > { %v4836_v59 = vrot.slane %v4835_v42, 4  ;;  %v4848_v11 = vmax.f32 %v4846_v8, %v4847_v60  ;;  %v4542_v25 = vpack.c.bf16 %v4372_v48, %v4368_v47  ;;  %v4374_v0 = vadd.f32 %v4373_v41, %v14210_v28  ;;  %v6445_v52 = vpop.f32.mrf.mxu1 }
 0x509   : > { %v7362_v56 = vmax.bf16 %v7361_v38, %v6702_v35  ;;  %v6703_v7 = vpack.c.bf16 %v6445_v52, %v6441_v13  ;;  %v4377_v54 = vpop.f32.mrf.mxu0 }
 0x50a   : > { %v4837_v5 = vmax.f32 %v4835_v42, %v4836_v59  ;;  %v4849_v55 = vrot.slane %v4848_v11, 4  ;;  %v4543_v44 = vpack.c.bf16 %v4374_v0, %v4370_v23  ;;  %v13585_v2 = vpop.f32.mrf.mxu1  ;;  %v4378_v19 = vadd.f32 %v4377_v54, %v14211_v63 }
 0x50b   : > { %v7363_v39 = vunpack.i.l.bf16 %v7362_v56  ;;  %v7364_v10 = vunpack.i.h.bf16 %v7362_v56  ;;  %v7375_v51 = vmax.bf16 %v7374_v31, %v6703_v7  ;;  %v4379_v9 = vpop.f32.mrf.mxu0 }
 0x50c   : > { %v4838_v16 = vrot.slane %v4837_v5, 2  ;;  %v4850_v58 = vmax.f32 %v4848_v11, %v4849_v55  ;;  %v13587_v49 = vpop.f32.mrf.mxu1  ;;  %v4380_v3 = vadd.f32 %v4379_v9, %v14213_v61  ;;  %v14215_v55 = vld [vmem:[#allocation53_spill] sm:$0xff] }
 0x50d   : > { %v7365_v37 = vmax.f32 %v7363_v39, %v7364_v10  ;;  %v7376_v14 = vunpack.i.l.bf16 %v7375_v51  ;;  %v7377_v53 = vunpack.i.h.bf16 %v7375_v51  ;;  %v4381_v26 = vpop.f32.mrf.mxu0  ;;  %v14216_v39 = vld [vmem:[#allocation55_spill] sm:$0xff] }
 0x50e   : > { %v4839_v24 = vmax.f32 %v4837_v5, %v4838_v16  ;;  %v4851_v30 = vrot.slane %v4850_v58, 2  ;;  %v4382_v34 = vadd.f32 %v4381_v26, %v14212_v4  ;;  %v6453_v38 = vpop.f32.mrf.mxu1  ;;  %v14217_v16 = vld [vmem:[#allocation54_spill] sm:$0xff]  ;;  %v14218_v26 = vld [vmem:[#allocation56_spill] sm:$0xff] }
 0x50f   : > { %v7366_v6 = vrot.slane %v7365_v37, 4  ;;  %v7378_v50 = vmax.f32 %v7376_v14, %v7377_v53  ;;  %v6704_v22 = vpack.c.bf16 %v6453_v38, %v13585_v2  ;;  %v4383_v31 = vpop.f32.mrf.mxu0 }
 0x510   : > { %v4840_v12 = vrot.slane %v4839_v24, 1  ;;  %v4852_v32 = vmax.f32 %v4850_v58, %v4851_v30  ;;  %v4544_v46 = vpack.c.bf16 %v4382_v34, %v4378_v19  ;;  %v4384_v13 = vadd.f32 %v4383_v31, %v14214_v57  ;;  %v6455_v43 = vpop.f32.mrf.mxu1 }
 0x511   : > { %v7367_v47 = vmax.f32 %v7365_v37, %v7366_v6  ;;  %v7379_v62 = vrot.slane %v7378_v50, 4  ;;  %v6705_v42 = vpack.c.bf16 %v6455_v43, %v13587_v49  ;;  %v4387_v8 = vpop.f32.mrf.mxu0 }
 0x512   : > { %v4841_v60 = vmax.f32 %v4839_v24, %v4840_v12  ;;  %v4853_v17 = vrot.slane %v4852_v32, 1  ;;  %v4856_v48 = vmax.bf16 %v4544_v46, %v4542_v25  ;;  %v4545_v20 = vpack.c.bf16 %v4384_v13, %v4380_v3  ;;  %v6459_v1 = vpop.f32.mrf.mxu1 }
 0x513   : > { %v7368_v23 = vrot.slane %v7367_v47, 2  ;;  %v7380_v35 = vmax.f32 %v7378_v50, %v7379_v62  ;;  %v4389_v41 = vpop.f32.mrf.mxu0  ;;  %v4388_v2 = vadd.f32 %v4387_v8, %v14215_v55  ;;  %v14219_v62 = vld [vmem:[#allocation57_spill] sm:$0xff]  ;;  %v14220_v8 = vld [vmem:[#allocation59_spill] sm:$0xff] }
 0x514   : > { %v4842_v59 = vpack.i.bf16 %v4841_v60, %v4841_v60  ;;  %v4854_v11 = vmax.f32 %v4852_v32, %v4853_v17  ;;  %v4869_v28 = vmax.bf16 %v4545_v20, %v4543_v44  ;;  %v6461_v0 = vpop.f32.mrf.mxu1  ;;  %v4390_v58 = vadd.f32 %v4389_v41, %v14217_v16  ;;  %v14222_v41 = vld [vmem:[#allocation60_spill] sm:$0xff] }
 0x515   : > { %v7369_v52 = vmax.f32 %v7367_v47, %v7368_v23  ;;  %v7381_v56 = vrot.slane %v7380_v35, 2  ;;  %v4391_v7 = vpop.f32.mrf.mxu0  ;;  %v14221_v23 = vld [vmem:[#allocation58_spill] sm:$0xff] }
 0x516   : > { %v7790_v54 = vunpack.c.l.b16 %v4842_v59  ;;  %v4855_v5 = vpack.i.bf16 %v4854_v11, %v4854_v11  ;;  %v4392_v10 = vadd.f32 %v4391_v7, %v14216_v39  ;;  %v6463_v51 = vpop.f32.mrf.mxu1 }
 0x517   : > { %v7370_v25 = vrot.slane %v7369_v52, 1  ;;  %v7382_v9 = vmax.f32 %v7380_v35, %v7381_v56  ;;  %v6706_v49 = vpack.c.bf16 %v6463_v51, %v6459_v1  ;;  %v4393_v37 = vpop.f32.mrf.mxu0 }
 0x518   : > { %v13600_v44 = vsel %vm7749_vm12, %v7790_v54, %v13562_v21  ;;  %v7791_v14 = vunpack.c.l.b16 %v4855_v5  ;;  %v4546_v53 = vpack.c.bf16 %v4392_v10, %v4388_v2  ;;  %v4394_v24 = vadd.f32 %v4393_v37, %v14218_v26  ;;  %v6465_v30 = vpop.f32.mrf.mxu1  ;;  %v14225_v26 = vld [vmem:[#allocation62_spill] sm:$0xff] }
 0x519   : > { %v7371_v63 = vmax.f32 %v7369_v52, %v7370_v25  ;;  %v7383_v19 = vrot.slane %v7382_v9, 1  ;;  %v7386_v4 = vmax.bf16 %v6706_v49, %v6704_v22  ;;  %v6707_v34 = vpack.c.bf16 %v6465_v30, %v6461_v0  ;;  %v4397_v38 = vpop.f32.mrf.mxu0  ;;  %v14223_v25 = vld [vmem:[#allocation61_spill] sm:$0xff] }
 0x51a   : > { %v13605_v6 = vsel %vm7749_vm12, %v7791_v14, %v13567_v40  ;;  %v4857_v50 = vmax.bf16 %v4856_v48, %v4546_v53  ;;  %v4547_v61 = vpack.c.bf16 %v4394_v24, %v4390_v58  ;;  %v6469_v3 = vpop.f32.mrf.mxu1  ;;  %v4398_v22 = vadd.f32 %v4397_v38, %v14219_v62  ;;  %v14226_v38 = vld [vmem:[#allocation64_spill] sm:$0xff] }
 0x51b   : > { %v7372_v31 = vpack.i.bf16 %v7371_v63, %v7371_v63  ;;  %v7384_v21 = vmax.f32 %v7382_v9, %v7383_v19  ;;  %v7399_v12 = vmax.bf16 %v6707_v34, %v6705_v42  ;;  %v4399_v32 = vpop.f32.mrf.mxu0 }
 0x51c   : > { %v4870_v46 = vmax.bf16 %v4869_v28, %v4547_v61  ;;  %v6471_v57 = vpop.f32.mrf.mxu1  ;;  %v4400_v42 = vadd.f32 %v4399_v32, %v14221_v23 }
 0x51d   : > { %v7966_v13 = vunpack.c.l.b16 %v7372_v31  ;;  %v7385_v43 = vpack.i.bf16 %v7384_v21, %v7384_v21  ;;  %v4401_v47 = vpop.f32.mrf.mxu0 }
 0x51e   : > { %v4402_v60 = vadd.f32 %v4401_v47, %v14220_v8  ;;  %v6473_v17 = vpop.f32.mrf.mxu1 }
 0x51f   : > { %v13611_v40 = vsel %vm7749_vm12, %v7966_v13, %v13573_v36  ;;  %v7967_v48 = vunpack.c.l.b16 %v7385_v43  ;;  %v6708_v20 = vpack.c.bf16 %v6473_v17, %v6469_v3  ;;  %v4403_v1 = vpop.f32.mrf.mxu0 }
 0x520   : > { %v4548_v35 = vpack.c.bf16 %v4402_v60, %v4398_v22  ;;  %v4404_v59 = vadd.f32 %v4403_v1, %v14222_v41  ;;  %v6475_v11 = vpop.f32.mrf.mxu1 }
 0x521   : > { %v13617_v28 = vsel %vm7749_vm12, %v7967_v48, %v13579_v15  ;;  %v7387_v0 = vmax.bf16 %v7386_v4, %v6708_v20  ;;  %v6709_v52 = vpack.c.bf16 %v6475_v11, %v6471_v57  ;;  %v4407_v56 = vpop.f32.mrf.mxu0  ;;  %v14224_v15 = vld [vmem:[#allocation63_spill] sm:$0xff] }
 0x522   : > { %v4858_v7 = vmax.bf16 %v4857_v50, %v4548_v35  ;;  %v4549_v54 = vpack.c.bf16 %v4404_v59, %v4400_v42  ;;  %v6479_v36 = vpop.f32.mrf.mxu1  ;;  %v4408_v9 = vadd.f32 %v4407_v56, %v14223_v25  ;;  %v14227_v35 = vld [vmem:[#allocation65_spill] sm:$0xff]  ;;  %v14228_v59 = vld [vmem:[#allocation67_spill] sm:$0xff] }
 0x523   : > { %v7400_v5 = vmax.bf16 %v7399_v12, %v6709_v52  ;;  %v4409_v55 = vpop.f32.mrf.mxu0 }
 0x524   : > { %v4859_v2 = vunpack.i.l.bf16 %v4858_v7  ;;  %v4860_v39 = vunpack.i.h.bf16 %v4858_v7  ;;  %v4871_v10 = vmax.bf16 %v4870_v46, %v4549_v54  ;;  %v6481_v51 = vpop.f32.mrf.mxu1  ;;  %v4410_v24 = vadd.f32 %v4409_v55, %v14225_v26  ;;  %v14229_v7 = vld [vmem:[#allocation66_spill] sm:$0xff] }
 0x525   : > { %v4411_v16 = vpop.f32.mrf.mxu0 }
 0x526   : > { %v4861_v58 = vmax.f32 %v4859_v2, %v4860_v39  ;;  %v4872_v49 = vunpack.i.l.bf16 %v4871_v10  ;;  %v4873_v37 = vunpack.i.h.bf16 %v4871_v10  ;;  %v4412_v14 = vadd.f32 %v4411_v16, %v14224_v15  ;;  %v6483_v53 = vpop.f32.mrf.mxu1  ;;  %v14230_v39 = vld [vmem:[#allocation68_spill] sm:$0xff] }
 0x527   : > { %v6710_v30 = vpack.c.bf16 %v6483_v53, %v6479_v36  ;;  %v4413_v63 = vpop.f32.mrf.mxu0 }
 0x528   : > { %v4862_v19 = vrot.slane %v4861_v58, 4  ;;  %v4874_v4 = vmax.f32 %v4872_v49, %v4873_v37  ;;  %v4550_v34 = vpack.c.bf16 %v4412_v14, %v4408_v9  ;;  %v4414_v50 = vadd.f32 %v4413_v63, %v14226_v38  ;;  %v6485_v61 = vpop.f32.mrf.mxu1 }
 0x529   : > { %v7388_v3 = vmax.bf16 %v7387_v0, %v6710_v30  ;;  %v6711_v31 = vpack.c.bf16 %v6485_v61, %v6481_v51  ;;  %v4417_v21 = vpop.f32.mrf.mxu0 }
 0x52a   : > { %v4863_v12 = vmax.f32 %v4861_v58, %v4862_v19  ;;  %v4875_v32 = vrot.slane %v4874_v4, 4  ;;  %v4551_v46 = vpack.c.bf16 %v4414_v50, %v4410_v24  ;;  %v13623_v57 = vpop.f32.mrf.mxu1  ;;  %v4418_v41 = vadd.f32 %v4417_v21, %v14227_v35  ;;  %v14231_v21 = vld [vmem:[#allocation69_spill] sm:$0xff] }
 0x52b   : > { %v7389_v13 = vunpack.i.l.bf16 %v7388_v3  ;;  %v7390_v43 = vunpack.i.h.bf16 %v7388_v3  ;;  %v7401_v47 = vmax.bf16 %v7400_v5, %v6711_v31  ;;  %v4419_v62 = vpop.f32.mrf.mxu0 }
 0x52c   : > { %v4864_v22 = vrot.slane %v4863_v12, 2  ;;  %v4876_v8 = vmax.f32 %v4874_v4, %v4875_v32  ;;  %v13625_v60 = vpop.f32.mrf.mxu1  ;;  %v4420_v54 = vadd.f32 %v4419_v62, %v14229_v7  ;;  %v14232_v32 = vld [vmem:[#allocation71_spill] sm:$0xff]  ;;  %v14233_v62 = vld [vmem:[#allocation70_spill] sm:$0xff] }
 0x52d   : > { %v7391_v17 = vmax.f32 %v7389_v13, %v7390_v43  ;;  %v7402_v48 = vunpack.i.l.bf16 %v7401_v47  ;;  %v7403_v20 = vunpack.i.h.bf16 %v7401_v47  ;;  %v4421_v1 = vpop.f32.mrf.mxu0 }
 0x52e   : > { %v4865_v23 = vmax.f32 %v4863_v12, %v4864_v22  ;;  %v4877_v42 = vrot.slane %v4876_v8, 2  ;;  %v4422_v11 = vadd.f32 %v4421_v1, %v14228_v59  ;;  %v13629_v0 = vpop.f32.mrf.mxu1 }
 0x52f   : > { %v7392_v52 = vrot.slane %v7391_v17, 4  ;;  %v7404_v56 = vmax.f32 %v7402_v48, %v7403_v20  ;;  %v4423_v36 = vpop.f32.mrf.mxu0  ;;  %v14234_v20 = vld [vmem:[#allocation72_spill] sm:$0xff] }
 0x530   : > { %v4866_v5 = vrot.slane %v4865_v23, 1  ;;  %v4878_v55 = vmax.f32 %v4876_v8, %v4877_v42  ;;  %v4552_v2 = vpack.c.bf16 %v4422_v11, %v4418_v41  ;;  %v4424_v10 = vadd.f32 %v4423_v36, %v14230_v39  ;;  %v13633_v51 = vpop.f32.mrf.mxu1 }
 0x531   : > { %v7393_v25 = vmax.f32 %v7391_v17, %v7392_v52  ;;  %v7405_v9 = vrot.slane %v7404_v56, 4  ;;  %v4427_v16 = vpop.f32.mrf.mxu0 }
 0x532   : > { %v4867_v58 = vmax.f32 %v4865_v23, %v4866_v5  ;;  %v4879_v49 = vrot.slane %v4878_v55, 1  ;;  %v4882_v37 = vmax.bf16 %v4552_v2, %v4550_v34  ;;  %v4553_v15 = vpack.c.bf16 %v4424_v10, %v4420_v54  ;;  %v13635_v14 = vpop.f32.mrf.mxu1  ;;  %v14235_v10 = vld [vmem:[#allocation73_spill] sm:$0xff] }
 0x533   : > { %v7394_v53 = vrot.slane %v7393_v25, 2  ;;  %v7406_v26 = vmax.f32 %v7404_v56, %v7405_v9  ;;  %v4429_v24 = vpop.f32.mrf.mxu0  ;;  %v4428_v12 = vadd.f32 %v4427_v16, %v14231_v21  ;;  %v14236_v9 = vld [vmem:[#allocation75_spill] sm:$0xff] }
 0x534   : > { %v4868_v30 = vpack.i.bf16 %v4867_v58, %v4867_v58  ;;  %v4880_v63 = vmax.f32 %v4878_v55, %v4879_v49  ;;  %v4895_v19 = vmax.bf16 %v4553_v15, %v4551_v46  ;;  %v13637_v4 = vpop.f32.mrf.mxu1  ;;  %v4430_v22 = vadd.f32 %v4429_v24, %v14233_v62  ;;  %v14237_v15 = vld [vmem:[#allocation74_spill] sm:$0xff]  ;;  %v14238_v24 = vld [vmem:[#allocation76_spill] sm:$0xff] }
 0x535   : > { %v7395_v38 = vmax.f32 %v7393_v25, %v7394_v53  ;;  %v7407_v50 = vrot.slane %v7406_v26, 2  ;;  %v4431_v61 = vpop.f32.mrf.mxu0 }
 0x536   : > { %v7792_v3 = vunpack.c.l.b16 %v4868_v30  ;;  %v4881_v31 = vpack.i.bf16 %v4880_v63, %v4880_v63  ;;  %v4432_v34 = vadd.f32 %v4431_v61, %v14232_v32  ;;  %v6503_v13 = vpop.f32.mrf.mxu1 }
 0x537   : > { %v7396_v43 = vrot.slane %v7395_v38, 1  ;;  %v7408_v47 = vmax.f32 %v7406_v26, %v7407_v50  ;;  %v4433_v8 = vpop.f32.mrf.mxu0 }
 0x538   : > { %v13644_v46 = vsel %vm7751_vm13, %v7792_v3, %v13600_v44  ;;  %v7793_v17 = vunpack.c.l.b16 %v4881_v31  ;;  %v4554_v48 = vpack.c.bf16 %v4432_v34, %v4428_v12  ;;  %v4434_v1 = vadd.f32 %v4433_v8, %v14234_v20  ;;  %v6505_v23 = vpop.f32.mrf.mxu1 }
 0x539   : > { %v7397_v42 = vmax.f32 %v7395_v38, %v7396_v43  ;;  %v7409_v35 = vrot.slane %v7408_v47, 1  ;;  %v4437_v41 = vpop.f32.mrf.mxu0  ;;  %v6712_v34 = vpack.c.bf16 %v13629_v0, %v13623_v57  ;;  %v6713_v43 = vpack.c.bf16 %v13633_v51, %v13625_v60 }
 0x53a   : > { %v4883_v59 = vmax.bf16 %v4882_v37, %v4554_v48  ;;  %v4555_v11 = vpack.c.bf16 %v4434_v1, %v4430_v22  ;;  %v6509_v52 = vpop.f32.mrf.mxu1  ;;  %v13649_v56 = vsel %vm7751_vm13, %v7793_v17, %v13605_v6  ;;  %v4438_v25 = vadd.f32 %v4437_v41, %v14235_v10 }
 0x53b   : > { %v7398_v7 = vpack.i.bf16 %v7397_v42, %v7397_v42  ;;  %v7410_v54 = vmax.f32 %v7408_v47, %v7409_v35  ;;  %v4439_v36 = vpop.f32.mrf.mxu0  ;;  %v6714_v47 = vpack.c.bf16 %v6503_v13, %v13635_v14 }
 0x53c   : > { %v4896_v44 = vmax.bf16 %v4895_v19, %v4555_v11  ;;  %v6511_v5 = vpop.f32.mrf.mxu1  ;;  %v4440_v53 = vadd.f32 %v4439_v36, %v14237_v15 }
 0x53d   : > { %v7968_v55 = vunpack.c.l.b16 %v7398_v7  ;;  %v7411_v2 = vpack.i.bf16 %v7410_v54, %v7410_v54  ;;  %v4441_v39 = vpop.f32.mrf.mxu0  ;;  %v7412_v11 = vmax.bf16 %v6714_v47, %v6712_v34 }
 0x53e   : > { %v4442_v16 = vadd.f32 %v4441_v39, %v14236_v9  ;;  %v6513_v58 = vpop.f32.mrf.mxu1 }
 0x53f   : > { %v13655_v49 = vsel %vm7751_vm13, %v7968_v55, %v13611_v40  ;;  %v7969_v37 = vunpack.c.l.b16 %v7411_v2  ;;  %v4443_v6 = vpop.f32.mrf.mxu0  ;;  %v6716_v20 = vpack.c.bf16 %v6513_v58, %v6509_v52 }
 0x540   : > { %v4556_v26 = vpack.c.bf16 %v4442_v16, %v4438_v25  ;;  %v4444_v30 = vadd.f32 %v4443_v6, %v14238_v24  ;;  %v6515_v63 = vpop.f32.mrf.mxu1 }
 0x541   : > { %v13659_v19 = vpop.f32.mrf.mxu0  ;;  %v13663_v38 = vsel %vm7751_vm13, %v7969_v37, %v13617_v28  ;;  %v6715_v28 = vpack.c.bf16 %v6505_v23, %v13637_v4  ;;  %v6717_v41 = vpack.c.bf16 %v6515_v63, %v6511_v5  ;;  %v7413_v4 = vmax.bf16 %v7412_v11, %v6716_v20  ;;  %v14241_v20 = vld [vmem:[#allocation81_spill] sm:$0xff] }
 0x542   : > { %v4884_v50 = vmax.bf16 %v4883_v59, %v4556_v26  ;;  %v4557_v61 = vpack.c.bf16 %v4444_v30, %v4440_v53  ;;  %v6519_v3 = vpop.f32.mrf.mxu1 }
 0x543   : > { %v13665_v31 = vpop.f32.mrf.mxu0  ;;  %v7425_v7 = vmax.bf16 %v6715_v28, %v6713_v43 }
 0x544   : > { %v4885_v40 = vunpack.i.l.bf16 %v4884_v50  ;;  %v4886_v21 = vunpack.i.h.bf16 %v4884_v50  ;;  %v4897_v12 = vmax.bf16 %v4896_v44, %v4557_v61  ;;  %v6521_v32 = vpop.f32.mrf.mxu1 }
 0x545   : > { %v4451_v62 = vpop.f32.mrf.mxu0  ;;  %v7426_v44 = vmax.bf16 %v7425_v7, %v6717_v41 }
 0x546   : > { %v4887_v22 = vmax.f32 %v4885_v40, %v4886_v21  ;;  %v4898_v8 = vunpack.i.l.bf16 %v4897_v12  ;;  %v4899_v17 = vunpack.i.h.bf16 %v4897_v12  ;;  %v6523_v48 = vpop.f32.mrf.mxu1 }
 0x547   : > { %v4453_v1 = vpop.f32.mrf.mxu0  ;;  %v6718_v57 = vpack.c.bf16 %v6523_v48, %v6519_v3 }
 0x548   : > { %v4888_v42 = vrot.slane %v4887_v22, 4  ;;  %v4900_v35 = vmax.f32 %v4898_v8, %v4899_v17  ;;  %v6525_v59 = vpop.f32.mrf.mxu1  ;;  %v14240_v17 = vld [vmem:[#allocation79_spill] sm:$0xff] }
 0x549   : > { %v4457_v0 = vpop.f32.mrf.mxu0  ;;  %v6719_v14 = vpack.c.bf16 %v6525_v59, %v6521_v32  ;;  %v7414_v55 = vmax.bf16 %v7413_v4, %v6718_v57  ;;  %v14239_v32 = vld [vmem:[#allocation83_spill] sm:$0xff]  ;;  %v4452_v48 = vadd.f32 %v4451_v62, %v14240_v17  ;;  %v14243_v57 = vld [vmem:[#allocation77_spill] sm:$0xff]  ;;  %v14246_v62 = vld [vmem:[#allocation82_spill] sm:$0xff] }
 0x54a   : > { %v4889_v60 = vmax.f32 %v4887_v22, %v4888_v42  ;;  %v4901_v51 = vrot.slane %v4900_v35, 4  ;;  %v13673_v13 = vpop.f32.mrf.mxu1  ;;  %v4458_v42 = vadd.f32 %v4457_v0, %v14241_v20  ;;  %v4448_v7 = vadd.f32 %v13659_v19, %v14243_v57 }
 0x54b   : > { %v4459_v23 = vpop.f32.mrf.mxu0  ;;  %v7427_v10 = vmax.bf16 %v7426_v44, %v6719_v14  ;;  %v7415_v6 = vunpack.i.l.bf16 %v7414_v55  ;;  %v7416_v15 = vunpack.i.h.bf16 %v7414_v55 }
 0x54c   : > { %v4890_v54 = vrot.slane %v4889_v60, 2  ;;  %v4902_v36 = vmax.f32 %v4900_v35, %v4901_v51  ;;  %v13675_v52 = vpop.f32.mrf.mxu1  ;;  %v14242_v35 = vld [vmem:[#allocation84_spill] sm:$0xff]  ;;  %v4460_v55 = vadd.f32 %v4459_v23, %v14246_v62 }
 0x54d   : > { %v4461_v2 = vpop.f32.mrf.mxu0  ;;  %v7428_v30 = vunpack.i.l.bf16 %v7427_v10  ;;  %v7429_v63 = vunpack.i.h.bf16 %v7427_v10  ;;  %v7417_v12 = vmax.f32 %v7415_v6, %v7416_v15  ;;  %v14249_v6 = vld [vmem:[#allocation78_spill] sm:$0xff]  ;;  %v4558_v15 = vpack.c.bf16 %v4452_v48, %v4448_v7 }
 0x54e   : > { %v4891_v5 = vmax.f32 %v4889_v60, %v4890_v54  ;;  %v4903_v39 = vrot.slane %v4902_v36, 2  ;;  %v13677_v25 = vpop.f32.mrf.mxu1  ;;  %v4462_v34 = vadd.f32 %v4461_v2, %v14239_v32  ;;  %v14244_v60 = vld [vmem:[#allocation87_spill] sm:$0xff] }
 0x54f   : > { %v4463_v9 = vpop.f32.mrf.mxu0  ;;  %v7430_v22 = vmax.f32 %v7428_v30, %v7429_v63  ;;  %v7418_v54 = vrot.slane %v7417_v12, 4  ;;  %v6720_v7 = vpack.c.bf16 %v13677_v25, %v13673_v13 }
 0x550   : > { %v4892_v16 = vrot.slane %v4891_v5, 1  ;;  %v4904_v58 = vmax.f32 %v4902_v36, %v4903_v39  ;;  %v13679_v37 = vpop.f32.mrf.mxu1  ;;  %v4464_v41 = vadd.f32 %v4463_v9, %v14242_v35  ;;  %v14245_v36 = vld [vmem:[#allocation80_spill] sm:$0xff]  ;;  %v4560_v0 = vpack.c.bf16 %v4462_v34, %v4458_v42  ;;  %v14247_v39 = vld [vmem:[#allocation85_spill] sm:$0xff]  ;;  %v14253_v35 = vld [vmem:[#allocation90_spill] sm:$0xff] }
 0x551   : > { %v4467_v53 = vpop.f32.mrf.mxu0  ;;  %v4454_v44 = vadd.f32 %v4453_v1, %v14245_v36  ;;  %v14248_v9 = vld [vmem:[#allocation88_spill] sm:$0xff] }
 0x552   : > { %v4893_v26 = vmax.f32 %v4891_v5, %v4892_v16  ;;  %v4905_v24 = vrot.slane %v4904_v58, 1  ;;  %v13681_v50 = vpop.f32.mrf.mxu1  ;;  %v7431_v5 = vrot.slane %v7430_v22, 4  ;;  %v4468_v10 = vadd.f32 %v4467_v53, %v14247_v39 }
 0x553   : > { %v4469_v61 = vpop.f32.mrf.mxu0  ;;  %v4908_v53 = vmax.bf16 %v4560_v0, %v4558_v15 }
 0x554   : > { %v4894_v3 = vpack.i.bf16 %v4893_v26, %v4893_v26  ;;  %v4906_v40 = vmax.f32 %v4904_v58, %v4905_v24  ;;  %v13683_v21 = vpop.f32.mrf.mxu1  ;;  %v4561_v26 = vpack.c.bf16 %v4464_v41, %v4460_v55  ;;  %v14250_v24 = vld [vmem:[#allocation86_spill] sm:$0xff]  ;;  %v7432_v34 = vmax.f32 %v7430_v22, %v7431_v5 }
 0x555   : > { %v4471_v43 = vpop.f32.mrf.mxu0  ;;  %v4470_v23 = vadd.f32 %v4469_v61, %v14250_v24  ;;  %v14254_v61 = vld [vmem:[#allocation9_spill] sm:$0xff]  ;;  %v6721_v55 = vpack.c.bf16 %v13679_v37, %v13675_v52 }
 0x556   : > { %v7794_v47 = vunpack.c.l.b16 %v4894_v3  ;;  %v4907_v28 = vpack.i.bf16 %v4906_v40, %v4906_v40  ;;  %v6543_v8 = vpop.f32.mrf.mxu1  ;;  %v4472_v51 = vadd.f32 %v4471_v43, %v14244_v60  ;;  %v7419_v3 = vmax.f32 %v7417_v12, %v7418_v54 }
 0x557   : > { %v4473_v59 = vpop.f32.mrf.mxu0  ;;  %v6722_v22 = vpack.c.bf16 %v6543_v8, %v13681_v50 }
 0x558   : > { %v7795_v11 = vunpack.c.l.b16 %v4907_v28  ;;  %v6545_v14 = vpop.f32.mrf.mxu1  ;;  %v13694_v4 = vsel %vm7753_vm14, %v7794_v47, %v13644_v46  ;;  %v4474_v16 = vadd.f32 %v4473_v59, %v14248_v9  ;;  %v4450_v46 = vadd.f32 %v13665_v31, %v14249_v6  ;;  %v14251_v47 = vld [vmem:[#allocation89_spill] sm:$0xff] }
 0x559   : > { %v4477_v2 = vpop.f32.mrf.mxu0  ;;  %v4562_v30 = vpack.c.bf16 %v4472_v51, %v4468_v10  ;;  %v7420_v12 = vrot.slane %v7419_v3, 2  ;;  %v7433_v51 = vrot.slane %v7432_v34, 2  ;;  %v6723_v0 = vpack.c.bf16 %v6545_v14, %v13683_v21 }
 0x55a   : > { %v6549_v19 = vpop.f32.mrf.mxu1  ;;  %v13702_v58 = vsel %vm7753_vm14, %v7795_v11, %v13649_v56  ;;  %v4559_v40 = vpack.c.bf16 %v4454_v44, %v4450_v46  ;;  %v4563_v43 = vpack.c.bf16 %v4474_v16, %v4470_v23  ;;  %v4478_v28 = vadd.f32 %v4477_v2, %v14251_v47  ;;  %v14252_v56 = vld [vmem:[#allocation8_spill] sm:$0xff] }
 0x55b   : > { %v4479_v1 = vpop.f32.mrf.mxu0  ;;  %v4909_v48 = vmax.bf16 %v4908_v53, %v4562_v30  ;;  %v7421_v50 = vmax.f32 %v7419_v3, %v7420_v12  ;;  %v7438_v8 = vmax.bf16 %v6722_v22, %v6720_v7  ;;  %v7434_v6 = vmax.f32 %v7432_v34, %v7433_v51  ;;  %v13721_v30 = vpop.permute.xlu1 %8141 }
 0x55c   : > { %v6551_v63 = vpop.f32.mrf.mxu1  ;;  %v4921_v42 = vmax.bf16 %v4561_v26, %v4559_v40  ;;  %v4480_v41 = vadd.f32 %v4479_v1, %v14253_v35  ;;  %v7451_v24 = vmax.bf16 %v6723_v0, %v6721_v55 }
 0x55d   : > { %v4481_v32 = vpop.f32.mrf.mxu0  ;;  %v7422_v40 = vrot.slane %v7421_v50, 1  ;;  %v7435_v34 = vrot.slane %v7434_v6, 1 }
 0x55e   : > { %v4482_v17 = vadd.f32 %v4481_v32, %v14252_v56  ;;  %v6553_v20 = vpop.f32.mrf.mxu1  ;;  %v4922_v54 = vmax.bf16 %v4921_v42, %v4563_v43 }
 0x55f   : > { %v4483_v31 = vpop.f32.mrf.mxu0  ;;  %v6724_v2 = vpack.c.bf16 %v6553_v20, %v6549_v19  ;;  %v13725_v12 = vpop.permute.xlu1 %8131 }
 0x560   : > { %v4564_v59 = vpack.c.bf16 %v4482_v17, %v4478_v28  ;;  %v4484_v11 = vadd.f32 %v4483_v31, %v14254_v61  ;;  %v6555_v57 = vpop.f32.mrf.mxu1 }
 0x561   : > { %v13714_v60 = vpop.f32.mrf.mxu0  ;;  %v6725_v9 = vpack.c.bf16 %v6555_v57, %v6551_v63  ;;  %v7439_v52 = vmax.bf16 %v7438_v8, %v6724_v2 }
 0x562   : > { %v4910_v36 = vmax.bf16 %v4909_v48, %v4564_v59  ;;  %v4565_v44 = vpack.c.bf16 %v4484_v11, %v4480_v41  ;;  %v6559_v62 = vpop.f32.mrf.mxu1  ;;  %v7423_v48 = vmax.f32 %v7421_v50, %v7422_v40  ;;  %v7436_v11 = vmax.f32 %v7434_v6, %v7435_v34 }
 0x563   : > { %v13719_v5 = vpop.f32.mrf.mxu0  ;;  %v7452_v53 = vmax.bf16 %v7451_v24, %v6725_v9  ;;  %v13729_v6 = vpop.permute.xlu1 %8136  ;;  %v7764_v34 = vpack.c.b16 %v13391_v45, %v13391_v45 }
 0x564   : > { %v4911_v39 = vunpack.i.l.bf16 %v4910_v36  ;;  %v4912_v10 = vunpack.i.h.bf16 %v4910_v36  ;;  %v4923_v13 = vmax.bf16 %v4922_v54, %v4565_v44  ;;  %v6561_v25 = vpop.f32.mrf.mxu1  ;;  %v7424_v44 = vpack.i.bf16 %v7423_v48, %v7423_v48 }
 0x565   : > { %v7667_v16 = vpop.f32.mrf.mxu0  ;;  %v7437_v2 = vpack.i.bf16 %v7436_v11, %v7436_v11 }
 0x566   : > { %v4913_v46 = vmax.f32 %v4911_v39, %v4912_v10  ;;  %v4924_v15 = vunpack.i.l.bf16 %v4923_v13  ;;  %v4925_v26 = vunpack.i.h.bf16 %v4923_v13  ;;  %v6563_v1 = vpop.f32.mrf.mxu1  ;;  %v13727_v10 = vpop.permute.xlu0 %8146 }
 0x567   : > { %v6726_v37 = vpack.c.bf16 %v6563_v1, %v6559_v62  ;;  %v7669_v21 = vpop.f32.mrf.mxu0  ;;  %v7971_v24 = vunpack.c.l.b16 %v7437_v2 }
 0x568   : > { %v4914_v14 = vrot.slane %v4913_v46, 4  ;;  %v4926_v19 = vmax.f32 %v4924_v15, %v4925_v26  ;;  %v6565_v23 = vpop.f32.mrf.mxu1 }
 0x569   : > { %v7440_v3 = vmax.bf16 %v7439_v52, %v6726_v37  ;;  %v6727_v32 = vpack.c.bf16 %v6565_v23, %v6561_v25  ;;  %v13723_v63 = vpop.f32.mrf.mxu0  ;;  %v13732_v37 = vpack.c.bf16 %v7667_v16, %v13714_v60 }
 0x56a   : > { %v4915_v43 = vmax.f32 %v4913_v46, %v4914_v14  ;;  %v4927_v47 = vrot.slane %v4926_v19, 4  ;;  %v7970_v46 = vunpack.c.l.b16 %v7424_v44 }
 0x56b   : > { %v7441_v28 = vunpack.i.l.bf16 %v7440_v3  ;;  %v7442_v56 = vunpack.i.h.bf16 %v7440_v3  ;;  %v7453_v17 = vmax.bf16 %v7452_v53, %v6727_v32  ;;  %v7675_v20 = vpop.f32.mrf.mxu0  ;;  %v13735_v3 = vpack.c.bf16 %v7669_v21, %v13719_v5  ;;  %v8127_v21 = vpop.permute.xlu1 %8126 }
 0x56c   : > { %v4916_v42 = vrot.slane %v4915_v43, 2  ;;  %v4928_v31 = vmax.f32 %v4926_v19, %v4927_v47  ;;  %v7765_v32 = vpack.c.b16 %v13381_v33, %v13381_v33  ;;  %v8000_v5 = vsel %vm7753_vm14, %v7971_v24, %v13663_v38 }
 0x56d   : > { %v7443_v35 = vmax.f32 %v7441_v28, %v7442_v56  ;;  %v7454_v41 = vunpack.i.l.bf16 %v7453_v17  ;;  %v7455_v59 = vunpack.i.h.bf16 %v7453_v17  ;;  %v7677_v61 = vpop.f32.mrf.mxu0  ;;  %v7993_v56 = vsel %vm7753_vm14, %v7970_v46, %v13655_v49 }
 0x56e   : > { %v4929_v57 = vrot.slane %v4928_v31, 2  ;;  %v4917_v7 = vmax.f32 %v4915_v43, %v4916_v42  ;;  %v13741_v43 = vpop.permute.xlu0 %8121  ;;  %v8037_v17 = vunpack.c.l.bf16 %v13732_v37  ;;  %v8038_v11 = vunpack.c.l.bf16 %v13735_v3 }
 0x56f   : > { %v7444_v22 = vrot.slane %v7443_v35, 4  ;;  %v7456_v51 = vmax.f32 %v7454_v41, %v7455_v59  ;;  %v7679_v54 = vpop.f32.mrf.mxu0  ;;  %v7704_v49 = vpack.c.bf16 %v7677_v61, %v13723_v63 }
 0x570   : > { %v4930_v36 = vmax.f32 %v4928_v31, %v4929_v57  ;;  %v4918_v13 = vrot.slane %v4917_v7, 1  ;;  %v7705_v42 = vpack.c.bf16 %v7679_v54, %v7675_v20  ;;  %v8040_v57 = vunpack.c.h.bf16 %v13735_v3 }
 0x571   : > { %v7445_v62 = vmax.f32 %v7443_v35, %v7444_v22  ;;  %v7457_v55 = vrot.slane %v7456_v51, 4  ;;  %v7683_v0 = vpop.f32.mrf.mxu0 }
 0x572   : > { %v4931_v39 = vrot.slane %v4930_v36, 1  ;;  %v4919_v14 = vmax.f32 %v4917_v7, %v4918_v13 }
 0x573   : > { %v7446_v25 = vrot.slane %v7445_v62, 2  ;;  %v7458_v50 = vmax.f32 %v7456_v51, %v7457_v55  ;;  %v7685_v8 = vpop.f32.mrf.mxu0  ;;  %v8112_v55 = vpop.permute.xlu0 %8111 }
 0x574   : > { %v4932_v9 = vmax.f32 %v4930_v36, %v4931_v39  ;;  %v4920_v31 = vpack.i.bf16 %v4919_v14, %v4919_v14  ;;  %v8042_v36 = vunpack.c.l.bf16 %v7705_v42 }
 0x575   : > { %v7447_v15 = vmax.f32 %v7445_v62, %v7446_v25  ;;  %v7459_v26 = vrot.slane %v7458_v50, 2  ;;  %v7687_v1 = vpop.f32.mrf.mxu0 }
 0x576   : > { %v4933_v52 = vpack.i.bf16 %v4932_v9, %v4932_v9  ;;  %v7706_v41 = vpack.c.bf16 %v7687_v1, %v7683_v0  ;;  %v7796_v0 = vunpack.c.l.b16 %v4920_v31  ;;  %v8117_v9 = vpop.permute.xlu1 %8116 }
 0x577   : > { %v7448_v19 = vrot.slane %v7447_v15, 1  ;;  %v7460_v23 = vmax.f32 %v7458_v50, %v7459_v26  ;;  %v7689_v40 = vpop.f32.mrf.mxu0 }
 0x578   : > { %v7797_v53 = vunpack.c.l.b16 %v4933_v52  ;;  %v7707_v60 = vpack.c.bf16 %v7689_v40, %v7685_v8  ;;  %v8045_v39 = vunpack.c.l.bf16 %v7706_v41  ;;  %v8047_v63 = vunpack.c.h.bf16 %v7706_v41 }
 0x579   : > { %v7449_v47 = vmax.f32 %v7447_v15, %v7448_v19  ;;  %v7461_v28 = vrot.slane %v7460_v23, 1  ;;  %v7693_v16 = vpop.f32.mrf.mxu0  ;;  %v8043_v40 = vunpack.c.h.bf16 %v7704_v49  ;;  %v8039_v41 = vunpack.c.h.bf16 %v13732_v37 }
 0x57a   : > { %v7811_v33 = vsel %vm7755_vm1, %v7797_v53, %v13702_v58  ;;  %v8046_v51 = vunpack.c.l.bf16 %v7707_v60  ;;  %v8048_v38 = vunpack.c.h.bf16 %v7707_v60  ;;  %v8044_v58 = vunpack.c.h.bf16 %v7705_v42  ;;  %v8102_v60 = vpop.permute.xlu0 %8101 }
 0x57b   : > { %v7450_v48 = vpack.i.bf16 %v7449_v47, %v7449_v47  ;;  %v7462_v35 = vmax.f32 %v7460_v23, %v7461_v28  ;;  %v7695_v59 = vpop.f32.mrf.mxu0  ;;  %v7813_v7 = vpack.c.b16 %v7811_v33, %v7811_v33  ;;  %v8041_v23 = vunpack.c.l.bf16 %v7704_v49 }
 0x57c   : > { %v8174_v46 = vadd.f32 %v13725_v12, %v8046_v51  ;;  %v8176_v15 = vadd.f32 %v13729_v6, %v8048_v38  ;;  %v8170_v53 = vadd.f32 %v13741_v43, %v8042_v36  ;;  %v8173_v47 = vadd.f32 %v13725_v12, %v8045_v39 }
 0x57d   : > { %v7972_v20 = vunpack.c.l.b16 %v7450_v48  ;;  %v7463_v22 = vpack.i.bf16 %v7462_v35, %v7462_v35  ;;  %v7697_v54 = vpop.f32.mrf.mxu0  ;;  %v13754_v62 = vsel %vm8006_vm15, %v7765_v32, %v7813_v7  ;;  %v8172_v32 = vadd.f32 %v8127_v21, %v8044_v58 }
 0x57e   : > { %v7708_v44 = vpack.c.bf16 %v7697_v54, %v7693_v16  ;;  %v8175_v16 = vadd.f32 %v13729_v6, %v8047_v63  ;;  %v8206_v33 = vmax.f32 %v8174_v46, 0.0  ;;  %v8208_v31 = vmax.f32 %v8176_v15, 0.0 }
 0x57f   : > { %v7973_v2 = vunpack.c.l.b16 %v7463_v22  ;;  %v7699_v13 = vpop.f32.mrf.mxu0  ;;  %v7994_v25 = vsel %vm7755_vm1, %v7972_v20, %v7993_v56  ;;  %v8166_v12 = vadd.f32 %v8112_v55, %v8038_v11  ;;  %v8202_v49 = vmax.f32 %v8170_v53, 0.0 }
 0x580   : > { %v8049_v61 = vunpack.c.l.bf16 %v7708_v44  ;;  %v8051_v50 = vunpack.c.h.bf16 %v7708_v44  ;;  %v7709_v8 = vpack.c.bf16 %v7699_v13, %v7695_v59  ;;  %v13761_v1 = vpack.c.b16 %v7994_v25, %v13364_v18 }
 0x581   : > { %v8001_v26 = vsel %vm7755_vm1, %v7973_v2, %v8000_v5  ;;  %v7804_v5 = vsel %vm7755_vm1, %v7796_v0, %v13694_v4  ;;  %v8168_v59 = vadd.f32 %v8117_v9, %v8040_v57  ;;  %v8204_v20 = vmax.f32 %v8172_v32, 0.0  ;;  %v8092_v57 = vpop.permute.xlu0 %8091 }
 0x582   : > { %v8177_v24 = vadd.f32 %v13721_v30, %v8049_v61  ;;  %v8179_v52 = vadd.f32 %v13727_v10, %v8051_v50  ;;  %v8050_v14 = vunpack.c.l.bf16 %v7709_v8  ;;  %v8052_v19 = vunpack.c.h.bf16 %v7709_v8 }
 0x583   : > { %v8003_v3 = vpack.c.b16 %v8001_v26, %v13358_v29  ;;  %v8107_v29 = vpop.permute.xlu1 %8106  ;;  %v7812_v6 = vpack.c.b16 %v7804_v5, %v7804_v5  ;;  %v8205_v22 = vmax.f32 %v8173_v47, 0.0  ;;  %v8207_v51 = vmax.f32 %v8175_v16, 0.0 }
 0x584   : > { %v8178_v28 = vadd.f32 %v13721_v30, %v8050_v14  ;;  %v8180_v18 = vadd.f32 %v13727_v10, %v8052_v19  ;;  %v8209_v56 = vmax.f32 %v8177_v24, 0.0  ;;  %v8211_v42 = vmax.f32 %v8179_v52, 0.0 }
 0x585   : > { %v8169_v30 = vadd.f32 %v13741_v43, %v8041_v23  ;;  %v8171_v10 = vadd.f32 %v8127_v21, %v8043_v40  ;;  %v8226_v4 = vpack.c.bf16 %v8208_v31, %v8206_v33  ;;  %v8034_v54 = vunpack.c.l.bf16 %v8003_v3  ;;  %v14255_v21 = vld [vmem:[#allocation26_spill] sm:$0xff]  ;;  %v8082_v52 = vpop.permute.xlu0 %8081 }
 0x586   : > { %v8210_v48 = vmax.f32 %v8178_v28, 0.0  ;;  %v8212_v35 = vmax.f32 %v8180_v18, 0.0  ;;  %v8227_v38 = vpack.c.bf16 %v8211_v42, %v8209_v56  ;;  %v8036_v36 = vunpack.c.h.bf16 %v8003_v3  ;;  %v14257_v28 = vld [vmem:[#allocation24_spill] sm:$0xff] }
 0x587   : > { %v13779_v11 = vsel %vm8006_vm15, %v7764_v34, %v7812_v6  ;;  %v8165_v43 = vadd.f32 %v8112_v55, %v8037_v17  ;;  %v8030_v58 = vunpack.c.l.bf16 %v14255_v21  ;;  %v8032_v44 = vunpack.c.h.bf16 %v14255_v21  ;;  %v8097_v25 = vpop.permute.xlu1 %8096  ;;  %v14256_v55 = vld [vmem:[#allocation25_spill] sm:$0xff] }
 0x588   : > { %v8228_v7 = vpack.c.bf16 %v8212_v35, %v8210_v48  ;;  %v8167_v0 = vadd.f32 %v8117_v9, %v8039_v41  ;;  %v8198_v2 = vmax.f32 %v8166_v12, 0.0  ;;  %v8200_v39 = vmax.f32 %v8168_v59, 0.0 }
 0x589   : > { %v8201_v13 = vmax.f32 %v8169_v30, 0.0  ;;  %v8203_v63 = vmax.f32 %v8171_v10, 0.0  ;;  %v8225_v45 = vpack.c.bf16 %v8207_v51, %v8205_v22  ;;  %v8033_v34 = vunpack.c.l.bf16 %v13761_v1  ;;  %v8072_v59 = vpop.permute.xlu0 %8071  ;;  %v14258_v30 = vld [vmem:[#allocation23_spill] sm:$0xff] }
 0x58a   : > { %8269 = vmatprep.subr.bf16.mxu0 %v8228_v7  ;;  %v8035_v61 = vunpack.c.h.bf16 %v13761_v1  ;;  %v8224_v50 = vpack.c.bf16 %v8204_v20, %v8202_v49  ;;  %v8162_v37 = vadd.f32 %v8102_v60, %v8034_v54  ;;  %v8164_v17 = vadd.f32 %v8107_v29, %v8036_v36 }
 0x58b   : > { %8270 = vmatpush1.bf16.msra.mxu0 %v8227_v38  ;;  %v8029_v8 = vunpack.c.l.bf16 %v14256_v55  ;;  %v8031_v46 = vunpack.c.h.bf16 %v14256_v55  ;;  %v8197_v9 = vmax.f32 %v8165_v43, 0.0  ;;  %v8199_v15 = vmax.f32 %v8167_v0, 0.0  ;;  %v8087_v47 = vpop.permute.xlu1 %8086 }
 0x58c   : > { %8271 = vmatprep.subr.bf16.mxu0 %v8226_v4  ;;  %v8158_v26 = vadd.f32 %v8092_v57, %v8030_v58  ;;  %v8160_v24 = vadd.f32 %v8097_v25, %v8032_v44  ;;  %v8223_v14 = vpack.c.bf16 %v8203_v63, %v8201_v13  ;;  %v8222_v19 = vpack.c.bf16 %v8200_v39, %v8198_v2 }
 0x58d   : > { %v8161_v23 = vadd.f32 %v8102_v60, %v8033_v34  ;;  %v8163_v40 = vadd.f32 %v8107_v29, %v8035_v61  ;;  %v8194_v53 = vmax.f32 %v8162_v37, 0.0  ;;  %v8196_v1 = vmax.f32 %v8164_v17, 0.0  ;;  %v9558_v37 = vld [vmem:[%s13887_s6 + $0x8] sm:$0xff]   ;;  %v8240_v17 = vpop.permute.xlu0 %8239 }
 0x58e   : > { %v8026_v3 = vunpack.c.l.bf16 %v13754_v62  ;;  %v8028_v32 = vunpack.c.h.bf16 %v13754_v62  ;;  %v8022_v18 = vunpack.c.l.bf16 %v14257_v28  ;;  %v8024_v16 = vunpack.c.h.bf16 %v14257_v28 }
 0x58f   : > { %8272 = vmatpush1.bf16.msra.mxu0 %v8225_v45  ;;  %v8221_v56 = vpack.c.bf16 %v8199_v15, %v8197_v9  ;;  %v8190_v42 = vmax.f32 %v8158_v26, 0.0  ;;  %v8157_v5 = vadd.f32 %v8092_v57, %v8029_v8  ;;  %v8159_v33 = vadd.f32 %v8097_v25, %v8031_v46  ;;  %v8077_v20 = vpop.permute.xlu1 %8076 }
 0x590   : > { %8273 = vmatprep.subr.bf16.mxu0 %v8224_v50  ;;  %v8193_v31 = vmax.f32 %v8161_v23, 0.0  ;;  %v8195_v60 = vmax.f32 %v8163_v40, 0.0  ;;  %v8025_v48 = vunpack.c.l.bf16 %v13779_v11  ;;  %v8027_v35 = vunpack.c.h.bf16 %v13779_v11  ;;  %v9557_v50 = vld [vmem:[%s13887_s6] sm:$0xff]  }
 0x591   : > { %v8220_v29 = vpack.c.bf16 %v8196_v1, %v8194_v53  ;;  %v8192_v41 = vmax.f32 %v8160_v24, 0.0  ;;  %v8154_v62 = vadd.f32 %v8082_v52, %v8026_v3  ;;  %v8156_v12 = vadd.f32 %v8087_v47, %v8028_v32  ;;  %v8250_v40 = vpop.permute.xlu0 %8249 }
 0x592   : > { %v8021_v10 = vunpack.c.l.bf16 %v14258_v30  ;;  %v8150_v49 = vadd.f32 %v8072_v59, %v8022_v18  ;;  %v8023_v7 = vunpack.c.h.bf16 %v14258_v30  ;;  %v8189_v6 = vmax.f32 %v8157_v5, 0.0 }
 0x593   : > { %8274 = vmatpush1.bf16.msra.mxu0 %v8223_v14  ;;  %v8219_v22 = vpack.c.bf16 %v8195_v60, %v8193_v31  ;;  %v8191_v51 = vmax.f32 %v8159_v33, 0.0  ;;  %v8153_v38 = vadd.f32 %v8082_v52, %v8025_v48  ;;  %v8155_v4 = vadd.f32 %v8087_v47, %v8027_v35  ;;  %v8245_v26 = vpop.permute.xlu1 %8244 }
 0x594   : > { %8275 = vmatprep.subr.bf16.mxu0 %v8222_v19  ;;  %v8152_v54 = vadd.f32 %v8077_v20, %v8024_v16  ;;  %v8218_v36 = vpack.c.bf16 %v8192_v41, %v8190_v42  ;;  %v8186_v11 = vmax.f32 %v8154_v62, 0.0  ;;  %v8188_v57 = vmax.f32 %v8156_v12, 0.0 }
 0x595   : > { %v8149_v43 = vadd.f32 %v8072_v59, %v8021_v10  ;;  %v8151_v21 = vadd.f32 %v8077_v20, %v8023_v7  ;;  %v8217_v58 = vpack.c.bf16 %v8191_v51, %v8189_v6  ;;  %v8185_v44 = vmax.f32 %v8153_v38, 0.0 }
 0x596   : > { %v8187_v0 = vmax.f32 %v8155_v4, 0.0  ;;  %v8182_v2 = vmax.f32 %v8150_v49, 0.0  ;;  %v8184_v39 = vmax.f32 %v8152_v54, 0.0  ;;  %v8216_v13 = vpack.c.bf16 %v8188_v57, %v8186_v11 }
 0x597   : > { %8276 = vmatpush1.bf16.msra.mxu0 %v8221_v56  ;;  %v8181_v25 = vmax.f32 %v8149_v43, 0.0  ;;  %v8183_v63 = vmax.f32 %v8151_v21, 0.0  ;;  %v8255_v18 = vpop.permute.xlu1 %8254 }
 0x598   : > { %8277 = vmatprep.subr.bf16.mxu0 %v8220_v29  ;;  %v8215_v45 = vpack.c.bf16 %v8187_v0, %v8185_v44  ;;  %v8214_v34 = vpack.c.bf16 %v8184_v39, %v8182_v2 }
 0x599   : > { %v8213_v61 = vpack.c.bf16 %v8183_v63, %v8181_v25 }
 0x59b   : > { %8278 = vmatpush1.bf16.msra.mxu0 %v8219_v22 }
 0x59c   : > { %8279 = vmatprep.subr.bf16.mxu0 %v8218_v36 }
 0x59f   : > { %8280 = vmatpush1.bf16.msra.mxu0 %v8217_v58 }
 0x5a0   : > { %8281 = vmatprep.subr.bf16.mxu0 %v8216_v13 }
 0x5a3   : > { %8282 = vmatpush1.bf16.msra.mxu0 %v8215_v45 }
 0x5a4   : > { %8283 = vmatprep.subr.bf16.mxu0 %v8214_v34 }
 0x5a7   : > { %8284 = vmatpush1.bf16.msra.mxu0 %v8213_v61 }
 0x5aa   : > { %8302 = vmatmul.mubr.bf16.vlgmr.msra.gmra.mxu0 %v9557_v50 }
 0x5ab   : > { %8311 = vmatprep.mubr.bf16.mxu0 %v13920_v27 }
 0x5b2   : > { %8312 = vmatmul.mubr.bf16.gmra.mxu0 %v9558_v37 }
 0x66a   : > { %v8303_v55 = vpop.f32.mrf.mxu0 }
 0x66b   : > { %v8304_v8 = vadd.f32 %v8303_v55, %v8240_v17 }
 0x66c   : > { %v8305_v46 = vpop.f32.mrf.mxu0 }
 0x66d   : > { %v8322_v9 = vmax.f32 %v8304_v8, 0.0  ;;  %v8306_v15 = vadd.f32 %v8305_v46, %v8240_v17 }
 0x66e   : > { %v8307_v24 = vpop.f32.mrf.mxu0 }
 0x66f   : > { %8330 = vst [vmem:[%s13807_s18] sm:$0xff] %v8322_v9  ;;  %v8323_v27 = vmax.f32 %v8306_v15, 0.0  ;;  %v8308_v52 = vadd.f32 %v8307_v24, %v8245_v26 }
 0x670   : > { %v8309_v14 = vpop.f32.mrf.mxu0 }
 0x671   : > { %8331 = vst [vmem:[%s13807_s18 + $0x8] sm:$0xff] %v8323_v27  ;;  %v8324_v19 = vmax.f32 %v8308_v52, 0.0  ;;  %v8310_v23 = vadd.f32 %v8309_v14, %v8245_v26 }
 0x672   : > { %v8313_v53 = vpop.f32.mrf.mxu0 }
 0x673   : > { %8332 = vst [vmem:[%s13807_s18 + $0x10] sm:$0xff] %v8324_v19  ;;  %v8325_v1 = vmax.f32 %v8310_v23, 0.0  ;;  %v8314_v3 = vadd.f32 %v8313_v53, %v8250_v40 }
 0x674   : > { %v8315_v32 = vpop.f32.mrf.mxu0 }
 0x675   : > { %8333 = vst [vmem:[%s13807_s18 + $0x18] sm:$0xff] %v8325_v1  ;;  %v8326_v47 = vmax.f32 %v8314_v3, 0.0  ;;  %v8316_v28 = vadd.f32 %v8315_v32, %v8250_v40 }
 0x676   : > { %v8317_v16 = vpop.f32.mrf.mxu0 }
 0x677   : > { %8334 = vst [vmem:[%s13807_s18 + $0x20] sm:$0xff] %v8326_v47  ;;  %v8327_v56 = vmax.f32 %v8316_v28, 0.0  ;;  %v8318_v42 = vadd.f32 %v8317_v16, %v8255_v18 }
 0x678   : > { %v8319_v5 = vpop.f32.mrf.mxu0 }
 0x679   : > { %8335 = vst [vmem:[%s13807_s18 + $0x28] sm:$0xff] %v8327_v56  ;;  %v8328_v33 = vmax.f32 %v8318_v42, 0.0  ;;  %v8320_v31 = vadd.f32 %v8319_v5, %v8255_v18 }
 0x67b   : > { %8336 = vst [vmem:[%s13807_s18 + $0x30] sm:$0xff] %v8328_v33  ;;  %v8329_v60 = vmax.f32 %v8320_v31, 0.0 }
 0x67d   : > { %8337 = vst [vmem:[%s13807_s18 + $0x38] sm:$0xff] %v8329_v60 }
 0x67e   : > { %9593 = shalt.err (!%p9590_p7)
}
 0x67f   : > { %s9594_s26 = scalar_lea.hbm %s13824_s15, 1024  ;;  %s9598_s12 = scalar_lea.hbm %s13890_s9, 4096 }
 0x680   : > { %p9595_p9 = scmp.ne.s32.totalorder %s13824_s15, %s9594_s26  ;;  %p9599_p12 = scmp.lt.s32.totalorder %s13824_s15, %s13890_s9 }
 0x681   : > { %p9600_p13 = scmp.lt.s32.totalorder %s9598_s12, %s9594_s26 }
 0x682   : > { %p9596_p10 = pnand %p9595_p9, %p9792_p3 }
 0x683   : > { %p9601_p0 = por %p9600_p13, %p9599_p12 }
 0x684   : > { %p9597_p11 = pneg %p9596_p10 }
 0x686   : > { %p9602_p1 = pnand %p9601_p0, %p9597_p11 }
 0x688   : > { %9605 = shalt.err (!%p9602_p1)
}
 0x689   : > { %s9689_s0 = smov 256   ;;  %s9690_s20 = smov 512  }
 0x68a   : > { %9006 = dma.vmem_to_hbm [thread:$0]  (%p9792_p3), %s13818_s24, 1024, %s13824_s15, %s13829_s25, %s9689_s0, %s9690_s20, %s9681_s21  }
 0x68b PF: > { %p9012_p2 = scmp.ge.s32.totalorder %s9672_s16, 2  ;;  %s8369_s19 = sand.u32 1, %s9644_s30  }
 0x68c   : > { %s8370_s17 = scalar_lea.sflag [#allocation3], %s8369_s19 }
 0x68d   : > { %p9009_p4 = pnand %p9012_p2, %p9801_p8 }
 0x68f   : > { %p9010_p5 = pneg %p9009_p4 }
 0x691   : > { %9639 = dma.done.wait (%p9010_p5), %s8370_s17, 1024  }
 0x692   : > { %9641 = vsyncadd (%p9010_p5), %s8370_s17, 4294966272  ;;  %s22_s16 = sadd.s32 1, %s9672_s16   ;;  %s14259_s13 = sld [smem:[#allocation5_spill]] }
 0x693   : > { %p19_p6 = scmp.ge.s32.totalorder %s22_s16, 6   ;;  %s14260_s22 = sld [smem:[#allocation6_spill]] }
 0x694   : > { %s14261_s15 = sld [smem:[#allocation7_spill]]  ;;  %s14262_s30 = smov %s9648_s10 }
 0x695   : > { %s14263_s10 = smov %s9652_s11  ;;  %s14264_s11 = smov %s9810_s27 }
 0x696   : > { %s14265_s12 = smov %s9664_s14  ;;  %21 = sbr.rel (!%p19_p6) target bundleno = 7 (0x7), region = 94 }
 0x699   : > { %s14266_s14 = smov %s14260_s22 }
 0x69b   :  { %8375 = vsyncpa [#allocation3], 1 }
 0x69c   :  { %8377 = vsyncpa [#allocation3 + $0x1], 1 }

</bundles_post_ra>
